<compile_context>
chip_gen: v6e
topology: v6e:2x2x1
jax: 0.10.0
libtpu: 0.0.40
codegen_flags: <defaults>
</compile_context>

<pallas_src>
import math

import numpy as np
import jax
import jax.numpy as jnp
from jax.experimental import pallas as pl
from jax.experimental.pallas import tpu as pltpu


FREQ = 8                         # n_frequencies
NM = 8                           # neural_material_size
ENC = 3 * FREQ * 2               # tcnn Frequency encoding of a 3-vector -> 48
RAW = 3 + 3 + 3 + NM + 1         # wi, wo, pos, neural_material, hint -> 18
RAW_PAD = 32                     # raw slab padded to a lane-friendly width
HALF = 128                       # per-head padded feature width
FEAT = 2 * HALF                  # combined feature width (both heads)
HID_S = 64                       # shadow_func hidden width
HID_O = 128                      # other_effects_func hidden width
OUT_W = 128                      # padded width of the packed last matmul
OUT_COLS = 4                     # col 0 = decay, cols 1..3 = other_effects


# ---------------------------------------------------------------------------
# Host-side construction of the in-kernel "encoding" matrix.
#   arg = x_raw @ A + b ;  feature = sin(arg) on encoded lanes, arg elsewhere
# Column order of each encoded 3-vector matches tcnn Frequency: input-dim
# major, then frequency, then (sin, cos).  Both heads packed side by side:
#   lanes [0,128)  : enc(wi) | enc(pos) | nm | hint | 0-pad     (shadow head)
#   lanes [128,256): enc(wo) | enc(pos) | nm | 0-pad            (other head)
# ---------------------------------------------------------------------------
def _build_encoder():
    A = np.zeros((RAW_PAD, FEAT), np.float32)
    b = np.zeros((1, FEAT), np.float32)

    def fill(base, enc_starts, pass_rows):
        col = base
        for start in enc_starts:
            for d in range(3):
                for f in range(FREQ):
                    for s in range(2):                 # 0 -> sin, 1 -> cos
                        A[start + d, col] = math.pi * (2.0 ** f)
                        b[0, col] = s * (math.pi / 2.0)
                        col += 1
        for r in pass_rows:
            A[r, col] = 1.0
            col += 1

    # raw column layout: wi 0:3 | wo 3:6 | pos 6:9 | nm 9:17 | hint 17
    fill(0,    (0, 6), list(range(9, 18)))             # shadow head
    fill(HALF, (3, 6), list(range(9, 17)))             # other-effects head
    return jnp.asarray(A), jnp.asarray(b)


def _leaky(x):
    return jnp.where(x > 0, x, 0.01 * x)


# ---------------------------------------------------------------------------
# Fused kernel: in-kernel frequency encoding + both bias-free 4-layer MLPs
# (block-diagonal weights), LeakyReLU(0.01) hidden, Sigmoid output, final
# relu(decay - 1e-5) / other * 2.0 packed into a dense (tn, 4) output block.
# ---------------------------------------------------------------------------
def fused_kernel(x_ref, a_ref, b_ref, w0_ref, w1_ref, w2_ref, w3_ref, out_ref):
    x = x_ref[...]                                              # (tn, 32) f32
    hp = jax.lax.Precision.HIGHEST

    # Frequency encoding + concat for both heads: one selection matmul.
    arg = jnp.dot(x, a_ref[...], precision=hp,
                  preferred_element_type=jnp.float32) + b_ref[...]   # (tn,256)
    lane = jax.lax.broadcasted_iota(jnp.int32, arg.shape, 1)
    enc = (lane & (HALF - 1)) < 2 * ENC          # first 96 lanes of each half
    feat = jnp.where(enc, jnp.sin(arg), arg)                    # (tn, 256) f32

    # Both MLPs as block-diagonal 256-wide bf16 MXU matmuls, f32 accumulate.
    h = _leaky(jnp.dot(feat.astype(jnp.bfloat16), w0_ref[...],
                       preferred_element_type=jnp.float32))
    h = _leaky(jnp.dot(h.astype(jnp.bfloat16), w1_ref[...],
                       preferred_element_type=jnp.float32))
    h = _leaky(jnp.dot(h.astype(jnp.bfloat16), w2_ref[...],
                       preferred_element_type=jnp.float32))
    y = jnp.dot(h.astype(jnp.bfloat16), w3_ref[...],
                preferred_element_type=jnp.float32)             # (tn, 128)

    z = y[:, :OUT_COLS]                                         # (tn, 4)
    sig = jax.nn.sigmoid(z)                                     # f32, EUP
    lane4 = jax.lax.broadcasted_iota(jnp.int32, z.shape, 1)
    out_ref[...] = jnp.where(lane4 == 0,
                             jnp.maximum(sig - 1e-5, 0.0),      # relu(decay-1e-5)
                             2.0 * sig)                         # other_effects*2


def _fused_forward(x_raw, A, b, W, tn):
    n_pad = x_raw.shape[0]
    grid = (n_pad // tn,)

    def full(arr):
        return pl.BlockSpec(arr.shape, lambda i: (0, 0))

    in_specs = [pl.BlockSpec((tn, RAW_PAD), lambda i: (i, 0)),
                full(A), full(b)] + [full(w) for w in W]
    out_specs = pl.BlockSpec((tn, OUT_COLS), lambda i: (i, 0))

    return pl.pallas_call(
        fused_kernel,
        out_shape=jax.ShapeDtypeStruct((n_pad, OUT_COLS), jnp.float32),
        grid_spec=pltpu.PrefetchScalarGridSpec(
            num_scalar_prefetch=0,
            grid=grid,
            in_specs=in_specs,
            out_specs=out_specs,
        ),
        compiler_params=pltpu.CompilerParams(
            dimension_semantics=("parallel",)),
    )(x_raw, A, b, *W)


# ---------------------------------------------------------------------------
# Module wrapper (deterministic parameter setup; packed bf16 weight storage).
# ---------------------------------------------------------------------------
class NeuralPhasePallas:
    def __init__(self, key, hidden_feature_size=64, hidden_feature_layers=3,
                 frequency=8, neural_material_size=8, row_tile=256):
        assert frequency == FREQ and neural_material_size == NM
        assert hidden_feature_size == HID_S and hidden_feature_layers == 3
        assert row_tile % 8 == 0
        self.tn = row_tile

        self.A, self.b = _build_encoder()

        shadow_in = NM + 2 * ENC + 1            # 105
        other_in = NM + 2 * ENC                 # 104

        # TODO(synk): the original tcnn module zero-inits these weights; a
        # deterministic random init is used here so the kernel test is
        # non-degenerate (forward math is identical).
        def rnd(k, shape):
            return (jax.random.normal(k, shape, jnp.float32)
                    / math.sqrt(shape[0])).astype(jnp.bfloat16)

        ks = jax.random.split(key, 8)
        ws = [rnd(ks[0], (shadow_in, HID_S)),   # shadow: 105 -> 64 -> 64 -> 64 -> 1
              rnd(ks[1], (HID_S, HID_S)),
              rnd(ks[2], (HID_S, HID_S)),
              rnd(ks[3], (HID_S, 1))]
        wo = [rnd(ks[4], (other_in, HID_O)),    # other: 104 -> 128 -> 128 -> 128 -> 3
              rnd(ks[5], (HID_O, HID_O)),
              rnd(ks[6], (HID_O, HID_O)),
              rnd(ks[7], (HID_O, 3))]
        self._ref_shadow_w = ws                 # kept for the pure-JAX reference
        self._ref_other_w = wo

        # Block-diagonal packing: one 256-wide weight per layer drives both heads.
        W0 = jnp.zeros((FEAT, FEAT), jnp.bfloat16)
        W0 = W0.at[:shadow_in, :HID_S].set(ws[0])
        W0 = W0.at[HALF:HALF + other_in, HALF:HALF + HID_O].set(wo[0])

        W1 = jnp.zeros((FEAT, FEAT), jnp.bfloat16)
        W1 = W1.at[:HID_S, :HID_S].set(ws[1])
        W1 = W1.at[HALF:, HALF:].set(wo[1])

        W2 = jnp.zeros((FEAT, FEAT), jnp.bfloat16)
        W2 = W2.at[:HID_S, :HID_S].set(ws[2])
        W2 = W2.at[HALF:, HALF:].set(wo[2])

        W3 = jnp.zeros((FEAT, OUT_W), jnp.bfloat16)
        W3 = W3.at[:HID_S, 0:1].set(ws[3])      # decay pre-act -> col 0
        W3 = W3.at[HALF:, 1:4].set(wo[3])       # other pre-act -> cols 1..3

        self.W = [W0, W1, W2, W3]

    def __call__(self, wi, wo, pos, neural_material, hint):
        n = wi.shape[0]
        x = jnp.concatenate([wi, wo, pos, neural_material, hint],
                            axis=-1).astype(jnp.float32)
        assert x.shape[1] == RAW

        tn = self.tn
        n_pad = ((n + tn - 1) // tn) * tn
        x = jnp.pad(x, ((0, n_pad - n), (0, RAW_PAD - RAW)))

        out = _fused_forward(x, self.A, self.b, self.W, tn)
        decay = out[:n, 0:1]             # relu(sigmoid(shadow_mlp) - 1e-5)
        other_effects = out[:n, 1:4]     # sigmoid(other_mlp) * 2.0
        return decay, other_effects


if __name__ == "__main__":
    key = jax.random.PRNGKey(0)
    k_param, k_wi, k_wo, k_pos, k_nm, k_hint = jax.random.split(key, 6)

    # N not a multiple of the row tile -> exercises padding and a 2-step grid.
    N = 200
    wi = jax.random.normal(k_wi, (N, 3), jnp.float32)
    wo_d = jax.random.normal(k_wo, (N, 3), jnp.float32)
    pos = jax.random.normal(k_pos, (N, 3), jnp.float32)
    nm = jax.random.normal(k_nm, (N, NM), jnp.float32)
    hint = jax.random.normal(k_hint, (N, 1), jnp.float32)

    model = NeuralPhasePallas(k_param, row_tile=128)
    decay, other = model(wi, wo_d, pos, nm, hint)
    jax.block_until_ready((decay, other))

    # ---- pure-JAX reference (independent of the block-diagonal packing) ----
    def ref_encode(v):
        freqs = jnp.asarray(math.pi * (2.0 ** np.arange(FREQ)), jnp.float32)
        ang = v[:, :, None] * freqs[None, None, :]                # (N, 3, 8)
        sc = jnp.stack([jnp.sin(ang), jnp.cos(ang)], axis=-1)     # (N, 3, 8, 2)
        return sc.reshape(v.shape[0], -1)                         # (N, 48)

    def ref_mlp(x, weights):
        h = x.astype(jnp.float32)
        for w in weights[:-1]:
            h = jnp.dot(h.astype(jnp.bfloat16), w,
                        preferred_element_type=jnp.float32)
            h = jnp.where(h > 0, h, 0.01 * h)
        return jnp.dot(h.astype(jnp.bfloat16), weights[-1],
                       preferred_element_type=jnp.float32)

    feat_s = jnp.concatenate([ref_encode(wi), ref_encode(pos), nm, hint], -1)
    feat_o = jnp.concatenate([ref_encode(wo_d), ref_encode(pos), nm], -1)
    dec_ref = jnp.maximum(
        jax.nn.sigmoid(ref_mlp(feat_s, model._ref_shadow_w)) - 1e-5, 0.0)
    oth_ref = jax.nn.sigmoid(ref_mlp(feat_o, model._ref_other_w)) * 2.0

    assert decay.shape == (N, 1) and other.shape == (N, 3)
    assert not bool(jnp.isnan(decay).any())
    assert not bool(jnp.isnan(other).any())
    assert bool((decay >= 0.0).all())
    assert bool(((other >= 0.0) & (other <= 2.0)).all())
    np.testing.assert_allclose(np.asarray(decay), np.asarray(dec_ref), atol=5e-2)
    np.testing.assert_allclose(np.asarray(other), np.asarray(oth_ref), atol=5e-2)

    print("KERNEL_OK")
</pallas_src>

<mosaic_0001>
module attributes {stable_mosaic.version = 11 : i64} {
  func.func @fused_kernel(%arg0: i32, %arg1: memref<128x32xf32, #tpu.memory_space<vmem>>, %arg2: memref<32x256xf32, #tpu.memory_space<vmem>>, %arg3: memref<1x256xf32, #tpu.memory_space<vmem>>, %arg4: memref<256x256xbf16, #tpu.memory_space<vmem>>, %arg5: memref<256x256xbf16, #tpu.memory_space<vmem>>, %arg6: memref<256x256xbf16, #tpu.memory_space<vmem>>, %arg7: memref<256x128xbf16, #tpu.memory_space<vmem>>, %arg8: memref<128x4xf32, #tpu.memory_space<vmem>>) attributes {dimension_semantics = [#tpu.dimension_semantics<parallel>], iteration_bounds = array<i64: 2>, scalar_prefetch = 0 : i64, scratch_operands = 0 : i64, tpu.core_type = #tpu.core_type<tc>, window_params = [{transform_indices = @transform_0, window_bounds = array<i64: 128, 32>}, {pipeline_mode = #tpu.pipeline_mode<synchronous>, transform_indices = @transform_1, window_bounds = array<i64: 32, 256>}, {pipeline_mode = #tpu.pipeline_mode<synchronous>, transform_indices = @transform_2, window_bounds = array<i64: 1, 256>}, {pipeline_mode = #tpu.pipeline_mode<synchronous>, transform_indices = @transform_3, window_bounds = array<i64: 256, 256>}, {pipeline_mode = #tpu.pipeline_mode<synchronous>, transform_indices = @transform_4, window_bounds = array<i64: 256, 256>}, {pipeline_mode = #tpu.pipeline_mode<synchronous>, transform_indices = @transform_5, window_bounds = array<i64: 256, 256>}, {pipeline_mode = #tpu.pipeline_mode<synchronous>, transform_indices = @transform_6, window_bounds = array<i64: 256, 128>}, {transform_indices = @transform_7, window_bounds = array<i64: 128, 4>}]} {
    %c0 = arith.constant 0 : index
    %c0_0 = arith.constant 0 : index
    %0 = vector.load %arg1[%c0, %c0_0] : memref<128x32xf32, #tpu.memory_space<vmem>>, vector<128x32xf32>
    %c0_1 = arith.constant 0 : index
    %c0_2 = arith.constant 0 : index
    %1 = vector.load %arg2[%c0_1, %c0_2] : memref<32x256xf32, #tpu.memory_space<vmem>>, vector<32x256xf32>
    %cst = arith.constant dense<0.000000e+00> : vector<128x256xf32>
    %2 = tpu.matmul %0, %1, %cst {dimension_numbers = #tpu.dot_dimension_numbers<[1], [0], [0], [1], [0, 0, 1, 1], [], []>, precision = #tpu.contract_precision<fp32>} : vector<128x32xf32>, vector<32x256xf32>, vector<128x256xf32> -> vector<128x256xf32>
    %c0_3 = arith.constant 0 : index
    %c0_4 = arith.constant 0 : index
    %3 = vector.load %arg3[%c0_3, %c0_4] : memref<1x256xf32, #tpu.memory_space<vmem>>, vector<1x256xf32>
    %4 = vector.broadcast %3 : vector<1x256xf32> to vector<128x256xf32>
    %5 = arith.addf %2, %4 : vector<128x256xf32>
    %6 = tpu.iota {dimensions = array<i32: 1>} : vector<128x256xi32>
    %c127_i32 = arith.constant 127 : i32
    %7 = vector.broadcast %c127_i32 : i32 to vector<128x256xi32>
    %8 = arith.andi %6, %7 : vector<128x256xi32>
    %c96_i32 = arith.constant 96 : i32
    %9 = vector.broadcast %c96_i32 : i32 to vector<128x256xi32>
    %10 = arith.cmpi slt, %8, %9 : vector<128x256xi32>
    %11 = math.sin %5 : vector<128x256xf32>
    %12 = arith.select %10, %11, %5 : vector<128x256xi1>, vector<128x256xf32>
    %13 = arith.truncf %12 : vector<128x256xf32> to vector<128x256xbf16>
    %c0_5 = arith.constant 0 : index
    %c0_6 = arith.constant 0 : index
    %14 = vector.load %arg4[%c0_5, %c0_6] : memref<256x256xbf16, #tpu.memory_space<vmem>>, vector<256x256xbf16>
    %cst_7 = arith.constant dense<0.000000e+00> : vector<128x256xf32>
    %15 = tpu.matmul %13, %14, %cst_7 {dimension_numbers = #tpu.dot_dimension_numbers<[1], [0], [0], [1], [0, 0, 1, 1], [], []>} : vector<128x256xbf16>, vector<256x256xbf16>, vector<128x256xf32> -> vector<128x256xf32>
    %cst_8 = arith.constant 0.000000e+00 : f32
    %16 = vector.broadcast %cst_8 : f32 to vector<128x256xf32>
    %17 = arith.cmpf ogt, %15, %16 : vector<128x256xf32>
    %cst_9 = arith.constant 0.00999999977 : f32
    %18 = vector.broadcast %cst_9 : f32 to vector<128x256xf32>
    %19 = arith.mulf %18, %15 : vector<128x256xf32>
    %20 = arith.select %17, %15, %19 : vector<128x256xi1>, vector<128x256xf32>
    %21 = arith.truncf %20 : vector<128x256xf32> to vector<128x256xbf16>
    %c0_10 = arith.constant 0 : index
    %c0_11 = arith.constant 0 : index
    %22 = vector.load %arg5[%c0_10, %c0_11] : memref<256x256xbf16, #tpu.memory_space<vmem>>, vector<256x256xbf16>
    %cst_12 = arith.constant dense<0.000000e+00> : vector<128x256xf32>
    %23 = tpu.matmul %21, %22, %cst_12 {dimension_numbers = #tpu.dot_dimension_numbers<[1], [0], [0], [1], [0, 0, 1, 1], [], []>} : vector<128x256xbf16>, vector<256x256xbf16>, vector<128x256xf32> -> vector<128x256xf32>
    %cst_13 = arith.constant 0.000000e+00 : f32
    %24 = vector.broadcast %cst_13 : f32 to vector<128x256xf32>
    %25 = arith.cmpf ogt, %23, %24 : vector<128x256xf32>
    %cst_14 = arith.constant 0.00999999977 : f32
    %26 = vector.broadcast %cst_14 : f32 to vector<128x256xf32>
    %27 = arith.mulf %26, %23 : vector<128x256xf32>
    %28 = arith.select %25, %23, %27 : vector<128x256xi1>, vector<128x256xf32>
    %29 = arith.truncf %28 : vector<128x256xf32> to vector<128x256xbf16>
    %c0_15 = arith.constant 0 : index
    %c0_16 = arith.constant 0 : index
    %30 = vector.load %arg6[%c0_15, %c0_16] : memref<256x256xbf16, #tpu.memory_space<vmem>>, vector<256x256xbf16>
    %cst_17 = arith.constant dense<0.000000e+00> : vector<128x256xf32>
    %31 = tpu.matmul %29, %30, %cst_17 {dimension_numbers = #tpu.dot_dimension_numbers<[1], [0], [0], [1], [0, 0, 1, 1], [], []>} : vector<128x256xbf16>, vector<256x256xbf16>, vector<128x256xf32> -> vector<128x256xf32>
    %cst_18 = arith.constant 0.000000e+00 : f32
    %32 = vector.broadcast %cst_18 : f32 to vector<128x256xf32>
    %33 = arith.cmpf ogt, %31, %32 : vector<128x256xf32>
    %cst_19 = arith.constant 0.00999999977 : f32
    %34 = vector.broadcast %cst_19 : f32 to vector<128x256xf32>
    %35 = arith.mulf %34, %31 : vector<128x256xf32>
    %36 = arith.select %33, %31, %35 : vector<128x256xi1>, vector<128x256xf32>
    %37 = arith.truncf %36 : vector<128x256xf32> to vector<128x256xbf16>
    %c0_20 = arith.constant 0 : index
    %c0_21 = arith.constant 0 : index
    %38 = vector.load %arg7[%c0_20, %c0_21] : memref<256x128xbf16, #tpu.memory_space<vmem>>, vector<256x128xbf16>
    %cst_22 = arith.constant dense<0.000000e+00> : vector<128x128xf32>
    %39 = tpu.matmul %37, %38, %cst_22 {dimension_numbers = #tpu.dot_dimension_numbers<[1], [0], [0], [1], [0, 0, 1, 1], [], []>} : vector<128x256xbf16>, vector<256x128xbf16>, vector<128x128xf32> -> vector<128x128xf32>
    %40 = vector.extract_strided_slice %39 {offsets = [0, 0], sizes = [128, 4], strides = [1, 1]} : vector<128x128xf32> to vector<128x4xf32>
    %41 = arith.negf %40 : vector<128x4xf32>
    %42 = math.exp %41 : vector<128x4xf32>
    %cst_23 = arith.constant 1.000000e+00 : f32
    %43 = vector.broadcast %cst_23 : f32 to vector<128x4xf32>
    %44 = arith.addf %43, %42 : vector<128x4xf32>
    %45 = arith.divf %43, %44 : vector<128x4xf32>
    %46 = tpu.iota {dimensions = array<i32: 1>} : vector<128x4xi32>
    %c0_i32 = arith.constant 0 : i32
    %47 = vector.broadcast %c0_i32 : i32 to vector<128x4xi32>
    %48 = arith.cmpi eq, %46, %47 : vector<128x4xi32>
    %cst_24 = arith.constant 9.99999974E-6 : f32
    %49 = vector.broadcast %cst_24 : f32 to vector<128x4xf32>
    %50 = arith.subf %45, %49 : vector<128x4xf32>
    %cst_25 = arith.constant 0.000000e+00 : f32
    %51 = vector.broadcast %cst_25 : f32 to vector<128x4xf32>
    %52 = arith.maximumf %50, %51 : vector<128x4xf32>
    %cst_26 = arith.constant 2.000000e+00 : f32
    %53 = vector.broadcast %cst_26 : f32 to vector<128x4xf32>
    %54 = arith.mulf %53, %45 : vector<128x4xf32>
    %55 = arith.select %48, %52, %54 : vector<128x4xi1>, vector<128x4xf32>
    %c0_27 = arith.constant 0 : index
    %c0_28 = arith.constant 0 : index
    %56 = vector.load %arg8[%c0_27, %c0_28] : memref<128x4xf32, #tpu.memory_space<vmem>>, vector<128x4xf32>
    tpu.vector_store %arg8[%c0_27, %c0_28], %55 {strides = array<i32>} : memref<128x4xf32, #tpu.memory_space<vmem>>, vector<128x4xf32>,
    return
  }
  func.func @transform_0(%arg0: i32) -> (i32, i32) {
    %c0_i32 = arith.constant 0 : i32
    %c0_i32_0 = arith.constant 0 : i32
    return %arg0, %c0_i32 : i32, i32
  }
  func.func @transform_1(%arg0: i32) -> (i32, i32) {
    %c0_i32 = arith.constant 0 : i32
    %c0_i32_0 = arith.constant 0 : i32
    %c0_i32_1 = arith.constant 0 : i32
    return %c0_i32, %c0_i32_0 : i32, i32
  }
  func.func @transform_2(%arg0: i32) -> (i32, i32) {
    %c0_i32 = arith.constant 0 : i32
    %c0_i32_0 = arith.constant 0 : i32
    %c0_i32_1 = arith.constant 0 : i32
    return %c0_i32, %c0_i32_0 : i32, i32
  }
  func.func @transform_3(%arg0: i32) -> (i32, i32) {
    %c0_i32 = arith.constant 0 : i32
    %c0_i32_0 = arith.constant 0 : i32
    %c0_i32_1 = arith.constant 0 : i32
    return %c0_i32, %c0_i32_0 : i32, i32
  }
  func.func @transform_4(%arg0: i32) -> (i32, i32) {
    %c0_i32 = arith.constant 0 : i32
    %c0_i32_0 = arith.constant 0 : i32
    %c0_i32_1 = arith.constant 0 : i32
    return %c0_i32, %c0_i32_0 : i32, i32
  }
  func.func @transform_5(%arg0: i32) -> (i32, i32) {
    %c0_i32 = arith.constant 0 : i32
    %c0_i32_0 = arith.constant 0 : i32
    %c0_i32_1 = arith.constant 0 : i32
    return %c0_i32, %c0_i32_0 : i32, i32
  }
  func.func @transform_6(%arg0: i32) -> (i32, i32) {
    %c0_i32 = arith.constant 0 : i32
    %c0_i32_0 = arith.constant 0 : i32
    %c0_i32_1 = arith.constant 0 : i32
    return %c0_i32, %c0_i32_0 : i32, i32
  }
  func.func @transform_7(%arg0: i32) -> (i32, i32) {
    %c0_i32 = arith.constant 0 : i32
    %c0_i32_0 = arith.constant 0 : i32
    return %arg0, %c0_i32 : i32, i32
  }
}

</mosaic_0001>

<bundles_post_ra>
// kernel: tpu_custom_call.1
= control target key start
LH: loop header
LB: loop body
LE: loop exit
PB: predicated region body
PF: predicated region fallthrough
CT: control target
= control target key end

     0   :  { %12 = vsyncpa [#allocation3], 0  ;;  %s12364_s0 = inlined_call_operand.vmem [shape: f32[256,32], index: 0, kind: input, shape index: {}]   ;;  %s12365_s1 = inlined_call_operand.vmem [shape: f32[32,256], index: 1, kind: input, shape index: {}]   ;;  %s12366_s2 = inlined_call_operand.vmem [shape: f32[1,256], index: 2, kind: input, shape index: {}]   ;;  %s12367_s3 = inlined_call_operand.vmem [shape: bf16[256,256], index: 3, kind: input, shape index: {}]   ;;  %s12368_s4 = inlined_call_operand.hbm [shape: bf16[256,256], index: 4, kind: input, shape index: {}]   ;;  %s12369_s5 = inlined_call_operand.hbm [shape: bf16[256,256], index: 5, kind: input, shape index: {}]   ;;  %s12370_s6 = inlined_call_operand.hbm [shape: bf16[256,128], index: 6, kind: input, shape index: {}]   ;;  %s12371_s7 = inlined_call_operand.vmem [shape: f32[256,4], index: 7, kind: output, shape index: {}]  }
   0x1   :  { %13 = vsyncpa [#allocation5], 0  ;;  %s7845_s24 = smov 0  }
   0x2 LB: > { %s6814_s25 = sadd.s32 4294967295, %s7789_s24   ;;  %p6816_p0 = scmp.ge.s32.totalorder %s7789_s24, 1  ;;  %s7789_s24 = sphi %s7845_s24, %s19_s24  }
   0x3   : > { %p202_p1 = scmp.lt.s32.totalorder %s7789_s24, 3  ;;  %p7855_p2 = scmp.eq.s32.totalorder %s6814_s25, 0 }
   0x4   : > { %s7791_s28 = smov [#allocation4]   ;;  %s7792_s30 = smov [#allocation2]  }
   0x5   : > { %p7859_p3 = pnand %p6816_p0, %p202_p1  ;;  %s236_s29 = sshll.u32 %s7791_s28, 4  ;;  %s237_s29 = int_to_ptr.vmem [resolvable:$true] %s236_s29 }
   0x6   : > { %s223_s8 = sshll.u32 %s7792_s30, 4  ;;  %s7793_s10 = smov [#allocation6]   ;;  %s7865_s8 = int_to_ptr.vmem [resolvable:$true] %s223_s8 }
   0x7   : > { %p7307_p4 = pneg %p7859_p3  ;;  %s249_s11 = sshll.u32 %s7793_s10, 4  ;;  %s7873_s11 = int_to_ptr.vmem [resolvable:$true] %s249_s11 }
   0x8   : > { %s7708_s12 = scalar_lea.vmem %s237_s29, 4096  ;;  %p7716_p10 = scmp.lt.s32.totalorder %s237_s29, %s237_s29 }
   0x9   : > { %p7869_p5 = pnand %p7855_p2, %p7307_p4  ;;  %p7709_p7 = scmp.ne.s32.totalorder %s237_s29, %s7708_s12 }
   0xa   : > { %p7717_p11 = scmp.lt.s32.totalorder %s7708_s12, %s7708_s12 }
   0xb   : > { %p7699_p6 = pneg %p7869_p5 }
   0xc   : > { %p7718_p12 = por %p7717_p11, %p7716_p10 }
   0xd   : > { %p7711_p8 = pnand %p7709_p7, %p7699_p6 }
   0xf   : > { %p7712_p9 = pneg %p7711_p8 }
  0x11   : > { %p7719_p13 = pnand %p7718_p12, %p7712_p9 }
  0x13   : > { %7722 = shalt.err (!%p7719_p13)
}
  0x14   : > { %s7794_s13 = smov 128   ;;  %s7795_s14 = smov 8  }
  0x15   : > { %7313 = dma.hbm_to_vmem [thread:$0]  (!%p7869_p5), %s12369_s5, 4096, %s237_s29, [#allocation5], %s7794_s13, %s7794_s13, %s7795_s14  }
  0x16   : > { %s7734_s17 = scalar_lea.vmem %s7865_s8, 4096  ;;  %p7742_p7 = scmp.lt.s32.totalorder %s7865_s8, %s7865_s8 }
  0x17   : > { %p7735_p0 = scmp.ne.s32.totalorder %s7865_s8, %s7734_s17  ;;  %p7743_p8 = scmp.lt.s32.totalorder %s7734_s17, %s7734_s17 }
  0x19   : > { %p7737_p1 = pnand %p7735_p0, %p7699_p6  ;;  %p7744_p9 = por %p7743_p8, %p7742_p7 }
  0x1b   : > { %p7738_p4 = pneg %p7737_p1 }
  0x1d   : > { %p7745_p10 = pnand %p7744_p9, %p7738_p4 }
  0x1f   : > { %7748 = shalt.err (!%p7745_p10)
}
  0x20   : > { %7310 = dma.hbm_to_vmem [thread:$0]  (!%p7869_p5), %s12368_s4, 4096, %s7865_s8, [#allocation3], %s7794_s13, %s7794_s13, %s7795_s14  }
  0x21   : > { %s7760_s20 = scalar_lea.vmem %s7873_s11, 2048  ;;  %p7768_p0 = scmp.lt.s32.totalorder %s7873_s11, %s7873_s11 }
  0x22   : > { %p7761_p11 = scmp.ne.s32.totalorder %s7873_s11, %s7760_s20  ;;  %p7769_p1 = scmp.lt.s32.totalorder %s7760_s20, %s7760_s20 }
  0x24   : > { %p7763_p12 = pnand %p7761_p11, %p7699_p6  ;;  %p7770_p4 = por %p7769_p1, %p7768_p0 }
  0x26   : > { %p7764_p13 = pneg %p7763_p12 }
  0x28   : > { %p7771_p7 = pnand %p7770_p4, %p7764_p13 }
  0x2a   : > { %7774 = shalt.err (!%p7771_p7)
}
  0x2b   : > { %s7796_s21 = smov 64   ;;  %s7797_s22 = smov 4  }
  0x2c   : > { %7316 = dma.hbm_to_vmem [thread:$0]  (!%p7869_p5), %s12370_s6, 2048, %s7873_s11, [#allocation5], %s7796_s21, %s7796_s21, %s7797_s22  }
  0x2d   : > { %274 = sbr.rel (%p7859_p3) target bundleno = 2102 (0x836), region = 48 }
  0x32   : > { %7780 = dma.done.wait (%p7855_p2), [#allocation3], 4096  }
  0x33   : > { %7782 = vsyncadd (%p7855_p2), [#allocation3], 4294963200 }
  0x34   : > { %7784 = dma.done.wait (%p7855_p2), [#allocation5], 6144  }
  0x35   : > { %7786 = vsyncadd (%p7855_p2), [#allocation5], 4294961152  ;;  %s6825_s29 = sshll.u32 %s6814_s25, 4  ;;  %v7798_v0 = vmov 0.0   ;;  %v350_v1 = vld [vmem:[%s12365_s1 + $0x38] sm:$0xff]  ;;  %v349_v2 = vld [vmem:[%s12365_s1 + $0x30] sm:$0xff] }
  0x36   : > { %484 = vmatprep.mubr.f32.mxu0 %v7798_v0  ;;  %p315_p5 = scmp.lt.s32.totalorder %s6825_s29, 31  ;;  %765 = vmatprep.mubr.f32.mxu1 %v7798_v0  ;;  %v348_v3 = vld [vmem:[%s12365_s1 + $0x28] sm:$0xff]  ;;  %vm363_vm0 = vcmask 261120   ;;  %v7944_v4 = vand.u32 4294901760, %v350_v1  ;;  %v7946_v5 = vand.u32 4294901760, %v349_v2  ;;  %v347_v7 = vld [vmem:[%s12365_s1 + $0x20] sm:$0xff] }
  0x37   : > { %v7948_v6 = vand.u32 4294901760, %v348_v3  ;;  %v346_v8 = vld [vmem:[%s12365_s1 + $0x18] sm:$0xff]  ;;  %v345_v9 = vld [vmem:[%s12365_s1 + $0x10] sm:$0xff]  ;;  %v7959_v10 = vand.u32 4294901760, %v347_v7  ;;  %v344_v13 = vld [vmem:[%s12365_s1 + $0x8] sm:$0xff] }
  0x38   : > { %s12991_s29 = smov (!%p315_p5, %s6825_s29), 31  ;;  %v7961_v11 = vand.u32 4294901760, %v346_v8  ;;  %v7963_v12 = vand.u32 4294901760, %v345_v9  ;;  %v343_v14 = vld [vmem:[%s12365_s1] sm:$0xff]  ;;  %437 = vmatprep.subr.mxu0 %v7944_v4  ;;  %v7973_v16 = vand.u32 4294901760, %v344_v13  ;;  %v7978_v18 = vsub.f32 %v350_v1, %v7944_v4 }
  0x39   : > { %s6826_s27 = sshll.u32 %s12991_s29, 3  ;;  %v7975_v17 = vand.u32 4294901760, %v343_v14  ;;  %439 = vmatpush1.msra.mxu0 %v7946_v5  ;;  %v7986_v22 = vsub.f32 %v349_v2, %v7946_v5  ;;  %v7989_v23 = vsub.f32 %v348_v3, %v7948_v6  ;;  %v7992_v24 = vsub.f32 %v347_v7, %v7959_v10 }
  0x3a   : > { %s7933_s26 = scalar_lea.vmem %s12364_s0, %s6826_s27  ;;  %441 = vmatprep.subr.mxu0 %v7948_v6  ;;  %v687_v25 = vand.u32 4294901760, %v7978_v18  ;;  %v7997_v26 = vsub.f32 %v346_v8, %v7961_v11  ;;  %v8001_v28 = vsub.f32 %v345_v9, %v7963_v12  ;;  %v8050_v57 = vsub.f32 %v344_v13, %v7973_v16  ;;  %s12295_s12 = scalar_lea.vmem %s12371_s7, %s6826_s27 }
  0x3b   : > { %v327_v15 = vld [vmem:[%s7933_s26] sm:$0xff]  ;;  %v328_v20 = vld [vmem:[%s7933_s26 + $0x8] sm:$0xff]  ;;  %443 = vmatpush1.msra.mxu0 %v7959_v10  ;;  %v693_v30 = vand.u32 4294901760, %v7986_v22  ;;  %v699_v31 = vand.u32 4294901760, %v7989_v23  ;;  %v705_v32 = vand.u32 4294901760, %v7992_v24  ;;  %v329_v37 = vld [vmem:[%s7933_s26 + $0x10] sm:$0xff]  ;;  %v8054_v59 = vsub.f32 %v343_v14, %v7975_v17 }
  0x3c   : > { %v365_v19 = vsel %vm363_vm0, %v327_v15, 0  ;;  %v368_v27 = vsel %vm363_vm0, %v328_v20, 0  ;;  %445 = vmatprep.subr.mxu0 %v7961_v11  ;;  %v688_v33 = vsub.f32 %v7978_v18, %v687_v25  ;;  %v711_v34 = vand.u32 4294901760, %v7997_v26  ;;  %v330_v38 = vld [vmem:[%s7933_s26 + $0x18] sm:$0xff]  ;;  %v331_v47 = vld [vmem:[%s7933_s26 + $0x20] sm:$0xff]  ;;  %v332_v48 = vld [vmem:[%s7933_s26 + $0x28] sm:$0xff] }
  0x3d   : > { %v7983_v21 = vand.u32 4294901760, %v365_v19  ;;  %v8015_v35 = vand.u32 4294901760, %v368_v27  ;;  %v717_v36 = vand.u32 4294901760, %v8001_v28  ;;  %447 = vmatpush1.msra.mxu0 %v7963_v12  ;;  %v694_v40 = vsub.f32 %v7986_v22, %v693_v30  ;;  %v333_v49 = vld [vmem:[%s7933_s26 + $0x30] sm:$0xff]  ;;  %v334_v13 = vld [vmem:[%s7933_s26 + $0x38] sm:$0xff] }
  0x3e   : > { %v700_v41 = vsub.f32 %v7989_v23, %v699_v31  ;;  %v706_v42 = vsub.f32 %v7992_v24, %v705_v32  ;;  %449 = vmatprep.subr.mxu0 %v7973_v16  ;;  %v689_v43 = vand.u32 4294901760, %v688_v33  ;;  %v712_v44 = vsub.f32 %v7997_v26, %v711_v34 }
  0x3f   : > { %v8005_v29 = vsub.f32 %v365_v19, %v7983_v21  ;;  %v8036_v45 = vsub.f32 %v368_v27, %v8015_v35  ;;  %v718_v46 = vsub.f32 %v8001_v28, %v717_v36  ;;  %451 = vmatpush1.msra.mxu0 %v7975_v17  ;;  %v695_v51 = vand.u32 4294901760, %v694_v40 }
  0x40   : > { %v701_v52 = vand.u32 4294901760, %v700_v41  ;;  %v707_v53 = vand.u32 4294901760, %v706_v42  ;;  %690 = vmatprep.subr.mxu1 %v689_v43  ;;  %v713_v54 = vand.u32 4294901760, %v712_v44  ;;  %904 = vmatprep.subr.mxu0 %v7978_v18  ;;  %v371_v60 = vsel %vm363_vm0, %v329_v37, 0  ;;  %v336_v43 = vld [vmem:[%s7933_s26 + $0x48] sm:$0xff] }
  0x41   : > { %v487_v39 = vand.u32 4294901760, %v8005_v29  ;;  %v498_v55 = vand.u32 4294901760, %v8036_v45  ;;  %v719_v56 = vand.u32 4294901760, %v718_v46  ;;  %696 = vmatpush1.msra.mxu1 %v695_v51  ;;  %v374_v61 = vsel %vm363_vm0, %v330_v38, 0  ;;  %v335_v38 = vld [vmem:[%s7933_s26 + $0x40] sm:$0xff] }
  0x42   : > { %702 = vmatprep.subr.mxu1 %v701_v52  ;;  %v723_v63 = vand.u32 4294901760, %v8050_v57  ;;  %v8062_v1 = vand.u32 4294901760, %v371_v60  ;;  %v8064_v2 = vand.u32 4294901760, %v374_v61  ;;  %v12377_v3 = vand.u32 4294901760, %v8054_v59 }
  0x43   : > { %v488_v50 = vsub.f32 %v8005_v29, %v487_v39  ;;  %v499_v62 = vsub.f32 %v8036_v45, %v498_v55  ;;  %708 = vmatpush1.msra.mxu1 %v707_v53  ;;  %v377_v7 = vsel %vm363_vm0, %v331_v47, 0  ;;  %v380_v8 = vsel %vm363_vm0, %v332_v48, 0  ;;  %v337_v53 = vld [vmem:[%s7933_s26 + $0x50] sm:$0xff] }
  0x44   : > { %v383_v9 = vsel %vm363_vm0, %v333_v49, 0  ;;  %714 = vmatprep.subr.mxu1 %v713_v54  ;;  %v724_v15 = vsub.f32 %v8050_v57, %v723_v63  ;;  %v8076_v19 = vsub.f32 %v371_v60, %v8062_v1  ;;  %v8079_v20 = vsub.f32 %v374_v61, %v8064_v2 }
  0x45   : > { %v489_v58 = vand.u32 4294901760, %v488_v50  ;;  %v500_v14 = vand.u32 4294901760, %v499_v62  ;;  %720 = vmatpush1.msra.mxu1 %v719_v56  ;;  %v730_v27 = vsub.f32 %v8054_v59, %v12377_v3  ;;  %v8085_v33 = vand.u32 4294901760, %v377_v7 }
  0x46   : > { %v8087_v37 = vand.u32 4294901760, %v380_v8  ;;  %v725_v40 = vand.u32 4294901760, %v724_v15  ;;  %v12376_v41 = vand.u32 4294901760, %v8076_v19  ;;  %v12375_v42 = vand.u32 4294901760, %v8079_v20  ;;  %v338_v15 = vld [vmem:[%s7933_s26 + $0x58] sm:$0xff] }
  0x47   : > { %490 = vmatmul.mubr.f32.vlgmr.msra.gmra.mxu0 %v489_v58  ;;  %v731_v44 = vand.u32 4294901760, %v730_v27  ;;  %v8095_v46 = vsub.f32 %v377_v7, %v8085_v33  ;;  %v8097_v47 = vand.u32 4294901760, %v383_v9  ;;  %v386_v51 = vsel %vm363_vm0, %v334_v13, 0 }
  0x48   : > { %495 = vmatprep.mubr.f32.mxu0 %v7798_v0  ;;  %907 = vmatpush1.msra.mxu0 %v7986_v22  ;;  %v510_v48 = vsub.f32 %v8076_v19, %v12376_v41  ;;  %v521_v49 = vsub.f32 %v8079_v20, %v12375_v42  ;;  %v8107_v50 = vsub.f32 %v380_v8, %v8087_v37  ;;  %v389_v56 = vsel %vm363_vm0, %v335_v38, 0  ;;  %v339_v38 = vld [vmem:[%s7933_s26 + $0x60] sm:$0xff] }
  0x49   : > { %910 = vmatprep.subr.mxu0 %v7989_v23  ;;  %726 = vmatprep.subr.mxu1 %v725_v40  ;;  %v12373_v52 = vand.u32 4294901760, %v8095_v46  ;;  %v392_v58 = vsel %vm363_vm0, %v336_v43, 0  ;;  %v8120_v60 = vsub.f32 %v383_v9, %v8097_v47  ;;  %v8122_v61 = vand.u32 4294901760, %v386_v51 }
  0x4a   : > { %732 = vmatpush1.msra.mxu1 %v731_v44  ;;  %913 = vmatpush1.msra.mxu0 %v7992_v24  ;;  %v511_v54 = vand.u32 4294901760, %v510_v48  ;;  %v522_v62 = vand.u32 4294901760, %v521_v49  ;;  %v12372_v8 = vand.u32 4294901760, %v8107_v50  ;;  %v395_v13 = vsel %vm363_vm0, %v337_v53, 0 }
  0x4b   : > { %501 = vmatmul.mubr.f32.gmra.mxu0 %v500_v14  ;;  %767 = vmatmul.mubr.f32.vlgmr.msra.gmra.mxu1 %v7983_v21  ;;  %v532_v7 = vsub.f32 %v8095_v46, %v12373_v52  ;;  %v8132_v9 = vand.u32 4294901760, %v389_v56  ;;  %v8134_v14 = vand.u32 4294901760, %v392_v58  ;;  %v8139_v27 = vand.u32 4294901760, %v395_v13 }
  0x4c   : > { %506 = vmatprep.mubr.f32.mxu0 %v7798_v0  ;;  %1112 = vmatprep.subr.mxu1 %v7944_v4  ;;  %v543_v43 = vsub.f32 %v8107_v50, %v12372_v8  ;;  %v12374_v44 = vand.u32 4294901760, %v8120_v60  ;;  %v8149_v48 = vsub.f32 %v386_v51, %v8122_v61  ;;  %v398_v51 = vsel %vm363_vm0, %v338_v15, 0  ;;  %v341_v15 = vld [vmem:[%s7933_s26 + $0x70] sm:$0xff] }
  0x4d   : > { %1114 = vmatpush1.msra.mxu1 %v7946_v5  ;;  %772 = vmatprep.mubr.f32.mxu1 %v7798_v0  ;;  %v533_v40 = vand.u32 4294901760, %v532_v7  ;;  %v8154_v49 = vsub.f32 %v389_v56, %v8132_v9  ;;  %v8157_v53 = vsub.f32 %v392_v58, %v8134_v14  ;;  %v401_v56 = vsel %vm363_vm0, %v339_v38, 0 }
  0x4e   : > { %1116 = vmatprep.subr.mxu1 %v7948_v6  ;;  %916 = vmatprep.subr.mxu0 %v7997_v26  ;;  %v544_v58 = vand.u32 4294901760, %v543_v43  ;;  %v554_v7 = vsub.f32 %v8120_v60, %v12374_v44  ;;  %v8179_v52 = vand.u32 4294901760, %v398_v51  ;;  %v8184_v43 = vand.u32 4294901760, %v401_v56 }
  0x4f   : > { %512 = vmatmul.mubr.f32.gmra.mxu0 %v511_v54  ;;  %1118 = vmatpush1.msra.mxu1 %v7959_v10  ;;  %v8162_v54 = vsub.f32 %v395_v13, %v8139_v27  ;;  %v12380_v13 = vand.u32 4294901760, %v8149_v48  ;;  %v12379_v8 = vand.u32 4294901760, %v8154_v49  ;;  %v12378_v38 = vand.u32 4294901760, %v8157_v53 }
  0x50   : > { %517 = vmatprep.mubr.f32.mxu0 %v7798_v0  ;;  %774 = vmatmul.mubr.f32.gmra.mxu1 %v8015_v35  ;;  %v555_v44 = vand.u32 4294901760, %v554_v7  ;;  %v12570_v22 = vand.u32 4294901760, %v8154_v49  ;;  %v12571_v23 = vand.u32 4294901760, %v8157_v53 }
  0x51   : > { %779 = vmatprep.mubr.f32.mxu1 %v7798_v0  ;;  %919 = vmatpush1.msra.mxu0 %v8001_v28  ;;  %v565_v42 = vsub.f32 %v8149_v48, %v12380_v13  ;;  %v576_v3 = vsub.f32 %v8154_v49, %v12379_v8  ;;  %v587_v18 = vsub.f32 %v8157_v53, %v12378_v38  ;;  %v12572_v24 = vand.u32 4294901760, %v8162_v54 }
  0x52   : > { %1120 = vmatprep.subr.mxu1 %v7961_v11  ;;  %922 = vmatprep.subr.mxu0 %v8050_v57 }
  0x53   : > { %523 = vmatmul.mubr.f32.gmra.mxu0 %v522_v62  ;;  %1122 = vmatpush1.msra.mxu1 %v7963_v12  ;;  %v340_v62 = vld [vmem:[%s7933_s26 + $0x68] sm:$0xff]  ;;  %v566_v7 = vand.u32 4294901760, %v565_v42  ;;  %v588_v8 = vand.u32 4294901760, %v587_v18  ;;  %v342_v42 = vld [vmem:[%s7933_s26 + $0x78] sm:$0xff] }
  0x54   : > { %528 = vmatprep.mubr.f32.mxu0 %v7798_v0  ;;  %781 = vmatmul.mubr.f32.gmra.mxu1 %v8062_v1  ;;  %v404_v41 = vsel %vm363_vm0, %v340_v62, 0  ;;  %v410_v18 = vsel %vm363_vm0, %v342_v42, 0 }
  0x55   : > { %786 = vmatprep.mubr.f32.mxu1 %v7798_v0  ;;  %925 = vmatpush1.msra.mxu0 %v8054_v59  ;;  %v8213_v38 = vand.u32 4294901760, %v404_v41 }
  0x56   : > { %1124 = vmatprep.subr.mxu1 %v7973_v16  ;;  %1331 = vmatprep.subr.mxu0 %v687_v25  ;;  %v407_v25 = vsel %vm363_vm0, %v341_v15, 0  ;;  %v577_v15 = vand.u32 4294901760, %v576_v3 }
  0x57   : > { %534 = vmatmul.mubr.f32.gmra.mxu0 %v533_v40  ;;  %1126 = vmatpush1.msra.mxu1 %v7975_v17  ;;  %v12381_v40 = vand.u32 4294901760, %v8162_v54 }
  0x58   : > { %539 = vmatprep.mubr.f32.mxu0 %v7798_v0  ;;  %788 = vmatmul.mubr.f32.gmra.mxu1 %v8064_v2 }
  0x59   : > { %793 = vmatprep.mubr.f32.mxu1 %v7798_v0  ;;  %1530 = vmatprep.subr.mxu1 %v7944_v4  ;;  %v8202_v4 = vsub.f32 %v398_v51, %v8179_v52  ;;  %v598_v62 = vsub.f32 %v8162_v54, %v12381_v40  ;;  %v8215_v51 = vand.u32 4294901760, %v407_v25 }
  0x5b   : > { %545 = vmatmul.mubr.f32.gmra.mxu0 %v544_v58  ;;  %v8210_v58 = vsub.f32 %v401_v56, %v8184_v43  ;;  %v608_v13 = vand.u32 4294901760, %v8202_v4  ;;  %v599_v40 = vand.u32 4294901760, %v598_v62  ;;  %v8240_v62 = vsub.f32 %v407_v25, %v8215_v51 }
  0x5c   : > { %550 = vmatprep.mubr.f32.mxu0 %v7798_v0  ;;  %795 = vmatmul.mubr.f32.gmra.mxu1 %v8085_v33 }
  0x5d   : > { %800 = vmatprep.mubr.f32.mxu1 %v7798_v0  ;;  %v12382_v56 = vand.u32 4294901760, %v8210_v58  ;;  %v609_v3 = vsub.f32 %v8202_v4, %v608_v13  ;;  %v641_v25 = vand.u32 4294901760, %v8240_v62  ;;  %v12573_v26 = vand.u32 4294901760, %v8210_v58 }
  0x5f   : > { %556 = vmatmul.mubr.f32.gmra.mxu0 %v555_v44  ;;  %v8233_v44 = vsub.f32 %v404_v41, %v8213_v38 }
  0x60   : > { %561 = vmatprep.mubr.f32.mxu0 %v7798_v0  ;;  %802 = vmatmul.mubr.f32.gmra.mxu1 %v8087_v37 }
  0x61   : > { %807 = vmatprep.mubr.f32.mxu1 %v7798_v0  ;;  %v12383_v41 = vand.u32 4294901760, %v8233_v44  ;;  %v12574_v28 = vand.u32 4294901760, %v8233_v44 }
  0x63   : > { %567 = vmatmul.mubr.f32.gmra.mxu0 %v566_v7  ;;  %v620_v7 = vsub.f32 %v8210_v58, %v12382_v56 }
  0x64   : > { %572 = vmatprep.mubr.f32.mxu0 %v7798_v0  ;;  %809 = vmatmul.mubr.f32.gmra.mxu1 %v8097_v47 }
  0x65   : > { %814 = vmatprep.mubr.f32.mxu1 %v7798_v0  ;;  %v621_v42 = vand.u32 4294901760, %v620_v7 }
  0x67   : > { %578 = vmatmul.mubr.f32.gmra.mxu0 %v577_v15  ;;  %v8246_v15 = vand.u32 4294901760, %v410_v18 }
  0x68   : > { %583 = vmatprep.mubr.f32.mxu0 %v7798_v0  ;;  %816 = vmatmul.mubr.f32.gmra.mxu1 %v8122_v61 }
  0x69   : > { %821 = vmatprep.mubr.f32.mxu1 %v7798_v0 }
  0x6b   : > { %589 = vmatmul.mubr.f32.gmra.mxu0 %v588_v8  ;;  %v610_v8 = vand.u32 4294901760, %v609_v3  ;;  %v8256_v3 = vsub.f32 %v410_v18, %v8246_v15 }
  0x6c   : > { %594 = vmatprep.mubr.f32.mxu0 %v7798_v0  ;;  %823 = vmatmul.mubr.f32.gmra.mxu1 %v8132_v9 }
  0x6d   : > { %828 = vmatprep.mubr.f32.mxu1 %v7798_v0  ;;  %v652_v7 = vand.u32 4294901760, %v8256_v3 }
  0x6f   : > { %600 = vmatmul.mubr.f32.gmra.mxu0 %v599_v40  ;;  %v631_v40 = vsub.f32 %v8233_v44, %v12383_v41  ;;  %v653_v41 = vsub.f32 %v8256_v3, %v652_v7 }
  0x70   : > { %605 = vmatprep.mubr.f32.mxu0 %v7798_v0  ;;  %830 = vmatmul.mubr.f32.gmra.mxu1 %v8134_v14 }
  0x71   : > { %835 = vmatprep.mubr.f32.mxu1 %v7798_v0  ;;  %v632_v56 = vand.u32 4294901760, %v631_v40 }
  0x73   : > { %611 = vmatmul.mubr.f32.gmra.mxu0 %v610_v8  ;;  %v642_v8 = vsub.f32 %v8240_v62, %v641_v25 }
  0x74   : > { %616 = vmatprep.mubr.f32.mxu0 %v7798_v0  ;;  %837 = vmatmul.mubr.f32.gmra.mxu1 %v8139_v27 }
  0x75   : > { %842 = vmatprep.mubr.f32.mxu1 %v7798_v0  ;;  %v643_v18 = vand.u32 4294901760, %v642_v8 }
  0x77   : > { %622 = vmatmul.mubr.f32.gmra.mxu0 %v621_v42  ;;  %v654_v42 = vand.u32 4294901760, %v653_v41 }
  0x78   : > { %627 = vmatprep.mubr.f32.mxu0 %v7798_v0  ;;  %844 = vmatmul.mubr.f32.gmra.mxu1 %v8179_v52 }
  0x79   : > { %849 = vmatprep.mubr.f32.mxu1 %v7798_v0 }
  0x7b   : > { %633 = vmatmul.mubr.f32.gmra.mxu0 %v632_v56 }
  0x7c   : > { %638 = vmatprep.mubr.f32.mxu0 %v7798_v0  ;;  %851 = vmatmul.mubr.f32.gmra.mxu1 %v8184_v43 }
  0x7d   : > { %856 = vmatprep.mubr.f32.mxu1 %v7798_v0 }
  0x7f   : > { %644 = vmatmul.mubr.f32.gmra.mxu0 %v643_v18 }
  0x80   : > { %649 = vmatprep.mubr.f32.mxu0 %v7798_v0  ;;  %858 = vmatmul.mubr.f32.gmra.mxu1 %v8213_v38 }
  0x81   : > { %863 = vmatprep.mubr.f32.mxu1 %v7798_v0 }
  0x83   : > { %655 = vmatmul.mubr.f32.gmra.mxu0 %v654_v42 }
  0x84   : > { %958 = vmatprep.mubr.f32.mxu0 %v7798_v0  ;;  %865 = vmatmul.mubr.f32.gmra.mxu1 %v8215_v51 }
  0x85   : > { %870 = vmatprep.mubr.f32.mxu1 %v7798_v0 }
  0x87   : > { %961 = vmatmul.mubr.f32.vlgmr.msra.gmra.mxu0 %v8005_v29 }
  0x88   : > { %966 = vmatprep.mubr.f32.mxu0 %v7798_v0  ;;  %1335 = vmatpush1.msra.mxu0 %v693_v30 }
  0x89   : > { %872 = vmatmul.mubr.f32.gmra.mxu1 %v8246_v15  ;;  %1339 = vmatprep.subr.mxu0 %v699_v31  ;;  %v351_v31 = vld [vmem:[%s12366_s2] sm:$0x3] }
  0x8a   : > { %1159 = vmatprep.mubr.f32.mxu1 %v7798_v0  ;;  %1343 = vmatpush1.msra.mxu0 %v705_v32 }
  0x8b   : > { %969 = vmatmul.mubr.f32.gmra.mxu0 %v8036_v45  ;;  %1347 = vmatprep.subr.mxu0 %v711_v34 }
  0x8c   : > { %974 = vmatprep.mubr.f32.mxu0 %v7798_v0  ;;  %1351 = vmatpush1.msra.mxu0 %v717_v36 }
  0x8d   : > { %1163 = vmatmul.mubr.f32.vlgmr.msra.gmra.mxu1 %v487_v39  ;;  %1355 = vmatprep.subr.mxu0 %v723_v63 }
  0x8e   : > { %1532 = vmatpush1.msra.mxu1 %v7946_v5  ;;  %1168 = vmatprep.mubr.f32.mxu1 %v7798_v0  ;;  %v12563_v5 = vand.u32 4294901760, %v8054_v59 }
  0x8f   : > { %977 = vmatmul.mubr.f32.gmra.mxu0 %v8076_v19  ;;  %1534 = vmatprep.subr.mxu1 %v7948_v6  ;;  %v12564_v6 = vand.u32 4294901760, %v8076_v19 }
  0x90   : > { %982 = vmatprep.mubr.f32.mxu0 %v7798_v0  ;;  %1536 = vmatpush1.msra.mxu1 %v7959_v10  ;;  %v12565_v10 = vand.u32 4294901760, %v8079_v20 }
  0x91   : > { %1172 = vmatmul.mubr.f32.gmra.mxu1 %v498_v55  ;;  %1538 = vmatprep.subr.mxu1 %v7961_v11  ;;  %v12566_v11 = vand.u32 4294901760, %v8095_v46 }
  0x92   : > { %1177 = vmatprep.mubr.f32.mxu1 %v7798_v0  ;;  %1540 = vmatpush1.msra.mxu1 %v7963_v12  ;;  %v12567_v12 = vand.u32 4294901760, %v8107_v50 }
  0x93   : > { %985 = vmatmul.mubr.f32.gmra.mxu0 %v8079_v20  ;;  %1542 = vmatprep.subr.mxu1 %v7973_v16  ;;  %v12568_v16 = vand.u32 4294901760, %v8120_v60 }
  0x94   : > { %990 = vmatprep.mubr.f32.mxu0 %v7798_v0  ;;  %1359 = vmatpush1.msra.mxu0 %v12563_v5 }
  0x95   : > { %1181 = vmatmul.mubr.f32.gmra.mxu1 %v12564_v6 }
  0x96   : > { %1186 = vmatprep.mubr.f32.mxu1 %v7798_v0  ;;  %1544 = vmatpush1.msra.mxu1 %v7975_v17  ;;  %v12569_v17 = vand.u32 4294901760, %v8149_v48 }
  0x97   : > { %993 = vmatmul.mubr.f32.gmra.mxu0 %v8095_v46 }
  0x98   : > { %998 = vmatprep.mubr.f32.mxu0 %v7798_v0 }
  0x99   : > { %1190 = vmatmul.mubr.f32.gmra.mxu1 %v12565_v10 }
  0x9a   : > { %1195 = vmatprep.mubr.f32.mxu1 %v7798_v0 }
  0x9b   : > { %1001 = vmatmul.mubr.f32.gmra.mxu0 %v8107_v50 }
  0x9c   : > { %1006 = vmatprep.mubr.f32.mxu0 %v7798_v0 }
  0x9d   : > { %1199 = vmatmul.mubr.f32.gmra.mxu1 %v12566_v11 }
  0x9e   : > { %1204 = vmatprep.mubr.f32.mxu1 %v7798_v0 }
  0x9f   : > { %1009 = vmatmul.mubr.f32.gmra.mxu0 %v8120_v60 }
  0xa0   : > { %1014 = vmatprep.mubr.f32.mxu0 %v7798_v0 }
  0xa1   : > { %1208 = vmatmul.mubr.f32.gmra.mxu1 %v12567_v12 }
  0xa2   : > { %1213 = vmatprep.mubr.f32.mxu1 %v7798_v0 }
  0xa3   : > { %1017 = vmatmul.mubr.f32.gmra.mxu0 %v8149_v48 }
  0xa4   : > { %1022 = vmatprep.mubr.f32.mxu0 %v7798_v0 }
  0xa5   : > { %1217 = vmatmul.mubr.f32.gmra.mxu1 %v12568_v16 }
  0xa6   : > { %1222 = vmatprep.mubr.f32.mxu1 %v7798_v0 }
  0xa7   : > { %1025 = vmatmul.mubr.f32.gmra.mxu0 %v8154_v49 }
  0xa8   : > { %1030 = vmatprep.mubr.f32.mxu0 %v7798_v0 }
  0xa9   : > { %1226 = vmatmul.mubr.f32.gmra.mxu1 %v12569_v17 }
  0xaa   : > { %1231 = vmatprep.mubr.f32.mxu1 %v7798_v0 }
  0xab   : > { %1033 = vmatmul.mubr.f32.gmra.mxu0 %v8157_v53 }
  0xac   : > { %1038 = vmatprep.mubr.f32.mxu0 %v7798_v0 }
  0xad   : > { %1235 = vmatmul.mubr.f32.gmra.mxu1 %v12570_v22 }
  0xae   : > { %1240 = vmatprep.mubr.f32.mxu1 %v7798_v0 }
  0xaf   : > { %1041 = vmatmul.mubr.f32.gmra.mxu0 %v8162_v54 }
  0xb0   : > { %1046 = vmatprep.mubr.f32.mxu0 %v7798_v0 }
  0xb1   : > { %1244 = vmatmul.mubr.f32.gmra.mxu1 %v12571_v23 }
  0xb2   : > { %1249 = vmatprep.mubr.f32.mxu1 %v7798_v0 }
  0xb3   : > { %1049 = vmatmul.mubr.f32.gmra.mxu0 %v8202_v4 }
  0xb4   : > { %1054 = vmatprep.mubr.f32.mxu0 %v7798_v0 }
  0xb5   : > { %1253 = vmatmul.mubr.f32.gmra.mxu1 %v12572_v24 }
  0xb6   : > { %1258 = vmatprep.mubr.f32.mxu1 %v7798_v0 }
  0xb7   : > { %1057 = vmatmul.mubr.f32.gmra.mxu0 %v8210_v58 }
  0xb8   : > { %1062 = vmatprep.mubr.f32.mxu0 %v7798_v0 }
  0xb9   : > { %1262 = vmatmul.mubr.f32.gmra.mxu1 %v608_v13 }
  0xba   : > { %1267 = vmatprep.mubr.f32.mxu1 %v7798_v0 }
  0xbb   : > { %1065 = vmatmul.mubr.f32.gmra.mxu0 %v8233_v44 }
  0xbc   : > { %1070 = vmatprep.mubr.f32.mxu0 %v7798_v0 }
  0xbd   : > { %1271 = vmatmul.mubr.f32.gmra.mxu1 %v12573_v26 }
  0xbe   : > { %1276 = vmatprep.mubr.f32.mxu1 %v7798_v0 }
  0xbf   : > { %1073 = vmatmul.mubr.f32.gmra.mxu0 %v8240_v62 }
  0xc0   : > { %1078 = vmatprep.mubr.f32.mxu0 %v7798_v0 }
  0xc1   : > { %1280 = vmatmul.mubr.f32.gmra.mxu1 %v12574_v28 }
  0xc2   : > { %1285 = vmatprep.mubr.f32.mxu1 %v7798_v0 }
  0xc3   : > { %1081 = vmatmul.mubr.f32.gmra.mxu0 %v8256_v3 }
  0xc4   : > { %1392 = vmatprep.mubr.f32.mxu0 %v7798_v0 }
  0xc5   : > { %1289 = vmatmul.mubr.f32.gmra.mxu1 %v641_v25 }
  0xc6   : > { %1294 = vmatprep.mubr.f32.mxu1 %v7798_v0 }
  0xc7   : > { %1394 = vmatmul.mubr.f32.vlgmr.msra.gmra.mxu0 %v7983_v21 }
  0xc8   : > { %1399 = vmatprep.mubr.f32.mxu0 %v7798_v0 }
  0xc9   : > { %1298 = vmatmul.mubr.f32.gmra.mxu1 %v652_v7 }
  0xca   : > { %1577 = vmatprep.mubr.f32.mxu1 %v7798_v0 }
  0xcb   : > { %1401 = vmatmul.mubr.f32.gmra.mxu0 %v8015_v35 }
  0xcc   : > { %1406 = vmatprep.mubr.f32.mxu0 %v7798_v0 }
  0xcd   : > { %1579 = vmatmul.mubr.f32.vlgmr.msra.gmra.mxu1 %v7983_v21  ;;  %v12384_v21 = vlaneseq }
  0xce   : > { %1584 = vmatprep.mubr.f32.mxu1 %v7798_v0 }
  0xcf   : > { %1408 = vmatmul.mubr.f32.gmra.mxu0 %v8062_v1  ;;  %v354_v29 = vshrl.u32 %v12384_v21, 7 }
  0xd0   : > { %1413 = vmatprep.mubr.f32.mxu0 %v7798_v0 }
  0xd1   : > { %1586 = vmatmul.mubr.f32.gmra.mxu1 %v8015_v35  ;;  %v355_v30 = vsub.s32 0, %v354_v29  ;;  %v359_v35 = vsub.s32 1, %v354_v29 }
  0xd2   : > { %1591 = vmatprep.mubr.f32.mxu1 %v7798_v0 }
  0xd3   : > { %1415 = vmatmul.mubr.f32.gmra.mxu0 %v8064_v2  ;;  %v8447_v32 = vrot.slane %v351_v31, %v355_v30  ;;  %v8452_v45 = vrot.slane %v351_v31, %v359_v35 }
  0xd4   : > { %1420 = vmatprep.mubr.f32.mxu0 %v7798_v0 }
  0xd5   : > { %1593 = vmatmul.mubr.f32.gmra.mxu1 %v8062_v1 }
  0xd6   : > { %1598 = vmatprep.mubr.f32.mxu1 %v7798_v0 }
  0xd7   : > { %1422 = vmatmul.mubr.f32.gmra.mxu0 %v8085_v33 }
  0xd8   : > { %1427 = vmatprep.mubr.f32.mxu0 %v7798_v0 }
  0xd9   : > { %1600 = vmatmul.mubr.f32.gmra.mxu1 %v8064_v2 }
  0xda   : > { %1605 = vmatprep.mubr.f32.mxu1 %v7798_v0 }
  0xdb   : > { %1429 = vmatmul.mubr.f32.gmra.mxu0 %v8087_v37 }
  0xdc   : > { %1434 = vmatprep.mubr.f32.mxu0 %v7798_v0 }
  0xdd   : > { %1607 = vmatmul.mubr.f32.gmra.mxu1 %v8085_v33 }
  0xde   : > { %1612 = vmatprep.mubr.f32.mxu1 %v7798_v0 }
  0xdf   : > { %1436 = vmatmul.mubr.f32.gmra.mxu0 %v8097_v47 }
  0xe0   : > { %1441 = vmatprep.mubr.f32.mxu0 %v7798_v0 }
  0xe1   : > { %1614 = vmatmul.mubr.f32.gmra.mxu1 %v8087_v37 }
  0xe2   : > { %1619 = vmatprep.mubr.f32.mxu1 %v7798_v0 }
  0xe3   : > { %1443 = vmatmul.mubr.f32.gmra.mxu0 %v8122_v61 }
  0xe4   : > { %1448 = vmatprep.mubr.f32.mxu0 %v7798_v0 }
  0xe5   : > { %1621 = vmatmul.mubr.f32.gmra.mxu1 %v8097_v47 }
  0xe6   : > { %1626 = vmatprep.mubr.f32.mxu1 %v7798_v0 }
  0xe7   : > { %1450 = vmatmul.mubr.f32.gmra.mxu0 %v8132_v9 }
  0xe8   : > { %1455 = vmatprep.mubr.f32.mxu0 %v7798_v0 }
  0xe9   : > { %1628 = vmatmul.mubr.f32.gmra.mxu1 %v8122_v61 }
  0xea   : > { %1633 = vmatprep.mubr.f32.mxu1 %v7798_v0 }
  0xeb   : > { %1457 = vmatmul.mubr.f32.gmra.mxu0 %v8134_v14 }
  0xec   : > { %1462 = vmatprep.mubr.f32.mxu0 %v7798_v0 }
  0xed   : > { %1635 = vmatmul.mubr.f32.gmra.mxu1 %v8132_v9 }
  0xee   : > { %1640 = vmatprep.mubr.f32.mxu1 %v7798_v0 }
  0xef   : > { %1464 = vmatmul.mubr.f32.gmra.mxu0 %v8139_v27 }
  0xf0   : > { %1469 = vmatprep.mubr.f32.mxu0 %v7798_v0 }
  0xf1   : > { %1642 = vmatmul.mubr.f32.gmra.mxu1 %v8134_v14 }
  0xf2   : > { %1647 = vmatprep.mubr.f32.mxu1 %v7798_v0 }
  0xf3   : > { %1471 = vmatmul.mubr.f32.gmra.mxu0 %v8179_v52 }
  0xf4   : > { %1476 = vmatprep.mubr.f32.mxu0 %v7798_v0 }
  0xf5   : > { %1649 = vmatmul.mubr.f32.gmra.mxu1 %v8139_v27 }
  0xf6   : > { %1654 = vmatprep.mubr.f32.mxu1 %v7798_v0 }
  0xf7   : > { %1478 = vmatmul.mubr.f32.gmra.mxu0 %v8184_v43 }
  0xf8   : > { %1483 = vmatprep.mubr.f32.mxu0 %v7798_v0 }
  0xf9   : > { %1656 = vmatmul.mubr.f32.gmra.mxu1 %v8179_v52 }
  0xfa   : > { %1661 = vmatprep.mubr.f32.mxu1 %v7798_v0 }
  0xfb   : > { %1485 = vmatmul.mubr.f32.gmra.mxu0 %v8213_v38 }
  0xfc   : > { %1490 = vmatprep.mubr.f32.mxu0 %v7798_v0 }
  0xfd   : > { %1663 = vmatmul.mubr.f32.gmra.mxu1 %v8184_v43 }
  0xfe   : > { %1668 = vmatprep.mubr.f32.mxu1 %v7798_v0 }
  0xff   : > { %1492 = vmatmul.mubr.f32.gmra.mxu0 %v8215_v51 }
 0x100   : > { %1497 = vmatprep.mubr.f32.mxu0 %v7798_v0 }
 0x101   : > { %1670 = vmatmul.mubr.f32.gmra.mxu1 %v8213_v38 }
 0x102   : > { %1675 = vmatprep.mubr.f32.mxu1 %v7798_v0 }
 0x103   : > { %1499 = vmatmul.mubr.f32.gmra.mxu0 %v8246_v15 }
 0x105   : > { %1677 = vmatmul.mubr.f32.gmra.mxu1 %v8215_v51 }
 0x106   : > { %1682 = vmatprep.mubr.f32.mxu1 %v7798_v0 }
 0x107   : > { %v491_v34 = vpop.f32.mrf.mxu0 }
 0x108   : > { %v492_v39 = vadd.f32 %v491_v34, %v8447_v32 }
 0x109   : > { %v493_v36 = vpop.f32.mrf.mxu0  ;;  %1684 = vmatmul.mubr.f32.gmra.mxu1 %v8246_v15 }
 0x10a   : > { %v494_v63 = vadd.f32 %v493_v36, %v8452_v45 }
 0x10b   : > { %v502_v55 = vpop.f32.mrf.mxu0  ;;  %v768_v59 = vpop.f32.mrf.mxu1 }
 0x10c   : > { %v503_v1 = vadd.f32 %v502_v55, %v8447_v32  ;;  %v8458_v2 = vadd.f32 %v768_v59, %v492_v39 }
 0x10d   : > { %v8454_v57 = vpop.f32.mrf.mxu0  ;;  %v770_v20 = vpop.f32.mrf.mxu1 }
 0x10e   : > { %v8460_v0 = vadd.f32 %v770_v20, %v494_v63 }
 0x10f   : > { %v513_v19 = vpop.f32.mrf.mxu0 }
 0x110   : > { %v775_v37 = vpop.f32.mrf.mxu1  ;;  %v514_v46 = vadd.f32 %v513_v19, %v8447_v32 }
 0x111   : > { %v515_v33 = vpop.f32.mrf.mxu0  ;;  %v8463_v47 = vadd.f32 %v775_v37, %v503_v1 }
 0x112   : > { %v8465_v52 = vpop.f32.mrf.mxu1  ;;  %v516_v9 = vadd.f32 %v515_v33, %v8452_v45 }
 0x113   : > { %v524_v50 = vpop.f32.mrf.mxu0 }
 0x114   : > { %v782_v61 = vpop.f32.mrf.mxu1  ;;  %v525_v14 = vadd.f32 %v524_v50, %v8447_v32 }
 0x115   : > { %v8467_v60 = vpop.f32.mrf.mxu0  ;;  %v8471_v27 = vadd.f32 %v782_v61, %v514_v46 }
 0x116   : > { %v784_v49 = vpop.f32.mrf.mxu1 }
 0x117   : > { %v535_v48 = vpop.f32.mrf.mxu0  ;;  %v8473_v53 = vadd.f32 %v784_v49, %v516_v9 }
 0x118   : > { %v789_v13 = vpop.f32.mrf.mxu1  ;;  %v536_v38 = vadd.f32 %v535_v48, %v8447_v32 }
 0x119   : > { %v537_v54 = vpop.f32.mrf.mxu0  ;;  %v8476_v43 = vadd.f32 %v789_v13, %v525_v14 }
 0x11a   : > { %v8478_v58 = vpop.f32.mrf.mxu1  ;;  %v538_v44 = vadd.f32 %v537_v54, %v8452_v45 }
 0x11b   : > { %v546_v4 = vpop.f32.mrf.mxu0 }
 0x11c   : > { %v796_v56 = vpop.f32.mrf.mxu1  ;;  %v547_v62 = vadd.f32 %v546_v4, %v8447_v32 }
 0x11d   : > { %v8480_v51 = vpop.f32.mrf.mxu0  ;;  %v8484_v41 = vadd.f32 %v796_v56, %v536_v38 }
 0x11e   : > { %v798_v40 = vpop.f32.mrf.mxu1 }
 0x11f   : > { %v557_v15 = vpop.f32.mrf.mxu0  ;;  %v8487_v3 = vadd.f32 %v798_v40, %v538_v44 }
 0x120   : > { %v558_v25 = vadd.f32 %v557_v15, %v8447_v32  ;;  %v803_v7 = vpop.f32.mrf.mxu1 }
 0x121   : > { %v559_v8 = vpop.f32.mrf.mxu0  ;;  %v8489_v18 = vadd.f32 %v803_v7, %v547_v62 }
 0x122   : > { %v8491_v5 = vpop.f32.mrf.mxu1  ;;  %v560_v12 = vadd.f32 %v559_v8, %v8452_v45 }
 0x123   : > { %v568_v42 = vpop.f32.mrf.mxu0 }
 0x124   : > { %v569_v6 = vadd.f32 %v568_v42, %v8447_v32  ;;  %v810_v11 = vpop.f32.mrf.mxu1 }
 0x125   : > { %v8494_v10 = vpop.f32.mrf.mxu0  ;;  %v8497_v16 = vadd.f32 %v810_v11, %v558_v25 }
 0x126   : > { %v812_v22 = vpop.f32.mrf.mxu1 }
 0x127   : > { %v579_v17 = vpop.f32.mrf.mxu0  ;;  %v8500_v24 = vadd.f32 %v812_v22, %v560_v12 }
 0x128   : > { %v580_v23 = vadd.f32 %v579_v17, %v8447_v32  ;;  %v817_v28 = vpop.f32.mrf.mxu1 }
 0x129   : > { %v581_v26 = vpop.f32.mrf.mxu0  ;;  %v8503_v30 = vadd.f32 %v817_v28, %v569_v6 }
 0x12a   : > { %v582_v29 = vadd.f32 %v581_v26, %v8452_v45  ;;  %v8505_v34 = vpop.f32.mrf.mxu1 }
 0x12b   : > { %v590_v31 = vpop.f32.mrf.mxu0 }
 0x12c   : > { %v591_v35 = vadd.f32 %v590_v31, %v8447_v32  ;;  %v824_v39 = vpop.f32.mrf.mxu1 }
 0x12d   : > { %v8508_v36 = vpop.f32.mrf.mxu0  ;;  %v8510_v55 = vadd.f32 %v824_v39, %v580_v23 }
 0x12e   : > { %v826_v63 = vpop.f32.mrf.mxu1 }
 0x12f   : > { %v601_v59 = vpop.f32.mrf.mxu0  ;;  %v8513_v19 = vadd.f32 %v826_v63, %v582_v29 }
 0x130   : > { %v602_v1 = vadd.f32 %v601_v59, %v8447_v32  ;;  %v831_v33 = vpop.f32.mrf.mxu1 }
 0x131   : > { %v603_v20 = vpop.f32.mrf.mxu0  ;;  %v8516_v46 = vadd.f32 %v831_v33, %v591_v35 }
 0x132   : > { %v604_v37 = vadd.f32 %v603_v20, %v8452_v45  ;;  %v8518_v61 = vpop.f32.mrf.mxu1 }
 0x133   : > { %v612_v50 = vpop.f32.mrf.mxu0 }
 0x134   : > { %v613_v9 = vadd.f32 %v612_v50, %v8447_v32  ;;  %v838_v48 = vpop.f32.mrf.mxu1 }
 0x135   : > { %v8521_v14 = vpop.f32.mrf.mxu0  ;;  %v8523_v49 = vadd.f32 %v838_v48, %v602_v1 }
 0x136   : > { %v840_v13 = vpop.f32.mrf.mxu1 }
 0x137   : > { %v623_v54 = vpop.f32.mrf.mxu0  ;;  %v8526_v4 = vadd.f32 %v840_v13, %v604_v37 }
 0x138   : > { %v624_v38 = vadd.f32 %v623_v54, %v8447_v32  ;;  %v845_v44 = vpop.f32.mrf.mxu1 }
 0x139   : > { %v625_v56 = vpop.f32.mrf.mxu0  ;;  %v8529_v15 = vadd.f32 %v845_v44, %v613_v9 }
 0x13a   : > { %v626_v62 = vadd.f32 %v625_v56, %v8452_v45  ;;  %v8531_v25 = vpop.f32.mrf.mxu1 }
 0x13b   : > { %v634_v40 = vpop.f32.mrf.mxu0 }
 0x13c   : > { %v635_v8 = vadd.f32 %v634_v40, %v8447_v32  ;;  %v852_v42 = vpop.f32.mrf.mxu1 }
 0x13d   : > { %v8534_v7 = vpop.f32.mrf.mxu0  ;;  %v8536_v6 = vadd.f32 %v852_v42, %v624_v38 }
 0x13e   : > { %v854_v12 = vpop.f32.mrf.mxu1 }
 0x13f   : > { %v645_v11 = vpop.f32.mrf.mxu0  ;;  %v8539_v22 = vadd.f32 %v854_v12, %v626_v62 }
 0x140   : > { %v646_v17 = vadd.f32 %v645_v11, %v8447_v32  ;;  %v859_v26 = vpop.f32.mrf.mxu1 }
 0x141   : > { %v647_v23 = vpop.f32.mrf.mxu0  ;;  %v8542_v29 = vadd.f32 %v859_v26, %v635_v8 }
 0x142   : > { %v648_v28 = vadd.f32 %v647_v23, %v8452_v45  ;;  %v8544_v35 = vpop.f32.mrf.mxu1 }
 0x143   : > { %v656_v31 = vpop.f32.mrf.mxu0 }
 0x144   : > { %v657_v39 = vadd.f32 %v656_v31, %v8447_v32  ;;  %v866_v63 = vpop.f32.mrf.mxu1 }
 0x145   : > { %v8547_v59 = vpop.f32.mrf.mxu0  ;;  %v8549_v1 = vadd.f32 %v866_v63, %v646_v17 }
 0x146   : > { %v868_v33 = vpop.f32.mrf.mxu1 }
 0x147   : > { %v962_v20 = vpop.f32.mrf.mxu0  ;;  %v8552_v50 = vadd.f32 %v868_v33, %v648_v28 }
 0x148   : > { %v963_v37 = vadd.f32 %v962_v20, %v8458_v2 }
 0x149   : > { %v964_v9 = vpop.f32.mrf.mxu0  ;;  %v873_v48 = vpop.f32.mrf.mxu1 }
 0x14a   : > { %v965_v54 = vadd.f32 %v964_v9, %v8460_v0  ;;  %v8555_v13 = vadd.f32 %v873_v48, %v657_v39 }
 0x14b   : > { %v8557_v38 = vpop.f32.mrf.mxu0  ;;  %v8559_v32 = vpop.f32.mrf.mxu1 }
 0x14d   : > { %v8561_v56 = vpop.f32.mrf.mxu0  ;;  %v1164_v44 = vpop.f32.mrf.mxu1 }
 0x14e   : > { %v8563_v62 = vadd.f32 %v1164_v44, %v963_v37 }
 0x14f   : > { %v978_v40 = vpop.f32.mrf.mxu0  ;;  %v1166_v8 = vpop.f32.mrf.mxu1 }
 0x150   : > { %v979_v2 = vadd.f32 %v978_v40, %v8471_v27  ;;  %v8566_v42 = vadd.f32 %v1166_v8, %v965_v54 }
 0x151   : > { %v980_v11 = vpop.f32.mrf.mxu0  ;;  %v8568_v12 = vpop.f32.mrf.mxu1 }
 0x152   : > { %v981_v0 = vadd.f32 %v980_v11, %v8473_v53 }
 0x153   : > { %v986_v17 = vpop.f32.mrf.mxu0  ;;  %v8571_v23 = vpop.f32.mrf.mxu1 }
 0x154   : > { %v987_v26 = vadd.f32 %v986_v17, %v8476_v43 }
 0x155   : > { %v8574_v28 = vpop.f32.mrf.mxu0  ;;  %v1182_v31 = vpop.f32.mrf.mxu1 }
 0x156   : > { %v8576_v39 = vadd.f32 %v1182_v31, %v979_v2 }
 0x157   : > { %v994_v63 = vpop.f32.mrf.mxu0  ;;  %v1184_v20 = vpop.f32.mrf.mxu1 }
 0x158   : > { %v995_v27 = vadd.f32 %v994_v63, %v8484_v41  ;;  %v8579_v33 = vadd.f32 %v1184_v20, %v981_v0 }
 0x159   : > { %v996_v37 = vpop.f32.mrf.mxu0  ;;  %v1191_v9 = vpop.f32.mrf.mxu1 }
 0x15a   : > { %v997_v53 = vadd.f32 %v996_v37, %v8487_v3  ;;  %v8582_v48 = vadd.f32 %v1191_v9, %v987_v26 }
 0x15b   : > { %v1002_v54 = vpop.f32.mrf.mxu0  ;;  %v8584_v44 = vpop.f32.mrf.mxu1 }
 0x15c   : > { %v1003_v43 = vadd.f32 %v1002_v54, %v8489_v18 }
 0x15d   : > { %v8587_v40 = vpop.f32.mrf.mxu0  ;;  %v1200_v8 = vpop.f32.mrf.mxu1 }
 0x15e   : > { %v8589_v2 = vadd.f32 %v1200_v8, %v995_v27 }
 0x15f   : > { %v1010_v11 = vpop.f32.mrf.mxu0  ;;  %v1202_v41 = vpop.f32.mrf.mxu1 }
 0x160   : > { %v1011_v0 = vadd.f32 %v1010_v11, %v8497_v16  ;;  %v8592_v17 = vadd.f32 %v1202_v41, %v997_v53 }
 0x161   : > { %v1012_v31 = vpop.f32.mrf.mxu0  ;;  %v1209_v3 = vpop.f32.mrf.mxu1 }
 0x162   : > { %v1013_v26 = vadd.f32 %v1012_v31, %v8500_v24  ;;  %v8595_v63 = vadd.f32 %v1209_v3, %v1003_v43  ;;  %v593_v43 = vadd.f32 %v8508_v36, %v8452_v45 }
 0x163   : > { %v1018_v20 = vpop.f32.mrf.mxu0  ;;  %v8597_v37 = vpop.f32.mrf.mxu1 }
 0x164   : > { %12575 = vst [vmem:[#allocation9_spill] sm:$0xff] %v8595_v63  ;;  %v1019_v18 = vadd.f32 %v1018_v20, %v8503_v30 }
 0x165   : > { %v8600_v9 = vpop.f32.mrf.mxu0  ;;  %v1218_v27 = vpop.f32.mrf.mxu1 }
 0x166   : > { %v8602_v54 = vadd.f32 %v1218_v27, %v1011_v0  ;;  %v834_v0 = vadd.f32 %v8518_v61, %v593_v43 }
 0x167   : > { %v1026_v8 = vpop.f32.mrf.mxu0  ;;  %v1220_v16 = vpop.f32.mrf.mxu1 }
 0x168   : > { %12576 = vst [vmem:[#allocation10_spill] sm:$0xff] %v8602_v54  ;;  %v1027_v53 = vadd.f32 %v1026_v8, %v8510_v55  ;;  %v8605_v11 = vadd.f32 %v1220_v16, %v1013_v26 }
 0x169   : > { %v1028_v41 = vpop.f32.mrf.mxu0  ;;  %v1227_v24 = vpop.f32.mrf.mxu1 }
 0x16a   : > { %12577 = vst [vmem:[#allocation11_spill] sm:$0xff] %v8605_v11  ;;  %v1029_v31 = vadd.f32 %v1028_v41, %v8513_v19  ;;  %v8610_v3 = vadd.f32 %v1227_v24, %v1019_v18  ;;  %v615_v41 = vadd.f32 %v8521_v14, %v8452_v45 }
 0x16b   : > { %v1034_v30 = vpop.f32.mrf.mxu0  ;;  %v8612_v20 = vpop.f32.mrf.mxu1 }
 0x16c   : > { %12578 = vst [vmem:[#allocation12_spill] sm:$0xff] %v8610_v3  ;;  %v1035_v27 = vadd.f32 %v1034_v30, %v8516_v46 }
 0x16d   : > { %v1036_v21 = vpop.f32.mrf.mxu0  ;;  %v1236_v55 = vpop.f32.mrf.mxu1 }
 0x16e   : > { %v1037_v26 = vadd.f32 %v1036_v21, %v834_v0  ;;  %v8616_v8 = vadd.f32 %v1236_v55, %v1027_v53  ;;  %v848_v21 = vadd.f32 %v8531_v25, %v615_v41  ;;  %v637_v25 = vadd.f32 %v8534_v7, %v8452_v45 }
 0x16f   : > { %v1042_v16 = vpop.f32.mrf.mxu0  ;;  %v1238_v11 = vpop.f32.mrf.mxu1 }
 0x170   : > { %12579 = vst [vmem:[#allocation13_spill] sm:$0xff] %v8616_v8  ;;  %v1043_v36 = vadd.f32 %v1042_v16, %v8523_v49  ;;  %v8619_v54 = vadd.f32 %v1238_v11, %v1029_v31 }
 0x171   : > { %v1044_v19 = vpop.f32.mrf.mxu0  ;;  %v1245_v18 = vpop.f32.mrf.mxu1 }
 0x172   : > { %12580 = vst [vmem:[#allocation14_spill] sm:$0xff] %v8619_v54  ;;  %v1045_v61 = vadd.f32 %v1044_v19, %v8526_v4  ;;  %v8624_v24 = vadd.f32 %v1245_v18, %v1035_v27 }
 0x173   : > { %v1050_v46 = vpop.f32.mrf.mxu0  ;;  %v1247_v43 = vpop.f32.mrf.mxu1 }
 0x174   : > { %12581 = vst [vmem:[#allocation15_spill] sm:$0xff] %v8624_v24  ;;  %v1051_v53 = vadd.f32 %v1050_v46, %v8529_v15  ;;  %v8628_v30 = vadd.f32 %v1247_v43, %v1037_v26 }
 0x175   : > { %v1052_v49 = vpop.f32.mrf.mxu0  ;;  %v1254_v11 = vpop.f32.mrf.mxu1 }
 0x176   : > { %12582 = vst [vmem:[#allocation16_spill] sm:$0xff] %v8628_v30  ;;  %v1053_v31 = vadd.f32 %v1052_v49, %v848_v21  ;;  %v8630_v0 = vadd.f32 %v1254_v11, %v1043_v36  ;;  %v862_v36 = vadd.f32 %v8544_v35, %v637_v25  ;;  %v659_v35 = vadd.f32 %v8547_v59, %v8452_v45 }
 0x177   : > { %v1058_v55 = vpop.f32.mrf.mxu0  ;;  %v1256_v16 = vpop.f32.mrf.mxu1 }
 0x178   : > { %12583 = vst [vmem:[#allocation17_spill] sm:$0xff] %v8630_v0  ;;  %v1059_v14 = vadd.f32 %v1058_v55, %v8536_v6  ;;  %v8633_v4 = vadd.f32 %v1256_v16, %v1045_v61 }
 0x179   : > { %v1060_v27 = vpop.f32.mrf.mxu0  ;;  %v1263_v19 = vpop.f32.mrf.mxu1 }
 0x17a   : > { %12584 = vst [vmem:[#allocation18_spill] sm:$0xff] %v8633_v4  ;;  %v1061_v15 = vadd.f32 %v1060_v27, %v8539_v22  ;;  %v8638_v26 = vadd.f32 %v1263_v19, %v1051_v53 }
 0x17b   : > { %v1066_v18 = vpop.f32.mrf.mxu0  ;;  %v1265_v41 = vpop.f32.mrf.mxu1 }
 0x17c   : > { %12585 = vst [vmem:[#allocation19_spill] sm:$0xff] %v8638_v26  ;;  %v1067_v46 = vadd.f32 %v1066_v18, %v8542_v29  ;;  %v8642_v43 = vadd.f32 %v1265_v41, %v1053_v31 }
 0x17d   : > { %v1068_v6 = vpop.f32.mrf.mxu0  ;;  %v1272_v61 = vpop.f32.mrf.mxu1 }
 0x17e   : > { %12586 = vst [vmem:[#allocation20_spill] sm:$0xff] %v8642_v43  ;;  %v1069_v21 = vadd.f32 %v1068_v6, %v862_v36  ;;  %v8644_v49 = vadd.f32 %v1272_v61, %v1059_v14  ;;  %v876_v14 = vadd.f32 %v8559_v32, %v659_v35 }
 0x17f   : > { %v1074_v11 = vpop.f32.mrf.mxu0  ;;  %v1274_v55 = vpop.f32.mrf.mxu1 }
 0x180   : > { %12587 = vst [vmem:[#allocation21_spill] sm:$0xff] %v8644_v49  ;;  %v1075_v7 = vadd.f32 %v1074_v11, %v8549_v1  ;;  %v8647_v22 = vadd.f32 %v1274_v55, %v1061_v15 }
 0x181   : > { %v1076_v53 = vpop.f32.mrf.mxu0  ;;  %v1281_v16 = vpop.f32.mrf.mxu1 }
 0x182   : > { %12588 = vst [vmem:[#allocation22_spill] sm:$0xff] %v8647_v22  ;;  %v1077_v29 = vadd.f32 %v1076_v53, %v8552_v50  ;;  %v8652_v31 = vadd.f32 %v1281_v16, %v1067_v46 }
 0x183   : > { %v1082_v27 = vpop.f32.mrf.mxu0  ;;  %v1283_v19 = vpop.f32.mrf.mxu1 }
 0x184   : > { %12589 = vst [vmem:[#allocation23_spill] sm:$0xff] %v8652_v31  ;;  %v1083_v25 = vadd.f32 %v1082_v27, %v8555_v13  ;;  %v8656_v18 = vadd.f32 %v1283_v19, %v1069_v21  ;;  %v505_v27 = vadd.f32 %v8454_v57, %v8452_v45  ;;  %v971_v19 = vadd.f32 %v8557_v38, %v8463_v47 }
 0x185   : > { %v1084_v1 = vpop.f32.mrf.mxu0  ;;  %v1290_v15 = vpop.f32.mrf.mxu1 }
 0x186   : > { %12590 = vst [vmem:[#allocation24_spill] sm:$0xff] %v8656_v18  ;;  %v1085_v41 = vadd.f32 %v1084_v1, %v876_v14  ;;  %v8658_v36 = vadd.f32 %v1290_v15, %v1075_v7  ;;  %v778_v1 = vadd.f32 %v8465_v52, %v505_v27  ;;  %v1174_v15 = vadd.f32 %v8568_v12, %v971_v19 }
 0x187   : > { %v1292_v6 = vpop.f32.mrf.mxu1  ;;  %v1395_v61 = vpop.f32.mrf.mxu0 }
 0x188   : > { %12591 = vst [vmem:[#allocation25_spill] sm:$0xff] %v8658_v36  ;;  %v8660_v59 = vadd.f32 %v1292_v6, %v1077_v29  ;;  %v1396_v55 = vadd.f32 %v1395_v61, %v8563_v62 }
 0x189   : > { %v1299_v50 = vpop.f32.mrf.mxu1  ;;  %v1397_v32 = vpop.f32.mrf.mxu0 }
 0x18a   : > { %12592 = vst [vmem:[#allocation26_spill] sm:$0xff] %v8660_v59  ;;  %v8662_v46 = vadd.f32 %v1299_v50, %v1083_v25  ;;  %v1398_v16 = vadd.f32 %v1397_v32, %v8566_v42  ;;  %v973_v50 = vadd.f32 %v8561_v56, %v778_v1 }
 0x18b   : > { %v1301_v11 = vpop.f32.mrf.mxu1  ;;  %v1402_v14 = vpop.f32.mrf.mxu0 }
 0x18c   : > { %12593 = vst [vmem:[#allocation27_spill] sm:$0xff] %v8662_v46  ;;  %v8665_v53 = vadd.f32 %v1301_v11, %v1085_v41  ;;  %v1403_v47 = vadd.f32 %v1402_v14, %v1174_v15  ;;  %v1176_v32 = vadd.f32 %v8571_v23, %v973_v50 }
 0x18d   : > { %v1580_v13 = vpop.f32.mrf.mxu1  ;;  %v1404_v11 = vpop.f32.mrf.mxu0 }
 0x18e   : > { %12594 = vst [vmem:[#allocation28_spill] sm:$0xff] %v8665_v53  ;;  %v8667_v21 = vadd.f32 %v1580_v13, %v1396_v55 }
 0x18f   : > { %v1582_v7 = vpop.f32.mrf.mxu1 }
 0x190   : > { %12595 = vst [vmem:[#allocation29_spill] sm:$0xff] %v8667_v21  ;;  %v12386_v35 = vand.u32 2147483647, %v8667_v21  ;;  %v1700_v29 = vand.u32 2139095040, %v8667_v21  ;;  %v8676_v62 = vadd.f32 %v1582_v7, %v1398_v16 }
 0x191   : > { %v1587_v57 = vpop.f32.mrf.mxu1 }
 0x192   : > { %v1701_v25 = vshrl.u32 %v1700_v29, 23  ;;  %v1704_v42 = vand.u32 8388607, %v12386_v35  ;;  %v1804_v41 = vand.u32 2139095040, %v8676_v62  ;;  %v12385_v61 = vand.u32 2147483647, %v8676_v62 }
 0x193   : > { %v8686_v12 = vadd.f32 %v1587_v57, %v1403_v47  ;;  %v1589_v7 = vpop.f32.mrf.mxu1  ;;  %v1405_v29 = vadd.f32 %v1404_v11, %v1176_v32  ;;  %v12387_v57 = vmov 2475754826   ;;  %v12389_v47 = vmov 2131351028  }
 0x194   : > { %v6829_v6 = vadd.s32 4294967169, %v1701_v25  ;;  %v1805_v38 = vshrl.u32 %v1804_v41, 23  ;;  %v1705_v52 = vor.u32 8388608, %v1704_v42  ;;  %v8690_v16 = vand.u32 8388607, %v12385_v61 }
 0x195   : > { %12596 = vst [vmem:[#allocation30_spill] sm:$0xff] %v8686_v12  ;;  %v1908_v1 = vand.u32 2139095040, %v8686_v12  ;;  %v8695_v23 = vadd.f32 %v1589_v7, %v1405_v29  ;;  %v12393_v42 = vmov 683565275   ;;  %v12391_v11 = vmov 2102212464  }
 0x196   : > { %v1707_v55 = vadd.s32 1, %v6829_v6  ;;  %v6833_v13 = vadd.s32 4294967169, %v1805_v38  ;;  %v8692_v25 = vshll.u32 %v1705_v52, 8  ;;  %v12395_v32 = vmov 920167782  }
 0x197   : > { %v12397_v35 = vmov 1326507024  }
 0x198   : > { %vm1708_vm1 = vcmp.gt.s32.totalorder %v1707_v55, 0  ;;  %v1811_v19 = vadd.s32 1, %v6833_v13 }
 0x199   : > { %v1709_v27 = vsel %vm1708_vm1, %v1707_v55, 0 }
 0x19a   : > { %v1710_v56 = vshrl.u32 %v1709_v27, 5  ;;  %v1711_v14 = vand.u32 31, %v1709_v27  ;;  %vm1812_vm2 = vcmp.gt.s32.totalorder %v1811_v19, 0 }
 0x19c   : > { %v1712_v15 = vsub.s32 32, %v1711_v14  ;;  %v1714_v41 = vshll.u32 %v12393_v42, %v1711_v14  ;;  %v1717_v50 = vshll.u32 %v12387_v57, %v1711_v14  ;;  %v1720_v38 = vshll.u32 %v12389_v47, %v1711_v14 }
 0x19d   : > { %v1723_v55 = vshll.u32 %v12391_v11, %v1711_v14  ;;  %v1726_v52 = vshll.u32 %v12395_v32, %v1711_v14  ;;  %vm1729_vm3 = vcmp.lt.s32.totalorder %v1710_v56, 1  ;;  %vm1731_vm4 = vcmp.lt.s32.totalorder %v1710_v56, 3 }
 0x19e   : > { %v1715_v13 = vshrl.u32 %v12387_v57, %v1712_v15  ;;  %v1718_v7 = vshrl.u32 %v12389_v47, %v1712_v15  ;;  %v1721_v29 = vshrl.u32 %v12391_v11, %v1712_v15  ;;  %v1713_v27 = vshrl.u32 %v12393_v42, %v1712_v15 }
 0x19f   : > { %v1724_v61 = vshrl.u32 %v12395_v32, %v1712_v15  ;;  %v1727_v6 = vshrl.u32 %v12397_v35, %v1712_v15  ;;  %v1813_v14 = vsel %vm1812_vm2, %v1811_v19, 0  ;;  %vm1732_vm5 = vcmp.lt.s32.totalorder %v1710_v56, 4 }
 0x1a0   : > { %v1716_v53 = vor.u32 %v1715_v13, %v1714_v41  ;;  %v1719_v46 = vor.u32 %v1718_v7, %v1717_v50  ;;  %v1722_v59 = vor.u32 %v1721_v29, %v1720_v38  ;;  %v1815_v47 = vand.u32 31, %v1813_v14 }
 0x1a1   : > { %v1725_v36 = vor.u32 %v1724_v61, %v1723_v55  ;;  %v1728_v57 = vor.u32 %v1727_v6, %v1726_v52  ;;  %vm1730_vm6 = vcmp.lt.s32.totalorder %v1710_v56, 2  ;;  %v1909_v19 = vshrl.u32 %v1908_v1, 23 }
 0x1a2   : > { %v1733_v11 = vsel %vm1729_vm3, %v1713_v27, %v1716_v53  ;;  %v1734_v18 = vsel %vm1732_vm5, %v1722_v59, 2102212464  ;;  %v1737_v42 = vsel %vm1729_vm3, %v1716_v53, %v1719_v46  ;;  %v1741_v32 = vsel %vm1729_vm3, %v1719_v46, %v1722_v59 }
 0x1a3   : > { %v1735_v31 = vsel %vm1731_vm4, %v1719_v46, %v1734_v18  ;;  %v1738_v15 = vsel %vm1732_vm5, %v1725_v36, 920167782  ;;  %v1742_v35 = vsel %vm1732_vm5, %v1728_v57, 1326507024  ;;  %v1816_v41 = vsub.s32 32, %v1815_v47 }
 0x1a4   : > { %v1739_v50 = vsel %vm1731_vm4, %v1722_v59, %v1738_v15  ;;  %v1743_v61 = vsel %vm1731_vm4, %v1725_v36, %v1742_v35  ;;  %v1736_v6 = vsel %vm1730_vm6, %v1733_v11, %v1735_v31  ;;  %v8716_v52 = vshrl.u32 %v1813_v14, 5 }
 0x1a5   : > { %v1740_v38 = vsel %vm1730_vm6, %v1737_v42, %v1739_v50  ;;  %v1744_v55 = vsel %vm1730_vm6, %v1741_v32, %v1743_v61  ;;  %v12597_v57 = vmov 683565275   ;;  %v12598_v59 = vmov 2475754826  }
 0x1a6   : > { %v8719_v53 = vmul.u32.u64.low %v8692_v25, %v1744_v55  ;;  %v8720_v13 = vmul.u32.u64.high %v8692_v25, %v1744_v55, %v8719_v53  ;;  %v8723_v18 = vmul.u32.u64.low %v8692_v25, %v1740_v38  ;;  %v8724_v46 = vmul.u32.u64.high %v8692_v25, %v1740_v38, %v8723_v18 }
 0x1a7   : > { %v1818_v7 = vshll.u32 %v12597_v57, %v1815_v47  ;;  %v1819_v56 = vshrl.u32 %v12598_v59, %v1816_v41  ;;  %v1821_v36 = vshll.u32 %v12598_v59, %v1815_v47  ;;  %v12599_v31 = vmov 2131351028  }
 0x1a8   : > { %v1822_v35 = vshrl.u32 %v12599_v31, %v1816_v41  ;;  %v1824_v1 = vshll.u32 %v12599_v31, %v1815_v47  ;;  %v12600_v42 = vmov 2102212464   ;;  %v12601_v29 = vmov 920167782  }
 0x1a9   : > { %v1825_v11 = vshrl.u32 %v12600_v42, %v1816_v41  ;;  %v1827_v32 = vshll.u32 %v12600_v42, %v1815_v47  ;;  %v1828_v27 = vshrl.u32 %v12601_v29, %v1816_v41  ;;  %v1820_v14 = vor.u32 %v1819_v56, %v1818_v7 }
 0x1aa   : > { %v1823_v15 = vor.u32 %v1822_v35, %v1821_v36  ;;  %v1830_v50 = vshll.u32 %v12601_v29, %v1815_v47  ;;  %v12602_v61 = vmov 1326507024   ;;  %vm1754_vm7 = vc.u32 %v8720_v13, %v8723_v18 }
 0x1ab   : > { %v1831_v38 = vshrl.u32 %v12602_v61, %v1816_v41  ;;  %v1755_v55 = vadd.s32 1, %v8724_v46  ;;  %v1826_v53 = vor.u32 %v1825_v11, %v1824_v1  ;;  %v6837_v22 = vadd.s32 4294967169, %v1909_v19 }
 0x1ac   : > { %v1752_v49 = vmul.u32 %v8692_v25, %v1736_v6  ;;  %v1829_v43 = vor.u32 %v1828_v27, %v1827_v32  ;;  %vm1833_vm8 = vcmp.lt.s32.totalorder %v8716_v52, 1  ;;  %vm1836_vm9 = vcmp.lt.s32.totalorder %v8716_v52, 4 }
 0x1ad   : > { %v1832_v26 = vor.u32 %v1831_v38, %v1830_v50  ;;  %v1756_v7 = vsel %vm1754_vm7, %v1755_v55, %v8724_v46  ;;  %v1841_v47 = vsel %vm1833_vm8, %v1820_v14, %v1823_v15  ;;  %v12603_v56 = vor.u32 8388608, %v8690_v16 }
 0x1ae   : > { %v1757_v35 = vadd.s32 %v1756_v7, %v1752_v49  ;;  %vm1835_vm10 = vcmp.lt.s32.totalorder %v8716_v52, 3  ;;  %v1842_v25 = vsel %vm1836_vm9, %v1829_v43, 920167782  ;;  %v1845_v19 = vsel %vm1833_vm8, %v1823_v15, %v1826_v53 }
 0x1af   : > { %v1849_v36 = vshll.u32 %v12603_v56, 8  ;;  %vm1834_vm11 = vcmp.lt.s32.totalorder %v8716_v52, 2  ;;  %v1843_v6 = vsel %vm1835_vm10, %v1826_v53, %v1842_v25  ;;  %v1846_v46 = vsel %vm1836_vm9, %v1832_v26, 1326507024 }
 0x1b0   : > { %v1915_v1 = vadd.s32 1, %v6837_v22  ;;  %v1758_v16 = vadd.s32 536870912, %v1757_v35  ;;  %v1844_v49 = vsel %vm1834_vm11, %v1841_v47, %v1843_v6  ;;  %v1847_v11 = vsel %vm1835_vm10, %v1829_v43, %v1846_v46 }
 0x1b1   : > { %v1848_v32 = vsel %vm1834_vm11, %v1845_v19, %v1847_v11  ;;  %v8764_v27 = vmul.u32.u64.low %v1849_v36, %v1844_v49  ;;  %v8765_v50 = vmul.u32.u64.high %v1849_v36, %v1844_v49, %v8764_v27  ;;  %v2012_v38 = vand.u32 2139095040, %v8695_v23 }
 0x1b2   : > { %v8769_v55 = vmul.u32.u64.low %v1849_v36, %v1848_v32  ;;  %v8770_v7 = vmul.u32.u64.high %v1849_v36, %v1848_v32, %v8769_v55  ;;  %vm1916_vm12 = vcmp.gt.s32.totalorder %v1915_v1, 0  ;;  %v1838_v26 = vsel %vm1836_vm9, %v1826_v53, 2102212464 }
 0x1b3   : > { %v1917_v22 = vsel %vm1916_vm12, %v1915_v1, 0  ;;  %v8774_v47 = vshrl.u32 %v1758_v16, 30  ;;  %v1817_v43 = vshrl.u32 %v12597_v57, %v1816_v41  ;;  %v12399_v56 = vand.u32 2147483647, %v8686_v12 }
 0x1b4   : > { %v1919_v25 = vand.u32 31, %v1917_v22  ;;  %v2013_v19 = vshrl.u32 %v2012_v38, 23  ;;  %v1839_v46 = vsel %vm1835_vm10, %v1823_v15, %v1838_v26  ;;  %v1859_v49 = vadd.s32 1, %v8765_v50 }
 0x1b5   : > { %v1837_v6 = vsel %vm1833_vm8, %v1817_v43, %v1820_v14  ;;  %v1760_v53 = vshll.u32 %v8774_v47, 30  ;;  %vm1858_vm13 = vc.u32 %v8770_v7, %v8764_v27  ;;  %v1912_v41 = vand.u32 8388607, %v12399_v56 }
 0x1b6   : > { %v1920_v11 = vsub.s32 32, %v1919_v25  ;;  %v1840_v1 = vsel %vm1834_vm11, %v1837_v6, %v1839_v46  ;;  %v6841_v32 = vadd.s32 4294967169, %v2013_v19  ;;  %v1918_v15 = vshrl.u32 %v1917_v22, 5 }
 0x1b7   : > { %v1922_v38 = vshll.u32 %v12597_v57, %v1919_v25  ;;  %v1925_v55 = vshll.u32 %v12598_v59, %v1919_v25  ;;  %v1860_v43 = vsel %vm1858_vm13, %v1859_v49, %v8765_v50  ;;  %v1928_v4 = vshll.u32 %v12599_v31, %v1919_v25 }
 0x1b8   : > { %v1923_v16 = vshrl.u32 %v12598_v59, %v1920_v11  ;;  %v1926_v14 = vshrl.u32 %v12599_v31, %v1920_v11  ;;  %v1929_v26 = vshrl.u32 %v12600_v42, %v1920_v11  ;;  %v1931_v56 = vshll.u32 %v12600_v42, %v1919_v25 }
 0x1b9   : > { %v1932_v52 = vshrl.u32 %v12601_v29, %v1920_v11  ;;  %v8799_v6 = vsub.s32 %v1757_v35, %v1760_v53  ;;  %v1856_v46 = vmul.u32 %v1849_v36, %v1840_v1  ;;  %v1934_v24 = vshll.u32 %v12601_v29, %v1919_v25 }
 0x1ba   : > { %v1924_v0 = vor.u32 %v1923_v16, %v1922_v38  ;;  %v1927_v19 = vor.u32 %v1926_v14, %v1925_v55  ;;  %v1930_v22 = vor.u32 %v1929_v26, %v1928_v4  ;;  %v1935_v54 = vshrl.u32 %v12602_v61, %v1920_v11 }
 0x1bb   : > { %v1933_v30 = vor.u32 %v1932_v52, %v1931_v56  ;;  %v1861_v8 = vadd.s32 %v1860_v43, %v1856_v46  ;;  %v1913_v3 = vor.u32 8388608, %v1912_v41  ;;  %vm1937_vm14 = vcmp.lt.s32.totalorder %v1918_v15, 1 }
 0x1bc   : > { %v1936_v50 = vor.u32 %v1935_v54, %v1934_v24  ;;  %vm1940_vm15 = vcmp.lt.s32.totalorder %v1918_v15, 4  ;;  %v2019_v49 = vadd.s32 1, %v6841_v32  ;;  %v1763_v63 = vsub.s32 0, %v8799_v6 }
 0x1bd   : > { %vm1939_vm0 = vcmp.lt.s32.totalorder %v1918_v15, 3  ;;  %v1945_v35 = vsel %vm1937_vm14, %v1924_v0, %v1927_v19  ;;  %v1946_v36 = vsel %vm1940_vm15, %v1933_v30, 920167782  ;;  %v1862_v4 = vadd.s32 536870912, %v1861_v8 }
 0x1be   : > { %v1947_v53 = vsel %vm1939_vm0, %v1930_v22, %v1946_v36  ;;  %vm1938_vm1 = vcmp.lt.s32.totalorder %v1918_v15, 2  ;;  %v1949_v56 = vsel %vm1937_vm14, %v1927_v19, %v1930_v22  ;;  %v1953_v25 = vshll.u32 %v1913_v3, 8 }
 0x1bf   : > { %v1942_v1 = vsel %vm1940_vm15, %v1930_v22, 2102212464  ;;  %v1948_v41 = vsel %vm1938_vm1, %v1945_v35, %v1947_v53  ;;  %v1950_v54 = vsel %vm1940_vm15, %v1936_v50, 1326507024  ;;  %vm2020_vm2 = vcmp.gt.s32.totalorder %v2019_v49, 0 }
 0x1c0   : > { %v6830_v24 = vmin.u32 %v1763_v63, %v8799_v6  ;;  %v1921_v16 = vshrl.u32 %v12597_v57, %v1920_v11  ;;  %v1951_v14 = vsel %vm1939_vm0, %v1933_v30, %v1950_v54  ;;  %v2021_v26 = vsel %vm2020_vm2, %v2019_v49, 0 }
 0x1c1   : > { %v1952_v32 = vsel %vm1938_vm1, %v1949_v56, %v1951_v14  ;;  %v8812_v38 = vmul.u32.u64.low %v1953_v25, %v1948_v41  ;;  %v8813_v55 = vmul.u32.u64.high %v1953_v25, %v1948_v41, %v8812_v38  ;;  %v8816_v43 = vshrl.u32 %v1862_v4, 30 }
 0x1c2   : > { %v1941_v3 = vsel %vm1937_vm14, %v1921_v16, %v1924_v0  ;;  %v1943_v52 = vsel %vm1939_vm0, %v1927_v19, %v1942_v1  ;;  %v8820_v46 = vmul.u32.u64.low %v1953_v25, %v1952_v32  ;;  %v8821_v22 = vmul.u32.u64.high %v1953_v25, %v1952_v32, %v8820_v46  ;;  %v1409_v32 = vpop.f32.mrf.mxu0 }
 0x1c3   : > { %v2023_v63 = vand.u32 31, %v2021_v26  ;;  %v1765_v11 = vclz %v6830_v24  ;;  %v1944_v30 = vsel %vm1938_vm1, %v1941_v3, %v1943_v52  ;;  %v1963_v50 = vadd.s32 1, %v8813_v55 }
 0x1c4   : > { %v1864_v36 = vshll.u32 %v8816_v43, 30  ;;  %v12400_v49 = vand.u32 2147483647, %v8695_v23  ;;  %vm1962_vm3 = vc.u32 %v8821_v22, %v8812_v38  ;;  %v1960_v19 = vmul.u32 %v1953_v25, %v1944_v30 }
 0x1c5   : > { %v8825_v35 = vsub.s32 32, %v2023_v63  ;;  %v6831_v0 = vadd.s32 4294967294, %v1765_v11  ;;  %v527_v53 = vadd.f32 %v8467_v60, %v8452_v45  ;;  %v1964_v4 = vsel %vm1962_vm3, %v1963_v50, %v8813_v55 }
 0x1c6   : > { %v8838_v1 = vsub.s32 %v1861_v8, %v1864_v36  ;;  %v1965_v41 = vadd.s32 %v1964_v4, %v1960_v19  ;;  %v2016_v54 = vand.u32 8388607, %v12400_v49  ;;  %v2026_v24 = vshll.u32 %v12597_v57, %v2023_v63 }
 0x1c7   : > { %v2027_v15 = vshrl.u32 %v12598_v59, %v8825_v35  ;;  %v2030_v56 = vshrl.u32 %v12599_v31, %v8825_v35  ;;  %v2029_v25 = vshll.u32 %v12598_v59, %v2023_v63  ;;  %v2033_v60 = vshrl.u32 %v12600_v42, %v8825_v35 }
 0x1c8   : > { %v2035_v16 = vshll.u32 %v12600_v42, %v2023_v63  ;;  %v2036_v14 = vshrl.u32 %v12601_v29, %v8825_v35  ;;  %vm6832_vm4 = vcmp.lt.s32.totalorder %v6831_v0, 0  ;;  %v1966_v8 = vadd.s32 536870912, %v1965_v41 }
 0x1c9   : > { %v8849_v55 = vshrl.u32 %v2021_v26, 5  ;;  %v2032_v3 = vshll.u32 %v12599_v31, %v2023_v63  ;;  %v8852_v52 = vor.u32 %v2027_v15, %v2026_v24  ;;  %v8854_v46 = vor.u32 %v2030_v56, %v2029_v25  ;;  %v1594_v24 = vpop.f32.mrf.mxu1 }
 0x1ca   : > { %v2037_v11 = vor.u32 %v2036_v14, %v2035_v16  ;;  %v2039_v30 = vshrl.u32 %v12602_v61, %v8825_v35  ;;  %v792_v50 = vadd.f32 %v8478_v58, %v527_v53  ;;  %v549_v36 = vadd.f32 %v8480_v51, %v8452_v45  ;;  %v1411_v16 = vpop.f32.mrf.mxu0 }
 0x1cb   : > { %v2017_v19 = vor.u32 8388608, %v2016_v54  ;;  %v1410_v4 = vadd.f32 %v1409_v32, %v8576_v39  ;;  %v1867_v26 = vsub.s32 0, %v8838_v1  ;;  %v2034_v49 = vor.u32 %v2033_v60, %v2032_v3 }
 0x1cc   : > { %v2038_v15 = vshll.u32 %v12601_v29, %v2023_v63  ;;  %v1768_v56 = vsel %vm6832_vm4, 0, %v6831_v0  ;;  %v8865_v25 = vshrl.u32 %v1966_v8, 30  ;;  %vm2041_vm5 = vcmp.lt.s32.totalorder %v8849_v55, 1 }
 0x1cd   : > { %vm2044_vm6 = vcmp.lt.s32.totalorder %v8849_v55, 4  ;;  %v806_v58 = vadd.f32 %v8491_v5, %v549_v36  ;;  %v2049_v39 = vsel %vm2041_vm5, %v8852_v52, %v8854_v46  ;;  %v571_v0 = vadd.f32 %v8494_v10, %v8452_v45 }
 0x1ce   : > { %v2040_v51 = vor.u32 %v2039_v30, %v2038_v15  ;;  %v2050_v63 = vsel %vm2044_vm6, %v2037_v11, 920167782  ;;  %vm2043_vm7 = vcmp.lt.s32.totalorder %v8849_v55, 3  ;;  %v8879_v53 = vshll.u32 %v2017_v19, 8 }
 0x1cf   : > { %v8881_v54 = vadd.f32 %v1594_v24, %v1410_v4  ;;  %v1773_v60 = vsub.s32 4294967266, %v1768_v56  ;;  %v6834_v5 = vmin.u32 %v1867_v26, %v8838_v1  ;;  %vm2042_vm8 = vcmp.lt.s32.totalorder %v8849_v55, 2 }
 0x1d0   : > { %v2051_v14 = vsel %vm2043_vm7, %v2034_v49, %v2050_v63  ;;  %v820_v32 = vadd.f32 %v8505_v34, %v571_v0  ;;  %v1968_v8 = vshll.u32 %v8865_v25, 30  ;;  %v2053_v10 = vsel %vm2041_vm5, %v8854_v46, %v2034_v49  ;;  %v1596_v34 = vpop.f32.mrf.mxu1 }
 0x1d1   : > { %12604 = vst [vmem:[#allocation31_spill] sm:$0xff] %v8881_v54  ;;  %v2052_v45 = vsel %vm2042_vm8, %v2049_v39, %v2051_v14  ;;  %v989_v3 = vadd.f32 %v8574_v28, %v792_v50  ;;  %v2054_v30 = vsel %vm2044_vm6, %v2040_v51, 1326507024  ;;  %v1753_v4 = vadd.s32 %v8723_v18, %v8720_v13 }
 0x1d2   : > { %v8898_v36 = vmul.u32.u64.low %v8879_v53, %v2052_v45  ;;  %v8899_v19 = vmul.u32.u64.high %v8879_v53, %v2052_v45, %v8898_v36  ;;  %v1769_v26 = vsub.s32 32, %v1768_v56  ;;  %v1412_v15 = vadd.f32 %v1411_v16, %v8579_v33 }
 0x1d3   : > { %v2055_v24 = vsel %vm2043_vm7, %v2037_v11, %v2054_v30  ;;  %v1774_v39 = vadd.s32 127, %v1773_v60  ;;  %v1869_v28 = vclz %v6834_v5  ;;  %v2116_v51 = vand.u32 2139095040, %v8881_v54  ;;  %v1416_v30 = vpop.f32.mrf.mxu0 }
 0x1d4   : > { %v2056_v50 = vsel %vm2042_vm8, %v2053_v10, %v2055_v24  ;;  %v8910_v63 = vsub.s32 %v1965_v41, %v1968_v8  ;;  %v8916_v13 = vadd.f32 %v1596_v34, %v1412_v15  ;;  %v1194_v33 = vadd.f32 %v8584_v44, %v989_v3 }
 0x1d5   : > { %v8913_v0 = vmul.u32.u64.low %v8879_v53, %v2056_v50  ;;  %v8914_v14 = vmul.u32.u64.high %v8879_v53, %v2056_v50, %v8913_v0  ;;  %v2046_v18 = vsel %vm2044_vm6, %v2034_v49, 2102212464  ;;  %v2117_v11 = vshrl.u32 %v2116_v51, 23 }
 0x1d6   : > { %12605 = vst [vmem:[#allocation32_spill] sm:$0xff] %v8916_v13  ;;  %v1005_v60 = vadd.f32 %v8587_v40, %v806_v58  ;;  %v1021_v5 = vadd.f32 %v8600_v9, %v820_v32  ;;  %v1771_v16 = vshrl.u32 %v1753_v4, %v1769_v26  ;;  %v2025_v41 = vshrl.u32 %v12597_v57, %v8825_v35 }
 0x1d7   : > { %v1770_v8 = vshll.u32 %v8799_v6, %v1768_v56  ;;  %v1775_v45 = vshll.u32 %v1774_v39, 23  ;;  %v6835_v10 = vadd.s32 4294967294, %v1869_v28  ;;  %v6845_v34 = vadd.s32 4294967169, %v2117_v11 }
 0x1d8   : > { %v1971_v44 = vsub.s32 0, %v8910_v63  ;;  %v2045_v49 = vsel %vm2041_vm5, %v2025_v41, %v8852_v52  ;;  %v2047_v40 = vsel %vm2043_vm7, %v8854_v46, %v2046_v18  ;;  %v2220_v9 = vand.u32 2139095040, %v8916_v13 }
 0x1d9   : > { %v8935_v35 = vadd.f32 %v8597_v37, %v1005_v60  ;;  %v8938_v6 = vadd.f32 %v8612_v20, %v1021_v5  ;;  %v2067_v56 = vadd.s32 1, %v8899_v19  ;;  %v2123_v58 = vadd.s32 1, %v6845_v34  ;;  %v1418_v37 = vpop.f32.mrf.mxu0 }
 0x1da   : > { %vm1699_vm9 = vcmp.lt.s32.totalorder %v8667_v21, 0  ;;  %v1772_v32 = vor.u32 %v1771_v16, %v1770_v8  ;;  %v1783_v52 = vsub.s32 4, %v8774_v47  ;;  %vm2066_vm10 = vc.u32 %v8914_v14, %v8898_v36 }
 0x1db   : > { %v1776_v46 = vor.u32 4788187, %v1775_v45  ;;  %v2048_v3 = vsel %vm2042_vm8, %v2045_v49, %v2047_v40  ;;  %v12401_v4 = vand.u32 2147483647, %v8881_v54  ;;  %vm2124_vm11 = vcmp.gt.s32.totalorder %v2123_v58, 0 }
 0x1dc   : > { %vm6836_vm12 = vcmp.lt.s32.totalorder %v6835_v10, 0  ;;  %v6838_v20 = vmin.u32 %v1971_v44, %v8910_v63  ;;  %v2125_v26 = vsel %vm2124_vm11, %v2123_v58, 0  ;;  %v2221_v15 = vshrl.u32 %v2220_v9, 23 }
 0x1dd   : > { %v12606_v24 = vand.u32 2147483647, %v8667_v21  ;;  %v8956_v28 = vadd.f32 %v1416_v30, %v8582_v48  ;;  %v2068_v55 = vsel %vm2066_vm10, %v2067_v56, %v8899_v19  ;;  %v2127_v50 = vand.u32 31, %v2125_v26 }
 0x1de   : > { %v1779_v51 = vcvt.s32.f32 %v1772_v32  ;;  %v1784_v0 = vsel %vm1699_vm9, %v1783_v52, %v8774_v47  ;;  %v2064_v18 = vmul.u32 %v8879_v53, %v2048_v3  ;;  %v8963_v11 = vadd.f32 %v1418_v37, %v1194_v33 }
 0x1df   : > { %vm8951_vm13 = vcmp.le.f32.partialorder %v12606_v24, 0.7853982  ;;  %v1777_v60 = vand.u32 2147483647, %v1776_v46  ;;  %v8965_v5 = vsel %vm6836_vm12, 0, %v6835_v10  ;;  %v2128_v48 = vsub.s32 32, %v2127_v50 }
 0x1e0   : > { %v2120_v16 = vand.u32 8388607, %v12401_v4  ;;  %v1973_v41 = vclz %v6838_v20  ;;  %v8969_v8 = vadd.s32 %v2068_v55, %v2064_v18  ;;  %v2130_v19 = vshll.u32 %v12597_v57, %v2127_v50 }
 0x1e1   : > { %v6849_v45 = vadd.s32 4294967169, %v2221_v15  ;;  %v2131_v30 = vshrl.u32 %v12598_v59, %v2128_v48  ;;  %v2133_v47 = vshll.u32 %v12598_v59, %v2127_v50  ;;  %v2134_v53 = vshrl.u32 %v12599_v31, %v2128_v48 }
 0x1e2   : > { %v2137_v33 = vshrl.u32 %v12600_v42, %v2128_v48  ;;  %v8976_v10 = vshrl.u32 %v2125_v26, 5  ;;  %v2136_v34 = vshll.u32 %v12599_v31, %v2127_v50  ;;  %v2139_v44 = vshll.u32 %v12600_v42, %v2127_v50 }
 0x1e3   : > { %v2140_v49 = vshrl.u32 %v12601_v29, %v2128_v48  ;;  %v2132_v40 = vor.u32 %v2131_v30, %v2130_v19  ;;  %v2135_v9 = vor.u32 %v2134_v53, %v2133_v47  ;;  %v2142_v56 = vshll.u32 %v12601_v29, %v2127_v50 }
 0x1e4   : > { %v2143_v58 = vshrl.u32 %v12602_v61, %v2128_v48  ;;  %v1786_v32 = vsel %vm8951_vm13, 0, %v1784_v0  ;;  %v1857_v52 = vadd.s32 %v8764_v27, %v8770_v7  ;;  %v2138_v46 = vor.u32 %v2137_v33, %v2136_v34 }
 0x1e5   : > { %v2141_v3 = vor.u32 %v2140_v49, %v2139_v44  ;;  %v1780_v37 = vmul.f32 %v1779_v51, %v1777_v60  ;;  %v1877_v20 = vsub.s32 4294967266, %v8965_v5  ;;  %v2121_v26 = vor.u32 8388608, %v2120_v16 }
 0x1e6   : > { %v2144_v15 = vor.u32 %v2143_v58, %v2142_v56  ;;  %v2070_v24 = vadd.s32 536870912, %v8969_v8  ;;  %vm2145_vm14 = vcmp.lt.s32.totalorder %v8976_v10, 1  ;;  %vm2148_vm15 = vcmp.lt.s32.totalorder %v8976_v10, 4 }
 0x1e7   : > { %v2227_v55 = vadd.s32 1, %v6849_v45  ;;  %v6839_v50 = vadd.s32 4294967294, %v1973_v41  ;;  %vm2147_vm0 = vcmp.lt.s32.totalorder %v8976_v10, 3  ;;  %v2153_v27 = vsel %vm2145_vm14, %v2132_v40, %v2135_v9 }
 0x1e8   : > { %v2154_v7 = vsel %vm2148_vm15, %v2141_v3, 920167782  ;;  %vm2146_vm1 = vcmp.lt.s32.totalorder %v8976_v10, 2  ;;  %v2157_v0 = vsel %vm2145_vm14, %v2135_v9, %v2138_v46  ;;  %v12402_v18 = vand.u32 2147483647, %v8916_v13 }
 0x1e9   : > { %v2155_v51 = vsel %vm2147_vm0, %v2138_v46, %v2154_v7  ;;  %v1873_v60 = vsub.s32 32, %v8965_v5  ;;  %v2158_v41 = vsel %vm2148_vm15, %v2144_v15, 1326507024  ;;  %v9007_v19 = vshll.u32 %v2121_v26, 8 }
 0x1ea   : > { %v2156_v16 = vsel %vm2146_vm1, %v2153_v27, %v2155_v51  ;;  %v1781_v45 = vxor.u32 2147483648, %v1780_v37  ;;  %v9009_v30 = vshrl.u32 %v2070_v24, 30  ;;  %v2159_v47 = vsel %vm2147_vm0, %v2141_v3, %v2158_v41  ;;  %v1601_v27 = vpop.f32.mrf.mxu1 }
 0x1eb   : > { %vm2228_vm2 = vcmp.gt.s32.totalorder %v2227_v55, 0  ;;  %vm6840_vm3 = vcmp.lt.s32.totalorder %v6839_v50, 0  ;;  %v2160_v53 = vsel %vm2146_vm1, %v2157_v0, %v2159_v47  ;;  %v9020_v44 = vadd.s32 127, %v1877_v20 }
 0x1ec   : > { %12609 = vst [vmem:[#allocation33_spill] sm:$0xff] %v9009_v30  ;;  %v9016_v33 = vmul.u32.u64.low %v9007_v19, %v2156_v16  ;;  %v9017_v34 = vmul.u32.u64.high %v9007_v19, %v2156_v16, %v9016_v33  ;;  %v2150_v49 = vsel %vm2148_vm15, %v2138_v46, 2102212464  ;;  %v2224_v56 = vand.u32 8388607, %v12402_v18 }
 0x1ed   : > { %v2229_v58 = vsel %vm2228_vm2, %v2227_v55, 0  ;;  %v2129_v3 = vshrl.u32 %v12597_v57, %v2128_v48  ;;  %v9028_v26 = vmul.u32.u64.low %v9007_v19, %v2160_v53  ;;  %v9029_v15 = vmul.u32.u64.high %v9007_v19, %v2160_v53, %v9028_v26 }
 0x1ee   : > { %v2231_v24 = vand.u32 31, %v2229_v58  ;;  %v9031_v7 = vadd.s32 3, %v1786_v32  ;;  %v1961_v20 = vadd.s32 %v8812_v38, %v8821_v22  ;;  %v9035_v51 = vsel %vm6840_vm3, 0, %v6839_v50 }
 0x1ef   : > { %v2072_v46 = vshll.u32 %v9009_v30, 30  ;;  %v1874_v55 = vshll.u32 %v8838_v1, %v8965_v5  ;;  %v2149_v48 = vsel %vm2145_vm14, %v2129_v3, %v2132_v40  ;;  %v2151_v0 = vsel %vm2147_vm0, %v2135_v9, %v2150_v49 }
 0x1f0   : > { %v2232_v16 = vsub.s32 32, %v2231_v24  ;;  %v9046_v32 = vsel %vm1699_vm9, %v1781_v45, %v1780_v37  ;;  %v1875_v41 = vshrl.u32 %v1857_v52, %v1873_v60  ;;  %v1879_v38 = vshll.u32 %v9020_v44, 23 }
 0x1f1   : > { %v9050_v22 = vadd.f32 %v1601_v27, %v8956_v28  ;;  %v1981_v50 = vsub.s32 4294967266, %v9035_v51  ;;  %v2225_v47 = vor.u32 8388608, %v2224_v56  ;;  %v9056_v9 = vsub.s32 %v8969_v8, %v2072_v46 }
 0x1f2   : > { %v2235_v53 = vshrl.u32 %v12598_v59, %v2232_v16  ;;  %v2238_v40 = vshrl.u32 %v12599_v31, %v2232_v16  ;;  %v2152_v37 = vsel %vm2146_vm1, %v2149_v48, %v2151_v0  ;;  %v2234_v52 = vshll.u32 %v12597_v57, %v2231_v24 }
 0x1f3   : > { %12610 = vst [vmem:[#allocation34_spill] sm:$0xff] %v9050_v22  ;;  %v2237_v60 = vshll.u32 %v12598_v59, %v2231_v24  ;;  %v2171_v28 = vadd.s32 1, %v9017_v34  ;;  %v9063_v45 = vshrl.u32 %v2229_v58, 5  ;;  %v2240_v44 = vshll.u32 %v12599_v31, %v2231_v24 }
 0x1f4   : > { %v2241_v49 = vshrl.u32 %v12600_v42, %v2232_v16  ;;  %v2236_v56 = vor.u32 %v2235_v53, %v2234_v52  ;;  %v2243_v8 = vshll.u32 %v12600_v42, %v2231_v24  ;;  %v2244_v26 = vshrl.u32 %v12601_v29, %v2232_v16 }
 0x1f5   : > { %v2239_v3 = vor.u32 %v2238_v40, %v2237_v60  ;;  %vm2170_vm4 = vc.u32 %v9029_v15, %v9016_v33  ;;  %v2246_v27 = vshll.u32 %v12601_v29, %v2231_v24  ;;  %v2247_v46 = vshrl.u32 %v12602_v61, %v2232_v16 }
 0x1f6   : > { %v2242_v10 = vor.u32 %v2241_v49, %v2240_v44  ;;  %v1977_v58 = vsub.s32 32, %v9035_v51  ;;  %v1982_v48 = vadd.s32 127, %v1981_v50  ;;  %v2075_v0 = vsub.s32 0, %v9056_v9 }
 0x1f7   : > { %v2245_v4 = vor.u32 %v2244_v26, %v2243_v8  ;;  %v2248_v53 = vor.u32 %v2247_v46, %v2246_v27  ;;  %vm2249_vm5 = vcmp.lt.s32.totalorder %v9063_v45, 1  ;;  %v9076_v40 = vshll.u32 %v2225_v47, 8 }
 0x1f8   : > { %v2324_v52 = vand.u32 2139095040, %v9050_v22  ;;  %v2168_v60 = vmul.u32 %v9007_v19, %v2152_v37  ;;  %v2172_v44 = vsel %vm2170_vm4, %v2171_v28, %v9017_v34  ;;  %vm2252_vm6 = vcmp.lt.s32.totalorder %v9063_v45, 4 }
 0x1f9   : > { %v2257_v24 = vsel %vm2249_vm5, %v2236_v56, %v2239_v3  ;;  %vm1907_vm7 = vcmp.lt.s32.totalorder %v8686_v12, 0  ;;  %vm2251_vm8 = vcmp.lt.s32.totalorder %v9063_v45, 3  ;;  %v2258_v50 = vsel %vm2252_vm6, %v2245_v4, 920167782 }
 0x1fa   : > { %v2261_v47 = vsel %vm2249_vm5, %v2239_v3, %v2242_v10  ;;  %v2262_v19 = vsel %vm2252_vm6, %v2248_v53, 1326507024  ;;  %v1983_v37 = vshll.u32 %v1982_v48, 23  ;;  %v6842_v34 = vmin.u32 %v2075_v0, %v9056_v9 }
 0x1fb   : > { %vm2250_vm9 = vcmp.lt.s32.totalorder %v9063_v45, 2  ;;  %v2259_v28 = vsel %vm2251_vm8, %v2242_v10, %v2258_v50  ;;  %v9096_v49 = vadd.s32 %v2172_v44, %v2168_v60  ;;  %v2263_v26 = vsel %vm2251_vm8, %v2245_v4, %v2262_v19 }
 0x1fc   : > { %v2260_v8 = vsel %vm2250_vm9, %v2257_v24, %v2259_v28  ;;  %v2325_v27 = vshrl.u32 %v2324_v52, 23  ;;  %v1880_v46 = vor.u32 4788187, %v1879_v38  ;;  %v1979_v18 = vshrl.u32 %v1961_v20, %v1977_v58  ;;  %v1603_v20 = vpop.f32.mrf.mxu1 }
 0x1fd   : > { %v2254_v48 = vsel %vm2252_vm6, %v2242_v10, 2102212464  ;;  %v2264_v0 = vsel %vm2250_vm9, %v2261_v47, %v2263_v26  ;;  %v12611_v53 = vand.u32 2147483647, %v8686_v12  ;;  %v1876_v10 = vor.u32 %v1875_v41, %v1874_v55 }
 0x1fe   : > { %v9113_v44 = vmul.u32.u64.low %v9076_v40, %v2264_v0  ;;  %v9114_v24 = vmul.u32.u64.high %v9076_v40, %v2264_v0, %v9113_v44  ;;  %v9117_v4 = vmul.u32.u64.low %v9076_v40, %v2260_v8  ;;  %v9118_v38 = vmul.u32.u64.high %v9076_v40, %v2260_v8, %v9117_v4 }
 0x1ff   : > { %vm9108_vm10 = vcmp.le.f32.partialorder %v12611_v53, 0.7853982  ;;  %v1991_v58 = vsub.s32 4, %v8865_v25  ;;  %v2233_v52 = vshrl.u32 %v12597_v57, %v2232_v16  ;;  %v6853_v50 = vadd.s32 4294967169, %v2325_v27 }
 0x200   : > { %v1978_v47 = vshll.u32 %v8910_v63, %v9035_v51  ;;  %v1984_v19 = vor.u32 4788187, %v1983_v37  ;;  %v2077_v28 = vclz %v6842_v34  ;;  %v2174_v26 = vadd.s32 536870912, %v9096_v49 }
 0x201   : > { %v2253_v8 = vsel %vm2249_vm5, %v2233_v52, %v2236_v56  ;;  %v2255_v0 = vsel %vm2251_vm8, %v2239_v3, %v2254_v48  ;;  %v2331_v1 = vadd.s32 1, %v6853_v50  ;;  %v9134_v5 = vadd.f32 %v1603_v20, %v8963_v11  ;;  %v1423_v52 = vpop.f32.mrf.mxu0 }
 0x202   : > { %v1785_v55 = vsel %vm8951_vm13, %v8667_v21, %v9046_v32  ;;  %v1881_v63 = vand.u32 2147483647, %v1880_v46  ;;  %v1980_v51 = vor.u32 %v1979_v18, %v1978_v47  ;;  %v2275_v16 = vadd.s32 1, %v9118_v38 }
 0x203   : > { %12614 = vst [vmem:[#allocation35_spill] sm:$0xff] %v9134_v5  ;;  %v9144_v41 = vsel %vm1907_vm7, %v1991_v58, %v8865_v25  ;;  %vm2274_vm11 = vc.u32 %v9114_v24, %v9117_v4  ;;  %v12403_v11 = vand.u32 2147483647, %v9050_v22  ;;  %vm2332_vm12 = vcmp.gt.s32.totalorder %v2331_v1, 0 }
 0x204   : > { %v1985_v56 = vand.u32 2147483647, %v1984_v19  ;;  %v6843_v3 = vadd.s32 4294967294, %v2077_v28  ;;  %v2256_v39 = vsel %vm2250_vm9, %v2253_v8, %v2255_v0  ;;  %v2333_v32 = vsel %vm2332_vm12, %v2331_v1, 0 }
 0x205   : > { %v1883_v18 = vcvt.s32.f32 %v1876_v10  ;;  %v9151_v37 = vshrl.u32 %v2174_v26, 30  ;;  %v2335_v34 = vand.u32 31, %v2333_v32  ;;  %v2428_v27 = vand.u32 2139095040, %v9134_v5 }
 0x206   : > { %7505 = vcosq.f32 %v1785_v55  ;;  %v9155_v25 = vand.u32 3, %v9031_v7  ;;  %v1987_v46 = vcvt.s32.f32 %v1980_v51  ;;  %v2276_v48 = vsel %vm2274_vm11, %v2275_v16, %v9118_v38 }
 0x207   : > { %12615 = vst [vmem:[#allocation36_spill] sm:$0xff] %v9151_v37  ;;  %7507 = vsinq.f32 %v1785_v55  ;;  %v9158_v53 = vmul.f32 %v1883_v18, %v1881_v63  ;;  %v1994_v45 = vsel %vm9108_vm10, 0, %v9144_v41  ;;  %v2272_v44 = vmul.u32 %v9076_v40, %v2256_v39 }
 0x208   : > { %12616 = vst [vmem:[#allocation37_spill] sm:$0xff] %v9155_v25  ;;  %v9164_v20 = vmul.f32 %v1987_v46, %v1985_v56  ;;  %vm6844_vm13 = vcmp.lt.s32.totalorder %v6843_v3, 0  ;;  %v2328_v10 = vand.u32 8388607, %v12403_v11  ;;  %v2336_v7 = vsub.s32 32, %v2335_v34 }
 0x209   : > { %v2176_v58 = vshll.u32 %v9151_v37, 30  ;;  %v9169_v38 = vadd.s32 %v2276_v48, %v2272_v44  ;;  %v2338_v50 = vshll.u32 %v12597_v57, %v2335_v34  ;;  %v2429_v47 = vshrl.u32 %v2428_v27, 23 }
 0x20a   : > { %v2339_v19 = vshrl.u32 %v12598_v59, %v2336_v7  ;;  %v2341_v28 = vshll.u32 %v12598_v59, %v2335_v34  ;;  %v2342_v40 = vshrl.u32 %v12599_v31, %v2336_v7  ;;  %v2345_v26 = vshrl.u32 %v12600_v42, %v2336_v7 }
 0x20b   : > { %v2334_v8 = vshrl.u32 %v2333_v32, 5  ;;  %v2344_v0 = vshll.u32 %v12599_v31, %v2335_v34  ;;  %v2347_v1 = vshll.u32 %v12600_v42, %v2335_v34  ;;  %v2348_v55 = vshrl.u32 %v12601_v29, %v2336_v7 }
 0x20c   : > { %v1424_v51 = vadd.f32 %v1423_v52, %v8589_v2  ;;  %v2340_v16 = vor.u32 %v2339_v19, %v2338_v50  ;;  %v2343_v41 = vor.u32 %v2342_v40, %v2341_v28  ;;  %v9182_v56 = vsub.s32 %v9096_v49, %v2176_v58 }
 0x20d   : > { %v2329_v39 = vor.u32 8388608, %v2328_v10  ;;  %v2346_v18 = vor.u32 %v2345_v26, %v2344_v0  ;;  %v2349_v27 = vor.u32 %v2348_v55, %v2347_v1  ;;  %v1989_v32 = vxor.u32 2147483648, %v9164_v20 }
 0x20e   : > { %v9186_v46 = vsel %vm6844_vm13, 0, %v6843_v3  ;;  %v2350_v48 = vshll.u32 %v12601_v29, %v2335_v34  ;;  %v2351_v44 = vshrl.u32 %v12602_v61, %v2336_v7  ;;  %v2278_v11 = vadd.s32 536870912, %v9169_v38 }
 0x20f   : > { %vm2353_vm14 = vcmp.lt.s32.totalorder %v2334_v8, 1  ;;  %vm2356_vm15 = vcmp.lt.s32.totalorder %v2334_v8, 4  ;;  %v6857_v2 = vadd.s32 4294967169, %v2429_v47  ;;  %vm2355_vm0 = vcmp.lt.s32.totalorder %v2334_v8, 3 }
 0x210   : > { %v2352_v52 = vor.u32 %v2351_v44, %v2350_v48  ;;  %v2361_v49 = vsel %vm2353_vm14, %v2340_v16, %v2343_v41  ;;  %v2362_v10 = vsel %vm2356_vm15, %v2349_v27, 920167782  ;;  %v2179_v58 = vsub.s32 0, %v9182_v56 }
 0x211   : > { %vm2354_vm1 = vcmp.lt.s32.totalorder %v2334_v8, 2  ;;  %v2363_v3 = vsel %vm2355_vm0, %v2346_v18, %v2362_v10  ;;  %v2369_v50 = vshll.u32 %v2329_v39, 8  ;;  %v2358_v19 = vsel %vm2356_vm15, %v2346_v18, 2102212464 }
 0x212   : > { %v2364_v34 = vsel %vm2354_vm1, %v2361_v49, %v2363_v3  ;;  %v2365_v28 = vsel %vm2353_vm14, %v2343_v41, %v2346_v18  ;;  %v2366_v40 = vsel %vm2356_vm15, %v2352_v52, 1326507024  ;;  %v2081_v47 = vsub.s32 32, %v9186_v46  ;;  %v1608_v52 = vpop.f32.mrf.mxu1 }
 0x213   : > { %v9196_v26 = vpop.eup %7505  ;;  %v9199_v0 = vshrl.u32 %v2278_v11, 30  ;;  %v2337_v1 = vshrl.u32 %v12597_v57, %v2336_v7  ;;  %v2367_v55 = vsel %vm2355_vm0, %v2349_v27, %v2366_v40  ;;  %v2435_v18 = vadd.s32 1, %v6857_v2 }
 0x214   : > { %12617 = vst [vmem:[#allocation38_spill] sm:$0xff] %v9196_v26  ;;  %v9203_v48 = vpop.eup %7507  ;;  %v2368_v39 = vsel %vm2354_vm1, %v2365_v28, %v2367_v55  ;;  %v9206_v44 = vmul.u32.u64.low %v2369_v50, %v2364_v34  ;;  %v9207_v10 = vmul.u32.u64.high %v2369_v50, %v2364_v34, %v9206_v44  ;;  %v2359_v3 = vsel %vm2355_vm0, %v2343_v41, %v2358_v19  ;;  %v1425_v28 = vpop.f32.mrf.mxu0 }
 0x215   : > { %12618 = vst [vmem:[#allocation39_spill] sm:$0xff] %v9199_v0  ;;  %12619 = vst [vmem:[#allocation40_spill] sm:$0xff] %v9203_v48  ;;  %v2357_v49 = vsel %vm2353_vm14, %v2337_v1, %v2340_v16  ;;  %v9212_v11 = vmul.u32.u64.low %v2369_v50, %v2368_v39  ;;  %v9213_v63 = vmul.u32.u64.high %v2369_v50, %v2368_v39, %v9212_v11  ;;  %v9215_v7 = vadd.s32 3, %v1994_v45 }
 0x216   : > { %v2085_v27 = vsub.s32 4294967266, %v9186_v46  ;;  %v6846_v40 = vmin.u32 %v2179_v58, %v9182_v56  ;;  %vm2436_vm2 = vcmp.gt.s32.totalorder %v2435_v18, 0  ;;  %v2065_v34 = vadd.s32 %v8898_v36, %v8914_v14 }
 0x217   : > { %v12404_v2 = vand.u32 2147483647, %v9134_v5  ;;  %v2437_v55 = vsel %vm2436_vm2, %v2435_v18, 0  ;;  %v9222_v16 = vadd.f32 %v1608_v52, %v1424_v51  ;;  %v2280_v41 = vshll.u32 %v9199_v0, 30 }
 0x218   : > { %v2360_v19 = vsel %vm2354_vm1, %v2357_v49, %v2359_v3  ;;  %v2379_v45 = vadd.s32 1, %v9207_v10  ;;  %v2439_v1 = vand.u32 31, %v2437_v55  ;;  %v1990_v58 = vsel %vm1907_vm7, %v1989_v32, %v9164_v20 }
 0x219   : > { %12620 = vst [vmem:[#allocation41_spill] sm:$0xff] %v9222_v16  ;;  %v2082_v39 = vshll.u32 %v9056_v9, %v9186_v46  ;;  %v2083_v36 = vshrl.u32 %v2065_v34, %v2081_v47  ;;  %v9233_v14 = vadd.f32 %v1425_v28, %v8592_v17  ;;  %v2086_v51 = vadd.s32 127, %v2085_v27 }
 0x21a   : > { %v2181_v18 = vclz %v6846_v40  ;;  %vm2378_vm3 = vc.u32 %v9213_v63, %v9206_v44  ;;  %v2440_v8 = vsub.s32 32, %v2439_v1  ;;  %v2376_v52 = vmul.u32 %v2369_v50, %v2360_v19 }
 0x21b   : > { %v2380_v49 = vsel %vm2378_vm3, %v2379_v45, %v9207_v10  ;;  %v2432_v3 = vand.u32 8388607, %v12404_v2  ;;  %v2532_v20 = vand.u32 2139095040, %v9222_v16  ;;  %v9242_v9 = vsub.s32 %v9169_v38, %v2280_v41 }
 0x21c   : > { %v2442_v17 = vshll.u32 %v12597_v57, %v2439_v1  ;;  %v2443_v32 = vshrl.u32 %v12598_v59, %v2440_v8  ;;  %v2446_v46 = vshrl.u32 %v12599_v31, %v2440_v8  ;;  %v9247_v47 = vadd.s32 %v2380_v49, %v2376_v52 }
 0x21d   : > { %v2445_v50 = vshll.u32 %v12598_v59, %v2439_v1  ;;  %v2448_v10 = vshll.u32 %v12599_v31, %v2439_v1  ;;  %v2449_v11 = vshrl.u32 %v12600_v42, %v2440_v8  ;;  %v9252_v27 = vor.u32 %v2083_v36, %v2082_v39 }
 0x21e   : > { %v2438_v40 = vshrl.u32 %v2437_v55, 5  ;;  %v2451_v38 = vshll.u32 %v12600_v42, %v2439_v1  ;;  %v2452_v28 = vshrl.u32 %v12601_v29, %v2440_v8  ;;  %v2087_v34 = vshll.u32 %v2086_v51, 23 }
 0x21f   : > { %v2444_v41 = vor.u32 %v2443_v32, %v2442_v17  ;;  %v2447_v19 = vor.u32 %v2446_v46, %v2445_v50  ;;  %v2450_v45 = vor.u32 %v2449_v11, %v2448_v10  ;;  %v2433_v2 = vor.u32 8388608, %v2432_v3 }
 0x220   : > { %v2453_v52 = vor.u32 %v2452_v28, %v2451_v38  ;;  %v2454_v49 = vshll.u32 %v12601_v29, %v2439_v1  ;;  %v2455_v37 = vshrl.u32 %v12602_v61, %v2440_v8  ;;  %vm1803_vm4 = vcmp.lt.s32.totalorder %v8676_v62, 0 }
 0x221   : > { %v6847_v0 = vadd.s32 4294967294, %v2181_v18  ;;  %v2283_v39 = vsub.s32 0, %v9242_v9  ;;  %v2382_v55 = vadd.s32 536870912, %v9247_v47  ;;  %v2533_v36 = vshrl.u32 %v2532_v20, 23 }
 0x222   : > { %v2441_v21 = vshrl.u32 %v12597_v57, %v2440_v8  ;;  %v2456_v51 = vor.u32 %v2455_v37, %v2454_v49  ;;  %vm2457_vm5 = vcmp.lt.s32.totalorder %v2438_v40, 1  ;;  %vm2460_vm6 = vcmp.lt.s32.totalorder %v2438_v40, 4  ;;  %v1610_v49 = vpop.f32.mrf.mxu1 }
 0x223   : > { %vm2459_vm7 = vcmp.lt.s32.totalorder %v2438_v40, 3  ;;  %v2462_v3 = vsel %vm2460_vm6, %v2450_v45, 2102212464  ;;  %v2465_v17 = vsel %vm2457_vm5, %v2444_v41, %v2447_v19  ;;  %v2466_v32 = vsel %vm2460_vm6, %v2453_v52, 920167782 }
 0x224   : > { %vm2458_vm8 = vcmp.lt.s32.totalorder %v2438_v40, 2  ;;  %v2467_v1 = vsel %vm2459_vm7, %v2450_v45, %v2466_v32  ;;  %v2469_v46 = vsel %vm2457_vm5, %v2447_v19, %v2450_v45  ;;  %v2473_v50 = vshll.u32 %v2433_v2, 8  ;;  %v1430_v40 = vpop.f32.mrf.mxu0 }
 0x225   : > { %v9262_v10 = vshrl.u32 %v2382_v55, 30  ;;  %v2461_v18 = vsel %vm2457_vm5, %v2441_v21, %v2444_v41  ;;  %v2468_v11 = vsel %vm2458_vm8, %v2465_v17, %v2467_v1  ;;  %v2470_v38 = vsel %vm2460_vm6, %v2456_v51, 1326507024 }
 0x226   : > { %v2463_v20 = vsel %vm2459_vm7, %v2447_v19, %v2462_v3  ;;  %v2471_v28 = vsel %vm2459_vm7, %v2453_v52, %v2470_v38  ;;  %v9265_v8 = vmul.u32.u64.low %v2473_v50, %v2468_v11  ;;  %v9266_v37 = vmul.u32.u64.high %v2473_v50, %v2468_v11, %v9265_v8 }
 0x227   : > { %12621 = vst [vmem:[#allocation42_spill] sm:$0xff] %v9262_v10  ;;  %v1993_v25 = vsel %vm9108_vm10, %v8686_v12, %v1990_v58  ;;  %v2088_v32 = vor.u32 4788187, %v2087_v34  ;;  %v2472_v2 = vsel %vm2458_vm8, %v2469_v46, %v2471_v28  ;;  %v6861_v45 = vadd.s32 4294967169, %v2533_v36 }
 0x228   : > { %vm6848_vm9 = vcmp.lt.s32.totalorder %v6847_v0, 0  ;;  %v6850_v21 = vmin.u32 %v2283_v39, %v9242_v9  ;;  %v9274_v41 = vmul.u32.u64.low %v2473_v50, %v2472_v2  ;;  %v9275_v55 = vmul.u32.u64.high %v2473_v50, %v2472_v2, %v9274_v41 }
 0x229   : > { %v2384_v19 = vshll.u32 %v9262_v10, 30  ;;  %v2464_v52 = vsel %vm2458_vm8, %v2461_v18, %v2463_v20  ;;  %v2539_v51 = vadd.s32 1, %v6861_v45  ;;  %v9280_v3 = vadd.f32 %v1610_v49, %v9233_v14  ;;  %v12626_v20 = vld [vmem:[#allocation9_spill] sm:$0xff] }
 0x22a   : > { %v12623_v60 = vxor.u32 2147483648, %v9158_v53  ;;  %7509 = vcosq.f32 %v1993_v25  ;;  %v2091_v34 = vcvt.s32.f32 %v9252_v27  ;;  %v2483_v39 = vadd.s32 1, %v9266_v37 }
 0x22b   : > { %12622 = vst [vmem:[#allocation43_spill] sm:$0xff] %v9280_v3  ;;  %v2089_v36 = vand.u32 2147483647, %v2088_v32  ;;  %v9291_v17 = vsel %vm6848_vm9, 0, %v6847_v0  ;;  %v12412_v1 = vand.u32 2147483647, %v9222_v16  ;;  %v2285_v14 = vclz %v6850_v21 }
 0x22c   : > { %v9287_v58 = vsel %vm1803_vm4, %v12623_v60, %v9158_v53  ;;  %vm2540_vm10 = vcmp.gt.s32.totalorder %v2539_v51, 0  ;;  %v2480_v46 = vmul.u32 %v2473_v50, %v2464_v52  ;;  %vm2482_vm11 = vc.u32 %v9275_v55, %v9265_v8 }
 0x22d   : > { %12624 = vst [vmem:[#allocation44_spill] sm:$0xff] %v9287_v58  ;;  %v2541_v18 = vsel %vm2540_vm10, %v2539_v51, 0  ;;  %v9297_v53 = vsub.s32 %v9247_v47, %v2384_v19  ;;  %v2484_v27 = vsel %vm2482_vm11, %v2483_v39, %v9266_v37  ;;  %v2636_v38 = vand.u32 2139095040, %v9280_v3 }
 0x22e   : > { %v2543_v11 = vand.u32 31, %v2541_v18  ;;  %7511 = vsinq.f32 %v1993_v25  ;;  %v9302_v0 = vand.u32 3, %v9215_v7  ;;  %v9305_v28 = vadd.f32 %v1430_v40, %v12626_v20 }
 0x22f   : > { %v2485_v50 = vadd.s32 %v2484_v27, %v2480_v46  ;;  %v9307_v49 = vmul.f32 %v2091_v34, %v2089_v36  ;;  %v2169_v32 = vadd.s32 %v9016_v33, %v9029_v15  ;;  %v2185_v47 = vsub.s32 32, %v9291_v17 }
 0x230   : > { %12625 = vst [vmem:[#allocation45_spill] sm:$0xff] %v9302_v0  ;;  %v2544_v2 = vsub.s32 32, %v2543_v11  ;;  %v2189_v37 = vsub.s32 4294967266, %v9291_v17  ;;  %v6851_v45 = vadd.s32 4294967294, %v2285_v14  ;;  %v2536_v25 = vand.u32 8388607, %v12412_v1 }
 0x231   : > { %v2486_v21 = vadd.s32 536870912, %v2485_v50  ;;  %v2387_v7 = vsub.s32 0, %v9297_v53  ;;  %v2637_v52 = vshrl.u32 %v2636_v38, 23  ;;  %v9318_v51 = vshrl.u32 %v2541_v18, 5 }
 0x232   : > { %v2547_v41 = vshrl.u32 %v12598_v59, %v2544_v2  ;;  %v2550_v19 = vshrl.u32 %v12599_v31, %v2544_v2  ;;  %v2546_v33 = vshll.u32 %v12597_v57, %v2543_v11  ;;  %v2549_v15 = vshll.u32 %v12598_v59, %v2543_v11 }
 0x233   : > { %v2553_v60 = vshrl.u32 %v12600_v42, %v2544_v2  ;;  %v9323_v34 = vshrl.u32 %v2486_v21, 30  ;;  %v2552_v39 = vshll.u32 %v12599_v31, %v2543_v11  ;;  %v2555_v36 = vshll.u32 %v12600_v42, %v2543_v11 }
 0x234   : > { %v2556_v40 = vshrl.u32 %v12601_v29, %v2544_v2  ;;  %v2190_v14 = vadd.s32 127, %v2189_v37  ;;  %vm6852_vm12 = vcmp.lt.s32.totalorder %v6851_v45, 0  ;;  %v2548_v46 = vor.u32 %v2547_v41, %v2546_v33 }
 0x235   : > { %12627 = vst [vmem:[#allocation9_spill] sm:$0xff] %v9323_v34  ;;  %v2551_v27 = vor.u32 %v2550_v19, %v2549_v15  ;;  %v2554_v18 = vor.u32 %v2553_v60, %v2552_v39  ;;  %v2558_v20 = vshll.u32 %v12601_v29, %v2543_v11  ;;  %v2559_v1 = vshrl.u32 %v12602_v61, %v2544_v2 }
 0x236   : > { %v2557_v38 = vor.u32 %v2556_v40, %v2555_v36  ;;  %v2186_v21 = vshll.u32 %v9182_v56, %v9291_v17  ;;  %v2187_v10 = vshrl.u32 %v2169_v32, %v2185_v47  ;;  %v6854_v0 = vmin.u32 %v2387_v7, %v9297_v53 }
 0x237   : > { %v2537_v12 = vor.u32 8388608, %v2536_v25  ;;  %v9333_v26 = vpop.eup %7509  ;;  %v2488_v37 = vshll.u32 %v9323_v34, 30  ;;  %v2560_v48 = vor.u32 %v2559_v1, %v2558_v20  ;;  %vm2561_vm13 = vcmp.lt.s32.totalorder %v9318_v51, 1  ;;  %v1432_v20 = vpop.f32.mrf.mxu0 }
 0x238   : > { %12628 = vst [vmem:[#allocation46_spill] sm:$0xff] %v9333_v26  ;;  %v6865_v41 = vadd.s32 4294967169, %v2637_v52  ;;  %v2191_v19 = vshll.u32 %v2190_v14, 23  ;;  %v9338_v11 = vsel %vm6852_vm12, 0, %v6851_v45  ;;  %vm2564_vm14 = vcmp.lt.s32.totalorder %v9318_v51, 4 }
 0x239   : > { %v2569_v56 = vsel %vm2561_vm13, %v2548_v46, %v2551_v27  ;;  %vm2563_vm15 = vcmp.lt.s32.totalorder %v9318_v51, 3  ;;  %v2570_v17 = vsel %vm2564_vm14, %v2557_v38, 920167782  ;;  %v2573_v1 = vsel %vm2561_vm13, %v2551_v27, %v2554_v18 }
 0x23a   : > { %v2574_v32 = vsel %vm2564_vm14, %v2560_v48, 1326507024  ;;  %v2389_v47 = vclz %v6854_v0  ;;  %vm2562_vm0 = vcmp.lt.s32.totalorder %v9318_v51, 2  ;;  %v2571_v45 = vsel %vm2563_vm15, %v2554_v18, %v2570_v17 }
 0x23b   : > { %v9353_v25 = vshll.u32 %v2537_v12, 8  ;;  %v9355_v7 = vpop.eup %7511  ;;  %v9357_v52 = vsub.s32 %v2485_v50, %v2488_v37  ;;  %v2572_v33 = vsel %vm2562_vm0, %v2569_v56, %v2571_v45  ;;  %v2575_v15 = vsel %vm2563_vm15, %v2557_v38, %v2574_v32  ;;  %v1615_v38 = vpop.f32.mrf.mxu1 }
 0x23c   : > { %12629 = vst [vmem:[#allocation47_spill] sm:$0xff] %v9355_v7  ;;  %v2643_v60 = vadd.s32 1, %v6865_v41  ;;  %v9364_v0 = vor.u32 %v2187_v10, %v2186_v21  ;;  %v9366_v39 = vor.u32 4788187, %v2191_v19  ;;  %v2576_v12 = vsel %vm2562_vm0, %v2573_v1, %v2575_v15  ;;  %v7347_v7 = vld [vmem:[%s12367_s3 + $0x74] ss:$8 sps:$4 sm:$0xff]  }
 0x23d   : > { %v2293_v36 = vsub.s32 4294967266, %v9338_v11  ;;  %v2566_v50 = vsel %vm2564_vm14, %v2554_v18, 2102212464  ;;  %v9374_v40 = vmul.u32.u64.low %v9353_v25, %v2572_v33  ;;  %v9375_v14 = vmul.u32.u64.high %v9353_v25, %v2572_v33, %v9374_v40  ;;  %5265 = vmatprep.subr.bf16.mxu0 %v7347_v7 }
 0x23e   : > { %v2545_v10 = vshrl.u32 %v12597_v57, %v2544_v2  ;;  %v9380_v21 = vmul.u32.u64.low %v9353_v25, %v2576_v12  ;;  %v9381_v37 = vmul.u32.u64.high %v9353_v25, %v2576_v12, %v9380_v21  ;;  %vm2644_vm1 = vcmp.gt.s32.totalorder %v2643_v60, 0 }
 0x23f   : > { %v6855_v41 = vadd.s32 4294967294, %v2389_v47  ;;  %v2491_v19 = vsub.s32 0, %v9357_v52  ;;  %v12420_v56 = vand.u32 2147483647, %v9280_v3  ;;  %v2645_v18 = vsel %vm2644_vm1, %v2643_v60, 0 }
 0x240   : > { %v2565_v17 = vsel %vm2561_vm13, %v2545_v10, %v2548_v46  ;;  %v2567_v1 = vsel %vm2563_vm15, %v2551_v27, %v2566_v50  ;;  %v2647_v32 = vand.u32 31, %v2645_v18  ;;  %v9390_v2 = vadd.f32 %v1615_v38, %v9305_v28 }
 0x241   : > { %v2273_v47 = vadd.s32 %v9117_v4, %v9114_v24  ;;  %v9397_v15 = vadd.f32 %v1432_v20, %v8935_v35  ;;  %v2289_v60 = vsub.s32 32, %v9338_v11  ;;  %v9402_v27 = vadd.s32 127, %v2293_v36 }
 0x242   : > { %12630 = vst [vmem:[#allocation48_spill] sm:$0xff] %v9390_v2  ;;  %v2648_v12 = vsub.s32 32, %v2647_v32  ;;  %vm6856_vm2 = vcmp.lt.s32.totalorder %v6855_v41, 0  ;;  %v6858_v28 = vmin.u32 %v2491_v19, %v9357_v52  ;;  %v2568_v50 = vsel %vm2562_vm0, %v2565_v17, %v2567_v1 }
 0x243   : > { %v2640_v24 = vand.u32 8388607, %v12420_v56  ;;  %v2587_v35 = vadd.s32 1, %v9375_v14  ;;  %v9410_v4 = vshrl.u32 %v2645_v18, 5  ;;  %v2650_v38 = vshll.u32 %v12597_v57, %v2647_v32 }
 0x244   : > { %v2740_v20 = vand.u32 2139095040, %v9390_v2  ;;  %v2651_v36 = vshrl.u32 %v12598_v59, %v2648_v12  ;;  %v2653_v10 = vshll.u32 %v12598_v59, %v2647_v32  ;;  %v2654_v21 = vshrl.u32 %v12599_v31, %v2648_v12 }
 0x245   : > { %v2657_v51 = vshrl.u32 %v12600_v42, %v2648_v12  ;;  %vm2586_vm3 = vc.u32 %v9381_v37, %v9374_v40  ;;  %v2656_v19 = vshll.u32 %v12599_v31, %v2647_v32  ;;  %v2659_v18 = vshll.u32 %v12600_v42, %v2647_v32 }
 0x246   : > { %v2660_v17 = vshrl.u32 %v12601_v29, %v2648_v12  ;;  %v2291_v1 = vshrl.u32 %v2273_v47, %v2289_v60  ;;  %v2295_v56 = vshll.u32 %v9402_v27, 23  ;;  %v2652_v48 = vor.u32 %v2651_v36, %v2650_v38 }
 0x247   : > { %v2655_v46 = vor.u32 %v2654_v21, %v2653_v10  ;;  %v9425_v33 = vsel %vm6856_vm2, 0, %v6855_v41  ;;  %v2641_v45 = vor.u32 8388608, %v2640_v24  ;;  %v2658_v34 = vor.u32 %v2657_v51, %v2656_v19  ;;  %v7345_v41 = vld [vmem:[%s12367_s3 + $0x70] ss:$8 sps:$4 sm:$0xff]   ;;  %v1437_v51 = vpop.f32.mrf.mxu0 }
 0x248   : > { %v2661_v26 = vor.u32 %v2660_v17, %v2659_v18  ;;  %v2584_v30 = vmul.u32 %v9353_v25, %v2568_v50  ;;  %v2588_v58 = vsel %vm2586_vm3, %v2587_v35, %v9375_v14  ;;  %v2662_v47 = vshll.u32 %v12601_v29, %v2647_v32  ;;  %5266 = vmatpush1.bf16.msra.mxu0 %v7345_v41 }
 0x249   : > { %v2663_v60 = vshrl.u32 %v12602_v61, %v2648_v12  ;;  %v2493_v27 = vclz %v6858_v28  ;;  %vm2665_vm5 = vcmp.lt.s32.totalorder %v9410_v4, 1  ;;  %vm2668_vm6 = vcmp.lt.s32.totalorder %v9410_v4, 4 }
 0x24a   : > { %v2741_v24 = vshrl.u32 %v2740_v20, 23  ;;  %vm2667_vm7 = vcmp.lt.s32.totalorder %v9410_v4, 3  ;;  %v2673_v25 = vsel %vm2665_vm5, %v2652_v48, %v2655_v46  ;;  %v2674_v14 = vsel %vm2668_vm6, %v2661_v26, 920167782 }
 0x24b   : > { %v2664_v38 = vor.u32 %v2663_v60, %v2662_v47  ;;  %v9442_v32 = vadd.s32 %v2588_v58, %v2584_v30  ;;  %vm2666_vm8 = vcmp.lt.s32.totalorder %v9410_v4, 2  ;;  %v2675_v28 = vsel %vm2667_vm7, %v2658_v34, %v2674_v14  ;;  %v1617_v47 = vpop.f32.mrf.mxu1  ;;  %v12633_v14 = vld [vmem:[#allocation10_spill] sm:$0xff] }
 0x24c   : > { %v2681_v50 = vshll.u32 %v2641_v45, 8  ;;  %v2670_v35 = vsel %vm2668_vm6, %v2658_v34, 2102212464  ;;  %v2676_v7 = vsel %vm2666_vm8, %v2673_v25, %v2675_v28  ;;  %v2677_v20 = vsel %vm2665_vm5, %v2655_v46, %v2658_v34 }
 0x24d   : > { %v2678_v36 = vsel %vm2668_vm6, %v2664_v38, 1326507024  ;;  %v2397_v10 = vsub.s32 4294967266, %v9425_v33  ;;  %v6859_v21 = vadd.s32 4294967294, %v2493_v27  ;;  %v2649_v30 = vshrl.u32 %v12597_v57, %v2648_v12 }
 0x24e   : > { %v2679_v58 = vsel %vm2667_vm7, %v2661_v26, %v2678_v36  ;;  %v9457_v19 = vmul.u32.u64.low %v2681_v50, %v2676_v7  ;;  %v9458_v18 = vmul.u32.u64.high %v2681_v50, %v2676_v7, %v9457_v19  ;;  %v6869_v17 = vadd.s32 4294967169, %v2741_v24 }
 0x24f   : > { %v2680_v45 = vsel %vm2666_vm8, %v2677_v20, %v2679_v58  ;;  %v2669_v34 = vsel %vm2665_vm5, %v2649_v30, %v2652_v48  ;;  %v2671_v60 = vsel %vm2667_vm7, %v2655_v46, %v2670_v35  ;;  %v12631_v26 = vand.u32 2147483647, %v9366_v39 }
 0x250   : > { %v9465_v41 = vmul.u32.u64.low %v2681_v50, %v2680_v45  ;;  %v9466_v12 = vmul.u32.u64.high %v2681_v50, %v2680_v45, %v9465_v41  ;;  %v12632_v27 = vcvt.s32.f32 %v9364_v0  ;;  %v2590_v25 = vadd.s32 536870912, %v9442_v32 }
 0x251   : > { %v9476_v24 = vadd.f32 %v1437_v51, %v12633_v14  ;;  %v2747_v28 = vadd.s32 1, %v6869_v17  ;;  %v12634_v48 = vshll.u32 %v9242_v9, %v9338_v11  ;;  %v9483_v46 = vor.u32 4788187, %v2295_v56 }
 0x252   : > { %v9472_v38 = vmul.f32 %v12632_v27, %v12631_v26  ;;  %vm6860_vm9 = vcmp.lt.s32.totalorder %v6859_v21, 0  ;;  %v9486_v39 = vadd.f32 %v1617_v47, %v9397_v15  ;;  %v2672_v0 = vsel %vm2666_vm8, %v2669_v34, %v2671_v60 }
 0x253   : > { %v9481_v7 = vor.u32 %v2291_v1, %v12634_v48  ;;  %v2691_v35 = vadd.s32 1, %v9458_v18  ;;  %v12427_v20 = vand.u32 2147483647, %v9390_v2  ;;  %vm2748_vm10 = vcmp.gt.s32.totalorder %v2747_v28, 0 }
 0x254   : > { %v2393_v36 = vsub.s32 32, %v9425_v33  ;;  %v2398_v51 = vadd.s32 127, %v2397_v10  ;;  %vm2690_vm11 = vc.u32 %v9466_v12, %v9457_v19  ;;  %v2749_v9 = vsel %vm2748_vm10, %v2747_v28, 0 }
 0x255   : > { %v9495_v11 = vsel %vm6860_vm9, 0, %v6859_v21  ;;  %v9497_v56 = vshrl.u32 %v2590_v25, 30  ;;  %v2692_v15 = vsel %vm2690_vm11, %v2691_v35, %v9458_v18  ;;  %v2751_v4 = vand.u32 31, %v2749_v9 }
 0x256   : > { %v2377_v30 = vadd.s32 %v9206_v44, %v9213_v63  ;;  %v2688_v58 = vmul.u32 %v2681_v50, %v2672_v0  ;;  %v2844_v45 = vand.u32 2139095040, %v9486_v39  ;;  %v2394_v17 = vshll.u32 %v9297_v53, %v9425_v33 }
 0x257   : > { %12635 = vst [vmem:[#allocation10_spill] sm:$0xff] %v9497_v56  ;;  %v2481_v21 = vadd.s32 %v9265_v8, %v9275_v55  ;;  %v2752_v47 = vsub.s32 32, %v2751_v4  ;;  %v2399_v18 = vshll.u32 %v2398_v51, 23  ;;  %v2501_v60 = vsub.s32 4294967266, %v9495_v11 }
 0x258   : > { %v2395_v34 = vshrl.u32 %v2377_v30, %v2393_v36  ;;  %v9510_v41 = vadd.s32 %v2692_v15, %v2688_v58  ;;  %v2592_v63 = vshll.u32 %v9497_v56, 30  ;;  %v2744_v44 = vand.u32 8388607, %v12427_v20 }
 0x259   : > { %v2755_v50 = vshrl.u32 %v12598_v59, %v2752_v47  ;;  %v2758_v26 = vshrl.u32 %v12599_v31, %v2752_v47  ;;  %v2754_v53 = vshll.u32 %v12597_v57, %v2751_v4  ;;  %v2757_v8 = vshll.u32 %v12598_v59, %v2751_v4 }
 0x25a   : > { %v2761_v55 = vshrl.u32 %v12600_v42, %v2752_v47  ;;  %v2845_v33 = vshrl.u32 %v2844_v45, 23  ;;  %v2750_v27 = vshrl.u32 %v2749_v9, 5  ;;  %v2760_v25 = vshll.u32 %v12599_v31, %v2751_v4 }
 0x25b   : > { %v2763_v14 = vshll.u32 %v12600_v42, %v2751_v4  ;;  %v2764_v28 = vshrl.u32 %v12601_v29, %v2752_v47  ;;  %v2502_v48 = vadd.s32 127, %v2501_v60  ;;  %v2694_v0 = vadd.s32 536870912, %v9510_v41 }
 0x25c   : > { %v2756_v35 = vor.u32 %v2755_v50, %v2754_v53  ;;  %v2759_v36 = vor.u32 %v2758_v26, %v2757_v8  ;;  %v2762_v51 = vor.u32 %v2761_v55, %v2760_v25  ;;  %v2766_v30 = vshll.u32 %v12601_v29, %v2751_v4 }
 0x25d   : > { %v2765_v15 = vor.u32 %v2764_v28, %v2763_v14  ;;  %v2767_v58 = vshrl.u32 %v12602_v61, %v2752_v47  ;;  %v9526_v20 = vor.u32 %v2395_v34, %v2394_v17  ;;  %v9528_v9 = vor.u32 4788187, %v2399_v18 }
 0x25e   : > { %v9531_v45 = vsub.s32 %v9442_v32, %v2592_v63  ;;  %v2745_v1 = vor.u32 8388608, %v2744_v44  ;;  %v2497_v60 = vsub.s32 32, %v9495_v11  ;;  %vm2769_vm12 = vcmp.lt.s32.totalorder %v2750_v27, 1 }
 0x25f   : > { %v2768_v10 = vor.u32 %v2767_v58, %v2766_v30  ;;  %v6873_v50 = vadd.s32 4294967169, %v2845_v33  ;;  %v2503_v26 = vshll.u32 %v2502_v48, 23  ;;  %v9534_v53 = vshrl.u32 %v2694_v0, 30 }
 0x260   : > { %vm2772_vm13 = vcmp.lt.s32.totalorder %v2750_v27, 4  ;;  %v2777_v4 = vsel %vm2769_vm12, %v2756_v35, %v2759_v36  ;;  %vm2771_vm14 = vcmp.lt.s32.totalorder %v2750_v27, 3  ;;  %v2781_v34 = vsel %vm2769_vm12, %v2759_v36, %v2762_v51 }
 0x261   : > { %12636 = vst [vmem:[#allocation49_spill] sm:$0xff] %v9534_v53  ;;  %v2778_v17 = vsel %vm2772_vm13, %v2765_v15, 920167782  ;;  %v2782_v18 = vsel %vm2772_vm13, %v2768_v10, 1326507024  ;;  %v2595_v32 = vsub.s32 0, %v9531_v45  ;;  %v2499_v14 = vshrl.u32 %v2481_v21, %v2497_v60  ;;  %v1439_v10 = vpop.f32.mrf.mxu0 }
 0x262   : > { %vm2770_vm15 = vcmp.lt.s32.totalorder %v2750_v27, 2  ;;  %v2779_v63 = vsel %vm2771_vm14, %v2762_v51, %v2778_v17  ;;  %v2785_v44 = vshll.u32 %v2745_v1, 8  ;;  %v2774_v8 = vsel %vm2772_vm13, %v2762_v51, 2102212464 }
 0x263   : > { %v2780_v55 = vsel %vm2770_vm15, %v2777_v4, %v2779_v63  ;;  %v2783_v33 = vsel %vm2771_vm14, %v2765_v15, %v2782_v18  ;;  %v2851_v25 = vadd.s32 1, %v6873_v50  ;;  %v2696_v28 = vshll.u32 %v9534_v53, 30 }
 0x264   : > { %v2753_v48 = vshrl.u32 %v12597_v57, %v2752_v47  ;;  %v2784_v0 = vsel %vm2770_vm15, %v2781_v34, %v2783_v33  ;;  %v9548_v56 = vmul.u32.u64.low %v2785_v44, %v2780_v55  ;;  %v9549_v17 = vmul.u32.u64.high %v2785_v44, %v2780_v55, %v9548_v56 }
 0x265   : > { %v9545_v30 = vmul.u32.u64.low %v2785_v44, %v2784_v0  ;;  %v9546_v58 = vmul.u32.u64.high %v2785_v44, %v2784_v0, %v9545_v30  ;;  %v2504_v1 = vor.u32 4788187, %v2503_v26  ;;  %v2775_v15 = vsel %vm2771_vm14, %v2759_v36, %v2774_v8 }
 0x266   : > { %v2773_v51 = vsel %vm2769_vm12, %v2753_v48, %v2756_v35  ;;  %vm2852_vm0 = vcmp.gt.s32.totalorder %v2851_v25, 0  ;;  %v12637_v21 = vand.u32 2147483647, %v9483_v46  ;;  %v12638_v47 = vcvt.s32.f32 %v9481_v7  ;;  %v12639_v35 = vld [vmem:[#allocation11_spill] sm:$0xff]  ;;  %v1622_v46 = vpop.f32.mrf.mxu1 }
 0x267   : > { %v6862_v50 = vmin.u32 %v2595_v32, %v9531_v45  ;;  %v12431_v4 = vand.u32 2147483647, %v9486_v39  ;;  %v2853_v34 = vsel %vm2852_vm0, %v2851_v25, 0  ;;  %v2498_v18 = vshll.u32 %v9357_v52, %v9495_v11 }
 0x268   : > { %v9558_v60 = vmul.f32 %v12638_v47, %v12637_v21  ;;  %v9565_v26 = vsub.s32 %v9510_v41, %v2696_v28  ;;  %v9568_v36 = vadd.f32 %v1439_v10, %v12639_v35  ;;  %v2855_v63 = vand.u32 31, %v2853_v34 }
 0x269   : > { %v2403_v7 = vcvt.s32.f32 %v9526_v20  ;;  %v2776_v8 = vsel %vm2770_vm15, %v2773_v51, %v2775_v15  ;;  %vm2794_vm1 = vc.u32 %v9546_v58, %v9548_v56  ;;  %v2795_v32 = vadd.s32 1, %v9549_v17 }
 0x26a   : > { %v2401_v55 = vand.u32 2147483647, %v9528_v9  ;;  %v2500_v52 = vor.u32 %v2499_v14, %v2498_v18  ;;  %v2505_v11 = vand.u32 2147483647, %v2504_v1  ;;  %v2856_v41 = vsub.s32 32, %v2855_v63 }
 0x26b   : > { %v2597_v33 = vclz %v6862_v50  ;;  %v2796_v25 = vsel %vm2794_vm1, %v2795_v32, %v9549_v17  ;;  %v2848_v28 = vand.u32 8388607, %v12431_v4  ;;  %v9580_v20 = vadd.f32 %v1622_v46, %v9476_v24 }
 0x26c   : > { %v2699_v27 = vsub.s32 0, %v9565_v26  ;;  %v2792_v48 = vmul.u32 %v2785_v44, %v2776_v8  ;;  %v9583_v0 = vshrl.u32 %v2853_v34, 5  ;;  %v2858_v10 = vshll.u32 %v12597_v57, %v2855_v63 }
 0x26d   : > { %12640 = vst [vmem:[#allocation11_spill] sm:$0xff] %v9580_v20  ;;  %v2859_v9 = vshrl.u32 %v12598_v59, %v2856_v41  ;;  %v2861_v14 = vshll.u32 %v12598_v59, %v2855_v63  ;;  %v2862_v30 = vshrl.u32 %v12599_v31, %v2856_v41  ;;  %v2865_v17 = vshrl.u32 %v12600_v42, %v2856_v41 }
 0x26e   : > { %v9590_v1 = vadd.s32 %v2796_v25, %v2792_v48  ;;  %v2864_v24 = vshll.u32 %v12599_v31, %v2855_v63  ;;  %v2867_v51 = vshll.u32 %v12600_v42, %v2855_v63  ;;  %v2868_v44 = vshrl.u32 %v12601_v29, %v2856_v41 }
 0x26f   : > { %v9595_v15 = vmul.f32 %v2403_v7, %v2401_v55  ;;  %v2507_v21 = vcvt.s32.f32 %v2500_v52  ;;  %v2860_v47 = vor.u32 %v2859_v9, %v2858_v10  ;;  %v2863_v50 = vor.u32 %v2862_v30, %v2861_v14  ;;  %v7350_v7 = vld [vmem:[%s12367_s3 + $0x64] ss:$8 sps:$4 sm:$0xff]  }
 0x270   : > { %vm2011_vm2 = vcmp.lt.s32.totalorder %v8695_v23, 0  ;;  %v6866_v34 = vmin.u32 %v2699_v27, %v9565_v26  ;;  %v2849_v18 = vor.u32 8388608, %v2848_v28  ;;  %v2866_v35 = vor.u32 %v2865_v17, %v2864_v24  ;;  %5267 = vmatprep.subr.bf16.mxu0 %v7350_v7 }
 0x271   : > { %v2869_v46 = vor.u32 %v2868_v44, %v2867_v51  ;;  %v9599_v8 = vmul.f32 %v2507_v21, %v2505_v11  ;;  %v6863_v32 = vadd.s32 4294967294, %v2597_v33  ;;  %v2870_v25 = vshll.u32 %v12601_v29, %v2855_v63  ;;  %v7348_v11 = vld [vmem:[%s12367_s3 + $0x60] ss:$8 sps:$4 sm:$0xff]  }
 0x272   : > { %v2871_v48 = vshrl.u32 %v12602_v61, %v2856_v41  ;;  %v2798_v55 = vadd.s32 536870912, %v9590_v1  ;;  %vm2873_vm3 = vcmp.lt.s32.totalorder %v9583_v0, 1  ;;  %vm2876_vm5 = vcmp.lt.s32.totalorder %v9583_v0, 4  ;;  %5268 = vmatpush1.bf16.msra.mxu0 %v7348_v11 }
 0x273   : > { %v2948_v52 = vand.u32 2139095040, %v9580_v20  ;;  %vm2875_vm6 = vcmp.lt.s32.totalorder %v9583_v0, 3  ;;  %v2881_v63 = vsel %vm2873_vm3, %v2860_v47, %v2863_v50  ;;  %v2882_v28 = vsel %vm2876_vm5, %v2869_v46, 920167782 }
 0x274   : > { %v2872_v33 = vor.u32 %v2871_v48, %v2870_v25  ;;  %v2701_v27 = vclz %v6866_v34  ;;  %vm2874_vm7 = vcmp.lt.s32.totalorder %v9583_v0, 2  ;;  %v2883_v10 = vsel %vm2875_vm6, %v2866_v35, %v2882_v28  ;;  %v1624_v48 = vpop.f32.mrf.mxu1 }
 0x275   : > { %v2889_v9 = vshll.u32 %v2849_v18, 8  ;;  %v2878_v14 = vsel %vm2876_vm5, %v2866_v35, 2102212464  ;;  %v2884_v30 = vsel %vm2874_vm7, %v2881_v63, %v2883_v10  ;;  %v2885_v17 = vsel %vm2873_vm3, %v2863_v50, %v2866_v35 }
 0x276   : > { %v2886_v24 = vsel %vm2876_vm5, %v2872_v33, 1326507024  ;;  %vm12554_vm8 = vcmp.lt.s32.totalorder %v8881_v54, 0  ;;  %vm12556_vm9 = vcmp.lt.s32.totalorder %v8916_v13, 0  ;;  %vm6864_vm10 = vcmp.lt.s32.totalorder %v6863_v32, 0 }
 0x277   : > { %v9631_v51 = vshrl.u32 %v2798_v55, 30  ;;  %v2857_v44 = vshrl.u32 %v12597_v57, %v2856_v41  ;;  %v2887_v21 = vsel %vm2875_vm6, %v2869_v46, %v2886_v24  ;;  %vm12525_vm11 = vcmp.lt.s32.totalorder %v9050_v22, 0 }
 0x278   : > { %v2888_v34 = vsel %vm2874_vm7, %v2885_v17, %v2887_v21  ;;  %v9639_v18 = vmul.u32.u64.low %v2889_v9, %v2884_v30  ;;  %v9640_v35 = vmul.u32.u64.high %v2889_v9, %v2884_v30, %v9639_v18  ;;  %v2949_v25 = vshrl.u32 %v2948_v52, 23 }
 0x279   : > { %12641 = vst [vmem:[#allocation50_spill] sm:$0xff] %v9631_v51  ;;  %v2877_v7 = vsel %vm2873_vm3, %v2857_v44, %v2860_v47  ;;  %v2879_v41 = vsel %vm2875_vm6, %v2863_v50, %v2878_v14  ;;  %v9647_v55 = vmul.u32.u64.low %v2889_v9, %v2888_v34  ;;  %v9648_v11 = vmul.u32.u64.high %v2889_v9, %v2888_v34, %v9647_v55  ;;  %v1444_v44 = vpop.f32.mrf.mxu0 }
 0x27a   : > { %v12642_v46 = vxor.u32 2147483648, %v9307_v49  ;;  %vm12555_vm12 = vcmp.lt.s32.totalorder %v9134_v5, 0  ;;  %v6867_v52 = vadd.s32 4294967294, %v2701_v27  ;;  %v6877_v63 = vadd.s32 4294967169, %v2949_v25  ;;  %v12646_v55 = vld [vmem:[#allocation12_spill] sm:$0xff] }
 0x27b   : > { %v2197_v28 = vxor.u32 2147483648, %v9472_v38  ;;  %v9660_v47 = vsel %vm6864_vm10, 0, %v6863_v32  ;;  %v2800_v50 = vshll.u32 %v9631_v51, 30  ;;  %v9664_v10 = vadd.f32 %v1624_v48, %v9568_v36 }
 0x27c   : > { %v9655_v33 = vsel %vm2011_vm2, %v12642_v46, %v9307_v49  ;;  %v2301_v14 = vxor.u32 2147483648, %v9558_v60  ;;  %v2880_v49 = vsel %vm2874_vm7, %v2877_v7, %v2879_v41  ;;  %v2899_v30 = vadd.s32 1, %v9640_v35 }
 0x27d   : > { %12643 = vst [vmem:[#allocation51_spill] sm:$0xff] %v9655_v33  ;;  %v2955_v17 = vadd.s32 1, %v6877_v63  ;;  %v2405_v27 = vxor.u32 2147483648, %v9595_v15  ;;  %v2509_v24 = vxor.u32 2147483648, %v9599_v8  ;;  %vm2898_vm13 = vc.u32 %v9648_v11, %v9639_v18 }
 0x27e   : > { %v12430_v32 = vand.u32 2147483647, %v9580_v20  ;;  %v2605_v36 = vsub.s32 4294967266, %v9660_v47  ;;  %vm6868_vm14 = vcmp.lt.s32.totalorder %v6867_v52, 0  ;;  %v2900_v21 = vsel %vm2898_vm13, %v2899_v30, %v9640_v35 }
 0x27f   : > { %vm2956_vm15 = vcmp.gt.s32.totalorder %v2955_v17, 0  ;;  %v9678_v0 = vsub.s32 %v9590_v1, %v2800_v50  ;;  %v2896_v34 = vmul.u32 %v2889_v9, %v2880_v49  ;;  %v3052_v48 = vand.u32 2139095040, %v9664_v10 }
 0x280   : > { %v2957_v25 = vsel %vm2956_vm15, %v2955_v17, 0  ;;  %v9684_v7 = vsel %vm12554_vm8, %v2197_v28, %v9472_v38  ;;  %v9689_v41 = vsel %vm12556_vm9, %v2301_v14, %v9558_v60  ;;  %v9692_v35 = vadd.f32 %v1444_v44, %v12646_v55 }
 0x281   : > { %12644 = vst [vmem:[#allocation52_spill] sm:$0xff] %v9684_v7  ;;  %12645 = vst [vmem:[#allocation53_spill] sm:$0xff] %v9689_v41  ;;  %v2959_v46 = vand.u32 31, %v2957_v25  ;;  %v9697_v1 = vsel %vm12525_vm11, %v2405_v27, %v9595_v15  ;;  %v9702_v9 = vsel %vm12555_vm12, %v2509_v24, %v9599_v8  ;;  %v2585_v38 = vadd.s32 %v9374_v40, %v9381_v37 }
 0x282   : > { %12647 = vst [vmem:[#allocation12_spill] sm:$0xff] %v9697_v1  ;;  %12648 = vst [vmem:[#allocation54_spill] sm:$0xff] %v9702_v9  ;;  %v9706_v63 = vadd.s32 %v2900_v21, %v2896_v34  ;;  %v2606_v60 = vadd.s32 127, %v2605_v36  ;;  %v9709_v28 = vsel %vm6868_vm14, 0, %v6867_v52  ;;  %v2952_v50 = vand.u32 8388607, %v12430_v32 }
 0x283   : > { %v2960_v14 = vsub.s32 32, %v2959_v46  ;;  %v2803_v15 = vsub.s32 0, %v9678_v0  ;;  %v2962_v49 = vshll.u32 %v12597_v57, %v2959_v46  ;;  %v2965_v8 = vshll.u32 %v12598_v59, %v2959_v46 }
 0x284   : > { %v3053_v30 = vshrl.u32 %v3052_v48, 23  ;;  %v2968_v37 = vshll.u32 %v12599_v31, %v2959_v46  ;;  %v2902_v27 = vadd.s32 536870912, %v9706_v63  ;;  %v2958_v24 = vshrl.u32 %v2957_v25, 5 }
 0x285   : > { %v2963_v17 = vshrl.u32 %v12598_v59, %v2960_v14  ;;  %v2966_v40 = vshrl.u32 %v12599_v31, %v2960_v14  ;;  %v2969_v52 = vshrl.u32 %v12600_v42, %v2960_v14  ;;  %v2971_v44 = vshll.u32 %v12600_v42, %v2959_v46 }
 0x286   : > { %v2972_v36 = vshrl.u32 %v12601_v29, %v2960_v14  ;;  %v2601_v21 = vsub.s32 32, %v9660_v47  ;;  %v2607_v32 = vshll.u32 %v2606_v60, 23  ;;  %v2709_v4 = vsub.s32 4294967266, %v9709_v28 }
 0x287   : > { %v2964_v34 = vor.u32 %v2963_v17, %v2962_v49  ;;  %v2967_v55 = vor.u32 %v2966_v40, %v2965_v8  ;;  %v2970_v48 = vor.u32 %v2969_v52, %v2968_v37  ;;  %v6870_v51 = vmin.u32 %v2803_v15, %v9678_v0 }
 0x288   : > { %v2973_v53 = vor.u32 %v2972_v36, %v2971_v44  ;;  %v2953_v1 = vor.u32 8388608, %v2952_v50  ;;  %v2974_v22 = vshll.u32 %v12601_v29, %v2959_v46  ;;  %v2975_v25 = vshrl.u32 %v12602_v61, %v2960_v14 }
 0x289   : > { %v6881_v7 = vadd.s32 4294967169, %v3053_v30  ;;  %v9728_v54 = vshrl.u32 %v2902_v27, 30  ;;  %vm2977_vm0 = vcmp.lt.s32.totalorder %v2958_v24, 1  ;;  %vm2979_vm1 = vcmp.lt.s32.totalorder %v2958_v24, 3 }
 0x28a   : > { %vm2980_vm3 = vcmp.lt.s32.totalorder %v2958_v24, 4  ;;  %v2976_v49 = vor.u32 %v2975_v25, %v2974_v22  ;;  %v2985_v60 = vsel %vm2977_vm0, %v2964_v34, %v2967_v55  ;;  %v2805_v40 = vclz %v6870_v51 }
 0x28b   : > { %12649 = vst [vmem:[#allocation55_spill] sm:$0xff] %v9728_v54  ;;  %v2982_v8 = vsel %vm2980_vm3, %v2970_v48, 2102212464  ;;  %v2986_v17 = vsel %vm2980_vm3, %v2973_v53, 920167782  ;;  %v2961_v15 = vshrl.u32 %v12597_v57, %v2960_v14  ;;  %vm2978_vm5 = vcmp.lt.s32.totalorder %v2958_v24, 2 }
 0x28c   : > { %v2987_v50 = vsel %vm2979_vm1, %v2970_v48, %v2986_v17  ;;  %v2989_v30 = vsel %vm2977_vm0, %v2967_v55, %v2970_v48  ;;  %v2990_v37 = vsel %vm2980_vm3, %v2976_v49, 1326507024  ;;  %v2993_v52 = vshll.u32 %v2953_v1, 8 }
 0x28d   : > { %v2988_v46 = vsel %vm2978_vm5, %v2985_v60, %v2987_v50  ;;  %v2904_v27 = vshll.u32 %v9728_v54, 30  ;;  %v2981_v22 = vsel %vm2977_vm0, %v2961_v15, %v2964_v34  ;;  %v2983_v44 = vsel %vm2979_vm1, %v2967_v55, %v2982_v8 }
 0x28e   : > { %v2991_v36 = vsel %vm2979_vm1, %v2973_v53, %v2990_v37  ;;  %v9740_v14 = vmul.u32.u64.low %v2993_v52, %v2988_v46  ;;  %v9741_v25 = vmul.u32.u64.high %v2993_v52, %v2988_v46, %v9740_v14  ;;  %v3059_v17 = vadd.s32 1, %v6881_v7  ;;  %v1446_v53 = vpop.f32.mrf.mxu0 }
 0x28f   : > { %v2992_v51 = vsel %vm2978_vm5, %v2989_v30, %v2991_v36  ;;  %v2603_v60 = vshrl.u32 %v2585_v38, %v2601_v21  ;;  %v9744_v50 = vor.u32 4788187, %v2607_v32  ;;  %v2602_v34 = vshll.u32 %v9531_v45, %v9660_v47 }
 0x290   : > { %v9746_v48 = vmul.u32.u64.low %v2993_v52, %v2992_v51  ;;  %v9747_v1 = vmul.u32.u64.high %v2993_v52, %v2992_v51, %v9746_v48  ;;  %v2705_v55 = vsub.s32 32, %v9709_v28  ;;  %v2710_v49 = vadd.s32 127, %v2709_v4 }
 0x291   : > { %vm3060_vm6 = vcmp.gt.s32.totalorder %v3059_v17, 0  ;;  %v6871_v8 = vadd.s32 4294967294, %v2805_v40  ;;  %v2984_v15 = vsel %vm2978_vm5, %v2981_v22, %v2983_v44  ;;  %v12440_v46 = vand.u32 2147483647, %v9664_v10 }
 0x292   : > { %v3061_v7 = vsel %vm3060_vm6, %v3059_v17, 0  ;;  %v2689_v32 = vadd.s32 %v9457_v19, %v9466_v12  ;;  %v9757_v38 = vsub.s32 %v9706_v63, %v2904_v27  ;;  %v3003_v21 = vadd.s32 1, %v9741_v25 }
 0x293   : > { %v3063_v45 = vand.u32 31, %v3061_v7  ;;  %v9760_v47 = vor.u32 %v2603_v60, %v2602_v34  ;;  %v2706_v24 = vshll.u32 %v9565_v26, %v9709_v28  ;;  %v1447_v40 = vadd.f32 %v1446_v53, %v8938_v6  ;;  %v1629_v28 = vpop.f32.mrf.mxu1 }
 0x294   : > { %v2707_v30 = vshrl.u32 %v2689_v32, %v2705_v55  ;;  %v3000_v37 = vmul.u32 %v2993_v52, %v2984_v15  ;;  %vm3002_vm7 = vc.u32 %v9747_v1, %v9740_v14  ;;  %v2711_v12 = vshll.u32 %v2710_v49, 23 }
 0x295   : > { %v3064_v19 = vsub.s32 32, %v3063_v45  ;;  %vm6872_vm10 = vcmp.lt.s32.totalorder %v6871_v8, 0  ;;  %v3004_v63 = vsel %vm3002_vm7, %v3003_v21, %v9741_v25  ;;  %v3056_v27 = vand.u32 8388607, %v12440_v46 }
 0x296   : > { %v2907_v22 = vsub.s32 0, %v9757_v38  ;;  %v3005_v44 = vadd.s32 %v3004_v63, %v3000_v37  ;;  %v9774_v52 = vshrl.u32 %v3061_v7, 5  ;;  %v3066_v36 = vshll.u32 %v12597_v57, %v3063_v45 }
 0x297   : > { %v3067_v26 = vshrl.u32 %v12598_v59, %v3064_v19  ;;  %v3070_v6 = vshrl.u32 %v12599_v31, %v3064_v19  ;;  %v3069_v51 = vshll.u32 %v12598_v59, %v3063_v45  ;;  %v3073_v17 = vshrl.u32 %v12600_v42, %v3064_v19 }
 0x298   : > { %v3006_v25 = vadd.s32 536870912, %v3005_v44  ;;  %v3072_v60 = vshll.u32 %v12599_v31, %v3063_v45  ;;  %v3075_v48 = vshll.u32 %v12600_v42, %v3063_v45  ;;  %v3076_v34 = vshrl.u32 %v12601_v29, %v3064_v19 }
 0x299   : > { %v3057_v55 = vor.u32 8388608, %v3056_v27  ;;  %v3068_v49 = vor.u32 %v3067_v26, %v3066_v36  ;;  %v3071_v53 = vor.u32 %v3070_v6, %v3069_v51  ;;  %v9783_v15 = vadd.f32 %v1629_v28, %v9692_v35  ;;  %v1631_v35 = vpop.f32.mrf.mxu1 }
 0x29a   : > { %v3074_v7 = vor.u32 %v3073_v17, %v3072_v60  ;;  %v3077_v32 = vor.u32 %v3076_v34, %v3075_v48  ;;  %v3078_v21 = vshll.u32 %v12601_v29, %v3063_v45  ;;  %v3079_v37 = vshrl.u32 %v12602_v61, %v3064_v19  ;;  %v7351_v45 = vld [vmem:[%s12367_s3 + $0x50] ss:$8 sps:$4 sm:$0xff]  }
 0x29b   : > { %12650 = vst [vmem:[#allocation56_spill] sm:$0xff] %v9783_v15  ;;  %v9787_v63 = vor.u32 %v2707_v30, %v2706_v24  ;;  %v9789_v46 = vor.u32 4788187, %v2711_v12  ;;  %v9792_v4 = vsel %vm6872_vm10, 0, %v6871_v8  ;;  %v6874_v27 = vmin.u32 %v2907_v22, %v9757_v38  ;;  %v7353_v12 = vld [vmem:[%s12367_s3 + $0x54] ss:$8 sps:$4 sm:$0xff]  }
 0x29c   : > { %v9795_v26 = vshrl.u32 %v3006_v25, 30  ;;  %v3080_v6 = vor.u32 %v3079_v37, %v3078_v21  ;;  %vm3081_vm13 = vcmp.lt.s32.totalorder %v9774_v52, 1  ;;  %vm3084_vm14 = vcmp.lt.s32.totalorder %v9774_v52, 4  ;;  %5269 = vmatprep.subr.bf16.mxu0 %v7353_v12 }
 0x29d   : > { %vm3083_vm15 = vcmp.lt.s32.totalorder %v9774_v52, 3  ;;  %v3089_v8 = vsel %vm3081_vm13, %v3068_v49, %v3071_v53  ;;  %v3090_v24 = vsel %vm3084_vm14, %v3077_v32, 920167782  ;;  %v3156_v30 = vand.u32 2139095040, %v9783_v15  ;;  %5270 = vmatpush1.bf16.msra.mxu0 %v7351_v45 }
 0x29e   : > { %12651 = vst [vmem:[#allocation57_spill] sm:$0xff] %v9795_v26  ;;  %vm3082_vm0 = vcmp.lt.s32.totalorder %v9774_v52, 2  ;;  %v3091_v22 = vsel %vm3083_vm15, %v3074_v7, %v3090_v24  ;;  %v3093_v28 = vsel %vm3081_vm13, %v3071_v53, %v3074_v7  ;;  %v9816_v36 = vshll.u32 %v3057_v55, 8 }
 0x29f   : > { %v2909_v51 = vclz %v6874_v27  ;;  %v3092_v17 = vsel %vm3082_vm0, %v3089_v8, %v3091_v22  ;;  %v3094_v25 = vsel %vm3084_vm14, %v3080_v6, 1326507024  ;;  %v9822_v60 = vadd.f32 %v1631_v35, %v1447_v40 }
 0x2a0   : > { %v3008_v48 = vshll.u32 %v9795_v26, 30  ;;  %v3095_v34 = vsel %vm3083_vm15, %v3077_v32, %v3094_v25  ;;  %v9828_v21 = vmul.u32.u64.low %v9816_v36, %v3092_v17  ;;  %v9829_v37 = vmul.u32.u64.high %v9816_v36, %v3092_v17, %v9828_v21 }
 0x2a1   : > { %12652 = vst [vmem:[#allocation58_spill] sm:$0xff] %v9822_v60  ;;  %v2809_v55 = vsub.s32 32, %v9792_v4  ;;  %v3086_v27 = vsel %vm3084_vm14, %v3074_v7, 2102212464  ;;  %v3096_v40 = vsel %vm3082_vm0, %v3093_v28, %v3095_v34  ;;  %v3157_v6 = vshrl.u32 %v3156_v30, 23 }
 0x2a2   : > { %v2813_v35 = vsub.s32 4294967266, %v9792_v4  ;;  %v3065_v8 = vshrl.u32 %v12597_v57, %v3064_v19  ;;  %v9840_v32 = vmul.u32.u64.low %v9816_v36, %v3096_v40  ;;  %v9841_v24 = vmul.u32.u64.high %v9816_v36, %v3096_v40, %v9840_v32 }
 0x2a3   : > { %v2611_v12 = vcvt.s32.f32 %v9760_v47  ;;  %v2793_v45 = vadd.s32 %v9548_v56, %v9546_v58  ;;  %v6875_v22 = vadd.s32 4294967294, %v2909_v51  ;;  %v6885_v17 = vadd.s32 4294967169, %v3157_v6 }
 0x2a4   : > { %v9846_v7 = vsub.s32 %v3005_v44, %v3008_v48  ;;  %v3085_v30 = vsel %vm3081_vm13, %v3065_v8, %v3068_v49  ;;  %v3087_v28 = vsel %vm3083_vm15, %v3071_v53, %v3086_v27  ;;  %v3260_v19 = vand.u32 2139095040, %v9822_v60  ;;  %v1451_v49 = vpop.f32.mrf.mxu0 }
 0x2a5   : > { %v12653_v25 = vand.u32 2147483647, %v9744_v50  ;;  %v2713_v47 = vand.u32 2147483647, %v9789_v46  ;;  %v2715_v56 = vcvt.s32.f32 %v9787_v63  ;;  %v3163_v58 = vadd.s32 1, %v6885_v17 }
 0x2a6   : > { %v2810_v44 = vshll.u32 %v9678_v0, %v9792_v4  ;;  %v2811_v51 = vshrl.u32 %v2793_v45, %v2809_v55  ;;  %v2814_v48 = vadd.s32 127, %v2813_v35  ;;  %v12441_v40 = vand.u32 2147483647, %v9783_v15  ;;  %v12654_v55 = vld [vmem:[#allocation13_spill] sm:$0xff] }
 0x2a7   : > { %v9855_v34 = vmul.f32 %v2611_v12, %v12653_v25  ;;  %vm6876_vm1 = vcmp.lt.s32.totalorder %v6875_v22, 0  ;;  %v3088_v53 = vsel %vm3082_vm0, %v3085_v30, %v3087_v28  ;;  %v3107_v50 = vadd.s32 1, %v9829_v37 }
 0x2a8   : > { %vm3164_vm3 = vcmp.gt.s32.totalorder %v3163_v58, 0  ;;  %v3011_v46 = vsub.s32 0, %v9846_v7  ;;  %vm3106_vm5 = vc.u32 %v9841_v24, %v9828_v21  ;;  %v3261_v27 = vshrl.u32 %v3260_v19, 23 }
 0x2a9   : > { %v3165_v63 = vsel %vm3164_vm3, %v3163_v58, 0  ;;  %v9869_v4 = vmul.f32 %v2715_v56, %v2713_v47  ;;  %v9872_v6 = vadd.f32 %v1451_v49, %v12654_v55  ;;  %v9874_v52 = vor.u32 %v2811_v51, %v2810_v44 }
 0x2aa   : > { %v3167_v35 = vand.u32 31, %v3165_v63  ;;  %v2815_v8 = vshll.u32 %v2814_v48, 23  ;;  %v2897_v32 = vadd.s32 %v9639_v18, %v9648_v11  ;;  %v3160_v12 = vand.u32 8388607, %v12441_v40 }
 0x2ab   : > { %v9881_v45 = vsel %vm6876_vm1, 0, %v6875_v22  ;;  %v3104_v17 = vmul.u32 %v9816_v36, %v3088_v53  ;;  %v3108_v30 = vsel %vm3106_vm5, %v3107_v50, %v9829_v37  ;;  %v6878_v19 = vmin.u32 %v3011_v46, %v9846_v7 }
 0x2ac   : > { %v3168_v28 = vsub.s32 32, %v3167_v35  ;;  %v3170_v25 = vshll.u32 %v12597_v57, %v3167_v35  ;;  %v3173_v47 = vshll.u32 %v12598_v59, %v3167_v35  ;;  %v6889_v56 = vadd.s32 4294967169, %v3261_v27 }
 0x2ad   : > { %v3176_v58 = vshll.u32 %v12599_v31, %v3167_v35  ;;  %v9892_v44 = vadd.s32 %v3108_v30, %v3104_v17  ;;  %v3166_v36 = vshrl.u32 %v3165_v63, 5  ;;  %v3179_v37 = vshll.u32 %v12600_v42, %v3167_v35 }
 0x2ae   : > { %v3171_v18 = vshrl.u32 %v12598_v59, %v3168_v28  ;;  %v3174_v11 = vshrl.u32 %v12599_v31, %v3168_v28  ;;  %v3177_v22 = vshrl.u32 %v12600_v42, %v3168_v28  ;;  %v3180_v51 = vshrl.u32 %v12601_v29, %v3168_v28 }
 0x2af   : > { %v2816_v48 = vor.u32 4788187, %v2815_v8  ;;  %vm12475_vm6 = vcmp.lt.s32.totalorder %v9222_v16, 0  ;;  %v2913_v46 = vsub.s32 32, %v9881_v45  ;;  %v3161_v27 = vor.u32 8388608, %v3160_v12 }
 0x2b0   : > { %v3172_v49 = vor.u32 %v3171_v18, %v3170_v25  ;;  %v3175_v53 = vor.u32 %v3174_v11, %v3173_v47  ;;  %v3178_v50 = vor.u32 %v3177_v22, %v3176_v58  ;;  %v3181_v55 = vor.u32 %v3180_v51, %v3179_v37 }
 0x2b1   : > { %v3013_v0 = vclz %v6878_v19  ;;  %v3182_v17 = vshll.u32 %v12601_v29, %v3167_v35  ;;  %v3183_v63 = vshrl.u32 %v12602_v61, %v3168_v28  ;;  %v3267_v30 = vadd.s32 1, %v6889_v56 }
 0x2b2   : > { %v3110_v26 = vadd.s32 536870912, %v9892_v44  ;;  %vm3185_vm7 = vcmp.lt.s32.totalorder %v3166_v36, 1  ;;  %vm3187_vm10 = vcmp.lt.s32.totalorder %v3166_v36, 3  ;;  %vm3188_vm13 = vcmp.lt.s32.totalorder %v3166_v36, 4 }
 0x2b3   : > { %v3184_v8 = vor.u32 %v3183_v63, %v3182_v17  ;;  %v3190_v25 = vsel %vm3188_vm13, %v3178_v50, 2102212464  ;;  %v3193_v47 = vsel %vm3185_vm7, %v3172_v49, %v3175_v53  ;;  %v3194_v18 = vsel %vm3188_vm13, %v3181_v55, 920167782 }
 0x2b4   : > { %v3169_v12 = vshrl.u32 %v12597_v57, %v3168_v28  ;;  %vm3186_vm14 = vcmp.lt.s32.totalorder %v3166_v36, 2  ;;  %v3195_v19 = vsel %vm3187_vm10, %v3178_v50, %v3194_v18  ;;  %v3201_v11 = vshll.u32 %v3161_v27, 8  ;;  %v12660_v36 = vld [vmem:[#allocation14_spill] sm:$0xff] }
 0x2b5   : > { %v6879_v35 = vadd.s32 4294967294, %v3013_v0  ;;  %v3196_v58 = vsel %vm3186_vm14, %v3193_v47, %v3195_v19  ;;  %v3197_v56 = vsel %vm3185_vm7, %v3175_v53, %v3178_v50  ;;  %v3198_v22 = vsel %vm3188_vm13, %v3184_v8, 1326507024  ;;  %v1453_v47 = vpop.f32.mrf.mxu0 }
 0x2b6   : > { %v9907_v37 = vshrl.u32 %v3110_v26, 30  ;;  %v3189_v51 = vsel %vm3185_vm7, %v3169_v12, %v3172_v49  ;;  %v3191_v17 = vsel %vm3187_vm10, %v3175_v53, %v3190_v25  ;;  %v3199_v63 = vsel %vm3187_vm10, %v3181_v55, %v3198_v22  ;;  %v1636_v26 = vpop.f32.mrf.mxu1 }
 0x2b7   : > { %v3200_v28 = vsel %vm3186_vm14, %v3197_v56, %v3199_v63  ;;  %v9913_v40 = vmul.u32.u64.low %v3201_v11, %v3196_v58  ;;  %v9914_v54 = vmul.u32.u64.high %v3201_v11, %v3196_v58, %v9913_v40  ;;  %vm3268_vm15 = vcmp.gt.s32.totalorder %v3267_v30, 0 }
 0x2b8   : > { %12655 = vst [vmem:[#allocation13_spill] sm:$0xff] %v9907_v37  ;;  %v2817_v0 = vand.u32 2147483647, %v2816_v48  ;;  %v2917_v27 = vsub.s32 4294967266, %v9881_v45  ;;  %v9918_v50 = vmul.u32.u64.low %v3201_v11, %v3200_v28  ;;  %v9919_v8 = vmul.u32.u64.high %v3201_v11, %v3200_v28, %v9918_v50 }
 0x2b9   : > { %v12656_v49 = vxor.u32 2147483648, %v9855_v34  ;;  %v2819_v55 = vcvt.s32.f32 %v9874_v52  ;;  %v2915_v25 = vshrl.u32 %v2897_v32, %v2913_v46  ;;  %v3269_v18 = vsel %vm3268_vm15, %v3267_v30, 0 }
 0x2ba   : > { %v3112_v48 = vshll.u32 %v9907_v37, 30  ;;  %v3192_v12 = vsel %vm3186_vm14, %v3189_v51, %v3191_v17  ;;  %v12658_v19 = vand.u32 2147483647, %v9822_v60  ;;  %v3271_v56 = vand.u32 31, %v3269_v18 }
 0x2bb   : > { %v9926_v53 = vsel %vm12475_vm6, %v12656_v49, %v9855_v34  ;;  %v2914_v22 = vshll.u32 %v9757_v38, %v9881_v45  ;;  %vm6880_vm0 = vcmp.lt.s32.totalorder %v6879_v35, 0  ;;  %v3211_v34 = vadd.s32 1, %v9914_v54 }
 0x2bc   : > { %12657 = vst [vmem:[#allocation59_spill] sm:$0xff] %v9926_v53  ;;  %v3264_v58 = vand.u32 8388607, %v12658_v19  ;;  %v9937_v63 = vadd.f32 %v1636_v26, %v9872_v6  ;;  %v9940_v32 = vmul.f32 %v2819_v55, %v2817_v0  ;;  %v2918_v46 = vadd.s32 127, %v2917_v27 }
 0x2bd   : > { %v9943_v30 = vadd.f32 %v1453_v47, %v12660_v36  ;;  %v9945_v51 = vor.u32 %v2915_v25, %v2914_v22  ;;  %v3208_v17 = vmul.u32 %v3201_v11, %v3192_v12  ;;  %vm3210_vm1 = vc.u32 %v9919_v8, %v9913_v40 }
 0x2be   : > { %12659 = vst [vmem:[#allocation60_spill] sm:$0xff] %v9937_v63  ;;  %v3272_v38 = vsub.s32 32, %v3271_v56  ;;  %v9949_v45 = vsel %vm6880_vm0, 0, %v6879_v35  ;;  %v9952_v6 = vsub.s32 %v9892_v44, %v3112_v48  ;;  %v3212_v28 = vsel %vm3210_vm1, %v3211_v34, %v9914_v54 }
 0x2bf   : > { %v3265_v0 = vor.u32 8388608, %v3264_v58  ;;  %v3213_v50 = vadd.s32 %v3212_v28, %v3208_v17  ;;  %v3364_v49 = vand.u32 2139095040, %v9937_v63  ;;  %v3274_v11 = vshll.u32 %v12597_v57, %v3271_v56 }
 0x2c0   : > { %v3275_v27 = vshrl.u32 %v12598_v59, %v3272_v38  ;;  %v3278_v26 = vshrl.u32 %v12599_v31, %v3272_v38  ;;  %v3277_v55 = vshll.u32 %v12598_v59, %v3271_v56  ;;  %v3280_v35 = vshll.u32 %v12599_v31, %v3271_v56 }
 0x2c1   : > { %v3281_v25 = vshrl.u32 %v12600_v42, %v3272_v38  ;;  %v3214_v44 = vadd.s32 536870912, %v3213_v50  ;;  %v3270_v47 = vshrl.u32 %v3269_v18, 5  ;;  %v3283_v54 = vshll.u32 %v12600_v42, %v3271_v56  ;;  %v7356_v18 = vld [vmem:[%s12367_s3 + $0x44] ss:$8 sps:$4 sm:$0xff]  }
 0x2c2   : > { %v3284_v48 = vshrl.u32 %v12601_v29, %v3272_v38  ;;  %vm12522_vm3 = vcmp.lt.s32.totalorder %v9280_v3, 0  ;;  %v2919_v12 = vshll.u32 %v2918_v46, 23  ;;  %v3276_v19 = vor.u32 %v3275_v27, %v3274_v11  ;;  %5271 = vmatprep.subr.bf16.mxu0 %v7356_v18 }
 0x2c3   : > { %v3279_v58 = vor.u32 %v3278_v26, %v3277_v55  ;;  %v3282_v22 = vor.u32 %v3281_v25, %v3280_v35  ;;  %v3115_v34 = vsub.s32 0, %v9952_v6  ;;  %v3286_v17 = vshll.u32 %v12601_v29, %v3271_v56  ;;  %v7354_v56 = vld [vmem:[%s12367_s3 + $0x40] ss:$8 sps:$4 sm:$0xff]  }
 0x2c4   : > { %v3285_v36 = vor.u32 %v3284_v48, %v3283_v54  ;;  %v3287_v28 = vshrl.u32 %v12602_v61, %v3272_v38  ;;  %v3021_v52 = vsub.s32 4294967266, %v9949_v45  ;;  %v9972_v37 = vshrl.u32 %v3214_v44, 30  ;;  %5272 = vmatpush1.bf16.msra.mxu0 %v7354_v56 }
 0x2c5   : > { %v3305_v53 = vshll.u32 %v3265_v0, 8  ;;  %v3365_v46 = vshrl.u32 %v3364_v49, 23  ;;  %v3273_v27 = vshrl.u32 %v12597_v57, %v3272_v38  ;;  %vm3289_vm5 = vcmp.lt.s32.totalorder %v3270_v47, 1 }
 0x2c6   : > { %12661 = vst [vmem:[#allocation14_spill] sm:$0xff] %v9972_v37  ;;  %v3288_v26 = vor.u32 %v3287_v28, %v3286_v17  ;;  %vm3292_vm7 = vcmp.lt.s32.totalorder %v3270_v47, 4  ;;  %vm3291_vm10 = vcmp.lt.s32.totalorder %v3270_v47, 3  ;;  %v3297_v55 = vsel %vm3289_vm5, %v3276_v19, %v3279_v58  ;;  %v1458_v17 = vpop.f32.mrf.mxu0 }
 0x2c7   : > { %v3294_v11 = vsel %vm3292_vm7, %v3282_v22, 2102212464  ;;  %v3298_v35 = vsel %vm3292_vm7, %v3285_v36, 920167782  ;;  %v6882_v25 = vmin.u32 %v3115_v34, %v9952_v6  ;;  %vm3290_vm13 = vcmp.lt.s32.totalorder %v3270_v47, 2 }
 0x2c8   : > { %v3299_v0 = vsel %vm3291_vm10, %v3282_v22, %v3298_v35  ;;  %v3301_v38 = vsel %vm3289_vm5, %v3279_v58, %v3282_v22  ;;  %vm12474_vm14 = vcmp.lt.s32.totalorder %v9390_v2, 0  ;;  %v3216_v49 = vshll.u32 %v9972_v37, 30  ;;  %v1638_v37 = vpop.f32.mrf.mxu1 }
 0x2c9   : > { %v3293_v44 = vsel %vm3289_vm5, %v3273_v27, %v3276_v19  ;;  %v3300_v54 = vsel %vm3290_vm13, %v3297_v55, %v3299_v0  ;;  %v3302_v48 = vsel %vm3292_vm7, %v3288_v26, 1326507024  ;;  %v3295_v28 = vsel %vm3291_vm10, %v3279_v58, %v3294_v11  ;;  %v12664_v55 = vld [vmem:[#allocation15_spill] sm:$0xff] }
 0x2ca   : > { %v3303_v18 = vsel %vm3291_vm10, %v3285_v36, %v3302_v48  ;;  %v9988_v34 = vmul.u32.u64.low %v3305_v53, %v3300_v54  ;;  %v9989_v16 = vmul.u32.u64.high %v3305_v53, %v3300_v54, %v9988_v34  ;;  %v2920_v22 = vor.u32 4788187, %v2919_v12 }
 0x2cb   : > { %v3022_v56 = vadd.s32 127, %v3021_v52  ;;  %v3304_v35 = vsel %vm3290_vm13, %v3301_v38, %v3303_v18  ;;  %v6893_v9 = vadd.s32 4294967169, %v3365_v46  ;;  %v12662_v19 = vxor.u32 2147483648, %v9869_v4 }
 0x2cc   : > { %v3117_v58 = vclz %v6882_v25  ;;  %v10000_v26 = vmul.u32.u64.low %v3305_v53, %v3304_v35  ;;  %v10001_v36 = vmul.u32.u64.high %v3305_v53, %v3304_v35, %v10000_v26  ;;  %v10003_v11 = vsub.s32 %v3213_v50, %v3216_v49 }
 0x2cd   : > { %v9998_v27 = vsel %vm12522_vm3, %v12662_v19, %v9869_v4  ;;  %v10006_v12 = vadd.f32 %v1458_v17, %v12664_v55  ;;  %v3296_v52 = vsel %vm3290_vm13, %v3293_v44, %v3295_v28  ;;  %v3371_v46 = vadd.s32 1, %v6893_v9  ;;  %v1460_v9 = vpop.f32.mrf.mxu0 }
 0x2ce   : > { %12663 = vst [vmem:[#allocation61_spill] sm:$0xff] %v9998_v27  ;;  %v2821_v0 = vxor.u32 2147483648, %v9940_v32  ;;  %v2923_v38 = vcvt.s32.f32 %v9945_v51  ;;  %v3315_v54 = vadd.s32 1, %v9989_v16  ;;  %v10013_v4 = vadd.f32 %v1638_v37, %v9943_v30 }
 0x2cf   : > { %v2921_v25 = vand.u32 2147483647, %v2920_v22  ;;  %v3017_v48 = vsub.s32 32, %v9949_v45  ;;  %v3023_v50 = vshll.u32 %v3022_v56, 23  ;;  %vm3372_vm15 = vcmp.gt.s32.totalorder %v3371_v46, 0 }
 0x2d0   : > { %v6883_v49 = vadd.s32 4294967294, %v3117_v58  ;;  %v3312_v17 = vmul.u32 %v3305_v53, %v3296_v52  ;;  %vm3314_vm0 = vc.u32 %v10001_v36, %v9988_v34  ;;  %v3373_v47 = vsel %vm3372_vm15, %v3371_v46, 0 }
 0x2d1   : > { %v3219_v44 = vsub.s32 0, %v10003_v11  ;;  %v3316_v51 = vsel %vm3314_vm0, %v3315_v54, %v9989_v16  ;;  %v12452_v28 = vand.u32 2147483647, %v9937_v63  ;;  %v3375_v37 = vand.u32 31, %v3373_v47  ;;  %v12666_v16 = vld [vmem:[#allocation16_spill] sm:$0xff] }
 0x2d2   : > { %v10024_v30 = vsel %vm12474_vm14, %v2821_v0, %v9940_v32  ;;  %v3001_v53 = vadd.s32 %v9740_v14, %v9747_v1  ;;  %v3317_v18 = vadd.s32 %v3316_v51, %v3312_v17  ;;  %v3468_v22 = vand.u32 2139095040, %v10013_v4 }
 0x2d3   : > { %12665 = vst [vmem:[#allocation15_spill] sm:$0xff] %v10024_v30  ;;  %v10029_v56 = vmul.f32 %v2923_v38, %v2921_v25  ;;  %v3018_v35 = vshll.u32 %v9846_v7, %v9949_v45  ;;  %v10034_v19 = vadd.f32 %v1460_v9, %v12666_v16  ;;  %v3376_v58 = vsub.s32 32, %v3375_v37 }
 0x2d4   : > { %v3019_v26 = vshrl.u32 %v3001_v53, %v3017_v48  ;;  %v10036_v55 = vor.u32 4788187, %v3023_v50  ;;  %vm6884_vm1 = vcmp.lt.s32.totalorder %v6883_v49, 0  ;;  %v3318_v32 = vadd.s32 536870912, %v3317_v18 }
 0x2d5   : > { %v6886_v52 = vmin.u32 %v3219_v44, %v10003_v11  ;;  %v3368_v14 = vand.u32 8388607, %v12452_v28  ;;  %v3379_v1 = vshrl.u32 %v12598_v59, %v3376_v58  ;;  %v3382_v46 = vshrl.u32 %v12599_v31, %v3376_v58 }
 0x2d6   : > { %v3378_v7 = vshll.u32 %v12597_v57, %v3375_v37  ;;  %v3381_v45 = vshll.u32 %v12598_v59, %v3375_v37  ;;  %v3385_v0 = vshrl.u32 %v12600_v42, %v3376_v58  ;;  %v3469_v38 = vshrl.u32 %v3468_v22, 23 }
 0x2d7   : > { %v3374_v54 = vshrl.u32 %v3373_v47, 5  ;;  %v3384_v25 = vshll.u32 %v12599_v31, %v3375_v37  ;;  %v3387_v48 = vshll.u32 %v12600_v42, %v3375_v37  ;;  %v3388_v50 = vshrl.u32 %v12601_v29, %v3376_v58 }
 0x2d8   : > { %v3020_v17 = vor.u32 %v3019_v26, %v3018_v35  ;;  %v10049_v9 = vshrl.u32 %v3318_v32, 30  ;;  %v3380_v44 = vor.u32 %v3379_v1, %v3378_v7  ;;  %v3383_v51 = vor.u32 %v3382_v46, %v3381_v45 }
 0x2d9   : > { %v3386_v53 = vor.u32 %v3385_v0, %v3384_v25  ;;  %v3389_v16 = vor.u32 %v3388_v50, %v3387_v48  ;;  %v3390_v28 = vshll.u32 %v12601_v29, %v3375_v37  ;;  %v3391_v30 = vshrl.u32 %v12602_v61, %v3376_v58 }
 0x2da   : > { %12667 = vst [vmem:[#allocation16_spill] sm:$0xff] %v10049_v9  ;;  %v3025_v22 = vand.u32 2147483647, %v10036_v55  ;;  %v10055_v47 = vsel %vm6884_vm1, 0, %v6883_v49  ;;  %v3369_v2 = vor.u32 8388608, %v3368_v14  ;;  %v3221_v3 = vclz %v6886_v52 }
 0x2db   : > { %v3392_v35 = vor.u32 %v3391_v30, %v3390_v28  ;;  %vm3393_vm5 = vcmp.lt.s32.totalorder %v3374_v54, 1  ;;  %v6897_v26 = vadd.s32 4294967169, %v3469_v38  ;;  %v3320_v32 = vshll.u32 %v10049_v9, 30 }
 0x2dc   : > { %vm3395_vm7 = vcmp.lt.s32.totalorder %v3374_v54, 3  ;;  %vm3396_vm10 = vcmp.lt.s32.totalorder %v3374_v54, 4  ;;  %v3401_v37 = vsel %vm3393_vm5, %v3380_v44, %v3383_v51  ;;  %v3405_v55 = vsel %vm3393_vm5, %v3383_v51, %v3386_v53 }
 0x2dd   : > { %v3398_v1 = vsel %vm3396_vm10, %v3386_v53, 2102212464  ;;  %v3402_v46 = vsel %vm3396_vm10, %v3389_v16, 920167782  ;;  %v3406_v7 = vsel %vm3396_vm10, %v3392_v35, 1326507024  ;;  %v3377_v49 = vshrl.u32 %v12597_v57, %v3376_v58 }
 0x2de   : > { %vm3394_vm13 = vcmp.lt.s32.totalorder %v3374_v54, 2  ;;  %v3403_v14 = vsel %vm3395_vm7, %v3386_v53, %v3402_v46  ;;  %v3409_v52 = vshll.u32 %v3369_v2, 8  ;;  %v6887_v28 = vadd.s32 4294967294, %v3221_v3 }
 0x2df   : > { %v3404_v30 = vsel %vm3394_vm13, %v3401_v37, %v3403_v14  ;;  %v3407_v45 = vsel %vm3395_vm7, %v3389_v16, %v3406_v7  ;;  %v3475_v0 = vadd.s32 1, %v6897_v26  ;;  %v10065_v38 = vsub.s32 %v3317_v18, %v3320_v32 }
 0x2e0   : > { %v3397_v25 = vsel %vm3393_vm5, %v3377_v49, %v3380_v44  ;;  %v3399_v48 = vsel %vm3395_vm7, %v3383_v51, %v3398_v1  ;;  %v3408_v50 = vsel %vm3394_vm13, %v3405_v55, %v3407_v45  ;;  %v3121_v2 = vsub.s32 32, %v10055_v47  ;;  %v1643_v55 = vpop.f32.mrf.mxu1 }
 0x2e1   : > { %v10070_v35 = vmul.u32.u64.low %v3409_v52, %v3408_v50  ;;  %v10071_v58 = vmul.u32.u64.high %v3409_v52, %v3408_v50, %v10070_v35  ;;  %v10073_v27 = vmul.u32.u64.low %v3409_v52, %v3404_v30  ;;  %v10074_v53 = vmul.u32.u64.high %v3409_v52, %v3404_v30, %v10073_v27 }
 0x2e2   : > { %v3125_v18 = vsub.s32 4294967266, %v10055_v47  ;;  %vm3476_vm15 = vcmp.gt.s32.totalorder %v3475_v0, 0  ;;  %v3027_v16 = vcvt.s32.f32 %v3020_v17  ;;  %v3400_v44 = vsel %vm3394_vm13, %v3397_v25, %v3399_v48 }
 0x2e3   : > { %v12668_v51 = vand.u32 2147483647, %v10013_v4  ;;  %v3477_v32 = vsel %vm3476_vm15, %v3475_v0, 0  ;;  %v3105_v37 = vadd.s32 %v9828_v21, %v9841_v24  ;;  %vm6888_vm0 = vcmp.lt.s32.totalorder %v6887_v28, 0 }
 0x2e4   : > { %v3323_v1 = vsub.s32 0, %v10065_v38  ;;  %v3479_v46 = vand.u32 31, %v3477_v32  ;;  %v10086_v7 = vmul.f32 %v3027_v16, %v3025_v22  ;;  %v3122_v49 = vshll.u32 %v9952_v6, %v10055_v47 }
 0x2e5   : > { %v3472_v26 = vand.u32 8388607, %v12668_v51  ;;  %vm3418_vm1 = vc.u32 %v10071_v58, %v10073_v27  ;;  %v3419_v54 = vadd.s32 1, %v10074_v53  ;;  %v3123_v17 = vshrl.u32 %v3105_v37, %v3121_v2 }
 0x2e6   : > { %v10093_v14 = vadd.s32 127, %v3125_v18  ;;  %v3416_v30 = vmul.u32 %v3409_v52, %v3400_v44  ;;  %v10095_v21 = vsub.s32 32, %v3479_v46  ;;  %v10097_v24 = vsel %vm6888_vm0, 0, %v6887_v28 }
 0x2e7   : > { %v3420_v45 = vsel %vm3418_vm1, %v3419_v54, %v10074_v53  ;;  %v3473_v22 = vor.u32 8388608, %v3472_v26  ;;  %v10101_v0 = vadd.f32 %v1643_v55, %v10006_v12  ;;  %v6890_v6 = vmin.u32 %v3323_v1, %v10065_v38 }
 0x2e8   : > { %v3421_v47 = vadd.s32 %v3420_v45, %v3416_v30  ;;  %v10104_v25 = vshrl.u32 %v3477_v32, 5  ;;  %v3482_v48 = vshll.u32 %v12597_v57, %v3479_v46  ;;  %v3483_v52 = vshrl.u32 %v12598_v59, %v10095_v21 }
 0x2e9   : > { %12669 = vst [vmem:[#allocation62_spill] sm:$0xff] %v10101_v0  ;;  %v3485_v50 = vshll.u32 %v12598_v59, %v3479_v46  ;;  %v3486_v28 = vshrl.u32 %v12599_v31, %v10095_v21  ;;  %v3489_v35 = vshrl.u32 %v12600_v42, %v10095_v21  ;;  %v3488_v53 = vshll.u32 %v12599_v31, %v3479_v46 }
 0x2ea   : > { %v3422_v12 = vadd.s32 536870912, %v3421_v47  ;;  %v3491_v2 = vshll.u32 %v12600_v42, %v3479_v46  ;;  %v3492_v18 = vshrl.u32 %v12601_v29, %v10095_v21  ;;  %v10118_v16 = vor.u32 %v3123_v17, %v3122_v49 }
 0x2eb   : > { %v3127_v44 = vshll.u32 %v10093_v14, 23  ;;  %v3484_v51 = vor.u32 %v3483_v52, %v3482_v48  ;;  %v10121_v26 = vor.u32 %v3486_v28, %v3485_v50  ;;  %v3229_v32 = vsub.s32 4294967266, %v10097_v24  ;;  %v7359_v50 = vld [vmem:[%s12367_s3 + $0x34] ss:$8 sps:$4 sm:$0xff]  }
 0x2ec   : > { %v10124_v37 = vshrl.u32 %v3422_v12, 30  ;;  %v3490_v1 = vor.u32 %v3489_v35, %v3488_v53  ;;  %v3493_v55 = vor.u32 %v3492_v18, %v3491_v2  ;;  %v3325_v54 = vclz %v6890_v6  ;;  %v7357_v53 = vld [vmem:[%s12367_s3 + $0x30] ss:$8 sps:$4 sm:$0xff]   ;;  %5273 = vmatprep.subr.bf16.mxu0 %v7359_v50  ;;  %v12671_v50 = vld [vmem:[#allocation17_spill] sm:$0xff] }
 0x2ed   : > { %v3494_v30 = vshll.u32 %v12601_v29, %v3479_v46  ;;  %v3495_v45 = vshrl.u32 %v12602_v61, %v10095_v21  ;;  %v10129_v3 = vshll.u32 %v3473_v22, 8  ;;  %vm3497_vm5 = vcmp.lt.s32.totalorder %v10104_v25, 1  ;;  %5274 = vmatpush1.bf16.msra.mxu0 %v7357_v53 }
 0x2ee   : > { %12670 = vst [vmem:[#allocation63_spill] sm:$0xff] %v10124_v37  ;;  %v3424_v49 = vshll.u32 %v10124_v37, 30  ;;  %vm3500_vm7 = vcmp.lt.s32.totalorder %v10104_v25, 4  ;;  %v3572_v17 = vand.u32 2139095040, %v10101_v0  ;;  %vm3499_vm10 = vcmp.lt.s32.totalorder %v10104_v25, 3 }
 0x2ef   : > { %v3496_v14 = vor.u32 %v3495_v45, %v3494_v30  ;;  %v3505_v46 = vsel %vm3497_vm5, %v3484_v51, %v10121_v26  ;;  %v3506_v6 = vsel %vm3500_vm7, %v3493_v55, 920167782  ;;  %v3230_v22 = vadd.s32 127, %v3229_v32  ;;  %v1465_v30 = vpop.f32.mrf.mxu0 }
 0x2f0   : > { %v10141_v48 = vsub.s32 %v3421_v47, %v3424_v49  ;;  %vm3498_vm13 = vcmp.lt.s32.totalorder %v10104_v25, 2  ;;  %v3507_v52 = vsel %vm3499_vm10, %v3490_v1, %v3506_v6  ;;  %v3509_v35 = vsel %vm3497_vm5, %v10121_v26, %v3490_v1  ;;  %v1645_v49 = vpop.f32.mrf.mxu1 }
 0x2f1   : > { %v3508_v28 = vsel %vm3498_vm13, %v3505_v46, %v3507_v52  ;;  %v3510_v47 = vsel %vm3500_vm7, %v3496_v14, 1326507024  ;;  %v3225_v2 = vsub.s32 32, %v10097_v24  ;;  %v6891_v18 = vadd.s32 4294967294, %v3325_v54 }
 0x2f2   : > { %v3427_v32 = vsub.s32 0, %v10141_v48  ;;  %v3511_v45 = vsel %vm3499_vm10, %v3493_v55, %v3510_v47  ;;  %v10167_v46 = vmul.u32.u64.low %v10129_v3, %v3508_v28  ;;  %v10168_v6 = vmul.u32.u64.high %v10129_v3, %v3508_v28, %v10167_v46 }
 0x2f3   : > { %v3512_v14 = vsel %vm3498_vm13, %v3509_v35, %v3511_v45  ;;  %v3573_v52 = vshrl.u32 %v3572_v17, 23  ;;  %v3231_v12 = vshll.u32 %v3230_v22, 23  ;;  %v10178_v47 = vadd.f32 %v1465_v30, %v12671_v50 }
 0x2f4   : > { %v6894_v54 = vmin.u32 %v3427_v32, %v10141_v48  ;;  %v10173_v37 = vmul.u32.u64.low %v10129_v3, %v3512_v14  ;;  %v10174_v9 = vmul.u32.u64.high %v10129_v3, %v3512_v14, %v10173_v37  ;;  %v10181_v45 = vadd.f32 %v1645_v49, %v10034_v19 }
 0x2f5   : > { %v6901_v35 = vadd.s32 4294967169, %v3573_v52  ;;  %v10183_v28 = vor.u32 4788187, %v3127_v44  ;;  %v3209_v17 = vadd.s32 %v9913_v40, %v9919_v8  ;;  %vm6892_vm15 = vcmp.lt.s32.totalorder %v6891_v18, 0 }
 0x2f6   : > { %12672 = vst [vmem:[#allocation17_spill] sm:$0xff] %v10181_v45  ;;  %v3429_v22 = vclz %v6894_v54  ;;  %v3481_v37 = vshrl.u32 %v12597_v57, %v10095_v21  ;;  %v3502_v32 = vsel %vm3500_vm7, %v3490_v1, 2102212464  ;;  %v3226_v19 = vshll.u32 %v10003_v11, %v10097_v24 }
 0x2f7   : > { %v3579_v30 = vadd.s32 1, %v6901_v35  ;;  %v3227_v49 = vshrl.u32 %v3209_v17, %v3225_v2  ;;  %v10194_v44 = vor.u32 4788187, %v3231_v12  ;;  %v12673_v14 = vand.u32 2147483647, %v10101_v0 }
 0x2f8   : > { %v10198_v8 = vsel %vm6892_vm15, 0, %v6891_v18  ;;  %v3501_v52 = vsel %vm3497_vm5, %v3481_v37, %v3484_v51  ;;  %v3676_v21 = vand.u32 2139095040, %v10181_v45  ;;  %v6895_v54 = vadd.s32 4294967294, %v3429_v22 }
 0x2f9   : > { %v3576_v40 = vand.u32 8388607, %v12673_v14  ;;  %vm3580_vm0 = vcmp.gt.s32.totalorder %v3579_v30, 0  ;;  %v3503_v1 = vsel %vm3499_vm10, %v10121_v26, %v3502_v32  ;;  %v3523_v11 = vadd.s32 1, %v10168_v6 }
 0x2fa   : > { %v3581_v24 = vsel %vm3580_vm0, %v3579_v30, 0  ;;  %v3313_v2 = vadd.s32 %v9988_v34, %v10001_v36  ;;  %vm3522_vm1 = vc.u32 %v10174_v9, %v10167_v46  ;;  %v10212_v18 = vor.u32 %v3227_v49, %v3226_v19 }
 0x2fb   : > { %v3583_v51 = vand.u32 31, %v3581_v24  ;;  %v3329_v35 = vsub.s32 32, %v10198_v8  ;;  %v3333_v26 = vsub.s32 4294967266, %v10198_v8  ;;  %v3504_v17 = vsel %vm3498_vm13, %v3501_v52, %v3503_v1 }
 0x2fc   : > { %v3577_v22 = vor.u32 8388608, %v3576_v40  ;;  %v3677_v32 = vshrl.u32 %v3676_v21, 23  ;;  %vm6896_vm5 = vcmp.lt.s32.totalorder %v6895_v54, 0  ;;  %v3524_v34 = vsel %vm3522_vm1, %v3523_v11, %v10168_v6 }
 0x2fd   : > { %v3584_v37 = vsub.s32 32, %v3583_v51  ;;  %v3586_v36 = vshll.u32 %v12597_v57, %v3583_v51  ;;  %v3589_v30 = vshll.u32 %v12598_v59, %v3583_v51  ;;  %v3592_v14 = vshll.u32 %v12599_v31, %v3583_v51 }
 0x2fe   : > { %v3520_v25 = vmul.u32 %v10129_v3, %v3504_v17  ;;  %v3582_v40 = vshrl.u32 %v3581_v24, 5  ;;  %v3595_v52 = vshll.u32 %v12600_v42, %v3583_v51  ;;  %v10229_v6 = vsel %vm6896_vm5, 0, %v6895_v54 }
 0x2ff   : > { %v3587_v19 = vshrl.u32 %v12598_v59, %v3584_v37  ;;  %v3590_v49 = vshrl.u32 %v12599_v31, %v3584_v37  ;;  %v3593_v55 = vshrl.u32 %v12600_v42, %v3584_v37  ;;  %v3596_v21 = vshrl.u32 %v12601_v29, %v3584_v37 }
 0x300   : > { %v3334_v53 = vadd.s32 127, %v3333_v26  ;;  %v10231_v12 = vadd.s32 %v3524_v34, %v3520_v25  ;;  %v12465_v41 = vand.u32 2147483647, %v10181_v45  ;;  %v3598_v13 = vshll.u32 %v12601_v29, %v3583_v51 }
 0x301   : > { %v3588_v1 = vor.u32 %v3587_v19, %v3586_v36  ;;  %v3591_v11 = vor.u32 %v3590_v49, %v3589_v30  ;;  %v3594_v50 = vor.u32 %v3593_v55, %v3592_v14  ;;  %v3597_v5 = vor.u32 %v3596_v21, %v3595_v52 }
 0x302   : > { %v3599_v3 = vshrl.u32 %v12602_v61, %v3584_v37  ;;  %v3617_v24 = vshll.u32 %v3577_v22, 8  ;;  %v6905_v17 = vadd.s32 4294967169, %v3677_v32  ;;  %v3437_v33 = vsub.s32 4294967266, %v10229_v6 }
 0x303   : > { %vm3601_vm7 = vcmp.lt.s32.totalorder %v3582_v40, 1  ;;  %vm3603_vm10 = vcmp.lt.s32.totalorder %v3582_v40, 3  ;;  %vm3604_vm13 = vcmp.lt.s32.totalorder %v3582_v40, 4  ;;  %v3526_v34 = vadd.s32 536870912, %v10231_v12 }
 0x304   : > { %v3600_v54 = vor.u32 %v3599_v3, %v3598_v13  ;;  %v3606_v36 = vsel %vm3604_vm13, %v3594_v50, 2102212464  ;;  %v3609_v55 = vsel %vm3601_vm7, %v3588_v1, %v3591_v11  ;;  %v3610_v26 = vsel %vm3604_vm13, %v3597_v5, 920167782 }
 0x305   : > { %v3585_v30 = vshrl.u32 %v12597_v57, %v3584_v37  ;;  %vm3602_vm15 = vcmp.lt.s32.totalorder %v3582_v40, 2  ;;  %v3611_v51 = vsel %vm3603_vm10, %v3594_v50, %v3610_v26  ;;  %v3613_v32 = vsel %vm3601_vm7, %v3591_v11, %v3594_v50 }
 0x306   : > { %v3612_v22 = vsel %vm3602_vm15, %v3609_v55, %v3611_v51  ;;  %v3614_v19 = vsel %vm3604_vm13, %v3600_v54, 1326507024  ;;  %v3680_v49 = vand.u32 8388607, %v12465_v41  ;;  %v3433_v13 = vsub.s32 32, %v10229_v6 }
 0x307   : > { %v3605_v14 = vsel %vm3601_vm7, %v3585_v30, %v3588_v1  ;;  %v3607_v25 = vsel %vm3603_vm10, %v3591_v11, %v3606_v36  ;;  %v3615_v52 = vsel %vm3603_vm10, %v3597_v5, %v3614_v19  ;;  %v3683_v55 = vadd.s32 1, %v6905_v17  ;;  %v1650_v5 = vpop.f32.mrf.mxu1 }
 0x308   : > { %v3616_v37 = vsel %vm3602_vm15, %v3613_v32, %v3615_v52  ;;  %v10250_v21 = vmul.u32.u64.low %v3617_v24, %v3612_v22  ;;  %v10251_v3 = vmul.u32.u64.high %v3617_v24, %v3612_v22, %v10250_v21  ;;  %v3438_v50 = vadd.s32 127, %v3437_v33 }
 0x309   : > { %v10254_v54 = vshrl.u32 %v3526_v34, 30  ;;  %v10256_v26 = vmul.u32.u64.low %v3617_v24, %v3616_v37  ;;  %v10257_v51 = vmul.u32.u64.high %v3617_v24, %v3616_v37, %v10256_v26  ;;  %v3235_v41 = vcvt.s32.f32 %v10212_v18 }
 0x30a   : > { %v3331_v1 = vshrl.u32 %v3313_v2, %v3329_v35  ;;  %v3417_v11 = vadd.s32 %v10073_v27, %v10071_v58  ;;  %vm3684_vm0 = vcmp.gt.s32.totalorder %v3683_v55, 0  ;;  %v3335_v36 = vshll.u32 %v3334_v53, 23 }
 0x30b   : > { %12674 = vst [vmem:[#allocation64_spill] sm:$0xff] %v10254_v54  ;;  %v3608_v30 = vsel %vm3602_vm15, %v3605_v14, %v3607_v25  ;;  %v3681_v22 = vor.u32 8388608, %v3680_v49  ;;  %v3685_v32 = vsel %vm3684_vm0, %v3683_v55, 0  ;;  %v12675_v33 = vand.u32 2147483647, %v10183_v28 }
 0x30c   : > { %v12676_v17 = vcvt.s32.f32 %v10118_v16  ;;  %v12677_v19 = vand.u32 2147483647, %v10194_v44  ;;  %v3435_v2 = vshrl.u32 %v3417_v11, %v3433_v13  ;;  %v3627_v27 = vadd.s32 1, %v10251_v3 }
 0x30d   : > { %v3330_v58 = vshll.u32 %v10065_v38, %v10198_v8  ;;  %v3439_v53 = vshll.u32 %v3438_v50, 23  ;;  %v3528_v35 = vshll.u32 %v10254_v54, 30  ;;  %v10278_v40 = vadd.f32 %v1650_v5, %v10178_v47 }
 0x30e   : > { %v10267_v34 = vmul.f32 %v12676_v17, %v12675_v33  ;;  %v10271_v18 = vmul.f32 %v3235_v41, %v12677_v19  ;;  %v3434_v16 = vshll.u32 %v10141_v48, %v10229_v6  ;;  %v3624_v28 = vmul.u32 %v3617_v24, %v3608_v30 }
 0x30f   : > { %12678 = vst [vmem:[#allocation65_spill] sm:$0xff] %v10278_v40  ;;  %vm3626_vm1 = vc.u32 %v10257_v51, %v10250_v21  ;;  %v3687_v41 = vand.u32 31, %v3685_v32  ;;  %v10284_v44 = vor.u32 %v3331_v1, %v3330_v58  ;;  %v10286_v49 = vor.u32 4788187, %v3335_v36 }
 0x310   : > { %v3628_v38 = vsel %vm3626_vm1, %v3627_v27, %v10251_v3  ;;  %v10289_v8 = vshll.u32 %v3681_v22, 8  ;;  %v10291_v13 = vor.u32 %v3435_v2, %v3434_v16  ;;  %v3686_v14 = vshrl.u32 %v3685_v32, 5  ;;  %v7362_v27 = vld [vmem:[%s12367_s3 + $0x24] ss:$8 sps:$4 sm:$0xff]  }
 0x311   : > { %v3629_v47 = vadd.s32 %v3628_v38, %v3624_v28  ;;  %v3688_v25 = vsub.s32 32, %v3687_v41  ;;  %v10293_v52 = vor.u32 4788187, %v3439_v53  ;;  %v10296_v48 = vsub.s32 %v10231_v12, %v3528_v35  ;;  %v7360_v28 = vld [vmem:[%s12367_s3 + $0x20] ss:$8 sps:$4 sm:$0xff]   ;;  %5275 = vmatprep.subr.bf16.mxu0 %v7362_v27 }
 0x312   : > { %v3690_v6 = vshll.u32 %v12597_v57, %v3687_v41  ;;  %v3780_v24 = vand.u32 2139095040, %v10278_v40  ;;  %v3693_v3 = vshll.u32 %v12598_v59, %v3687_v41  ;;  %v3696_v26 = vshll.u32 %v12599_v31, %v3687_v41  ;;  %5276 = vmatpush1.bf16.msra.mxu0 %v7360_v28 }
 0x313   : > { %v3630_v37 = vadd.s32 536870912, %v3629_v47  ;;  %v3691_v55 = vshrl.u32 %v12598_v59, %v3688_v25  ;;  %v3694_v50 = vshrl.u32 %v12599_v31, %v3688_v25  ;;  %v3697_v1 = vshrl.u32 %v12600_v42, %v3688_v25 }
 0x314   : > { %v3699_v11 = vshll.u32 %v12600_v42, %v3687_v41  ;;  %v3700_v12 = vshrl.u32 %v12601_v29, %v3688_v25  ;;  %vm3705_vm5 = vcmp.lt.s32.totalorder %v3686_v14, 1  ;;  %v3702_v33 = vshll.u32 %v12601_v29, %v3687_v41 }
 0x315   : > { %v10307_v5 = vshrl.u32 %v3630_v37, 30  ;;  %v3692_v36 = vor.u32 %v3691_v55, %v3690_v6  ;;  %v3695_v30 = vor.u32 %v3694_v50, %v3693_v3  ;;  %v3698_v22 = vor.u32 %v3697_v1, %v3696_v26 }
 0x316   : > { %v3701_v32 = vor.u32 %v3700_v12, %v3699_v11  ;;  %v3703_v17 = vshrl.u32 %v12602_v61, %v3688_v25  ;;  %vm3707_vm7 = vcmp.lt.s32.totalorder %v3686_v14, 3  ;;  %vm3708_vm10 = vcmp.lt.s32.totalorder %v3686_v14, 4 }
 0x317   : > { %12679 = vst [vmem:[#allocation66_spill] sm:$0xff] %v10307_v5  ;;  %v3632_v19 = vshll.u32 %v10307_v5, 30  ;;  %v3713_v2 = vsel %vm3705_vm5, %v3692_v36, %v3695_v30  ;;  %v3689_v58 = vshrl.u32 %v12597_v57, %v3688_v25  ;;  %v3710_v35 = vsel %vm3708_vm10, %v3698_v22, 2102212464 }
 0x318   : > { %v3704_v53 = vor.u32 %v3703_v17, %v3702_v33  ;;  %v3714_v16 = vsel %vm3708_vm10, %v3701_v32, 920167782  ;;  %vm3706_vm13 = vcmp.lt.s32.totalorder %v3686_v14, 2  ;;  %v3717_v6 = vsel %vm3705_vm5, %v3695_v30, %v3698_v22  ;;  %v1467_v33 = vpop.f32.mrf.mxu0 }
 0x319   : > { %v10322_v41 = vsub.s32 %v3629_v47, %v3632_v19  ;;  %v3715_v38 = vsel %vm3707_vm7, %v3698_v22, %v3714_v16  ;;  %vm12519_vm15 = vcmp.lt.s32.totalorder %v9486_v39, 0  ;;  %v3709_v25 = vsel %vm3705_vm5, %v3689_v58, %v3692_v36  ;;  %v1652_v16 = vpop.f32.mrf.mxu1 }
 0x31a   : > { %v3711_v37 = vsel %vm3707_vm7, %v3695_v30, %v3710_v35  ;;  %v3716_v55 = vsel %vm3706_vm13, %v3713_v2, %v3715_v38  ;;  %v3718_v3 = vsel %vm3708_vm10, %v3704_v53, 1326507024  ;;  %vm12472_vm0 = vcmp.lt.s32.totalorder %v9580_v20, 0 }
 0x31b   : > { %vm12473_vm1 = vcmp.lt.s32.totalorder %v9664_v10, 0  ;;  %v3635_v47 = vsub.s32 0, %v10322_v41  ;;  %v3719_v50 = vsel %vm3707_vm7, %v3701_v32, %v3718_v3  ;;  %vm12471_vm5 = vcmp.lt.s32.totalorder %v9783_v15, 0 }
 0x31c   : > { %v10336_v26 = vmul.u32.u64.low %v10289_v8, %v3716_v55  ;;  %v10337_v1 = vmul.u32.u64.high %v10289_v8, %v3716_v55, %v10336_v26  ;;  %v3337_v11 = vand.u32 2147483647, %v10286_v49  ;;  %v3441_v12 = vand.u32 2147483647, %v10293_v52 }
 0x31d   : > { %v3720_v36 = vsel %vm3706_vm13, %v3717_v6, %v3719_v50  ;;  %v3781_v30 = vshrl.u32 %v3780_v24, 23  ;;  %v3531_v22 = vsub.s32 0, %v10296_v48  ;;  %v6902_v17 = vmin.u32 %v3635_v47, %v10322_v41  ;;  %v12680_v6 = vld [vmem:[#allocation18_spill] sm:$0xff] }
 0x31e   : > { %v10347_v32 = vmul.u32.u64.low %v10289_v8, %v3720_v36  ;;  %v10348_v19 = vmul.u32.u64.high %v10289_v8, %v3720_v36, %v10347_v32  ;;  %v3339_v2 = vcvt.s32.f32 %v10284_v44  ;;  %v3712_v27 = vsel %vm3706_vm13, %v3709_v25, %v3711_v37  ;;  %v1472_v37 = vpop.f32.mrf.mxu0 }
 0x31f   : > { %v12466_v49 = vand.u32 2147483647, %v10278_v40  ;;  %v6909_v58 = vadd.s32 4294967169, %v3781_v30  ;;  %v3133_v52 = vxor.u32 2147483648, %v10267_v34  ;;  %v3443_v24 = vcvt.s32.f32 %v10291_v13 }
 0x320   : > { %v3637_v53 = vclz %v6902_v17  ;;  %v3731_v35 = vadd.s32 1, %v10337_v1  ;;  %v3237_v28 = vxor.u32 2147483648, %v10271_v18  ;;  %v10357_v38 = vmul.f32 %v3339_v2, %v3337_v11  ;;  %v12684_v17 = vld [vmem:[#allocation19_spill] sm:$0xff] }
 0x321   : > { %v1468_v55 = vadd.f32 %v1467_v33, %v12680_v6  ;;  %v3787_v44 = vadd.s32 1, %v6909_v58  ;;  %v10360_v14 = vmul.f32 %v3443_v24, %v3441_v12  ;;  %v6898_v25 = vmin.u32 %v3531_v22, %v10296_v48 }
 0x322   : > { %v3728_v3 = vmul.u32 %v10289_v8, %v3712_v27  ;;  %vm3730_vm7 = vc.u32 %v10348_v19, %v10336_v26  ;;  %v3784_v47 = vand.u32 8388607, %v12466_v49  ;;  %v12681_v11 = vxor.u32 2147483648, %v10029_v56 }
 0x323   : > { %v3732_v13 = vsel %vm3730_vm7, %v3731_v35, %v10337_v1  ;;  %vm3788_vm10 = vcmp.gt.s32.totalorder %v3787_v44, 0  ;;  %v10369_v50 = vadd.f32 %v1652_v16, %v1468_v55  ;;  %v6903_v36 = vadd.s32 4294967294, %v3637_v53 }
 0x324   : > { %v10376_v12 = vsel %vm12519_vm15, %v12681_v11, %v10029_v56  ;;  %v3733_v8 = vadd.s32 %v3732_v13, %v3728_v3  ;;  %v3789_v30 = vsel %vm3788_vm10, %v3787_v44, 0  ;;  %v12682_v22 = vxor.u32 2147483648, %v10086_v7 }
 0x325   : > { %v10388_v33 = vsel %vm12473_vm1, %v3133_v52, %v10267_v34  ;;  %v10391_v32 = vadd.f32 %v1472_v37, %v12684_v17  ;;  %v3791_v56 = vand.u32 31, %v3789_v30  ;;  %v10396_v2 = vsel %vm12471_vm5, %v3237_v28, %v10271_v18 }
 0x326   : > { %v10383_v1 = vsel %vm12472_vm0, %v12682_v22, %v10086_v7  ;;  %12685 = vst [vmem:[#allocation19_spill] sm:$0xff] %v10396_v2  ;;  %v3734_v7 = vadd.s32 536870912, %v3733_v8  ;;  %v3533_v24 = vclz %v6898_v25  ;;  %v3785_v53 = vor.u32 8388608, %v3784_v47  ;;  %v12691_v22 = vld [vmem:[#allocation20_spill] sm:$0xff] }
 0x327   : > { %12683 = vst [vmem:[#allocation18_spill] sm:$0xff] %v10383_v1  ;;  %v3792_v35 = vsub.s32 32, %v3791_v56  ;;  %v3884_v34 = vand.u32 2139095040, %v10369_v50  ;;  %vm6904_vm13 = vcmp.lt.s32.totalorder %v6903_v36, 0  ;;  %v3790_v16 = vshrl.u32 %v3789_v30, 5 }
 0x328   : > { %v10401_v52 = vshrl.u32 %v3734_v7, 30  ;;  %v3794_v6 = vshll.u32 %v12597_v57, %v3791_v56  ;;  %v3797_v18 = vshll.u32 %v12598_v59, %v3791_v56  ;;  %v3800_v37 = vshll.u32 %v12599_v31, %v3791_v56 }
 0x329   : > { %v3795_v55 = vshrl.u32 %v12598_v59, %v3792_v35  ;;  %v3798_v28 = vshrl.u32 %v12599_v31, %v3792_v35  ;;  %v3801_v44 = vshrl.u32 %v12600_v42, %v3792_v35  ;;  %v3803_v3 = vshll.u32 %v12600_v42, %v3791_v56 }
 0x32a   : > { %12686 = vst [vmem:[#allocation67_spill] sm:$0xff] %v10401_v52  ;;  %v3736_v25 = vshll.u32 %v10401_v52, 30  ;;  %v3804_v13 = vshrl.u32 %v12601_v29, %v3792_v35  ;;  %v6899_v47 = vadd.s32 4294967294, %v3533_v24  ;;  %vm12490_vm7 = vcmp.lt.s32.totalorder %v9822_v60, 0 }
 0x32b   : > { %v3796_v11 = vor.u32 %v3795_v55, %v3794_v6  ;;  %v3799_v30 = vor.u32 %v3798_v28, %v3797_v18  ;;  %v3802_v7 = vor.u32 %v3801_v44, %v3800_v37  ;;  %v10416_v58 = vshll.u32 %v3785_v53, 8 }
 0x32c   : > { %v10414_v17 = vsub.s32 %v3733_v8, %v3736_v25  ;;  %v3805_v49 = vor.u32 %v3804_v13, %v3803_v3  ;;  %v10419_v27 = vsel %vm6904_vm13, 0, %v6903_v36  ;;  %v3806_v5 = vshll.u32 %v12601_v29, %v3791_v56  ;;  %v1474_v8 = vpop.f32.mrf.mxu0 }
 0x32d   : > { %v3807_v52 = vshrl.u32 %v12602_v61, %v3792_v35  ;;  %v3885_v24 = vshrl.u32 %v3884_v34, 23  ;;  %vm12489_vm10 = vcmp.lt.s32.totalorder %v9937_v63, 0  ;;  %v3793_v55 = vshrl.u32 %v12597_v57, %v3792_v35 }
 0x32e   : > { %v3739_v6 = vsub.s32 0, %v10414_v17  ;;  %vm3809_vm5 = vcmp.lt.s32.totalorder %v3790_v16, 1  ;;  %vm3812_vm0 = vcmp.lt.s32.totalorder %v3790_v16, 4  ;;  %vm3811_vm1 = vcmp.lt.s32.totalorder %v3790_v16, 3 }
 0x32f   : > { %v3808_v18 = vor.u32 %v3807_v52, %v3806_v5  ;;  %v3817_v53 = vsel %vm3809_vm5, %v3796_v11, %v3799_v30  ;;  %v3818_v36 = vsel %vm3812_vm0, %v3805_v49, 920167782  ;;  %vm3810_vm13 = vcmp.lt.s32.totalorder %v3790_v16, 2 }
 0x330   : > { %v6906_v28 = vmin.u32 %v3739_v6, %v10414_v17  ;;  %v3814_v56 = vsel %vm3812_vm0, %v3802_v7, 2102212464  ;;  %v3819_v34 = vsel %vm3811_vm1, %v3802_v7, %v3818_v36  ;;  %v3821_v25 = vsel %vm3809_vm5, %v3799_v30, %v3802_v7 }
 0x331   : > { %v3820_v44 = vsel %vm3810_vm13, %v3817_v53, %v3819_v34  ;;  %v3822_v37 = vsel %vm3812_vm0, %v3808_v18, 1326507024  ;;  %v6913_v35 = vadd.s32 4294967169, %v3885_v24  ;;  %v12687_v3 = vand.u32 2147483647, %v9937_v63  ;;  %v1479_v24 = vpop.f32.mrf.mxu0  ;;  %v1657_v34 = vpop.f32.mrf.mxu1 }
 0x332   : > { %v12688_v5 = vmov 0  ;;  %vm6900_vm6 = vcmp.lt.s32.totalorder %v6899_v47, 0  ;;  %v3741_v52 = vclz %v6906_v28  ;;  %v3813_v13 = vsel %vm3809_vm5, %v3793_v55, %v3796_v11 }
 0x333   : > { %vm10433_vm14 = vcmp.le.f32.partialorder %v12687_v3, 0.7853982  ;;  %v3823_v6 = vsel %vm3811_vm1, %v3805_v49, %v3822_v37  ;;  %v3815_v36 = vsel %vm3811_vm1, %v3799_v30, %v3814_v56  ;;  %v3645_v3 = vsub.s32 4294967266, %v10419_v27 }
 0x334   : > { %v12689_v5 = vsel %vm10433_vm14, 4294967295, %v12688_v5  ;;  %v3824_v53 = vsel %vm3810_vm13, %v3821_v25, %v3823_v6  ;;  %v10442_v7 = vmul.u32.u64.low %v10416_v58, %v3820_v44  ;;  %v10443_v18 = vmul.u32.u64.high %v10416_v58, %v3820_v44, %v10442_v7 }
 0x335   : > { %12690 = vst [vmem:[#allocation68_spill] sm:$0xff] %v12689_v5  ;;  %v10448_v54 = vadd.f32 %v1474_v8, %v12691_v22  ;;  %v10451_v11 = vmul.u32.u64.low %v10416_v58, %v3824_v53  ;;  %v10452_v55 = vmul.u32.u64.high %v10416_v58, %v3824_v53, %v10451_v11  ;;  %v12692_v49 = vxor.u32 2147483648, %v10357_v38  ;;  %v12695_v8 = vld [vmem:[#allocation21_spill] sm:$0xff] }
 0x336   : > { %v10461_v28 = vsel %vm6900_vm6, 0, %v6899_v47  ;;  %v12694_v56 = vand.u32 2147483647, %v10369_v50  ;;  %v3891_v25 = vadd.s32 1, %v6913_v35  ;;  %v6907_v37 = vadd.s32 4294967294, %v3741_v52 }
 0x337   : > { %v10459_v30 = vsel %vm12490_vm7, %v12692_v49, %v10357_v38  ;;  %v3816_v22 = vsel %vm3810_vm13, %v3813_v13, %v3815_v36  ;;  %v10467_v6 = vadd.f32 %v1479_v24, %v12695_v8  ;;  %v10470_v53 = vadd.f32 %v1657_v34, %v10391_v32 }
 0x338   : > { %12693 = vst [vmem:[#allocation20_spill] sm:$0xff] %v10459_v30  ;;  %v3888_v44 = vand.u32 8388607, %v12694_v56  ;;  %v12697_v11 = vxor.u32 2147483648, %v10360_v14  ;;  %v3521_v47 = vadd.s32 %v10167_v46, %v10174_v9  ;;  %v3835_v35 = vadd.s32 1, %v10443_v18 }
 0x339   : > { %12696 = vst [vmem:[#allocation21_spill] sm:$0xff] %v10470_v53  ;;  %vm3892_vm6 = vcmp.gt.s32.totalorder %v3891_v25, 0  ;;  %v3537_v16 = vsub.s32 32, %v10461_v28  ;;  %v3541_v52 = vsub.s32 4294967266, %v10461_v28  ;;  %v3641_v13 = vsub.s32 32, %v10419_v27 }
 0x33a   : > { %v3446_v38 = vsel %vm12489_vm10, %v12697_v11, %v10360_v14  ;;  %v10483_v32 = vadd.s32 127, %v3645_v3  ;;  %v3832_v36 = vmul.u32 %v10416_v58, %v3816_v22  ;;  %vm3834_vm0 = vc.u32 %v10452_v55, %v10442_v7 }
 0x33b   : > { %v3889_v14 = vor.u32 8388608, %v3888_v44  ;;  %v3893_v24 = vsel %vm3892_vm6, %v3891_v25, 0  ;;  %v3625_v9 = vadd.s32 %v10250_v21, %v10257_v51  ;;  %vm6908_vm1 = vcmp.lt.s32.totalorder %v6907_v37, 0 }
 0x33c   : > { %v3836_v46 = vsel %vm3834_vm0, %v3835_v35, %v10443_v18  ;;  %v3988_v34 = vand.u32 2139095040, %v10470_v53  ;;  %v10495_v3 = vsel %vm10433_vm14, %v9937_v63, %v3446_v38  ;;  %v3895_v56 = vand.u32 31, %v3893_v24 }
 0x33d   : > { %v3837_v49 = vadd.s32 %v3836_v46, %v3832_v36  ;;  %v10499_v44 = vshrl.u32 %v3521_v47, %v3537_v16  ;;  %v10501_v25 = vadd.s32 127, %v3541_v52  ;;  %v3643_v21 = vshrl.u32 %v3625_v9, %v3641_v13 }
 0x33e   : > { %v3647_v51 = vshll.u32 %v10483_v32, 23  ;;  %v10504_v18 = vsel %vm6908_vm1, 0, %v6907_v37  ;;  %v3896_v8 = vsub.s32 32, %v3895_v56  ;;  %v10506_v11 = vshll.u32 %v3889_v14, 8 }
 0x33f   : > { %v3838_v22 = vadd.s32 536870912, %v3837_v49  ;;  %v3894_v38 = vshrl.u32 %v3893_v24, 5  ;;  %v3898_v35 = vshll.u32 %v12597_v57, %v3895_v56  ;;  %v3901_v58 = vshll.u32 %v12598_v59, %v3895_v56 }
 0x340   : > { %v3989_v36 = vshrl.u32 %v3988_v34, 23  ;;  %v3899_v47 = vshrl.u32 %v12598_v59, %v3896_v8  ;;  %v3902_v16 = vshrl.u32 %v12599_v31, %v3896_v8  ;;  %v3904_v52 = vshll.u32 %v12599_v31, %v3895_v56 }
 0x341   : > { %v10510_v46 = vshrl.u32 %v3838_v22, 30  ;;  %v3905_v37 = vshrl.u32 %v12600_v42, %v3896_v8  ;;  %v3907_v13 = vshll.u32 %v12600_v42, %v3895_v56  ;;  %v3908_v32 = vshrl.u32 %v12601_v29, %v3896_v8 }
 0x342   : > { %v3910_v14 = vshll.u32 %v12601_v29, %v3895_v56  ;;  %v3900_v9 = vor.u32 %v3899_v47, %v3898_v35  ;;  %v3903_v34 = vor.u32 %v3902_v16, %v3901_v58  ;;  %v3911_v22 = vshrl.u32 %v12602_v61, %v3896_v8 }
 0x343   : > { %12698 = vst [vmem:[#allocation69_spill] sm:$0xff] %v10510_v46  ;;  %v3840_v24 = vshll.u32 %v10510_v46, 30  ;;  %v3906_v5 = vor.u32 %v3905_v37, %v3904_v52  ;;  %v3909_v63 = vor.u32 %v3908_v32, %v3907_v13  ;;  %vm3913_vm5 = vcmp.lt.s32.totalorder %v3894_v38, 1 }
 0x344   : > { %v6917_v2 = vadd.s32 4294967169, %v3989_v36  ;;  %v3897_v1 = vshrl.u32 %v12597_v57, %v3896_v8  ;;  %v3912_v20 = vor.u32 %v3911_v22, %v3910_v14  ;;  %vm3916_vm13 = vcmp.lt.s32.totalorder %v3894_v38, 4  ;;  %v7365_v8 = vld [vmem:[%s12367_s3 + $0x14] ss:$8 sps:$4 sm:$0xff]  }
 0x345   : > { %v10521_v15 = vsub.s32 %v3837_v49, %v3840_v24  ;;  %vm3915_vm6 = vcmp.lt.s32.totalorder %v3894_v38, 3  ;;  %v3918_v30 = vsel %vm3916_vm13, %v3906_v5, 2102212464  ;;  %v3921_v56 = vsel %vm3913_vm5, %v3900_v9, %v3903_v34  ;;  %v7363_v49 = vld [vmem:[%s12367_s3 + $0x10] ss:$8 sps:$4 sm:$0xff]   ;;  %5277 = vmatprep.subr.bf16.mxu0 %v7365_v8 }
 0x346   : > { %v3922_v60 = vsel %vm3916_vm13, %v3909_v63, 920167782  ;;  %vm3914_vm0 = vcmp.lt.s32.totalorder %v3894_v38, 2  ;;  %v3925_v47 = vsel %vm3913_vm5, %v3903_v34, %v3906_v5  ;;  %v3917_v36 = vsel %vm3913_vm5, %v3897_v1, %v3900_v9  ;;  %5278 = vmatpush1.bf16.msra.mxu0 %v7363_v49 }
 0x347   : > { %v3843_v35 = vsub.s32 0, %v10521_v15  ;;  %v3923_v58 = vsel %vm3915_vm6, %v3906_v5, %v3922_v60  ;;  %v3919_v16 = vsel %vm3915_vm6, %v3903_v34, %v3918_v30  ;;  %v3926_v37 = vsel %vm3916_vm13, %v3912_v20, 1326507024 }
 0x348   : > { %v3924_v52 = vsel %vm3914_vm0, %v3921_v56, %v3923_v58  ;;  %v3927_v32 = vsel %vm3915_vm6, %v3909_v63, %v3926_v37  ;;  %v3642_v14 = vshll.u32 %v10322_v41, %v10419_v27  ;;  %v12487_v1 = vand.u32 2147483647, %v10470_v53 }
 0x349   : > { %v6910_v13 = vmin.u32 %v3843_v35, %v10521_v15  ;;  %v10537_v60 = vmul.u32.u64.low %v10506_v11, %v3924_v52  ;;  %v10538_v5 = vmul.u32.u64.high %v10506_v11, %v3924_v52, %v10537_v60  ;;  %v3928_v24 = vsel %vm3914_vm0, %v3925_v47, %v3927_v32  ;;  %v1659_v52 = vpop.f32.mrf.mxu1 }
 0x34a   : > { %v3995_v30 = vadd.s32 1, %v6917_v2  ;;  %v3749_v20 = vsub.s32 4294967266, %v10504_v18  ;;  %v10547_v63 = vmul.u32.u64.low %v10506_v11, %v3928_v24  ;;  %v10548_v34 = vmul.u32.u64.high %v10506_v11, %v3928_v24, %v10547_v63 }
 0x34b   : > { %v3845_v9 = vclz %v6910_v13  ;;  %v3543_v22 = vshll.u32 %v10501_v25, 23  ;;  %v3644_v56 = vor.u32 %v3643_v21, %v3642_v14  ;;  %v3920_v35 = vsel %vm3914_vm0, %v3917_v36, %v3919_v16 }
 0x34c   : > { %vm3996_vm1 = vcmp.gt.s32.totalorder %v3995_v30, 0  ;;  %v3648_v41 = vor.u32 4788187, %v3647_v51  ;;  %v3745_v27 = vsub.s32 32, %v10504_v18  ;;  %v3939_v58 = vadd.s32 1, %v10538_v5 }
 0x34d   : > { %v3997_v2 = vsel %vm3996_vm1, %v3995_v30, 0  ;;  %v12699_v47 = vshll.u32 %v10296_v48, %v10461_v28  ;;  %v6911_v8 = vadd.s32 4294967294, %v3845_v9  ;;  %v3992_v25 = vand.u32 8388607, %v12487_v1 }
 0x34e   : > { %v3999_v21 = vand.u32 31, %v3997_v2  ;;  %v3729_v38 = vadd.s32 %v10336_v26, %v10348_v19  ;;  %v3750_v51 = vadd.s32 127, %v3749_v20  ;;  %v3936_v36 = vmul.u32 %v10506_v11, %v3920_v35 }
 0x34f   : > { %v10558_v49 = vor.u32 %v10499_v44, %v12699_v47  ;;  %vm3938_vm5 = vc.u32 %v10548_v34, %v10537_v60  ;;  %v10567_v16 = vor.u32 4788187, %v3543_v22  ;;  %v3651_v48 = vcvt.s32.f32 %v3644_v56 }
 0x350   : > { %v3940_v28 = vsel %vm3938_vm5, %v3939_v58, %v10538_v5  ;;  %v4000_v44 = vsub.s32 32, %v3999_v21  ;;  %v3649_v37 = vand.u32 2147483647, %v3648_v41  ;;  %v3746_v13 = vshll.u32 %v10414_v17, %v10504_v18 }
 0x351   : > { %v3747_v32 = vshrl.u32 %v3729_v38, %v3745_v27  ;;  %v3941_v14 = vadd.s32 %v3940_v28, %v3936_v36  ;;  %vm6912_vm13 = vcmp.lt.s32.totalorder %v6911_v8, 0  ;;  %v3993_v26 = vor.u32 8388608, %v3992_v25 }
 0x352   : > { %v4003_v19 = vshrl.u32 %v12598_v59, %v4000_v44  ;;  %v4006_v11 = vshrl.u32 %v12599_v31, %v4000_v44  ;;  %v3751_v24 = vshll.u32 %v3750_v51, 23  ;;  %v4002_v20 = vshll.u32 %v12597_v57, %v3999_v21 }
 0x353   : > { %v3942_v30 = vadd.s32 536870912, %v3941_v14  ;;  %v10576_v5 = vadd.f32 %v1659_v52, %v10448_v54  ;;  %v3998_v9 = vshrl.u32 %v3997_v2, 5  ;;  %v4005_v63 = vshll.u32 %v12598_v59, %v3999_v21 }
 0x354   : > { %v4008_v17 = vshll.u32 %v12599_v31, %v3999_v21  ;;  %v4009_v18 = vshrl.u32 %v12600_v42, %v4000_v44  ;;  %v10581_v22 = vsel %vm6912_vm13, 0, %v6911_v8  ;;  %v4004_v56 = vor.u32 %v4003_v19, %v4002_v20 }
 0x355   : > { %12700 = vst [vmem:[#allocation70_spill] sm:$0xff] %v10576_v5  ;;  %v4011_v35 = vshll.u32 %v12600_v42, %v3999_v21  ;;  %v4012_v41 = vshrl.u32 %v12601_v29, %v4000_v44  ;;  %v4007_v27 = vor.u32 %v4006_v11, %v4005_v63  ;;  %v4014_v47 = vshll.u32 %v12601_v29, %v3999_v21 }
 0x356   : > { %v4010_v58 = vor.u32 %v4009_v18, %v4008_v17  ;;  %v4015_v54 = vshrl.u32 %v12602_v61, %v4000_v44  ;;  %v3652_v2 = vmul.f32 %v3651_v48, %v3649_v37  ;;  %v3748_v25 = vor.u32 %v3747_v32, %v3746_v13 }
 0x357   : > { %v10587_v38 = vshrl.u32 %v3942_v30, 30  ;;  %v4013_v51 = vor.u32 %v4012_v41, %v4011_v35  ;;  %v3752_v36 = vor.u32 4788187, %v3751_v24  ;;  %v4033_v8 = vshll.u32 %v3993_v26, 8 }
 0x358   : > { %v4016_v28 = vor.u32 %v4015_v54, %v4014_v47  ;;  %v4092_v52 = vand.u32 2139095040, %v10576_v5  ;;  %v3853_v19 = vsub.s32 4294967266, %v10581_v22  ;;  %v4001_v20 = vshrl.u32 %v12597_v57, %v4000_v44 }
 0x359   : > { %12701 = vst [vmem:[#allocation71_spill] sm:$0xff] %v10587_v38  ;;  %vm4017_vm6 = vcmp.lt.s32.totalorder %v3998_v9, 1  ;;  %vm4020_vm0 = vcmp.lt.s32.totalorder %v3998_v9, 4  ;;  %vm4019_vm1 = vcmp.lt.s32.totalorder %v3998_v9, 3  ;;  %v3944_v37 = vshll.u32 %v10587_v38, 30 }
 0x35a   : > { %v4022_v21 = vsel %vm4020_vm0, %v4010_v58, 2102212464  ;;  %v4025_v11 = vsel %vm4017_vm6, %v4004_v56, %v4007_v27  ;;  %v4026_v48 = vsel %vm4020_vm0, %v4013_v51, 920167782  ;;  %vm4018_vm5 = vcmp.lt.s32.totalorder %v3998_v9, 2 }
 0x35b   : > { %v4027_v13 = vsel %vm4019_vm1, %v4010_v58, %v4026_v48  ;;  %v4029_v32 = vsel %vm4017_vm6, %v4007_v27, %v4010_v58  ;;  %vm12488_vm13 = vcmp.lt.s32.totalorder %v10101_v0, 0  ;;  %v3849_v26 = vsub.s32 32, %v10581_v22 }
 0x35c   : > { %v4028_v44 = vsel %vm4018_vm5, %v4025_v11, %v4027_v13  ;;  %v4030_v24 = vsel %vm4020_vm0, %v4016_v28, 1326507024  ;;  %v4093_v30 = vshrl.u32 %v4092_v52, 23  ;;  %v3854_v63 = vadd.s32 127, %v3853_v19 }
 0x35d   : > { %v4021_v17 = vsel %vm4017_vm6, %v4001_v20, %v4004_v56  ;;  %v4023_v18 = vsel %vm4019_vm1, %v4007_v27, %v4022_v21  ;;  %v4031_v35 = vsel %vm4019_vm1, %v4013_v51, %v4030_v24  ;;  %v3547_v48 = vcvt.s32.f32 %v10558_v49 }
 0x35e   : > { %v4032_v41 = vsel %vm4018_vm5, %v4029_v32, %v4031_v35  ;;  %v10603_v47 = vmul.u32.u64.low %v4033_v8, %v4028_v44  ;;  %v10604_v54 = vmul.u32.u64.high %v4033_v8, %v4028_v44, %v10603_v47  ;;  %v6921_v58 = vadd.s32 4294967169, %v4093_v30 }
 0x35f   : > { %v10608_v1 = vsub.s32 %v3941_v14, %v3944_v37  ;;  %v10610_v28 = vmul.u32.u64.low %v4033_v8, %v4032_v41  ;;  %v10611_v52 = vmul.u32.u64.high %v4033_v8, %v4032_v41, %v10610_v28  ;;  %v3545_v56 = vand.u32 2147483647, %v10567_v16  ;;  %v1664_v37 = vpop.f32.mrf.mxu1 }
 0x360   : > { %v3833_v27 = vadd.s32 %v10442_v7, %v10452_v55  ;;  %v4024_v51 = vsel %vm4018_vm5, %v4021_v17, %v4023_v18  ;;  %v4099_v19 = vadd.s32 1, %v6921_v58  ;;  %v3653_v20 = vxor.u32 2147483648, %v3652_v2 }
 0x361   : > { %v3753_v21 = vand.u32 2147483647, %v3752_v36  ;;  %v3755_v11 = vcvt.s32.f32 %v3748_v25  ;;  %v12491_v13 = vand.u32 2147483647, %v10576_v5  ;;  %v3855_v49 = vshll.u32 %v3854_v63, 23 }
 0x362   : > { %v3851_v32 = vshrl.u32 %v3833_v27, %v3849_v26  ;;  %v4043_v14 = vadd.s32 1, %v10604_v54  ;;  %vm4100_vm6 = vcmp.gt.s32.totalorder %v4099_v19, 0  ;;  %v3947_v44 = vsub.s32 0, %v10608_v1 }
 0x363   : > { %v4040_v16 = vmul.u32 %v4033_v8, %v4024_v51  ;;  %vm4042_vm0 = vc.u32 %v10611_v52, %v10603_v47  ;;  %v4101_v7 = vsel %vm4100_vm6, %v4099_v19, 0  ;;  %v10622_v55 = vmul.f32 %v3547_v48, %v3545_v56 }
 0x364   : > { %v3850_v9 = vshll.u32 %v10521_v15, %v10581_v22  ;;  %v4044_v25 = vsel %vm4042_vm0, %v4043_v14, %v10604_v54  ;;  %v4103_v36 = vand.u32 31, %v4101_v7  ;;  %v10629_v26 = vsel %vm12488_vm13, %v3653_v20, %v3652_v2 }
 0x365   : > { %v10631_v24 = vmul.f32 %v3755_v11, %v3753_v21  ;;  %v4045_v30 = vadd.s32 %v4044_v25, %v4040_v16  ;;  %v10634_v8 = vadd.f32 %v1664_v37, %v10467_v6  ;;  %v10638_v17 = vor.u32 4788187, %v3855_v49 }
 0x366   : > { %v10636_v63 = vor.u32 %v3851_v32, %v3850_v9  ;;  %v4096_v15 = vand.u32 8388607, %v12491_v13  ;;  %v4104_v22 = vsub.s32 32, %v4103_v36  ;;  %v6914_v18 = vmin.u32 %v3947_v44, %v10608_v1 }
 0x367   : > { %v4046_v35 = vadd.s32 536870912, %v4045_v30  ;;  %v4106_v2 = vshll.u32 %v12597_v57, %v4103_v36  ;;  %v4109_v41 = vshll.u32 %v12598_v59, %v4103_v36  ;;  %v4112_v58 = vshll.u32 %v12599_v31, %v4103_v36 }
 0x368   : > { %v4107_v54 = vshrl.u32 %v12598_v59, %v4104_v22  ;;  %v4110_v6 = vshrl.u32 %v12599_v31, %v4104_v22  ;;  %v4113_v48 = vshrl.u32 %v12600_v42, %v4104_v22  ;;  %v4102_v56 = vshrl.u32 %v4101_v7, 5 }
 0x369   : > { %v10649_v28 = vshrl.u32 %v4046_v35, 30  ;;  %v4115_v27 = vshll.u32 %v12600_v42, %v4103_v36  ;;  %v4116_v51 = vshrl.u32 %v12601_v29, %v4104_v22  ;;  %v3859_v19 = vcvt.s32.f32 %v10636_v63  ;;  %v1481_v35 = vpop.f32.mrf.mxu0 }
 0x36a   : > { %v4108_v20 = vor.u32 %v4107_v54, %v4106_v2  ;;  %v4111_v21 = vor.u32 %v4110_v6, %v4109_v41  ;;  %v4114_v11 = vor.u32 %v4113_v48, %v4112_v58  ;;  %v3857_v32 = vand.u32 2147483647, %v10638_v17 }
 0x36b   : > { %12702 = vst [vmem:[#allocation72_spill] sm:$0xff] %v10649_v28  ;;  %v4048_v49 = vshll.u32 %v10649_v28, 30  ;;  %v4097_v14 = vor.u32 8388608, %v4096_v15  ;;  %v4117_v37 = vor.u32 %v4116_v51, %v4115_v27  ;;  %v12703_v44 = vand.u32 2147483647, %v10101_v0 }
 0x36c   : > { %v12704_v16 = vmov 0  ;;  %v3949_v7 = vclz %v6914_v18  ;;  %v4118_v9 = vshll.u32 %v12601_v29, %v4103_v36  ;;  %v4119_v25 = vshrl.u32 %v12602_v61, %v4104_v22 }
 0x36d   : > { %vm10658_vm1 = vcmp.le.f32.partialorder %v12703_v44, 0.7853982  ;;  %v4196_v63 = vand.u32 2139095040, %v10634_v8  ;;  %v10665_v2 = vsub.s32 %v4045_v30, %v4048_v49  ;;  %vm4121_vm5 = vcmp.lt.s32.totalorder %v4102_v56, 1  ;;  %v7368_v30 = vld [vmem:[%s12367_s3 + $0x4] ss:$8 sps:$4 sm:$0xff]   ;;  %v1486_v44 = vpop.f32.mrf.mxu0 }
 0x36e   : > { %v12705_v16 = vsel %vm10658_vm1, 4294967295, %v12704_v16  ;;  %vm4123_vm6 = vcmp.lt.s32.totalorder %v4102_v56, 3  ;;  %vm4124_vm0 = vcmp.lt.s32.totalorder %v4102_v56, 4  ;;  %v4120_v17 = vor.u32 %v4119_v25, %v4118_v9  ;;  %v7366_v49 = vld [vmem:[%s12367_s3] ss:$8 sps:$4 sm:$0xff]   ;;  %5279 = vmatprep.subr.bf16.mxu0 %v7368_v30 }
 0x36f   : > { %12706 = vst [vmem:[#allocation73_spill] sm:$0xff] %v12705_v16  ;;  %v4126_v15 = vsel %vm4124_vm0, %v4114_v11, 2102212464  ;;  %v4129_v41 = vsel %vm4121_vm5, %v4108_v20, %v4111_v21  ;;  %v4130_v54 = vsel %vm4124_vm0, %v4117_v37, 920167782  ;;  %v4051_v6 = vsub.s32 0, %v10665_v2  ;;  %5280 = vmatpush1.bf16.msra.mxu0 %v7366_v49 }
 0x370   : > { %v4105_v18 = vshrl.u32 %v12597_v57, %v4104_v22  ;;  %vm4122_vm13 = vcmp.lt.s32.totalorder %v4102_v56, 2  ;;  %v4131_v36 = vsel %vm4123_vm6, %v4114_v11, %v4130_v54  ;;  %vm12518_vm10 = vcmp.lt.s32.totalorder %v10013_v4, 0 }
 0x371   : > { %v4132_v58 = vsel %vm4122_vm13, %v4129_v41, %v4131_v36  ;;  %v4133_v48 = vsel %vm4121_vm5, %v4111_v21, %v4114_v11  ;;  %v4134_v27 = vsel %vm4124_vm0, %v4120_v17, 1326507024  ;;  %v4137_v51 = vshll.u32 %v4097_v14, 8 }
 0x372   : > { %v6918_v22 = vmin.u32 %v4051_v6, %v10665_v2  ;;  %v4125_v9 = vsel %vm4121_vm5, %v4105_v18, %v4108_v20  ;;  %v4127_v25 = vsel %vm4123_vm6, %v4111_v21, %v4126_v15  ;;  %v4135_v54 = vsel %vm4123_vm6, %v4117_v37, %v4134_v27  ;;  %v12707_v18 = vld [vmem:[#allocation22_spill] sm:$0xff] }
 0x373   : > { %vm12503_vm7 = vcmp.lt.s32.totalorder %v10181_v45, 0  ;;  %v4136_v11 = vsel %vm4122_vm13, %v4133_v48, %v4135_v54  ;;  %v10686_v17 = vmul.u32.u64.low %v4137_v51, %v4132_v58  ;;  %v10687_v14 = vmul.u32.u64.high %v4137_v51, %v4132_v58, %v10686_v17  ;;  %v1666_v58 = vpop.f32.mrf.mxu1 }
 0x374   : > { %v4197_v41 = vshrl.u32 %v4196_v63, 23  ;;  %v6915_v36 = vadd.s32 4294967294, %v3949_v7  ;;  %v4053_v6 = vclz %v6918_v22  ;;  %7513 = vcosq.f32 %v10495_v3  ;;  %v1488_v7 = vpop.f32.mrf.mxu0 }
 0x375   : > { %v10690_v13 = vmul.u32.u64.low %v4137_v51, %v4136_v11  ;;  %v10691_v28 = vmul.u32.u64.high %v4137_v51, %v4136_v11, %v10690_v13  ;;  %v3860_v20 = vmul.f32 %v3859_v19, %v3857_v32  ;;  %v4128_v21 = vsel %vm4122_vm13, %v4125_v9, %v4127_v25 }
 0x376   : > { %v6925_v37 = vadd.s32 4294967169, %v4197_v41  ;;  %7515 = vsinq.f32 %v10495_v3  ;;  %v3549_v15 = vxor.u32 2147483648, %v10622_v55  ;;  %v3657_v63 = vsel %vm10658_vm1, %v10101_v0, %v10629_v26  ;;  %v12710_v41 = vld [vmem:[#allocation24_spill] sm:$0xff] }
 0x377   : > { %vm12502_vm5 = vcmp.lt.s32.totalorder %v10278_v40, 0  ;;  %v3757_v13 = vxor.u32 2147483648, %v10631_v24  ;;  %v1482_v30 = vadd.f32 %v1481_v35, %v12707_v18  ;;  %v4147_v56 = vadd.s32 1, %v10687_v14  ;;  %v12708_v35 = vld [vmem:[#allocation23_spill] sm:$0xff] }
 0x378   : > { %v4203_v19 = vadd.s32 1, %v6925_v37  ;;  %vm6916_vm13 = vcmp.lt.s32.totalorder %v6915_v36, 0  ;;  %v6919_v32 = vadd.s32 4294967294, %v4053_v6  ;;  %v4144_v3 = vmul.u32 %v4137_v51, %v4128_v21  ;;  %v1493_v51 = vpop.f32.mrf.mxu0  ;;  %v12711_v37 = vld [vmem:[#allocation25_spill] sm:$0xff] }
 0x379   : > { %vm4146_vm6 = vc.u32 %v10691_v28, %v10686_v17  ;;  %7517 = vcosq.f32 %v3657_v63  ;;  %v3861_v48 = vxor.u32 2147483648, %v3860_v20  ;;  %v10711_v27 = vsel %vm12518_vm10, %v3549_v15, %v10622_v55 }
 0x37a   : > { %v4148_v26 = vsel %vm4146_vm6, %v4147_v56, %v10687_v14  ;;  %vm4204_vm0 = vcmp.gt.s32.totalorder %v4203_v19, 0  ;;  %7519 = vsinq.f32 %v3657_v63  ;;  %v10714_v49 = vadd.f32 %v1486_v44, %v12708_v35 }
 0x37b   : > { %v4149_v22 = vadd.s32 %v4148_v26, %v4144_v3  ;;  %v10716_v9 = vsel %vm6916_vm13, 0, %v6915_v36  ;;  %v12494_v25 = vand.u32 2147483647, %v10634_v8  ;;  %v4205_v54 = vsel %vm4204_vm0, %v4203_v19, 0 }
 0x37c   : > { %v10719_v11 = vadd.f32 %v1666_v58, %v1482_v30  ;;  %v10724_v14 = vsel %vm12503_vm7, %v3757_v13, %v10631_v24  ;;  %vm6920_vm6 = vcmp.lt.s32.totalorder %v6919_v32, 0  ;;  %v10727_v6 = vadd.f32 %v1488_v7, %v12710_v41 }
 0x37d   : > { %12709 = vst [vmem:[#allocation22_spill] sm:$0xff] %v10724_v14  ;;  %v4150_v55 = vadd.s32 536870912, %v4149_v22  ;;  %v10731_v44 = vsel %vm12502_vm5, %v3861_v48, %v3860_v20  ;;  %v10735_v36 = vadd.s32 %v10537_v60, %v10548_v34  ;;  %v4207_v21 = vand.u32 31, %v4205_v54 }
 0x37e   : > { %v10738_v15 = vadd.f32 %v1493_v51, %v12711_v37  ;;  %v3957_v63 = vsub.s32 4294967266, %v10716_v9  ;;  %v10744_v7 = vadd.s32 %v10603_v47, %v10611_v52  ;;  %v10748_v20 = vsel %vm6920_vm6, 0, %v6919_v32 }
 0x37f   : > { %v10746_v13 = vshrl.u32 %v4150_v55, 30  ;;  %v4200_v60 = vand.u32 8388607, %v12494_v25  ;;  %v4208_v34 = vsub.s32 32, %v4207_v21  ;;  %v4300_v18 = vand.u32 2139095040, %v10719_v11 }
 0x380   : > { %v10754_v56 = vshrl.u32 %v4205_v54, 5  ;;  %v4210_v19 = vshll.u32 %v12597_v57, %v4207_v21  ;;  %v4213_v3 = vshll.u32 %v12598_v59, %v4207_v21  ;;  %v4216_v32 = vshll.u32 %v12599_v31, %v4207_v21 }
 0x381   : > { %12712 = vst [vmem:[#allocation23_spill] sm:$0xff] %v10746_v13  ;;  %v4152_v30 = vshll.u32 %v10746_v13, 30  ;;  %v4211_v47 = vshrl.u32 %v12598_v59, %v4208_v34  ;;  %v4214_v52 = vshrl.u32 %v12599_v31, %v4208_v34  ;;  %v4217_v58 = vshrl.u32 %v12600_v42, %v4208_v34  ;;  %v10762_v48 = vpop.eup %7513 }
 0x382   : > { %12713 = vst [vmem:[#allocation24_spill] sm:$0xff] %v10762_v48  ;;  %v4219_v35 = vshll.u32 %v12600_v42, %v4207_v21  ;;  %v4220_v51 = vshrl.u32 %v12601_v29, %v4208_v34  ;;  %v4222_v54 = vshll.u32 %v12601_v29, %v4207_v21  ;;  %v4223_v24 = vshrl.u32 %v12602_v61, %v4208_v34  ;;  %v7371_v21 = vld [vmem:[%s12367_s3 + $0xf4] ss:$8 sps:$4 sm:$0xff]  }
 0x383   : > { %v10764_v26 = vsub.s32 %v4149_v22, %v4152_v30  ;;  %v10769_v55 = vpop.eup %7515  ;;  %v4212_v41 = vor.u32 %v4211_v47, %v4210_v19  ;;  %v4215_v37 = vor.u32 %v4214_v52, %v4213_v3  ;;  %v4218_v25 = vor.u32 %v4217_v58, %v4216_v32  ;;  %5281 = vmatprep.subr.bf16.mxu0 %v7371_v21 }
 0x384   : > { %12714 = vst [vmem:[#allocation25_spill] sm:$0xff] %v10769_v55  ;;  %v12715_v46 = vand.u32 2147483647, %v10278_v40  ;;  %v12716_v13 = vmov 0  ;;  %v10778_v22 = vadd.s32 127, %v3957_v63  ;;  %v4201_v38 = vor.u32 8388608, %v4200_v60 }
 0x385   : > { %v4155_v30 = vsub.s32 0, %v10764_v26  ;;  %v4221_v16 = vor.u32 %v4220_v51, %v4219_v35  ;;  %v4061_v19 = vsub.s32 4294967266, %v10748_v20  ;;  %v4224_v3 = vor.u32 %v4223_v24, %v4222_v54  ;;  %v7369_v63 = vld [vmem:[%s12367_s3 + $0xf0] ss:$8 sps:$4 sm:$0xff]  }
 0x386   : > { %vm10774_vm13 = vcmp.le.f32.partialorder %v12715_v46, 0.7853982  ;;  %vm4225_vm0 = vcmp.lt.s32.totalorder %v10754_v56, 1  ;;  %v10790_v47 = vpop.eup %7517  ;;  %vm4227_vm6 = vcmp.lt.s32.totalorder %v10754_v56, 3  ;;  %vm4228_vm5 = vcmp.lt.s32.totalorder %v10754_v56, 4  ;;  %5282 = vmatpush2.bf16.msra.mxu0 %v7369_v63 }
 0x387   : > { %v12717_v13 = vsel %vm10774_vm13, 4294967295, %v12716_v13  ;;  %12719 = vst [vmem:[#allocation75_spill] sm:$0xff] %v10790_v47  ;;  %v4233_v60 = vsel %vm4225_vm0, %v4212_v41, %v4215_v37  ;;  %v4301_v52 = vshrl.u32 %v4300_v18, 23  ;;  %v10796_v24 = vpop.eup %7519  ;;  %v6922_v32 = vmin.u32 %v4155_v30, %v10764_v26  ;;  %v7374_v18 = vld [vmem:[%s12367_s3 + $0xe4] ss:$8 sps:$4 sm:$0xff]  }
 0x388   : > { %12718 = vst [vmem:[#allocation74_spill] sm:$0xff] %v12717_v13  ;;  %12720 = vst [vmem:[#allocation76_spill] sm:$0xff] %v10796_v24  ;;  %v4234_v58 = vsel %vm4228_vm5, %v4221_v16, 920167782  ;;  %v4237_v35 = vsel %vm4225_vm0, %v4215_v37, %v4218_v25  ;;  %v4238_v51 = vsel %vm4228_vm5, %v4224_v3, 1326507024  ;;  %v4209_v54 = vshrl.u32 %v12597_v57, %v4208_v34  ;;  %v1671_v34 = vpop.f32.mrf.mxu1  ;;  %5283 = vmatprep.subr.bf16.mxu0 %v7374_v18 }
 0x389   : > { %vm4226_vm7 = vcmp.lt.s32.totalorder %v10754_v56, 2  ;;  %v4230_v46 = vsel %vm4228_vm5, %v4218_v25, 2102212464  ;;  %v4235_v47 = vsel %vm4227_vm6, %v4218_v25, %v4234_v58  ;;  %v4057_v30 = vsub.s32 32, %v10748_v20  ;;  %v7372_v24 = vld [vmem:[%s12367_s3 + $0xe0] ss:$8 sps:$4 sm:$0xff]  }
 0x38a   : > { %v4236_v21 = vsel %vm4226_vm7, %v4233_v60, %v4235_v47  ;;  %v4239_v3 = vsel %vm4227_vm6, %v4221_v16, %v4238_v51  ;;  %v4241_v63 = vshll.u32 %v4201_v38, 8  ;;  %v4062_v0 = vadd.s32 127, %v4061_v19  ;;  %5284 = vmatpush2.bf16.msra.mxu0 %v7372_v24  ;;  %v7386_v13 = vld [vmem:[%s12367_s3 + $0xa4] ss:$8 sps:$4 sm:$0xff]  }
 0x38b   : > { %v4229_v25 = vsel %vm4225_vm0, %v4209_v54, %v4212_v41  ;;  %v4240_v58 = vsel %vm4226_vm7, %v4237_v35, %v4239_v3  ;;  %v6929_v48 = vadd.s32 4294967169, %v4301_v52  ;;  %v4157_v55 = vclz %v6922_v32  ;;  %v7377_v52 = vld [vmem:[%s12367_s3 + $0xd4] ss:$8 sps:$4 sm:$0xff]  }
 0x38c   : > { %v4231_v47 = vsel %vm4227_vm6, %v4215_v37, %v4230_v46  ;;  %v10822_v16 = vmul.u32.u64.low %v4241_v63, %v4240_v58  ;;  %v10823_v38 = vmul.u32.u64.high %v4241_v63, %v4240_v58, %v10822_v16  ;;  %v10830_v41 = vadd.f32 %v1671_v34, %v10714_v49  ;;  %5285 = vmatprep.subr.bf16.mxu0 %v7377_v52  ;;  %v7378_v58 = vld [vmem:[%s12367_s3 + $0xc0] ss:$8 sps:$4 sm:$0xff]  }
 0x38d   : > { %v10825_v60 = vmul.u32.u64.low %v4241_v63, %v4236_v21  ;;  %v10826_v51 = vmul.u32.u64.high %v4241_v63, %v4236_v21, %v10825_v60  ;;  %v4307_v19 = vadd.s32 1, %v6929_v48  ;;  %v10839_v37 = vsel %vm10774_vm13, %v10278_v40, %v10731_v44  ;;  %v7375_v44 = vld [vmem:[%s12367_s3 + $0xd0] ss:$8 sps:$4 sm:$0xff]  }
 0x38e   : > { %v3954_v46 = vshll.u32 %v10608_v1, %v10716_v9  ;;  %v12721_v24 = vsub.s32 32, %v10716_v9  ;;  %v3959_v49 = vshll.u32 %v10778_v22, 23  ;;  %v4059_v32 = vshrl.u32 %v10744_v7, %v4057_v30  ;;  %5286 = vmatpush2.bf16.msra.mxu0 %v7375_v44  ;;  %v7380_v30 = vld [vmem:[%s12367_s3 + $0xc4] ss:$8 sps:$4 sm:$0xff]  }
 0x38f   : > { %v4232_v35 = vsel %vm4226_vm7, %v4229_v25, %v4231_v47  ;;  %v12722_v54 = vand.u32 2147483647, %v10719_v11  ;;  %vm4308_vm5 = vcmp.gt.s32.totalorder %v4307_v19, 0  ;;  %v4063_v1 = vshll.u32 %v4062_v0, 23  ;;  %5287 = vmatprep.subr.bf16.mxu0 %v7380_v30 }
 0x390   : > { %v3955_v48 = vshrl.u32 %v10735_v36, %v12721_v24  ;;  %v6923_v9 = vadd.s32 4294967294, %v4157_v55  ;;  %vm4250_vm0 = vc.u32 %v10823_v38, %v10825_v60  ;;  %v4309_v36 = vsel %vm4308_vm5, %v4307_v19, 0  ;;  %v7383_v24 = vld [vmem:[%s12367_s3 + $0xb4] ss:$8 sps:$4 sm:$0xff]  }
 0x391   : > { %v4304_v18 = vand.u32 8388607, %v12722_v54  ;;  %7521 = vcosq.f32 %v10839_v37  ;;  %v4058_v7 = vshll.u32 %v10665_v2, %v10748_v20  ;;  %v4251_v56 = vadd.s32 1, %v10826_v51  ;;  %v7381_v54 = vld [vmem:[%s12367_s3 + $0xb0] ss:$8 sps:$4 sm:$0xff]  }
 0x392   : > { %v4404_v22 = vand.u32 2139095040, %v10830_v41  ;;  %v10865_v0 = vor.u32 %v3955_v48, %v3954_v46  ;;  %v10867_v55 = vor.u32 4788187, %v3959_v49  ;;  %v4248_v21 = vmul.u32 %v4241_v63, %v4232_v35  ;;  %5288 = vmatpush2.bf16.msra.mxu0 %v7378_v58 }
 0x393   : > { %v4311_v3 = vand.u32 31, %v4309_v36  ;;  %v10869_v34 = vor.u32 %v4059_v32, %v4058_v7  ;;  %v4252_v25 = vsel %vm4250_vm0, %v4251_v56, %v10826_v51  ;;  %v4305_v2 = vor.u32 8388608, %v4304_v18  ;;  %5289 = vmatprep.subr.bf16.mxu0 %v7383_v24 }
 0x394   : > { %v10876_v47 = vor.u32 4788187, %v4063_v1  ;;  %vm6924_vm7 = vcmp.lt.s32.totalorder %v6923_v9, 0  ;;  %v4253_v16 = vadd.s32 %v4252_v25, %v4248_v21  ;;  %v10878_v52 = vshrl.u32 %v4309_v36, 5 }
 0x395   : > { %v4312_v19 = vsub.s32 32, %v4311_v3  ;;  %v4314_v63 = vshll.u32 %v12597_v57, %v4311_v3  ;;  %v4317_v46 = vshll.u32 %v12598_v59, %v4311_v3  ;;  %v4405_v51 = vshrl.u32 %v4404_v22, 23 }
 0x396   : > { %v4254_v48 = vadd.s32 536870912, %v4253_v16  ;;  %v4320_v35 = vshll.u32 %v12599_v31, %v4311_v3  ;;  %v4323_v44 = vshll.u32 %v12600_v42, %v4311_v3  ;;  %v4326_v36 = vshll.u32 %v12601_v29, %v4311_v3  ;;  %5290 = vmatpush2.bf16.msra.mxu0 %v7381_v54 }
 0x397   : > { %v4315_v49 = vshrl.u32 %v12598_v59, %v4312_v19  ;;  %v4318_v32 = vshrl.u32 %v12599_v31, %v4312_v19  ;;  %v4321_v18 = vshrl.u32 %v12600_v42, %v4312_v19  ;;  %v4324_v1 = vshrl.u32 %v12601_v29, %v4312_v19  ;;  %5291 = vmatprep.subr.bf16.mxu0 %v7386_v13 }
 0x398   : > { %v10895_v7 = vshrl.u32 %v4254_v48, 30  ;;  %v4327_v30 = vshrl.u32 %v12602_v61, %v4312_v19  ;;  %v10899_v21 = vsel %vm6924_vm7, 0, %v6923_v9  ;;  %v10901_v20 = vshll.u32 %v4305_v2, 8  ;;  %v7384_v9 = vld [vmem:[%s12367_s3 + $0xa0] ss:$8 sps:$4 sm:$0xff]  }
 0x399   : > { %v4316_v56 = vor.u32 %v4315_v49, %v4314_v63  ;;  %v4319_v22 = vor.u32 %v4318_v32, %v4317_v46  ;;  %v4322_v25 = vor.u32 %v4321_v18, %v4320_v35  ;;  %v4325_v58 = vor.u32 %v4324_v1, %v4323_v44 }
 0x39a   : > { %12723 = vst [vmem:[#allocation77_spill] sm:$0xff] %v10895_v7  ;;  %v4256_v3 = vshll.u32 %v10895_v7, 30  ;;  %v4328_v24 = vor.u32 %v4327_v30, %v4326_v36  ;;  %vm4329_vm6 = vcmp.lt.s32.totalorder %v10878_v52, 1  ;;  %vm4332_vm5 = vcmp.lt.s32.totalorder %v10878_v52, 4  ;;  %5292 = vmatpush2.bf16.msra.mxu0 %v7384_v9  ;;  %v1673_v9 = vpop.f32.mrf.mxu1 }
 0x39b   : > { %v4313_v63 = vshrl.u32 %v12597_v57, %v4312_v19  ;;  %v4334_v2 = vsel %vm4332_vm5, %v4322_v25, 2102212464  ;;  %v4337_v46 = vsel %vm4329_vm6, %v4316_v56, %v4319_v22  ;;  %v6933_v48 = vadd.s32 4294967169, %v4405_v51  ;;  %v7389_v19 = vld [vmem:[%s12367_s3 + $0x94] ss:$8 sps:$4 sm:$0xff]  }
 0x39c   : > { %v10913_v49 = vsub.s32 %v4253_v16, %v4256_v3  ;;  %vm4331_vm0 = vcmp.lt.s32.totalorder %v10878_v52, 3  ;;  %v4338_v32 = vsel %vm4332_vm5, %v4325_v58, 920167782  ;;  %v4341_v35 = vsel %vm4329_vm6, %v4319_v22, %v4322_v25  ;;  %5293 = vmatprep.subr.bf16.mxu0 %v7389_v19  ;;  %v7390_v19 = vld [vmem:[%s12367_s3 + $0x80] ss:$8 sps:$4 sm:$0xff]  }
 0x39d   : > { %vm4330_vm7 = vcmp.lt.s32.totalorder %v10878_v52, 2  ;;  %v4333_v54 = vsel %vm4329_vm6, %v4313_v63, %v4316_v56  ;;  %v4339_v18 = vsel %vm4331_vm0, %v4322_v25, %v4338_v32  ;;  %v4342_v44 = vsel %vm4332_vm5, %v4328_v24, 1326507024  ;;  %v7387_v56 = vld [vmem:[%s12367_s3 + $0x90] ss:$8 sps:$4 sm:$0xff]  }
 0x39e   : > { %v10920_v1 = vpop.eup %7521  ;;  %v4259_v13 = vsub.s32 0, %v10913_v49  ;;  %v4335_v16 = vsel %vm4331_vm0, %v4319_v22, %v4334_v2  ;;  %v4340_v51 = vsel %vm4330_vm7, %v4337_v46, %v4339_v18  ;;  %v4343_v36 = vsel %vm4331_vm0, %v4325_v58, %v4342_v44  ;;  %5294 = vmatpush2.bf16.msra.mxu0 %v7387_v56 }
 0x39f   : > { %12724 = vst [vmem:[#allocation78_spill] sm:$0xff] %v10920_v1  ;;  %v4344_v30 = vsel %vm4330_vm7, %v4341_v35, %v4343_v36  ;;  %v10931_v25 = vmul.u32.u64.low %v10901_v20, %v4340_v51  ;;  %v10932_v3 = vmul.u32.u64.high %v10901_v20, %v4340_v51, %v10931_v25  ;;  %v4411_v24 = vadd.s32 1, %v6933_v48 }
 0x3a0   : > { %v3961_v22 = vand.u32 2147483647, %v10867_v55  ;;  %v6926_v63 = vmin.u32 %v4259_v13, %v10913_v49  ;;  %v10938_v58 = vmul.u32.u64.low %v10901_v20, %v4344_v30  ;;  %v10939_v2 = vmul.u32.u64.high %v10901_v20, %v4344_v30, %v10938_v58 }
 0x3a1   : > { %v3963_v46 = vcvt.s32.f32 %v10865_v0  ;;  %v4065_v32 = vand.u32 2147483647, %v10876_v47  ;;  %v4336_v35 = vsel %vm4330_vm7, %v4333_v54, %v4335_v16  ;;  %vm4412_vm6 = vcmp.gt.s32.totalorder %v4411_v24, 0  ;;  %v7392_v0 = vld [vmem:[%s12367_s3 + $0x84] ss:$8 sps:$4 sm:$0xff]  }
 0x3a2   : > { %v4165_v48 = vsub.s32 4294967266, %v10899_v21  ;;  %v4261_v18 = vclz %v6926_v63  ;;  %v4413_v44 = vsel %vm4412_vm6, %v4411_v24, 0  ;;  %v10947_v55 = vadd.f32 %v1673_v9, %v10727_v6  ;;  %5295 = vmatprep.subr.bf16.mxu0 %v7392_v0 }
 0x3a3   : > { %v4067_v47 = vcvt.s32.f32 %v10869_v34  ;;  %v4355_v52 = vadd.s32 1, %v10932_v3  ;;  %v12725_v54 = vand.u32 2147483647, %v10830_v41  ;;  %v4415_v16 = vand.u32 31, %v4413_v44  ;;  %5296 = vmatpush2.bf16.msra.mxu0 %v7390_v19 }
 0x3a4   : > { %7523 = vsinq.f32 %v10839_v37  ;;  %v10960_v6 = vmul.f32 %v3963_v46, %v3961_v22  ;;  %v4352_v51 = vmul.u32 %v10901_v20, %v4336_v35  ;;  %vm4354_vm5 = vc.u32 %v10939_v2, %v10931_v25 }
 0x3a5   : > { %v4408_v13 = vand.u32 8388607, %v12725_v54  ;;  %v10965_v36 = vmul.f32 %v4067_v47, %v4065_v32  ;;  %v4145_v34 = vadd.s32 %v10686_v17, %v10691_v28  ;;  %v4356_v56 = vsel %vm4354_vm5, %v4355_v52, %v10932_v3 }
 0x3a6   : > { %v4416_v30 = vsub.s32 32, %v4415_v16  ;;  %v4161_v24 = vsub.s32 32, %v10899_v21  ;;  %v10971_v37 = vadd.s32 127, %v4165_v48  ;;  %v6927_v9 = vadd.s32 4294967294, %v4261_v18 }
 0x3a7   : > { %v4357_v22 = vadd.s32 %v4356_v56, %v4352_v51  ;;  %v4409_v20 = vor.u32 8388608, %v4408_v13  ;;  %v4508_v46 = vand.u32 2139095040, %v10947_v55  ;;  %v4414_v35 = vshrl.u32 %v4413_v44, 5 }
 0x3a8   : > { %v4419_v63 = vshrl.u32 %v12598_v59, %v4416_v30  ;;  %v4422_v58 = vshrl.u32 %v12599_v31, %v4416_v30  ;;  %v4418_v28 = vshll.u32 %v12597_v57, %v4415_v16  ;;  %v4421_v17 = vshll.u32 %v12598_v59, %v4415_v16 }
 0x3a9   : > { %v4358_v32 = vadd.s32 536870912, %v4357_v22  ;;  %v4424_v3 = vshll.u32 %v12599_v31, %v4415_v16  ;;  %v4425_v48 = vshrl.u32 %v12600_v42, %v4416_v30  ;;  %v4427_v18 = vshll.u32 %v12600_v42, %v4415_v16 }
 0x3aa   : > { %v4428_v19 = vshrl.u32 %v12601_v29, %v4416_v30  ;;  %vm6928_vm0 = vcmp.lt.s32.totalorder %v6927_v9, 0  ;;  %v4420_v47 = vor.u32 %v4419_v63, %v4418_v28  ;;  %v4423_v52 = vor.u32 %v4422_v58, %v4421_v17 }
 0x3ab   : > { %v10982_v0 = vshrl.u32 %v4358_v32, 30  ;;  %v4426_v54 = vor.u32 %v4425_v48, %v4424_v3  ;;  %v4430_v44 = vshll.u32 %v12601_v29, %v4415_v16  ;;  %v4431_v51 = vshrl.u32 %v12602_v61, %v4416_v30 }
 0x3ac   : > { %v4429_v13 = vor.u32 %v4428_v19, %v4427_v18  ;;  %v4162_v56 = vshll.u32 %v10764_v26, %v10899_v21  ;;  %v4163_v7 = vshrl.u32 %v4145_v34, %v4161_v24  ;;  %v12520_v40 = vand.u32 2147483647, %v10947_v55  ;;  %v1495_v18 = vpop.f32.mrf.mxu0 }
 0x3ad   : > { %12726 = vst [vmem:[#allocation79_spill] sm:$0xff] %v10982_v0  ;;  %v4360_v1 = vshll.u32 %v10982_v0, 30  ;;  %v4167_v14 = vshll.u32 %v10971_v37, 23  ;;  %v4432_v32 = vor.u32 %v4431_v51, %v4430_v44  ;;  %v4449_v45 = vshll.u32 %v4409_v20, 8 }
 0x3ae   : > { %v4509_v63 = vshrl.u32 %v4508_v46, 23  ;;  %v10992_v58 = vsel %vm6928_vm0, 0, %v6927_v9  ;;  %vm4433_vm7 = vcmp.lt.s32.totalorder %v4414_v35, 1  ;;  %vm4436_vm6 = vcmp.lt.s32.totalorder %v4414_v35, 4 }
 0x3af   : > { %v10994_v28 = vsub.s32 %v4357_v22, %v4360_v1  ;;  %vm12521_vm5 = vcmp.lt.s32.totalorder %v10470_v53, 0  ;;  %vm4435_vm10 = vcmp.lt.s32.totalorder %v4414_v35, 3  ;;  %v4438_v26 = vsel %vm4436_vm6, %v4426_v54, 2102212464 }
 0x3b0   : > { %v4441_v21 = vsel %vm4433_vm7, %v4420_v47, %v4423_v52  ;;  %v4442_v16 = vsel %vm4436_vm6, %v4429_v13, 920167782  ;;  %v4417_v34 = vshrl.u32 %v12597_v57, %v4416_v30  ;;  %vm4434_vm15 = vcmp.lt.s32.totalorder %v4414_v35, 2 }
 0x3b1   : > { %v4443_v24 = vsel %vm4435_vm10, %v4426_v54, %v4442_v16  ;;  %v4445_v37 = vsel %vm4433_vm7, %v4423_v52, %v4426_v54  ;;  %v11001_v9 = vpop.eup %7523  ;;  %v4363_v1 = vsub.s32 0, %v10994_v28  ;;  %v4446_v20 = vsel %vm4436_vm6, %v4432_v32, 1326507024 }
 0x3b2   : > { %12727 = vst [vmem:[#allocation80_spill] sm:$0xff] %v11001_v9  ;;  %v4444_v22 = vsel %vm4434_vm15, %v4441_v21, %v4443_v24  ;;  %v6937_v46 = vadd.s32 4294967169, %v4509_v63  ;;  %v4269_v17 = vsub.s32 4294967266, %v10992_v58  ;;  %v4437_v3 = vsel %vm4433_vm7, %v4417_v34, %v4420_v47  ;;  %v12728_v34 = vld [vmem:[#allocation26_spill] sm:$0xff] }
 0x3b3   : > { %v4439_v48 = vsel %vm4435_vm10, %v4423_v52, %v4438_v26  ;;  %v4447_v30 = vsel %vm4435_vm10, %v4429_v13, %v4446_v20  ;;  %v11010_v54 = vmul.u32.u64.low %v4449_v45, %v4444_v22  ;;  %v11011_v44 = vmul.u32.u64.high %v4449_v45, %v4444_v22, %v11010_v54 }
 0x3b4   : > { %v4448_v19 = vsel %vm4434_vm15, %v4445_v37, %v4447_v30  ;;  %v4515_v51 = vadd.s32 1, %v6937_v46  ;;  %v4069_v32 = vxor.u32 2147483648, %v10965_v36  ;;  %v11019_v47 = vor.u32 %v4163_v7, %v4162_v56  ;;  %v1678_v30 = vpop.f32.mrf.mxu1 }
 0x3b5   : > { %v11016_v63 = vmul.u32.u64.low %v4449_v45, %v4448_v19  ;;  %v11017_v16 = vmul.u32.u64.high %v4449_v45, %v4448_v19, %v11016_v63  ;;  %v6930_v52 = vmin.u32 %v4363_v1, %v10994_v28  ;;  %v4440_v13 = vsel %vm4434_vm15, %v4437_v3, %v4439_v48 }
 0x3b6   : > { %vm4516_vm10 = vcmp.gt.s32.totalorder %v4515_v51, 0  ;;  %v11023_v26 = vor.u32 4788187, %v4167_v14  ;;  %v11026_v24 = vadd.f32 %v1495_v18, %v12728_v34  ;;  %v4512_v37 = vand.u32 8388607, %v12520_v40 }
 0x3b7   : > { %v4517_v22 = vsel %vm4516_vm10, %v4515_v51, 0  ;;  %v4265_v20 = vsub.s32 32, %v10992_v58  ;;  %v4270_v46 = vadd.s32 127, %v4269_v17  ;;  %v4459_v7 = vadd.s32 1, %v11011_v44 }
 0x3b8   : > { %v4519_v56 = vand.u32 31, %v4517_v22  ;;  %v11035_v35 = vsel %vm12521_vm5, %v4069_v32, %v10965_v36  ;;  %v4249_v14 = vadd.s32 %v10825_v60, %v10823_v38  ;;  %v4456_v1 = vmul.u32 %v4449_v45, %v4440_v13 }
 0x3b9   : > { %vm4458_vm15 = vc.u32 %v11017_v16, %v11010_v54  ;;  %v4365_v48 = vclz %v6930_v52  ;;  %v4169_v19 = vand.u32 2147483647, %v11023_v26  ;;  %v4513_v63 = vor.u32 8388608, %v4512_v37 }
 0x3ba   : > { %v4460_v17 = vsel %vm4458_vm15, %v4459_v7, %v11011_v44  ;;  %v4520_v18 = vsub.s32 32, %v4519_v56  ;;  %v11045_v36 = vadd.f32 %v1678_v30, %v10738_v15  ;;  %v4266_v38 = vshll.u32 %v10913_v49, %v10992_v58 }
 0x3bb   : > { %v4461_v51 = vadd.s32 %v4460_v17, %v4456_v1  ;;  %v4267_v45 = vshrl.u32 %v4249_v14, %v4265_v20  ;;  %v4271_v60 = vshll.u32 %v4270_v46, 23  ;;  %v4522_v52 = vshll.u32 %v12597_v57, %v4519_v56 }
 0x3bc   : > { %v4523_v32 = vshrl.u32 %v12598_v59, %v4520_v18  ;;  %v4525_v44 = vshll.u32 %v12598_v59, %v4519_v56  ;;  %v4526_v34 = vshrl.u32 %v12599_v31, %v4520_v18  ;;  %v6931_v26 = vadd.s32 4294967294, %v4365_v48 }
 0x3bd   : > { %v4462_v13 = vadd.s32 536870912, %v4461_v51  ;;  %v4518_v7 = vshrl.u32 %v4517_v22, 5  ;;  %v4528_v37 = vshll.u32 %v12599_v31, %v4519_v56  ;;  %v4529_v15 = vshrl.u32 %v12600_v42, %v4520_v18 }
 0x3be   : > { %v4524_v49 = vor.u32 %v4523_v32, %v4522_v52  ;;  %v4527_v58 = vor.u32 %v4526_v34, %v4525_v44  ;;  %v4531_v20 = vshll.u32 %v12600_v42, %v4519_v56  ;;  %v4532_v14 = vshrl.u32 %v12601_v29, %v4520_v18 }
 0x3bf   : > { %v11055_v30 = vshrl.u32 %v4462_v13, 30  ;;  %v4530_v46 = vor.u32 %v4529_v15, %v4528_v37  ;;  %v4534_v1 = vshll.u32 %v12601_v29, %v4519_v56  ;;  %v4535_v17 = vshrl.u32 %v12602_v61, %v4520_v18 }
 0x3c0   : > { %vm12543_vm0 = vcmp.lt.s32.totalorder %v10369_v50, 0  ;;  %v4268_v22 = vor.u32 %v4267_v45, %v4266_v38  ;;  %v4272_v48 = vor.u32 4788187, %v4271_v60  ;;  %v4553_v21 = vshll.u32 %v4513_v63, 8  ;;  %v1680_v38 = vpop.f32.mrf.mxu1 }
 0x3c1   : > { %12729 = vst [vmem:[#allocation26_spill] sm:$0xff] %v11055_v30  ;;  %v4464_v40 = vshll.u32 %v11055_v30, 30  ;;  %v12730_v13 = vand.u32 2147483647, %v10470_v53  ;;  %v12731_v32 = vmov 0  ;;  %vm6932_vm6 = vcmp.lt.s32.totalorder %v6931_v26, 0 }
 0x3c2   : > { %v4533_v52 = vor.u32 %v4532_v14, %v4531_v20  ;;  %v4536_v44 = vor.u32 %v4535_v17, %v4534_v1  ;;  %v4612_v56 = vand.u32 2139095040, %v11045_v36  ;;  %v4521_v37 = vshrl.u32 %v12597_v57, %v4520_v18 }
 0x3c3   : > { %vm11065_vm7 = vcmp.le.f32.partialorder %v12730_v13, 0.7853982  ;;  %v11070_v34 = vsub.s32 %v4461_v51, %v4464_v40  ;;  %vm4537_vm10 = vcmp.lt.s32.totalorder %v4518_v7, 1  ;;  %vm4540_vm15 = vcmp.lt.s32.totalorder %v4518_v7, 4 }
 0x3c4   : > { %v12732_v32 = vsel %vm11065_vm7, 4294967295, %v12731_v32  ;;  %vm4539_vm5 = vcmp.lt.s32.totalorder %v4518_v7, 3  ;;  %v4542_v63 = vsel %vm4540_vm15, %v4530_v46, 2102212464  ;;  %v4545_v45 = vsel %vm4537_vm10, %v4524_v49, %v4527_v58 }
 0x3c5   : > { %12733 = vst [vmem:[#allocation81_spill] sm:$0xff] %v12732_v32  ;;  %v4546_v60 = vsel %vm4540_vm15, %v4533_v52, 920167782  ;;  %v4467_v15 = vsub.s32 0, %v11070_v34  ;;  %vm4538_vm3 = vcmp.lt.s32.totalorder %v4518_v7, 2  ;;  %v4549_v20 = vsel %vm4537_vm10, %v4527_v58, %v4530_v46  ;;  %v12737_v7 = vld [vmem:[#allocation27_spill] sm:$0xff] }
 0x3c6   : > { %v4547_v13 = vsel %vm4539_vm5, %v4530_v46, %v4546_v60  ;;  %v11077_v14 = vsel %vm6932_vm6, 0, %v6931_v26  ;;  %v4550_v18 = vsel %vm4540_vm15, %v4536_v44, 1326507024  ;;  %v11081_v51 = vadd.f32 %v1680_v38, %v11026_v24 }
 0x3c7   : > { %v4548_v40 = vsel %vm4538_vm3, %v4545_v45, %v4547_v13  ;;  %v6934_v1 = vmin.u32 %v4467_v15, %v11070_v34  ;;  %v4541_v17 = vsel %vm4537_vm10, %v4521_v37, %v4524_v49  ;;  %v4543_v3 = vsel %vm4539_vm5, %v4527_v58, %v4542_v63 }
 0x3c8   : > { %12734 = vst [vmem:[#allocation82_spill] sm:$0xff] %v11081_v51  ;;  %v4551_v30 = vsel %vm4539_vm5, %v4533_v52, %v4550_v18  ;;  %vm12542_vm11 = vcmp.lt.s32.totalorder %v10576_v5, 0  ;;  %v11087_v46 = vmul.u32.u64.low %v4553_v21, %v4548_v40  ;;  %v11088_v0 = vmul.u32.u64.high %v4553_v21, %v4548_v40, %v11087_v46  ;;  %v1500_v52 = vpop.f32.mrf.mxu0 }
 0x3c9   : > { %v4552_v60 = vsel %vm4538_vm3, %v4549_v20, %v4551_v30  ;;  %v4613_v26 = vshrl.u32 %v4612_v56, 23  ;;  %v12735_v44 = vcvt.s32.f32 %v11019_v47  ;;  %v4469_v24 = vclz %v6934_v1 }
 0x3ca   : > { %v11093_v38 = vmul.u32.u64.low %v4553_v21, %v4552_v60  ;;  %v11094_v13 = vmul.u32.u64.high %v4553_v21, %v4552_v60, %v11093_v38  ;;  %v12736_v49 = vxor.u32 2147483648, %v10960_v6  ;;  %v4273_v30 = vand.u32 2147483647, %v4272_v48 }
 0x3cb   : > { %v4172_v45 = vmul.f32 %v12735_v44, %v4169_v19  ;;  %v4544_v37 = vsel %vm4538_vm3, %v4541_v17, %v4543_v3  ;;  %v6941_v63 = vadd.s32 4294967169, %v4613_v26  ;;  %v4073_v47 = vsel %vm11065_vm7, %v10470_v53, %v11035_v35 }
 0x3cc   : > { %v11101_v58 = vsel %vm12543_vm0, %v12736_v49, %v10960_v6  ;;  %v4275_v19 = vcvt.s32.f32 %v4268_v22  ;;  %v4373_v56 = vsub.s32 4294967266, %v11077_v14  ;;  %v6935_v15 = vadd.s32 4294967294, %v4469_v24 }
 0x3cd   : > { %v4563_v20 = vadd.s32 1, %v11088_v0  ;;  %v12528_v40 = vand.u32 2147483647, %v11045_v36  ;;  %v4619_v6 = vadd.s32 1, %v6941_v63  ;;  %v4716_v48 = vand.u32 2139095040, %v11081_v51 }
 0x3ce   : > { %v4173_v18 = vxor.u32 2147483648, %v4172_v45  ;;  %v11113_v3 = vadd.f32 %v1500_v52, %v12737_v7  ;;  %v4560_v1 = vmul.u32 %v4553_v21, %v4544_v37  ;;  %vm4562_vm3 = vc.u32 %v11094_v13, %v11087_v46 }
 0x3cf   : > { %v11117_v35 = vmul.f32 %v4275_v19, %v4273_v30  ;;  %vm6936_vm5 = vcmp.lt.s32.totalorder %v6935_v15, 0  ;;  %v4564_v22 = vsel %vm4562_vm3, %v4563_v20, %v11088_v0  ;;  %vm4620_vm6 = vcmp.gt.s32.totalorder %v4619_v6, 0 }
 0x3d0   : > { %7525 = vcosq.f32 %v4073_v47  ;;  %v4369_v17 = vsub.s32 32, %v11077_v14  ;;  %v11121_v60 = vadd.s32 127, %v4373_v56  ;;  %v4565_v26 = vadd.s32 %v4564_v22, %v4560_v1 }
 0x3d1   : > { %7527 = vsinq.f32 %v4073_v47  ;;  %v4616_v44 = vand.u32 8388607, %v12528_v40  ;;  %v4621_v21 = vsel %vm4620_vm6, %v4619_v6, 0  ;;  %v4717_v24 = vshrl.u32 %v4716_v48, 23 }
 0x3d2   : > { %v11127_v38 = vsel %vm12542_vm11, %v4173_v18, %v4172_v45  ;;  %v4353_v0 = vadd.s32 %v10931_v25, %v10939_v2  ;;  %v11131_v49 = vsel %vm6936_vm5, 0, %v6935_v15  ;;  %v4566_v30 = vadd.s32 536870912, %v4565_v26 }
 0x3d3   : > { %12738 = vst [vmem:[#allocation27_spill] sm:$0xff] %v11127_v38  ;;  %v4457_v63 = vadd.s32 %v11010_v54, %v11017_v16  ;;  %v4623_v47 = vand.u32 31, %v4621_v21  ;;  %v4477_v2 = vsub.s32 4294967266, %v11131_v49  ;;  %v4617_v15 = vor.u32 8388608, %v4616_v44 }
 0x3d4   : > { %v11138_v19 = vshrl.u32 %v4353_v0, %v4369_v17  ;;  %v11141_v56 = vshrl.u32 %v4566_v30, 30  ;;  %v6945_v6 = vadd.s32 4294967169, %v4717_v24  ;;  %v4622_v18 = vshrl.u32 %v4621_v21, 5 }
 0x3d5   : > { %v4624_v20 = vsub.s32 32, %v4623_v47  ;;  %v4626_v7 = vshll.u32 %v12597_v57, %v4623_v47  ;;  %v4629_v54 = vshll.u32 %v12598_v59, %v4623_v47  ;;  %v4632_v22 = vshll.u32 %v12599_v31, %v4623_v47 }
 0x3d6   : > { %12739 = vst [vmem:[#allocation83_spill] sm:$0xff] %v11141_v56  ;;  %v4568_v48 = vshll.u32 %v11141_v56, 30  ;;  %v4635_v44 = vshll.u32 %v12600_v42, %v4623_v47  ;;  %v4638_v21 = vshll.u32 %v12601_v29, %v4623_v47  ;;  %v4478_v52 = vadd.s32 127, %v4477_v2 }
 0x3d7   : > { %v4627_v16 = vshrl.u32 %v12598_v59, %v4624_v20  ;;  %v4630_v1 = vshrl.u32 %v12599_v31, %v4624_v20  ;;  %v4633_v17 = vshrl.u32 %v12600_v42, %v4624_v20  ;;  %v4636_v24 = vshrl.u32 %v12601_v29, %v4624_v20 }
 0x3d8   : > { %v11152_v0 = vsub.s32 %v4565_v26, %v4568_v48  ;;  %v4639_v37 = vshrl.u32 %v12602_v61, %v4624_v20  ;;  %v12740_v32 = vand.u32 2147483647, %v11081_v51  ;;  %vm12541_vm10 = vcmp.lt.s32.totalorder %v10634_v8, 0  ;;  %v1502_v51 = vpop.f32.mrf.mxu0 }
 0x3d9   : > { %v4628_v30 = vor.u32 %v4627_v16, %v4626_v7  ;;  %v4631_v40 = vor.u32 %v4630_v1, %v4629_v54  ;;  %v4634_v45 = vor.u32 %v4633_v17, %v4632_v22  ;;  %v4637_v56 = vor.u32 %v4636_v24, %v4635_v44 }
 0x3da   : > { %v4571_v25 = vsub.s32 0, %v11152_v0  ;;  %v4720_v53 = vand.u32 8388607, %v12740_v32  ;;  %v4473_v26 = vsub.s32 32, %v11131_v49  ;;  %v4640_v48 = vor.u32 %v4639_v37, %v4638_v21 }
 0x3db   : > { %vm4641_vm15 = vcmp.lt.s32.totalorder %v4622_v18, 1  ;;  %v4723_v9 = vadd.s32 1, %v6945_v6  ;;  %vm4643_vm3 = vcmp.lt.s32.totalorder %v4622_v18, 3  ;;  %vm4644_vm5 = vcmp.lt.s32.totalorder %v4622_v18, 4 }
 0x3dc   : > { %v6938_v47 = vmin.u32 %v4571_v25, %v11152_v0  ;;  %v4649_v7 = vsel %vm4641_vm15, %v4628_v30, %v4631_v40  ;;  %v4646_v54 = vsel %vm4644_vm5, %v4634_v45, 2102212464  ;;  %v4650_v16 = vsel %vm4644_vm5, %v4637_v56, 920167782 }
 0x3dd   : > { %v11165_v2 = vpop.eup %7525  ;;  %v4653_v1 = vsel %vm4641_vm15, %v4631_v40, %v4634_v45  ;;  %v4654_v32 = vsel %vm4644_vm5, %v4640_v48, 1326507024  ;;  %v4479_v17 = vshll.u32 %v4478_v52, 23  ;;  %v4625_v37 = vshrl.u32 %v12597_v57, %v4624_v20 }
 0x3de   : > { %12741 = vst [vmem:[#allocation84_spill] sm:$0xff] %v11165_v2  ;;  %v11168_v22 = vpop.eup %7527  ;;  %vm4642_vm6 = vcmp.lt.s32.totalorder %v4622_v18, 2  ;;  %v4651_v6 = vsel %vm4643_vm3, %v4634_v45, %v4650_v16  ;;  %v4475_v25 = vshrl.u32 %v4457_v63, %v4473_v26  ;;  %v4655_v24 = vsel %vm4643_vm3, %v4637_v56, %v4654_v32  ;;  %v1685_v45 = vpop.f32.mrf.mxu1 }
 0x3df   : > { %12742 = vst [vmem:[#allocation85_spill] sm:$0xff] %v11168_v22  ;;  %v4652_v44 = vsel %vm4642_vm6, %v4649_v7, %v4651_v6  ;;  %v4657_v21 = vshll.u32 %v4617_v15, 8  ;;  %v4645_v2 = vsel %vm4641_vm15, %v4625_v37, %v4628_v30  ;;  %v4647_v38 = vsel %vm4643_vm3, %v4631_v40, %v4646_v54  ;;  %v12743_v30 = vld [vmem:[#allocation28_spill] sm:$0xff] }
 0x3e0   : > { %v4656_v48 = vsel %vm4642_vm6, %v4653_v1, %v4655_v24  ;;  %vm4724_vm5 = vcmp.gt.s32.totalorder %v4723_v9, 0  ;;  %v4573_v52 = vclz %v6938_v47  ;;  %v4480_v63 = vor.u32 4788187, %v4479_v17 }
 0x3e1   : > { %v11177_v22 = vmul.u32.u64.low %v4657_v21, %v4656_v48  ;;  %v11178_v20 = vmul.u32.u64.high %v4657_v21, %v4656_v48, %v11177_v22  ;;  %v4725_v5 = vsel %vm4724_vm5, %v4723_v9, 0  ;;  %v4721_v56 = vor.u32 8388608, %v4720_v53 }
 0x3e2   : > { %v11180_v26 = vmul.u32.u64.low %v4657_v21, %v4652_v44  ;;  %v11181_v7 = vmul.u32.u64.high %v4657_v21, %v4652_v44, %v11180_v26  ;;  %v4474_v15 = vshll.u32 %v11070_v34, %v11131_v49  ;;  %v11187_v40 = vadd.f32 %v1502_v51, %v12743_v30 }
 0x3e3   : > { %v4648_v54 = vsel %vm4642_vm6, %v4645_v2, %v4647_v38  ;;  %v4727_v47 = vand.u32 31, %v4725_v5  ;;  %v12744_v16 = vxor.u32 2147483648, %v11117_v35  ;;  %v12745_v1 = vshll.u32 %v10994_v28, %v11077_v14 }
 0x3e4   : > { %v12746_v34 = vshll.u32 %v11121_v60, 23  ;;  %v11208_v38 = vadd.f32 %v1685_v45, %v11113_v3  ;;  %v4476_v49 = vor.u32 %v4475_v25, %v4474_v15  ;;  %v6939_v18 = vadd.s32 4294967294, %v4573_v52 }
 0x3e5   : > { %v11195_v9 = vsel %vm12541_vm10, %v12744_v16, %v11117_v35  ;;  %v11201_v53 = vor.u32 %v11138_v19, %v12745_v1  ;;  %vm4666_vm15 = vc.u32 %v11178_v20, %v11180_v26  ;;  %v4728_v35 = vsub.s32 32, %v4727_v47 }
 0x3e6   : > { %v11205_v51 = vor.u32 4788187, %v12746_v34  ;;  %v4481_v2 = vand.u32 2147483647, %v4480_v63  ;;  %v4664_v32 = vmul.u32 %v4657_v21, %v4648_v54  ;;  %v4667_v28 = vadd.s32 1, %v11181_v7 }
 0x3e7   : > { %v11213_v14 = vshll.u32 %v4721_v56, 8  ;;  %v4726_v19 = vshrl.u32 %v4725_v5, 5  ;;  %v4730_v60 = vshll.u32 %v12597_v57, %v4727_v47  ;;  %v4731_v22 = vshrl.u32 %v12598_v59, %v4728_v35 }
 0x3e8   : > { %v4734_v3 = vshrl.u32 %v12599_v31, %v4728_v35  ;;  %v4668_v17 = vsel %vm4666_vm15, %v4667_v28, %v11181_v7  ;;  %v4733_v37 = vshll.u32 %v12598_v59, %v4727_v47  ;;  %v4736_v6 = vshll.u32 %v12599_v31, %v4727_v47 }
 0x3e9   : > { %v4737_v25 = vshrl.u32 %v12600_v42, %v4728_v35  ;;  %v4483_v44 = vcvt.s32.f32 %v4476_v49  ;;  %vm6940_vm3 = vcmp.lt.s32.totalorder %v6939_v18, 0  ;;  %v4669_v24 = vadd.s32 %v4668_v17, %v4664_v32  ;;  %v1687_v17 = vpop.f32.mrf.mxu1 }
 0x3ea   : > { %v4732_v21 = vor.u32 %v4731_v22, %v4730_v60  ;;  %v4735_v48 = vor.u32 %v4734_v3, %v4733_v37  ;;  %v4739_v52 = vshll.u32 %v12600_v42, %v4727_v47  ;;  %v4740_v45 = vshrl.u32 %v12601_v29, %v4728_v35 }
 0x3eb   : > { %v4738_v5 = vor.u32 %v4737_v25, %v4736_v6  ;;  %v4484_v63 = vmul.f32 %v4483_v44, %v4481_v2  ;;  %v4670_v56 = vadd.s32 536870912, %v4669_v24  ;;  %v4742_v7 = vshll.u32 %v12601_v29, %v4727_v47 }
 0x3ec   : > { %v4743_v15 = vshrl.u32 %v12602_v61, %v4728_v35  ;;  %v12747_v30 = vand.u32 2147483647, %v10634_v8  ;;  %v11232_v16 = vsel %vm6940_vm3, 0, %v6939_v18  ;;  %v4741_v1 = vor.u32 %v4740_v45, %v4739_v52 }
 0x3ed   : > { %vm4748_vm5 = vcmp.lt.s32.totalorder %v4726_v19, 4  ;;  %v4820_v34 = vand.u32 2139095040, %v11208_v38  ;;  %v11235_v49 = vshrl.u32 %v4670_v56, 30  ;;  %vm4745_vm15 = vcmp.lt.s32.totalorder %v4726_v19, 1 }
 0x3ee   : > { %vm11228_vm6 = vcmp.le.f32.partialorder %v12747_v30, 0.7853982  ;;  %v4744_v2 = vor.u32 %v4743_v15, %v4742_v7  ;;  %v4750_v47 = vsel %vm4748_vm5, %v4738_v5, 2102212464  ;;  %vm12547_vm10 = vcmp.lt.s32.totalorder %v10830_v41, 0 }
 0x3ef   : > { %12750 = vst [vmem:[#allocation28_spill] sm:$0xff] %v11235_v49  ;;  %v4729_v32 = vshrl.u32 %v12597_v57, %v4728_v35  ;;  %vm4747_vm11 = vcmp.lt.s32.totalorder %v4726_v19, 3  ;;  %v4753_v28 = vsel %vm4745_vm15, %v4732_v21, %v4735_v48  ;;  %v4754_v60 = vsel %vm4748_vm5, %v4741_v1, 920167782 }
 0x3f0   : > { %v4672_v18 = vshll.u32 %v11235_v49, 30  ;;  %vm4746_vm3 = vcmp.lt.s32.totalorder %v4726_v19, 2  ;;  %v4755_v22 = vsel %vm4747_vm11, %v4738_v5, %v4754_v60  ;;  %v4757_v3 = vsel %vm4745_vm15, %v4735_v48, %v4738_v5 }
 0x3f1   : > { %v4749_v37 = vsel %vm4745_vm15, %v4729_v32, %v4732_v21  ;;  %v4751_v6 = vsel %vm4747_vm11, %v4735_v48, %v4750_v47  ;;  %v4756_v25 = vsel %vm4746_vm3, %v4753_v28, %v4755_v22  ;;  %v4758_v44 = vsel %vm4748_vm5, %v4744_v2, 1326507024 }
 0x3f2   : > { %v11244_v52 = vsub.s32 %v4669_v24, %v4672_v18  ;;  %v4759_v45 = vsel %vm4747_vm11, %v4741_v1, %v4758_v44  ;;  %v11247_v35 = vmul.u32.u64.low %v11213_v14, %v4756_v25  ;;  %v11248_v56 = vmul.u32.u64.high %v11213_v14, %v4756_v25, %v11247_v35 }
 0x3f3   : > { %v4377_v7 = vand.u32 2147483647, %v11205_v51  ;;  %v12751_v15 = vand.u32 2147483647, %v10830_v41  ;;  %v12752_v5 = vmov 0  ;;  %v4760_v21 = vsel %vm4746_vm3, %v4757_v3, %v4759_v45 }
 0x3f4   : > { %v4821_v48 = vshrl.u32 %v4820_v34, 23  ;;  %v11260_v24 = vadd.f32 %v1687_v17, %v11187_v40  ;;  %v4485_v30 = vxor.u32 2147483648, %v4484_v63  ;;  %v4675_v1 = vsub.s32 0, %v11244_v52 }
 0x3f5   : > { %vm11254_vm0 = vcmp.le.f32.partialorder %v12751_v15, 0.7853982  ;;  %v11264_v2 = vmul.u32.u64.low %v11213_v14, %v4760_v21  ;;  %v11265_v47 = vmul.u32.u64.high %v11213_v14, %v4760_v21, %v11264_v2  ;;  %v4379_v51 = vcvt.s32.f32 %v11201_v53 }
 0x3f6   : > { %v12753_v5 = vsel %vm11254_vm0, 4294967295, %v12752_v5  ;;  %v4577_v32 = vsub.s32 32, %v11232_v16  ;;  %v4752_v28 = vsel %vm4746_vm3, %v4749_v37, %v4751_v6  ;;  %v6949_v60 = vadd.s32 4294967169, %v4821_v48 }
 0x3f7   : > { %12754 = vst [vmem:[#allocation86_spill] sm:$0xff] %v12753_v5  ;;  %v4281_v40 = vsel %vm11228_vm6, %v10634_v8, %v11195_v9  ;;  %v6942_v34 = vmin.u32 %v4675_v1, %v11244_v52  ;;  %v4771_v18 = vadd.s32 1, %v11248_v56  ;;  %v12544_v22 = vand.u32 2147483647, %v11208_v38 }
 0x3f8   : > { %v11277_v3 = vmul.f32 %v4379_v51, %v4377_v7  ;;  %v4561_v53 = vadd.s32 %v11087_v46, %v11094_v13  ;;  %v4827_v17 = vadd.s32 1, %v6949_v60  ;;  %v4924_v19 = vand.u32 2139095040, %v11260_v24 }
 0x3f9   : > { %v4486_v37 = vsel %vm12547_vm10, %v4485_v30, %v4484_v63  ;;  %v4677_v6 = vclz %v6942_v34  ;;  %v4768_v9 = vmul.u32 %v11213_v14, %v4752_v28  ;;  %vm4770_vm11 = vc.u32 %v11265_v47, %v11247_v35 }
 0x3fa   : > { %v4579_v25 = vshrl.u32 %v4561_v53, %v4577_v32  ;;  %v4581_v44 = vsub.s32 4294967266, %v11232_v16  ;;  %v4772_v45 = vsel %vm4770_vm11, %v4771_v18, %v11248_v56  ;;  %vm4828_vm5 = vcmp.gt.s32.totalorder %v4827_v17, 0 }
 0x3fb   : > { %v6943_v7 = vadd.s32 4294967294, %v4677_v6  ;;  %v4773_v46 = vadd.s32 %v4772_v45, %v4768_v9  ;;  %v4824_v13 = vand.u32 8388607, %v12544_v22  ;;  %v4829_v15 = vsel %vm4828_vm5, %v4827_v17, 0 }
 0x3fc   : > { %7529 = vcosq.f32 %v4281_v40  ;;  %v4578_v63 = vshll.u32 %v11152_v0, %v11232_v16  ;;  %v4831_v14 = vand.u32 31, %v4829_v15  ;;  %v4925_v21 = vshrl.u32 %v4924_v19, 23 }
 0x3fd   : > { %7531 = vsinq.f32 %v4281_v40  ;;  %v11297_v56 = vsel %vm11254_vm0, %v10830_v41, %v4486_v37  ;;  %v4774_v30 = vadd.s32 536870912, %v4773_v46  ;;  %v11301_v2 = vadd.s32 127, %v4581_v44 }
 0x3fe   : > { %v11299_v1 = vor.u32 %v4579_v25, %v4578_v63  ;;  %v4665_v51 = vadd.s32 %v11180_v26, %v11178_v20  ;;  %v4832_v32 = vsub.s32 32, %v4831_v14  ;;  %vm6944_vm15 = vcmp.lt.s32.totalorder %v6943_v7, 0 }
 0x3ff   : > { %v11305_v0 = vshrl.u32 %v4774_v30, 30  ;;  %v4825_v16 = vor.u32 8388608, %v4824_v13  ;;  %v12548_v28 = vand.u32 2147483647, %v11260_v24  ;;  %v4830_v60 = vshrl.u32 %v4829_v15, 5 }
 0x400   : > { %v4835_v40 = vshrl.u32 %v12598_v59, %v4832_v32  ;;  %v4838_v34 = vshrl.u32 %v12599_v31, %v4832_v32  ;;  %v6953_v18 = vadd.s32 4294967169, %v4925_v21  ;;  %v4834_v17 = vshll.u32 %v12597_v57, %v4831_v14 }
 0x401   : > { %12755 = vst [vmem:[#allocation87_spill] sm:$0xff] %v11305_v0  ;;  %v4776_v53 = vshll.u32 %v11305_v0, 30  ;;  %v4837_v19 = vshll.u32 %v12598_v59, %v4831_v14  ;;  %v4841_v20 = vshrl.u32 %v12600_v42, %v4832_v32  ;;  %v11314_v26 = vsel %vm6944_vm15, 0, %v6943_v7 }
 0x402   : > { %v4840_v37 = vshll.u32 %v12599_v31, %v4831_v14  ;;  %v4843_v6 = vshll.u32 %v12600_v42, %v4831_v14  ;;  %v4844_v9 = vshrl.u32 %v12601_v29, %v4832_v32  ;;  %v4583_v25 = vshll.u32 %v11301_v2, 23 }
 0x403   : > { %v11320_v44 = vsub.s32 %v4773_v46, %v4776_v53  ;;  %v4836_v45 = vor.u32 %v4835_v40, %v4834_v17  ;;  %v4839_v13 = vor.u32 %v4838_v34, %v4837_v19  ;;  %v4846_v21 = vshll.u32 %v12601_v29, %v4831_v14 }
 0x404   : > { %v4842_v15 = vor.u32 %v4841_v20, %v4840_v37  ;;  %v4845_v63 = vor.u32 %v4844_v9, %v4843_v6  ;;  %v4847_v30 = vshrl.u32 %v12602_v61, %v4832_v32  ;;  %v4685_v7 = vsub.s32 4294967266, %v11314_v26 }
 0x405   : > { %v4779_v22 = vsub.s32 0, %v11320_v44  ;;  %v4865_v48 = vshll.u32 %v4825_v16, 8  ;;  %v11328_v49 = vand.u32 8388607, %v12548_v28  ;;  %v4681_v46 = vsub.s32 32, %v11314_v26 }
 0x406   : > { %v4848_v2 = vor.u32 %v4847_v30, %v4846_v21  ;;  %vm4849_vm3 = vcmp.lt.s32.totalorder %v4830_v60, 1  ;;  %v4931_v40 = vadd.s32 1, %v6953_v18  ;;  %vm4851_vm11 = vcmp.lt.s32.totalorder %v4830_v60, 3 }
 0x407   : > { %v6946_v34 = vmin.u32 %v4779_v22, %v11320_v44  ;;  %vm4852_vm5 = vcmp.lt.s32.totalorder %v4830_v60, 4  ;;  %v4857_v14 = vsel %vm4849_vm3, %v4836_v45, %v4839_v13  ;;  %v4861_v19 = vsel %vm4849_vm3, %v4839_v13, %v4842_v15 }
 0x408   : > { %v4854_v53 = vsel %vm4852_vm5, %v4842_v15, 2102212464  ;;  %v4858_v17 = vsel %vm4852_vm5, %v4845_v63, 920167782  ;;  %v4862_v16 = vsel %vm4852_vm5, %v4848_v2, 1326507024  ;;  %v4833_v6 = vshrl.u32 %v12597_v57, %v4832_v32 }
 0x409   : > { %v11334_v20 = vpop.eup %7529  ;;  %v4686_v37 = vadd.s32 127, %v4685_v7  ;;  %vm4850_vm15 = vcmp.lt.s32.totalorder %v4830_v60, 2  ;;  %v4859_v9 = vsel %vm4851_vm11, %v4842_v15, %v4858_v17  ;;  %v4781_v22 = vclz %v6946_v34 }
 0x40a   : > { %12756 = vst [vmem:[#allocation88_spill] sm:$0xff] %v11334_v20  ;;  %v11338_v18 = vpop.eup %7531  ;;  %v4860_v21 = vsel %vm4850_vm15, %v4857_v14, %v4859_v9  ;;  %v4863_v30 = vsel %vm4851_vm11, %v4845_v63, %v4862_v16  ;;  %vm4932_vm10 = vcmp.gt.s32.totalorder %v4931_v40, 0  ;;  %v4853_v28 = vsel %vm4849_vm3, %v4833_v6, %v4836_v45 }
 0x40b   : > { %v4855_v2 = vsel %vm4851_vm11, %v4839_v13, %v4854_v53  ;;  %v4864_v20 = vsel %vm4850_vm15, %v4861_v19, %v4863_v30  ;;  %v4933_v7 = vsel %vm4932_vm10, %v4931_v40, 0  ;;  %7533 = vcosq.f32 %v11297_v56 }
 0x40c   : > { %v11345_v0 = vmul.u32.u64.low %v4865_v48, %v4864_v20  ;;  %v11346_v32 = vmul.u32.u64.high %v4865_v48, %v4864_v20, %v11345_v0  ;;  %v11348_v5 = vmul.u32.u64.low %v4865_v48, %v4860_v21  ;;  %v11349_v15 = vmul.u32.u64.high %v4865_v48, %v4860_v21, %v11348_v5 }
 0x40d   : > { %v4683_v34 = vshrl.u32 %v4665_v51, %v4681_v46  ;;  %v4687_v14 = vshll.u32 %v4686_v37, 23  ;;  %v4935_v63 = vand.u32 31, %v4933_v7  ;;  %7535 = vsinq.f32 %v11297_v56 }
 0x40e   : > { %v11354_v45 = vor.u32 4788187, %v4583_v25  ;;  %v6947_v13 = vadd.s32 4294967294, %v4781_v22  ;;  %v4856_v53 = vsel %vm4850_vm15, %v4853_v28, %v4855_v2  ;;  %v4682_v0 = vshll.u32 %v11244_v52, %v11314_v26 }
 0x40f   : > { %v12757_v17 = vlaneseq  ;;  %v12758_v16 = vand.u32 2147483647, %v8676_v62  ;;  %vm4874_vm3 = vc.u32 %v11346_v32, %v11348_v5  ;;  %v4875_v56 = vadd.s32 1, %v11349_v15 }
 0x410   : > { %v4929_v28 = vor.u32 8388608, %v11328_v49  ;;  %v1887_v60 = vsub.s32 4, %v8816_v43  ;;  %v4684_v25 = vor.u32 %v4683_v34, %v4682_v0  ;;  %v4688_v52 = vor.u32 4788187, %v4687_v14 }
 0x411   : > { %v11361_v19 = vand.u32 127, %v12757_v17  ;;  %vm11365_vm10 = vcmp.le.f32.partialorder %v12758_v16, 0.7853982  ;;  %v4872_v26 = vmul.u32 %v4865_v48, %v4856_v53  ;;  %v4936_v46 = vsub.s32 32, %v4935_v63  ;;  %v12761_v53 = vld [vmem:[#allocation44_spill] sm:$0xff] }
 0x412   : > { %vm6948_vm11 = vcmp.lt.s32.totalorder %v6947_v13, 0  ;;  %v4876_v20 = vsel %vm4874_vm3, %v4875_v56, %v11349_v15  ;;  %v4934_v37 = vshrl.u32 %v4933_v7, 5  ;;  %v4938_v6 = vshll.u32 %v12597_v57, %v4935_v63 }
 0x413   : > { %v4877_v9 = vadd.s32 %v4876_v20, %v4872_v26  ;;  %v4941_v22 = vshll.u32 %v12598_v59, %v4935_v63  ;;  %v4944_v21 = vshll.u32 %v12599_v31, %v4935_v63  ;;  %v4947_v30 = vshll.u32 %v12600_v42, %v4935_v63 }
 0x414   : > { %v4939_v49 = vshrl.u32 %v12598_v59, %v4936_v46  ;;  %v4942_v2 = vshrl.u32 %v12599_v31, %v4936_v46  ;;  %v4945_v48 = vshrl.u32 %v12600_v42, %v4936_v46  ;;  %v4948_v34 = vshrl.u32 %v12601_v29, %v4936_v46 }
 0x415   : > { %v11383_v14 = vsel %vm6948_vm11, 0, %v6947_v13  ;;  %v4878_v7 = vadd.s32 536870912, %v4877_v9  ;;  %v11385_v15 = vshll.u32 %v4929_v28, 8  ;;  %v1889_v0 = vsel %vm11365_vm10, %v8676_v62, %v12761_v53 }
 0x416   : > { %v4940_v17 = vor.u32 %v4939_v49, %v4938_v6  ;;  %v4943_v16 = vor.u32 %v4942_v2, %v4941_v22  ;;  %v4946_v56 = vor.u32 %v4945_v48, %v4944_v21  ;;  %v4949_v59 = vor.u32 %v4948_v34, %v4947_v30 }
 0x417   : > { %v4691_v26 = vcvt.s32.f32 %v4684_v25  ;;  %v11391_v31 = vshrl.u32 %v4878_v7, 30  ;;  %v4950_v42 = vshll.u32 %v12601_v29, %v4935_v63  ;;  %v4951_v13 = vshrl.u32 %v12602_v61, %v4936_v46 }
 0x418   : > { %v4689_v20 = vand.u32 2147483647, %v4688_v52  ;;  %v4789_v28 = vsub.s32 4294967266, %v11383_v14  ;;  %vm4956_vm5 = vcmp.lt.s32.totalorder %v4934_v37, 4  ;;  %v1888_v40 = vsel %vm1803_vm4, %v1887_v60, %v8816_v43  ;;  %v11401_v21 = vpop.eup %7533 }
 0x419   : > { %v4880_v6 = vshll.u32 %v11391_v31, 30  ;;  %v4952_v22 = vor.u32 %v4951_v13, %v4950_v42  ;;  %vm4953_vm15 = vcmp.lt.s32.totalorder %v4934_v37, 1  ;;  %v4958_v25 = vsel %vm4956_vm5, %v4946_v56, 2102212464 }
 0x41a   : > { %v4937_v29 = vshrl.u32 %v12597_v57, %v4936_v46  ;;  %vm4955_vm3 = vcmp.lt.s32.totalorder %v4934_v37, 3  ;;  %v4961_v61 = vsel %vm4953_vm15, %v4940_v17, %v4943_v16  ;;  %v4962_v63 = vsel %vm4956_vm5, %v4949_v59, 920167782  ;;  %v11405_v52 = vpop.eup %7535 }
 0x41b   : > { %v11407_v30 = vsub.s32 %v4877_v9, %v4880_v6  ;;  %vm4954_vm11 = vcmp.lt.s32.totalorder %v4934_v37, 2  ;;  %v4963_v43 = vsel %vm4955_vm3, %v4946_v56, %v4962_v63  ;;  %v4965_v60 = vsel %vm4953_vm15, %v4943_v16, %v4946_v56 }
 0x41c   : > { %v4957_v49 = vsel %vm4953_vm15, %v4937_v29, %v4940_v17  ;;  %v4959_v2 = vsel %vm4955_vm3, %v4943_v16, %v4958_v25  ;;  %v4964_v48 = vsel %vm4954_vm11, %v4961_v61, %v4963_v43  ;;  %v4966_v34 = vsel %vm4956_vm5, %v4952_v22, 1326507024  ;;  %v12765_v22 = vld [vmem:[#allocation33_spill] sm:$0xff]  ;;  %v12766_v29 = vld [vmem:[#allocation51_spill] sm:$0xff] }
 0x41d   : > { %v4883_v7 = vsub.s32 0, %v11407_v30  ;;  %v4967_v57 = vsel %vm4955_vm3, %v4949_v59, %v4966_v34  ;;  %v1890_v46 = vsel %vm11365_vm10, 0, %v1888_v40  ;;  %7537 = vcosq.f32 %v1889_v0 }
 0x41e   : > { %v4968_v53 = vsel %vm4954_vm11, %v4965_v60, %v4967_v57  ;;  %v11416_v9 = vmul.u32.u64.low %v11385_v15, %v4964_v48  ;;  %v11417_v42 = vmul.u32.u64.high %v11385_v15, %v4964_v48, %v11416_v9  ;;  %7539 = vsinq.f32 %v1889_v0 }
 0x41f   : > { %vm12553_vm4 = vcmp.lt.s32.totalorder %v11045_v36, 0  ;;  %v4692_v17 = vmul.f32 %v4691_v26, %v4689_v20  ;;  %v6950_v16 = vmin.u32 %v4883_v7, %v11407_v30  ;;  %v4790_v51 = vadd.s32 127, %v4789_v28 }
 0x420   : > { %v11423_v56 = vmul.u32.u64.low %v11385_v15, %v4968_v53  ;;  %v11424_v59 = vmul.u32.u64.high %v11385_v15, %v4968_v53, %v11423_v56  ;;  %v4960_v40 = vsel %vm4954_vm11, %v4957_v49, %v4959_v2  ;;  %v12762_v13 = vand.u32 2147483647, %v8695_v23 }
 0x421   : > { %v2095_v0 = vsub.s32 4, %v12765_v22  ;;  %v4585_v25 = vand.u32 2147483647, %v11354_v45  ;;  %v4885_v26 = vclz %v6950_v16  ;;  %v1894_v20 = vadd.s32 3, %v1890_v46 }
 0x422   : > { %vm11429_vm10 = vcmp.le.f32.partialorder %v12762_v13, 0.7853982  ;;  %v4979_v37 = vadd.s32 1, %v11417_v42  ;;  %v1692_v28 = vadd.s32 128, %v11361_v19  ;;  %v4976_v60 = vmul.u32 %v11385_v15, %v4960_v40 }
 0x423   : > { %v2097_v61 = vsel %vm11429_vm10, %v8695_v23, %v12766_v29  ;;  %v2096_v63 = vsel %vm2011_vm2, %v2095_v0, %v12765_v22  ;;  %v6951_v43 = vadd.s32 4294967294, %v4885_v26  ;;  %vm4978_vm5 = vc.u32 %v11424_v59, %v11416_v9 }
 0x424   : > { %7541 = vcosq.f32 %v2097_v61  ;;  %v2098_v45 = vsel %vm11429_vm10, 0, %v2096_v63  ;;  %v4693_v49 = vxor.u32 2147483648, %v4692_v17  ;;  %v4785_v2 = vsub.s32 32, %v11383_v14 }
 0x425   : > { %v4791_v48 = vshll.u32 %v4790_v51, 23  ;;  %v4980_v34 = vsel %vm4978_vm5, %v4979_v37, %v11417_v42  ;;  %vm6952_vm15 = vcmp.lt.s32.totalorder %v6951_v43, 0  ;;  %v1895_v57 = vand.u32 3, %v1894_v20 }
 0x426   : > { %v4981_v7 = vadd.s32 %v4980_v34, %v4976_v60  ;;  %7543 = vsinq.f32 %v2097_v61  ;;  %v12767_v46 = vcvt.s32.f32 %v11299_v1  ;;  %v4769_v15 = vadd.s32 %v11247_v35, %v11265_v47  ;;  %v12773_v34 = vld [vmem:[#allocation29_spill] sm:$0xff] }
 0x427   : > { %v4888_v16 = vsel %vm6952_vm15, 0, %v6951_v43  ;;  %v2102_v56 = vadd.s32 3, %v2098_v45  ;;  %v1694_v22 = vand.u32 127, %v1692_v28  ;;  %v11459_v42 = vsel %vm12553_vm4, %v4693_v49, %v4692_v17  ;;  %v12768_v17 = vld [vmem:[#allocation40_spill] sm:$0xff]  ;;  %v12769_v43 = vld [vmem:[#allocation38_spill] sm:$0xff]  ;;  %v12770_v49 = vld [vmem:[#allocation37_spill] sm:$0xff] }
 0x428   : > { %v11453_v53 = vmul.f32 %v12767_v46, %v4585_v25  ;;  %v4889_v40 = vsub.s32 32, %v4888_v16  ;;  %v4893_v13 = vsub.s32 4294967266, %v4888_v16  ;;  %v4982_v6 = vadd.s32 536870912, %v4981_v7  ;;  %v12774_v46 = vld [vmem:[#allocation30_spill] sm:$0xff] }
 0x429   : > { %v11463_v0 = vshrl.u32 %v4769_v15, %v4785_v2  ;;  %v4873_v1 = vadd.s32 %v11348_v5, %v11346_v32  ;;  %v11467_v25 = vor.u32 4788187, %v4791_v48  ;;  %vm1897_vm3 = vcmp.eq.s32.totalorder %v1895_v57, 0  ;;  %v12775_v15 = vld [vmem:[#allocation47_spill] sm:$0xff] }
 0x42a   : > { %v4894_v35 = vadd.s32 127, %v4893_v13  ;;  %v11469_v47 = vshrl.u32 %v4982_v6, 30  ;;  %v7538_v26 = vpop.eup %7537  ;;  %v2103_v29 = vand.u32 3, %v2102_v56  ;;  %v1794_v61 = vxor.u32 2147483648, %v12768_v17 }
 0x42b   : > { %v4891_v20 = vshrl.u32 %v4873_v1, %v4889_v40  ;;  %v7540_v37 = vpop.eup %7539  ;;  %vm1900_vm11 = vcmp.eq.s32.totalorder %v1895_v57, 2  ;;  %v1901_v63 = vxor.u32 2147483648, %v7538_v26  ;;  %v1797_v60 = vxor.u32 2147483648, %v12769_v43 }
 0x42c   : > { %v4984_v28 = vshll.u32 %v11469_v47, 30  ;;  %v4890_v5 = vshll.u32 %v11407_v30, %v4888_v16  ;;  %v4895_v32 = vshll.u32 %v4894_v35, 23  ;;  %v1898_v45 = vxor.u32 2147483648, %v7540_v37 }
 0x42d   : > { %vm11479_vm15 = vcmp.lt.s32.totalorder %v1694_v22, 96  ;;  %vm1793_vm8 = vcmp.eq.s32.totalorder %v12770_v49, 0  ;;  %vm1796_vm12 = vcmp.eq.s32.totalorder %v12770_v49, 2  ;;  %vm1997_vm9 = vweird.f32 %v12774_v46 }
 0x42e   : > { %v11477_v2 = vsub.s32 %v4981_v7, %v4984_v28  ;;  %v4892_v30 = vor.u32 %v4891_v20, %v4890_v5  ;;  %vm2104_vm2 = vcmp.lt.s32.totalorder %v2103_v29, 2  ;;  %v1795_v7 = vsel %vm1793_vm8, %v12769_v43, %v1794_v61  ;;  %v12776_v20 = vld [vmem:[#allocation45_spill] sm:$0xff]  ;;  %v12777_v28 = vld [vmem:[#allocation46_spill] sm:$0xff] }
 0x42f   : > { %v2002_v16 = vxor.u32 2147483648, %v12775_v15  ;;  %v1899_v13 = vsel %vm1897_vm3, %v7538_v26, %v1898_v45  ;;  %v1902_v6 = vsel %vm1900_vm11, %v1901_v63, %v7540_v37  ;;  %v1798_v22 = vsel %vm1796_vm12, %v1797_v60, %v12768_v17  ;;  %v12779_v37 = vld [vmem:[#allocation39_spill] sm:$0xff] }
 0x430   : > { %v4987_v40 = vsub.s32 0, %v11477_v2  ;;  %v4896_v1 = vor.u32 4788187, %v4895_v32  ;;  %vm2001_vm10 = vcmp.eq.s32.totalorder %v12776_v20, 0  ;;  %v2005_v5 = vxor.u32 2147483648, %v12777_v28 }
 0x431   : > { %v7542_v56 = vpop.eup %7541  ;;  %vm2108_vm8 = vcmp.eq.s32.totalorder %v2103_v29, 2  ;;  %v2003_v61 = vsel %vm2001_vm10, %v12777_v28, %v2002_v16  ;;  %vm2004_vm5 = vcmp.eq.s32.totalorder %v12776_v20, 2  ;;  %vm12558_vm3 = vcmp.lt.s32.totalorder %v10719_v11, 0 }
 0x432   : > { %v2109_v35 = vxor.u32 2147483648, %v7542_v56  ;;  %v6954_v51 = vmin.u32 %v4987_v40, %v11477_v2  ;;  %vm12778_vm4 = vcmp.lt.s32.totalorder %v1895_v57, 2  ;;  %vm2000_vm12 = vcmp.lt.s32.totalorder %v12776_v20, 2 }
 0x433   : > { %v7544_v43 = vpop.eup %7543  ;;  %v1903_v26 = vsel %vm12778_vm4, %v1899_v13, %v1902_v6  ;;  %v2006_v17 = vsel %vm2004_vm5, %v2005_v5, %v12775_v15  ;;  %v2303_v63 = vsub.s32 4, %v12779_v37  ;;  %vm12780_vm11 = vcmp.lt.s32.totalorder %v12770_v49, 2 }
 0x434   : > { %v4989_v60 = vclz %v6954_v51  ;;  %v2106_v32 = vxor.u32 2147483648, %v7544_v43  ;;  %v2110_v45 = vsel %vm2108_vm8, %v2109_v35, %v7544_v43  ;;  %v1799_v40 = vsel %vm12780_vm11, %v1795_v7, %v1798_v22  ;;  %v12786_v22 = vld [vmem:[#allocation32_spill] sm:$0xff] }
 0x435   : > { %v12781_v16 = vand.u32 2147483647, %v11045_v36  ;;  %v4897_v57 = vand.u32 2147483647, %v4896_v1  ;;  %v4899_v13 = vcvt.s32.f32 %v4892_v30  ;;  %vm2105_vm4 = vcmp.eq.s32.totalorder %v2103_v29, 0  ;;  %v12804_v1 = vld [vmem:[#allocation31_spill] sm:$0xff] }
 0x436   : > { %v2007_v6 = vsel %vm2000_vm12, %v2003_v61, %v2006_v17  ;;  %v6955_v20 = vadd.s32 4294967294, %v4989_v60  ;;  %vm12784_vm5 = vweird.f32 %v8676_v62  ;;  %v2107_v51 = vsel %vm2105_vm4, %v7542_v56, %v2106_v32  ;;  %v12793_v61 = vld [vmem:[#allocation53_spill] sm:$0xff] }
 0x437   : > { %vm11509_vm10 = vcmp.le.f32.partialorder %v12781_v16, 0.7853982  ;;  %v1904_v15 = vsel %vm12784_vm5, nan, %v1903_v26  ;;  %v2008_v35 = vsel %vm1997_vm9, nan, %v2007_v6  ;;  %v2111_v49 = vsel %vm2104_vm2, %v2107_v51, %v2110_v45  ;;  %v12795_v45 = vld [vmem:[#allocation35_spill] sm:$0xff]  ;;  %v12800_v6 = vld [vmem:[#allocation54_spill] sm:$0xff] }
 0x438   : > { %vm12785_vm8 = vweird.f32 %v12773_v34  ;;  %v12787_v5 = vand.u32 2147483647, %v12786_v22  ;;  %vm12790_vm12 = vcmp.lt.s32.totalorder %v12786_v22, 0  ;;  %vm6956_vm5 = vcmp.lt.s32.totalorder %v6955_v20, 0 }
 0x439   : > { %v1800_v7 = vsel %vm12785_vm8, nan, %v1799_v40  ;;  %v2304_v30 = vsel %vm12790_vm12, %v2303_v63, %v12779_v37  ;;  %vm12791_vm4 = vweird.f32 %v8695_v23  ;;  %vm12792_vm9 = vcmp.lt.s32.totalorder %v11361_v19, 96 }
 0x43a   : > { %vm11522_vm11 = vcmp.le.f32.partialorder %v12787_v5, 0.7853982  ;;  %v2112_v56 = vsel %vm12791_vm4, nan, %v2111_v49  ;;  %v5027_v29 = vsel %vm12792_vm9, %v2008_v35, %v12774_v46  ;;  %v4900_v26 = vmul.f32 %v4899_v13, %v4897_v57  ;;  %vm12794_vm2 = vmmov %vm12792_vm9 }
 0x43b   : > { %v2305_v43 = vsel %vm11522_vm11, %v12786_v22, %v12793_v61  ;;  %v11538_v17 = vsel %vm6956_vm5, 0, %v6955_v20  ;;  %v5026_v37 = vsel %vm11479_vm15, %v1904_v15, %v8676_v62  ;;  %v5028_v63 = vsel %vm11479_vm15, %v2112_v56, %v8695_v23  ;;  %v12799_v62 = vld [vmem:[#allocation9_spill] sm:$0xff] }
 0x43c   : > { %v5058_v60 = vpack.c.bf16 %v5028_v63, %v5026_v37  ;;  %v5025_v46 = vsel %vm12794_vm2, %v1800_v7, %v12773_v34  ;;  %v2306_v32 = vsel %vm11522_vm11, 0, %v2304_v30  ;;  %v12796_v40 = vand.u32 2147483647, %v12795_v45  ;;  %v12809_v63 = vld [vmem:[#allocation52_spill] sm:$0xff] }
 0x43d   : > { %v5057_v57 = vpack.c.bf16 %v5027_v29, %v5025_v46  ;;  %7545 = vcosq.f32 %v2305_v43  ;;  %v2511_v13 = vsub.s32 4, %v12799_v62  ;;  %v12801_v34 = vxor.u32 2147483648, %v11277_v3  ;;  %v12808_v29 = vld [vmem:[#allocation36_spill] sm:$0xff] }
 0x43e   : > { %vm11553_vm8 = vcmp.le.f32.partialorder %v12796_v40, 0.7853982  ;;  %v12802_v15 = vshll.u32 %v11320_v44, %v11383_v14  ;;  %v4997_v35 = vsub.s32 4294967266, %v11538_v17  ;;  %5297 = vmatprep.mubr.bf16.mxu0 %v5058_v60  ;;  %7547 = vsinq.f32 %v2305_v43 }
 0x43f   : > { %v2513_v23 = vsel %vm11553_vm8, %v12795_v45, %v12800_v6  ;;  %v11567_v20 = vsel %vm12558_vm3, %v12801_v34, %v11277_v3  ;;  %v4589_v49 = vxor.u32 2147483648, %v11453_v53  ;;  %vm12557_vm11 = vcmp.lt.s32.totalorder %v11208_v38, 0  ;;  %5298 = vmatmul.mubr.bf16.vlgmr.msra.gmra.mxu0 %v5057_v57  ;;  %v12811_v57 = vld [vmem:[#allocation42_spill] sm:$0xff] }
 0x440   : > { %v4788_v51 = vor.u32 %v11463_v0, %v12802_v15  ;;  %v2310_v7 = vadd.s32 3, %v2306_v32  ;;  %vm12803_vm12 = vcmp.lt.s32.totalorder %v12795_v45, 0  ;;  %v11583_v44 = vsel %vm11509_vm10, %v11045_v36, %v11459_v42 }
 0x441   : > { %v2512_v3 = vsel %vm12803_vm12, %v2511_v13, %v12799_v62  ;;  %v4793_v14 = vand.u32 2147483647, %v11467_v25  ;;  %v4901_v0 = vxor.u32 2147483648, %v4900_v26  ;;  %7549 = vcosq.f32 %v2513_v23 }
 0x442   : > { %v2514_v5 = vsel %vm11553_vm8, 0, %v2512_v3  ;;  %7551 = vsinq.f32 %v2513_v23  ;;  %v12805_v30 = vand.u32 2147483647, %v12804_v1  ;;  %v2199_v61 = vsub.s32 4, %v12808_v29 }
 0x443   : > { %v4795_v43 = vcvt.s32.f32 %v4788_v51  ;;  %v4993_v42 = vsub.s32 32, %v11538_v17  ;;  %v4998_v37 = vadd.s32 127, %v4997_v35  ;;  %v4977_v60 = vadd.s32 %v11416_v9, %v11424_v59  ;;  %v12812_v59 = vld [vmem:[#allocation34_spill] sm:$0xff] }
 0x444   : > { %vm11590_vm5 = vcmp.le.f32.partialorder %v12805_v30, 0.7853982  ;;  %v2311_v46 = vand.u32 3, %v2310_v7  ;;  %vm12810_vm4 = vcmp.lt.s32.totalorder %v12804_v1, 0  ;;  %v2518_v40 = vadd.s32 3, %v2514_v5  ;;  %v12817_v7 = vld [vmem:[#allocation12_spill] sm:$0xff] }
 0x445   : > { %v2201_v25 = vsel %vm11590_vm5, %v12804_v1, %v12809_v63  ;;  %v2200_v32 = vsel %vm12810_vm4, %v2199_v61, %v12808_v29  ;;  %v2407_v62 = vsub.s32 4, %v12811_v57  ;;  %v11608_v13 = vmul.f32 %v4795_v43, %v4793_v14  ;;  %v12818_v14 = vld [vmem:[#allocation43_spill] sm:$0xff]  ;;  %v12822_v30 = vld [vmem:[#allocation49_spill] sm:$0xff] }
 0x446   : > { %7553 = vcosq.f32 %v2201_v25  ;;  %v2202_v16 = vsel %vm11590_vm5, 0, %v2200_v32  ;;  %v11612_v6 = vsel %vm12557_vm11, %v4901_v0, %v4900_v26  ;;  %v4994_v9 = vshll.u32 %v11477_v2, %v11538_v17  ;;  %v12823_v61 = vld [vmem:[#allocation61_spill] sm:$0xff]  ;;  %v7393_v5 = vld [vmem:[#allocation2 + $0x70] ss:$8 sps:$4 sm:$0xff]  }
 0x447   : > { %7555 = vsinq.f32 %v2201_v25  ;;  %v12813_v23 = vand.u32 2147483647, %v12812_v59  ;;  %v4995_v15 = vshrl.u32 %v4977_v60, %v4993_v42  ;;  %v4999_v51 = vshll.u32 %v4998_v37, 23 }
 0x448   : > { %vm12816_vm2 = vcmp.lt.s32.totalorder %v12812_v59, 0  ;;  %v2206_v2 = vadd.s32 3, %v2202_v16  ;;  %v2519_v3 = vand.u32 3, %v2518_v40  ;;  %v12819_v0 = vand.u32 2147483647, %v12818_v14 }
 0x449   : > { %vm11618_vm9 = vcmp.le.f32.partialorder %v12813_v23, 0.7853982  ;;  %v2408_v35 = vsel %vm12816_vm2, %v2407_v62, %v12811_v57  ;;  %v2719_v56 = vsub.s32 4, %v12822_v30  ;;  %vm2313_vm4 = vcmp.eq.s32.totalorder %v2311_v46, 0 }
 0x44a   : > { %v2409_v26 = vsel %vm11618_vm9, %v12812_v59, %v12817_v7  ;;  %v2410_v17 = vsel %vm11618_vm9, 0, %v2408_v35  ;;  %vm11634_vm5 = vcmp.le.f32.partialorder %v12819_v0, 0.7853982  ;;  %vm2316_vm2 = vcmp.eq.s32.totalorder %v2311_v46, 2  ;;  %v7546_v42 = vpop.eup %7545 }
 0x44b   : > { %7557 = vcosq.f32 %v2409_v26  ;;  %v2414_v29 = vadd.s32 3, %v2410_v17  ;;  %v2721_v43 = vsel %vm11634_vm5, %v12818_v14, %v12823_v61  ;;  %v11643_v37 = vor.u32 %v4995_v15, %v4994_v9  ;;  %v7548_v60 = vpop.eup %7547 }
 0x44c   : > { %7559 = vsinq.f32 %v2409_v26  ;;  %v11645_v63 = vor.u32 4788187, %v4999_v51  ;;  %vm12824_vm11 = vcmp.lt.s32.totalorder %v12818_v14, 0  ;;  %v2317_v32 = vxor.u32 2147483648, %v7546_v42  ;;  %v12828_v51 = vld [vmem:[#allocation55_spill] sm:$0xff] }
 0x44d   : > { %v2720_v25 = vsel %vm12824_vm11, %v2719_v56, %v12822_v30  ;;  %7561 = vcosq.f32 %v2721_v43  ;;  %v2207_v40 = vand.u32 3, %v2206_v2  ;;  %v2314_v57 = vxor.u32 2147483648, %v7548_v60  ;;  %v7395_v30 = vld [vmem:[#allocation2 + $0x74] ss:$8 sps:$4 sm:$0xff]  }
 0x44e   : > { %v2722_v16 = vsel %vm11634_vm5, 0, %v2720_v25  ;;  %7563 = vsinq.f32 %v2721_v43  ;;  %vm2521_vm8 = vcmp.eq.s32.totalorder %v2519_v3, 0  ;;  %vm2524_vm12 = vcmp.eq.s32.totalorder %v2519_v3, 2  ;;  %v7550_v62 = vpop.eup %7549  ;;  %v7398_v43 = vld [vmem:[#allocation2 + $0x64] ss:$8 sps:$4 sm:$0xff]   ;;  %5682 = vmatprep.subr.bf16.mxu1 %v7395_v30 }
 0x44f   : > { %v2318_v9 = vsel %vm2316_vm2, %v2317_v32, %v7548_v60  ;;  %v11654_v23 = vand.u32 3, %v2414_v29  ;;  %v12825_v34 = vand.u32 2147483647, %v9486_v39  ;;  %v2927_v35 = vsub.s32 4, %v12828_v51  ;;  %v7552_v7 = vpop.eup %7551  ;;  %5683 = vmatpush1.bf16.msra.mxu1 %v7393_v5 }
 0x450   : > { %v2315_v26 = vsel %vm2313_vm4, %v7546_v42, %v2314_v57  ;;  %v2525_v2 = vxor.u32 2147483648, %v7550_v62  ;;  %v2726_v17 = vadd.s32 3, %v2722_v16  ;;  %vm12829_vm2 = vcmp.lt.s32.totalorder %v2311_v46, 2  ;;  %v7396_v57 = vld [vmem:[#allocation2 + $0x60] ss:$8 sps:$4 sm:$0xff]   ;;  %5684 = vmatprep.subr.bf16.mxu1 %v7398_v43 }
 0x451   : > { %vm11658_vm11 = vcmp.le.f32.partialorder %v12825_v34, 0.7853982  ;;  %v2319_v56 = vsel %vm12829_vm2, %v2315_v26, %v2318_v9  ;;  %v2522_v29 = vxor.u32 2147483648, %v7552_v7  ;;  %vm12830_vm3 = vcmp.lt.s32.totalorder %v9486_v39, 0 }
 0x452   : > { %v2929_v0 = vsel %vm11658_vm11, %v9486_v39, %v10376_v12  ;;  %v2928_v61 = vsel %vm12830_vm3, %v2927_v35, %v12828_v51  ;;  %vm12831_vm4 = vweird.f32 %v12786_v22  ;;  %v2526_v60 = vsel %vm2524_vm12, %v2525_v2, %v7552_v7  ;;  %v7401_v35 = vld [vmem:[#allocation2 + $0x54] ss:$8 sps:$4 sm:$0xff]  }
 0x453   : > { %v7554_v42 = vpop.eup %7553  ;;  %v2320_v25 = vsel %vm12831_vm4, nan, %v2319_v56  ;;  %vm2209_vm5 = vcmp.eq.s32.totalorder %v2207_v40, 0  ;;  %7565 = vcosq.f32 %v2929_v0  ;;  %v2523_v46 = vsel %vm2521_vm8, %v7550_v62, %v2522_v29  ;;  %5685 = vmatpush1.bf16.msra.mxu1 %v7396_v57 }
 0x454   : > { %v7556_v12 = vpop.eup %7555  ;;  %vm2212_vm2 = vcmp.eq.s32.totalorder %v2207_v40, 2  ;;  %v2213_v32 = vxor.u32 2147483648, %v7554_v42  ;;  %v2930_v16 = vsel %vm11658_vm11, 0, %v2928_v61  ;;  %vm12832_vm3 = vcmp.lt.s32.totalorder %v2519_v3, 2  ;;  %5686 = vmatprep.subr.bf16.mxu1 %v7401_v35 }
 0x455   : > { %v2527_v9 = vsel %vm12832_vm3, %v2523_v46, %v2526_v60  ;;  %v2210_v34 = vxor.u32 2147483648, %v7556_v12  ;;  %vm2416_vm12 = vcmp.lt.s32.totalorder %v11654_v23, 2  ;;  %v2727_v51 = vand.u32 3, %v2726_v17  ;;  %v12834_v17 = vld [vmem:[#allocation10_spill] sm:$0xff]  ;;  %v12836_v60 = vld [vmem:[#allocation41_spill] sm:$0xff] }
 0x456   : > { %vm12833_vm4 = vweird.f32 %v12795_v45  ;;  %v5030_v7 = vsel %vm11479_vm15, %v2320_v25, %v12786_v22  ;;  %v2214_v26 = vsel %vm2212_vm2, %v2213_v32, %v7556_v12  ;;  %7567 = vsinq.f32 %v2929_v0  ;;  %v7399_v0 = vld [vmem:[#allocation2 + $0x50] ss:$8 sps:$4 sm:$0xff]   ;;  %v7404_v12 = vld [vmem:[#allocation2 + $0x44] ss:$8 sps:$4 sm:$0xff]  }
 0x457   : > { %v2528_v62 = vsel %vm12833_vm4, nan, %v2527_v9  ;;  %v2211_v2 = vsel %vm2209_vm5, %v7554_v42, %v2210_v34  ;;  %v2934_v5 = vadd.s32 3, %v2930_v16  ;;  %v2615_v30 = vsub.s32 4, %v12834_v17  ;;  %v12841_v42 = vld [vmem:[#allocation59_spill] sm:$0xff]  ;;  %5687 = vmatpush1.bf16.msra.mxu1 %v7399_v0 }
 0x458   : > { %v7558_v15 = vpop.eup %7557  ;;  %v5032_v3 = vsel %vm11479_vm15, %v2528_v62, %v12795_v45  ;;  %vm12835_vm8 = vcmp.lt.s32.totalorder %v2207_v40, 2  ;;  %v12837_v46 = vand.u32 2147483647, %v12836_v60  ;;  %vm2420_vm2 = vcmp.eq.s32.totalorder %v11654_v23, 2  ;;  %5688 = vmatprep.subr.bf16.mxu1 %v7404_v12 }
 0x459   : > { %v7560_v56 = vpop.eup %7559  ;;  %v5060_v29 = vpack.c.bf16 %v5032_v3, %v5030_v7  ;;  %v2215_v61 = vsel %vm12835_vm8, %v2211_v2, %v2214_v26  ;;  %v2421_v43 = vxor.u32 2147483648, %v7558_v15  ;;  %vm12840_vm5 = vcmp.lt.s32.totalorder %v12836_v60, 0  ;;  %v7402_v2 = vld [vmem:[#allocation2 + $0x40] ss:$8 sps:$4 sm:$0xff]  }
 0x45a   : > { %vm11695_vm11 = vcmp.le.f32.partialorder %v12837_v46, 0.7853982  ;;  %v2418_v25 = vxor.u32 2147483648, %v7560_v56  ;;  %v2616_v45 = vsel %vm12840_vm5, %v2615_v30, %v12834_v17  ;;  %v7562_v32 = vpop.eup %7561  ;;  %vm12842_vm3 = vweird.f32 %v12804_v1  ;;  %v12850_v46 = vld [vmem:[#allocation50_spill] sm:$0xff] }
 0x45b   : > { %v2617_v40 = vsel %vm11695_vm11, %v12836_v60, %v12841_v42  ;;  %5307 = vmatprep.mubr.bf16.mxu0 %v5060_v29  ;;  %v2216_v16 = vsel %vm12842_vm3, nan, %v2215_v61  ;;  %vm2417_vm4 = vcmp.eq.s32.totalorder %v11654_v23, 0  ;;  %v2422_v57 = vsel %vm2420_vm2, %v2421_v43, %v7560_v56  ;;  %v7564_v9 = vpop.eup %7563  ;;  %v12846_v29 = vld [vmem:[#allocation48_spill] sm:$0xff]  ;;  %5689 = vmatpush1.bf16.msra.mxu1 %v7402_v2  ;;  %v12856_v2 = vld [vmem:[#allocation13_spill] sm:$0xff]  ;;  %v12858_v43 = vld [vmem:[#allocation58_spill] sm:$0xff] }
 0x45c   : > { %vm2729_vm8 = vcmp.eq.s32.totalorder %v2727_v51, 0  ;;  %v2419_v34 = vsel %vm2417_vm4, %v7558_v15, %v2418_v25  ;;  %vm2732_vm9 = vcmp.eq.s32.totalorder %v2727_v51, 2  ;;  %v2733_v62 = vxor.u32 2147483648, %v7562_v32  ;;  %v12851_v25 = vld [vmem:[#allocation15_spill] sm:$0xff] }
 0x45d   : > { %v11710_v7 = vand.u32 3, %v2934_v5  ;;  %v2423_v26 = vsel %vm2416_vm12, %v2419_v34, %v2422_v57  ;;  %v2730_v35 = vxor.u32 2147483648, %v7564_v9  ;;  %v2618_v3 = vsel %vm11695_vm11, 0, %v2616_v45  ;;  %v7407_v5 = vld [vmem:[#allocation2 + $0x34] ss:$8 sps:$4 sm:$0xff]  }
 0x45e   : > { %7569 = vcosq.f32 %v2617_v40  ;;  %vm12843_vm5 = vweird.f32 %v12812_v59  ;;  %vm12844_vm2 = vcmp.lt.s32.totalorder %v11361_v19, 96  ;;  %v2734_v30 = vsel %vm2732_vm9, %v2733_v62, %v7564_v9  ;;  %5690 = vmatprep.subr.bf16.mxu1 %v7407_v5  ;;  %v7410_v57 = vld [vmem:[#allocation2 + $0x24] ss:$8 sps:$4 sm:$0xff]  }
 0x45f   : > { %v2424_v17 = vsel %vm12843_vm5, nan, %v2423_v26  ;;  %v5029_v15 = vsel %vm12844_vm2, %v2216_v16, %v12804_v1  ;;  %7571 = vsinq.f32 %v2617_v40  ;;  %vm12845_vm12 = vmmov %vm12844_vm2  ;;  %v2731_v56 = vsel %vm2729_vm8, %v7562_v32, %v2730_v35  ;;  %v7405_v32 = vld [vmem:[#allocation2 + $0x30] ss:$8 sps:$4 sm:$0xff]  }
 0x460   : > { %v5031_v23 = vsel %vm12845_vm12, %v2424_v17, %v12812_v59  ;;  %v12847_v61 = vand.u32 2147483647, %v12846_v29  ;;  %v2823_v22 = vsub.s32 4, %v12850_v46  ;;  %vm2728_vm3 = vcmp.lt.s32.totalorder %v2727_v51, 2  ;;  %v7566_v42 = vpop.eup %7565  ;;  %5691 = vmatpush1.bf16.msra.mxu1 %v7405_v32 }
 0x461   : > { %v5059_v0 = vpack.c.bf16 %v5031_v23, %v5029_v15  ;;  %v2622_v1 = vadd.s32 3, %v2618_v3  ;;  %v5003_v59 = vcvt.s32.f32 %v11643_v37  ;;  %v2735_v40 = vsel %vm2728_vm3, %v2731_v56, %v2734_v30  ;;  %v7408_v56 = vld [vmem:[#allocation2 + $0x20] ss:$8 sps:$4 sm:$0xff]   ;;  %5692 = vmatprep.subr.bf16.mxu1 %v7410_v57 }
 0x462   : > { %vm11727_vm11 = vcmp.le.f32.partialorder %v12847_v61, 0.7853982  ;;  %vm12852_vm9 = vcmp.lt.s32.totalorder %v12846_v29, 0  ;;  %v5001_v16 = vand.u32 2147483647, %v11645_v63  ;;  %vm2725_vm4 = vweird.f32 %v12818_v14 }
 0x463   : > { %v2825_v45 = vsel %vm11727_vm11, %v12846_v29, %v12851_v25  ;;  %v2824_v12 = vsel %vm12852_vm9, %v2823_v22, %v12850_v46  ;;  %5308 = vmatmul.mubr.bf16.gmra.mxu0 %v5059_v0  ;;  %vm2937_vm8 = vcmp.eq.s32.totalorder %v11710_v7, 0  ;;  %v2941_v51 = vxor.u32 2147483648, %v7566_v42  ;;  %v7568_v26 = vpop.eup %7567  ;;  %v12862_v0 = vld [vmem:[#allocation16_spill] sm:$0xff]  ;;  %v12870_v22 = vld [vmem:[#allocation18_spill] sm:$0xff] }
 0x464   : > { %7573 = vcosq.f32 %v2825_v45  ;;  %vm2940_vm5 = vcmp.eq.s32.totalorder %v11710_v7, 2  ;;  %v2826_v9 = vsel %vm11727_vm11, 0, %v2824_v12  ;;  %v12853_v34 = vand.u32 2147483647, %v9664_v10  ;;  %5693 = vmatpush1.bf16.msra.mxu1 %v7408_v56  ;;  %v12877_v56 = vld [vmem:[#allocation14_spill] sm:$0xff] }
 0x465   : > { %7575 = vsinq.f32 %v2825_v45  ;;  %v2736_v35 = vsel %vm2725_vm4, nan, %v2735_v40  ;;  %v2623_v3 = vand.u32 3, %v2622_v1  ;;  %v3135_v17 = vsub.s32 4, %v12856_v2  ;;  %v12863_v40 = vld [vmem:[#allocation20_spill] sm:$0xff] }
 0x466   : > { %vm11748_vm2 = vcmp.le.f32.partialorder %v12853_v34, 0.7853982  ;;  %v2938_v30 = vxor.u32 2147483648, %v7568_v26  ;;  %v2942_v5 = vsel %vm2940_vm5, %v2941_v51, %v7568_v26  ;;  %v2830_v23 = vadd.s32 3, %v2826_v9  ;;  %v7411_v9 = vld [vmem:[#allocation2 + $0x10] ss:$8 sps:$4 sm:$0xff]  }
 0x467   : > { %v3137_v15 = vsel %vm11748_vm2, %v9664_v10, %v10388_v33  ;;  %vm12857_vm12 = vcmp.lt.s32.totalorder %v9664_v10, 0  ;;  %v12859_v46 = vand.u32 2147483647, %v12858_v43  ;;  %v3343_v1 = vsub.s32 4, %v12862_v0  ;;  %v7413_v33 = vld [vmem:[#allocation2 + $0x14] ss:$8 sps:$4 sm:$0xff]  }
 0x468   : > { %7577 = vcosq.f32 %v3137_v15  ;;  %v3136_v61 = vsel %vm12857_vm12, %v3135_v17, %v12856_v2  ;;  %vm2936_vm3 = vcmp.lt.s32.totalorder %v11710_v7, 2  ;;  %v2939_v25 = vsel %vm2937_vm8, %v7566_v42, %v2938_v30  ;;  %5694 = vmatprep.subr.bf16.mxu1 %v7413_v33 }
 0x469   : > { %7579 = vsinq.f32 %v3137_v15  ;;  %vm11762_vm11 = vcmp.le.f32.partialorder %v12859_v46, 0.7853982  ;;  %v3138_v45 = vsel %vm11748_vm2, 0, %v3136_v61  ;;  %vm2933_vm9 = vweird.f32 %v9486_v39  ;;  %5695 = vmatpush1.bf16.msra.mxu1 %v7411_v9  ;;  %v7417_v9 = vld [vmem:[#allocation2 + $0xf0] ss:$8 sps:$4 sm:$0xff]  }
 0x46a   : > { %v3345_v12 = vsel %vm11762_vm11, %v12858_v43, %v12863_v40  ;;  %v2943_v32 = vsel %vm2936_vm3, %v2939_v25, %v2942_v5  ;;  %v5034_v51 = vsel %vm11479_vm15, %v2736_v35, %v12818_v14  ;;  %vm2628_vm4 = vcmp.eq.s32.totalorder %v2623_v3, 2  ;;  %v7416_v35 = vld [vmem:[#allocation2 + $0x4] ss:$8 sps:$4 sm:$0xff]   ;;  %v12865_v5 = vld [vmem:[#allocation11_spill] sm:$0xff]  ;;  %v7414_v25 = vld [vmem:[#allocation2] ss:$8 sps:$4 sm:$0xff]  }
 0x46b   : > { %v2944_v57 = vsel %vm2933_vm9, nan, %v2943_v32  ;;  %v3142_v7 = vadd.s32 3, %v3138_v45  ;;  %vm12864_vm8 = vcmp.lt.s32.totalorder %v12858_v43, 0  ;;  %7581 = vcosq.f32 %v3345_v12  ;;  %v7570_v34 = vpop.eup %7569  ;;  %5696 = vmatprep.subr.bf16.mxu1 %v7416_v35 }
 0x46c   : > { %v3344_v42 = vsel %vm12864_vm8, %v3343_v1, %v12862_v0  ;;  %v5036_v62 = vsel %vm11479_vm15, %v2944_v57, %v9486_v39  ;;  %v2831_v26 = vand.u32 3, %v2830_v23  ;;  %7583 = vsinq.f32 %v3345_v12  ;;  %v7572_v2 = vpop.eup %7571  ;;  %v12869_v39 = vld [vmem:[#allocation57_spill] sm:$0xff] }
 0x46d   : > { %v3346_v14 = vsel %vm11762_vm11, 0, %v3344_v42  ;;  %v5062_v17 = vpack.c.bf16 %v5036_v62, %v5034_v51  ;;  %v2629_v15 = vxor.u32 2147483648, %v7570_v34  ;;  %v12866_v61 = vand.u32 2147483647, %v12865_v5  ;;  %v7419_v51 = vld [vmem:[#allocation2 + $0xf4] ss:$8 sps:$4 sm:$0xff]   ;;  %5697 = vmatpush1.bf16.msra.mxu1 %v7414_v25 }
 0x46e   : > { %v3350_v30 = vadd.s32 3, %v3346_v14  ;;  %v2626_v46 = vxor.u32 2147483648, %v7572_v2  ;;  %v11795_v0 = vand.u32 3, %v3142_v7  ;;  %v3031_v23 = vsub.s32 4, %v12869_v39  ;;  %v7422_v14 = vld [vmem:[#allocation2 + $0xe4] ss:$8 sps:$4 sm:$0xff]   ;;  %5698 = vmatprep.subr.bf16.mxu1 %v7419_v51 }
 0x46f   : > { %vm11791_vm2 = vcmp.le.f32.partialorder %v12866_v61, 0.7853982  ;;  %5317 = vmatprep.mubr.bf16.mxu0 %v5062_v17  ;;  %vm2624_vm12 = vcmp.lt.s32.totalorder %v2623_v3, 2  ;;  %vm2625_vm11 = vcmp.eq.s32.totalorder %v2623_v3, 0  ;;  %v2630_v33 = vsel %vm2628_vm4, %v2629_v15, %v7572_v2  ;;  %v12873_v15 = vld [vmem:[#allocation56_spill] sm:$0xff] }
 0x470   : > { %v3033_v1 = vsel %vm11791_vm2, %v12865_v5, %v12870_v22  ;;  %v2627_v40 = vsel %vm2625_vm11, %v7570_v34, %v2626_v46  ;;  %v11804_v12 = vand.u32 3, %v3350_v30  ;;  %vm12871_vm9 = vcmp.lt.s32.totalorder %v12865_v5, 0 }
 0x471   : > { %v7574_v45 = vpop.eup %7573  ;;  %v3032_v32 = vsel %vm12871_vm9, %v3031_v23, %v12869_v39  ;;  %7585 = vcosq.f32 %v3033_v1  ;;  %v2631_v57 = vsel %vm2624_vm12, %v2627_v40, %v2630_v33  ;;  %vm2833_vm8 = vcmp.eq.s32.totalorder %v2831_v26, 0  ;;  %5699 = vmatpush2.bf16.msra.mxu1 %v7417_v9 }
 0x472   : > { %v2837_v7 = vxor.u32 2147483648, %v7574_v45  ;;  %v3034_v3 = vsel %vm11791_vm2, 0, %v3032_v32  ;;  %7587 = vsinq.f32 %v3033_v1  ;;  %v7576_v42 = vpop.eup %7575  ;;  %vm2836_vm3 = vcmp.eq.s32.totalorder %v2831_v26, 2  ;;  %v12878_v1 = vld [vmem:[#allocation19_spill] sm:$0xff]  ;;  %5700 = vmatprep.subr.bf16.mxu1 %v7422_v14 }
 0x473   : > { %v2834_v34 = vxor.u32 2147483648, %v7576_v42  ;;  %vm3145_vm9 = vcmp.eq.s32.totalorder %v11795_v0, 0  ;;  %vm3148_vm12 = vcmp.eq.s32.totalorder %v11795_v0, 2  ;;  %vm12872_vm2 = vweird.f32 %v12836_v60 }
 0x474   : > { %v2838_v62 = vsel %vm2836_vm3, %v2837_v7, %v7576_v42  ;;  %v2632_v2 = vsel %vm12872_vm2, nan, %v2631_v57  ;;  %v3038_v17 = vadd.s32 3, %v3034_v3  ;;  %v12874_v30 = vand.u32 2147483647, %v12873_v15 }
 0x475   : > { %v7578_v35 = vpop.eup %7577  ;;  %v3239_v46 = vsub.s32 4, %v12877_v56  ;;  %v2835_v23 = vsel %vm2833_vm8, %v7574_v45, %v2834_v34  ;;  %vm12879_vm2 = vcmp.lt.s32.totalorder %v2831_v26, 2  ;;  %vm12880_vm5 = vcmp.lt.s32.totalorder %v12873_v15, 0  ;;  %v7420_v26 = vld [vmem:[#allocation2 + $0xe0] ss:$8 sps:$4 sm:$0xff]  }
 0x476   : > { %vm11819_vm4 = vcmp.le.f32.partialorder %v12874_v30, 0.7853982  ;;  %v7580_v39 = vpop.eup %7579  ;;  %v3149_v22 = vxor.u32 2147483648, %v7578_v35  ;;  %v2839_v25 = vsel %vm12879_vm2, %v2835_v23, %v2838_v62  ;;  %vm12881_vm8 = vweird.f32 %v12846_v29  ;;  %5701 = vmatpush2.bf16.msra.mxu1 %v7420_v26 }
 0x477   : > { %v3241_v33 = vsel %vm11819_vm4, %v12873_v15, %v12878_v1  ;;  %v3146_v40 = vxor.u32 2147483648, %v7580_v39  ;;  %v3240_v32 = vsel %vm12880_vm5, %v3239_v46, %v12877_v56  ;;  %v2840_v45 = vsel %vm12881_vm8, nan, %v2839_v25  ;;  %v7428_v25 = vld [vmem:[#allocation2 + $0xc4] ss:$8 sps:$4 sm:$0xff]  }
 0x478   : > { %7589 = vcosq.f32 %v3241_v33  ;;  %vm12882_vm3 = vcmp.lt.s32.totalorder %v11361_v19, 96  ;;  %v3150_v57 = vsel %vm3148_vm12, %v3149_v22, %v7580_v39  ;;  %vm3356_vm11 = vcmp.eq.s32.totalorder %v11804_v12, 2  ;;  %v7582_v7 = vpop.eup %7581  ;;  %v7423_v22 = vld [vmem:[#allocation2 + $0xd0] ss:$8 sps:$4 sm:$0xff]  }
 0x479   : > { %v5033_v51 = vsel %vm12882_vm3, %v2632_v2, %v12836_v60  ;;  %vm12883_vm2 = vmmov %vm12882_vm3  ;;  %v3147_v42 = vsel %vm3145_vm9, %v7578_v35, %v3146_v40  ;;  %v3039_v34 = vand.u32 3, %v3038_v17  ;;  %v3242_v62 = vsel %vm11819_vm4, 0, %v3240_v32  ;;  %v7425_v60 = vld [vmem:[#allocation2 + $0xd4] ss:$8 sps:$4 sm:$0xff]   ;;  %v7584_v2 = vpop.eup %7583 }
 0x47a   : > { %v5035_v3 = vsel %vm12883_vm2, %v2840_v45, %v12846_v29  ;;  %vm12884_vm5 = vcmp.lt.s32.totalorder %v11795_v0, 2  ;;  %v3357_v56 = vxor.u32 2147483648, %v7582_v7  ;;  %7591 = vsinq.f32 %v3241_v33  ;;  %v12888_v17 = vld [vmem:[#allocation64_spill] sm:$0xff]  ;;  %5702 = vmatprep.subr.bf16.mxu1 %v7425_v60 }
 0x47b   : > { %v5061_v30 = vpack.c.bf16 %v5035_v3, %v5033_v51  ;;  %v3151_v9 = vsel %vm12884_vm5, %v3147_v42, %v3150_v57  ;;  %v3354_v46 = vxor.u32 2147483648, %v7584_v2  ;;  %vm3037_vm12 = vweird.f32 %v12865_v5  ;;  %5703 = vmatpush2.bf16.msra.mxu1 %v7423_v22 }
 0x47c   : > { %v3246_v29 = vadd.s32 3, %v3242_v62  ;;  %v12885_v39 = vand.u32 2147483647, %v10013_v4  ;;  %v3551_v14 = vsub.s32 4, %v12888_v17  ;;  %vm12889_vm4 = vweird.f32 %v9664_v10  ;;  %v12893_v62 = vld [vmem:[#allocation17_spill] sm:$0xff]  ;;  %5704 = vmatprep.subr.bf16.mxu1 %v7428_v25 }
 0x47d   : > { %5318 = vmatmul.mubr.bf16.gmra.mxu0 %v5061_v30  ;;  %v3152_v61 = vsel %vm12889_vm4, nan, %v3151_v9  ;;  %vm3353_vm3 = vcmp.eq.s32.totalorder %v11804_v12, 0  ;;  %v3358_v0 = vsel %vm3356_vm11, %v3357_v56, %v7584_v2  ;;  %vm3041_vm8 = vcmp.eq.s32.totalorder %v3039_v34, 0  ;;  %v7426_v30 = vld [vmem:[#allocation2 + $0xc0] ss:$8 sps:$4 sm:$0xff]  }
 0x47e   : > { %vm11855_vm9 = vcmp.le.f32.partialorder %v12885_v39, 0.7853982  ;;  %v3355_v1 = vsel %vm3353_vm3, %v7582_v7, %v3354_v46  ;;  %vm12890_vm2 = vcmp.lt.s32.totalorder %v10013_v4, 0  ;;  %v7586_v40 = vpop.eup %7585  ;;  %vm12891_vm5 = vcmp.lt.s32.totalorder %v11804_v12, 2 }
 0x47f   : > { %v3553_v23 = vsel %vm11855_vm9, %v10013_v4, %v10711_v27  ;;  %v3552_v33 = vsel %vm12890_vm2, %v3551_v14, %v12888_v17  ;;  %v3359_v32 = vsel %vm12891_vm5, %v3355_v1, %v3358_v0  ;;  %vm3044_vm11 = vcmp.eq.s32.totalorder %v3039_v34, 2  ;;  %v7588_v27 = vpop.eup %7587  ;;  %v12900_v0 = vld [vmem:[#allocation63_spill] sm:$0xff]  ;;  %5705 = vmatpush2.bf16.msra.mxu1 %v7426_v30 }
 0x480   : > { %7593 = vcosq.f32 %v3553_v23  ;;  %v3554_v45 = vsel %vm11855_vm9, 0, %v3552_v33  ;;  %vm12892_vm4 = vweird.f32 %v12858_v43  ;;  %v5038_v57 = vsel %vm11479_vm15, %v3152_v61, %v9664_v10  ;;  %v12897_v10 = vld [vmem:[#allocation67_spill] sm:$0xff] }
 0x481   : > { %7595 = vsinq.f32 %v3553_v23  ;;  %v3360_v51 = vsel %vm12892_vm4, nan, %v3359_v32  ;;  %v3045_v26 = vxor.u32 2147483648, %v7586_v40  ;;  %v11881_v7 = vand.u32 3, %v3246_v29  ;;  %v12898_v29 = vld [vmem:[#allocation22_spill] sm:$0xff] }
 0x482   : > { %v5040_v12 = vsel %vm11479_vm15, %v3360_v51, %v12858_v43  ;;  %v3042_v3 = vxor.u32 2147483648, %v7588_v27  ;;  %v3558_v42 = vadd.s32 3, %v3554_v45  ;;  %v12894_v60 = vand.u32 2147483647, %v12893_v62  ;;  %v7431_v43 = vld [vmem:[#allocation2 + $0xb4] ss:$8 sps:$4 sm:$0xff]  }
 0x483   : > { %v5064_v9 = vpack.c.bf16 %v5040_v12, %v5038_v57  ;;  %v3046_v56 = vsel %vm3044_vm11, %v3045_v26, %v7588_v27  ;;  %v3759_v46 = vsub.s32 4, %v12897_v10  ;;  %vm3040_vm3 = vcmp.lt.s32.totalorder %v3039_v34, 2  ;;  %v7429_v34 = vld [vmem:[#allocation2 + $0xb0] ss:$8 sps:$4 sm:$0xff]   ;;  %5706 = vmatprep.subr.bf16.mxu1 %v7431_v43 }
 0x484   : > { %vm11888_vm9 = vcmp.le.f32.partialorder %v12894_v60, 0.7853982  ;;  %v3043_v35 = vsel %vm3041_vm8, %v7586_v40, %v3042_v3  ;;  %v11898_v17 = vand.u32 3, %v3558_v42  ;;  %vm12899_vm2 = vcmp.lt.s32.totalorder %v12893_v62, 0  ;;  %v12901_v40 = vld [vmem:[#allocation60_spill] sm:$0xff]  ;;  %v12905_v3 = vld [vmem:[#allocation66_spill] sm:$0xff]  ;;  %5707 = vmatpush2.bf16.msra.mxu1 %v7429_v34 }
 0x485   : > { %v3761_v39 = vsel %vm11888_vm9, %v12893_v62, %v12898_v29  ;;  %5327 = vmatprep.mubr.bf16.mxu0 %v5064_v9  ;;  %v3047_v14 = vsel %vm3040_vm3, %v3043_v35, %v3046_v56  ;;  %v3760_v61 = vsel %vm12899_vm2, %v3759_v46, %v12897_v10  ;;  %v3447_v23 = vsub.s32 4, %v12900_v0  ;;  %v7590_v22 = vpop.eup %7589  ;;  %v12906_v9 = vld [vmem:[#allocation25_spill] sm:$0xff]  ;;  %v12907_v46 = vld [vmem:[#allocation24_spill] sm:$0xff] }
 0x486   : > { %7597 = vcosq.f32 %v3761_v39  ;;  %v3048_v1 = vsel %vm3037_vm12, nan, %v3047_v14  ;;  %vm3249_vm11 = vcmp.eq.s32.totalorder %v11881_v7, 0  ;;  %vm3252_vm4 = vcmp.eq.s32.totalorder %v11881_v7, 2  ;;  %v12910_v43 = vld [vmem:[#allocation76_spill] sm:$0xff]  ;;  %v7432_v14 = vld [vmem:[#allocation2 + $0xa0] ss:$8 sps:$4 sm:$0xff]  }
 0x487   : > { %7599 = vsinq.f32 %v3761_v39  ;;  %v3253_v33 = vxor.u32 2147483648, %v7590_v22  ;;  %v3762_v25 = vsel %vm11888_vm9, 0, %v3760_v61  ;;  %vm12902_vm3 = vcmp.lt.s32.totalorder %v12901_v40, 0  ;;  %v7592_v57 = vpop.eup %7591 }
 0x488   : > { %v3448_v32 = vsel %vm12902_vm3, %v3447_v23, %v12900_v0  ;;  %v3766_v45 = vadd.s32 3, %v3762_v25  ;;  %vm12904_vm8 = vcmp.lt.s32.totalorder %v11361_v19, 96  ;;  %v3655_v42 = vsub.s32 4, %v12905_v3  ;;  %v12911_v23 = vld [vmem:[#allocation75_spill] sm:$0xff]  ;;  %v7434_v25 = vld [vmem:[#allocation2 + $0xa4] ss:$8 sps:$4 sm:$0xff]  }
 0x489   : > { %v3450_v51 = vsel %vm10433_vm14, 0, %v3448_v32  ;;  %v5037_v26 = vsel %vm12904_vm8, %v3048_v1, %v12865_v5  ;;  %v3250_v60 = vxor.u32 2147483648, %v7592_v57  ;;  %v3254_v2 = vsel %vm3252_vm4, %v3253_v33, %v7592_v57  ;;  %v12908_v5 = vld [vmem:[#allocation62_spill] sm:$0xff]  ;;  %5708 = vmatprep.subr.bf16.mxu1 %v7434_v25  ;;  %v7437_v25 = vld [vmem:[#allocation2 + $0x94] ss:$8 sps:$4 sm:$0xff]  }
 0x48a   : > { %v3454_v12 = vadd.s32 3, %v3450_v51  ;;  %v11928_v30 = vand.u32 3, %v3766_v45  ;;  %v3458_v56 = vxor.u32 2147483648, %v12906_v9  ;;  %v3461_v29 = vxor.u32 2147483648, %v12907_v46  ;;  %5709 = vmatpush2.bf16.msra.mxu1 %v7432_v14 }
 0x48b   : > { %vm12909_vm14 = vcmp.lt.s32.totalorder %v12908_v5, 0  ;;  %v3666_v35 = vxor.u32 2147483648, %v12910_v43  ;;  %v3251_v0 = vsel %vm3249_vm11, %v7590_v22, %v3250_v60  ;;  %v3669_v1 = vxor.u32 2147483648, %v12911_v23  ;;  %5710 = vmatprep.subr.bf16.mxu1 %v7437_v25 }
 0x48c   : > { %v3455_v10 = vand.u32 3, %v3454_v12  ;;  %v3656_v39 = vsel %vm12909_vm14, %v3655_v42, %v12905_v3  ;;  %v12912_v34 = vand.u32 2147483647, %v10369_v50  ;;  %vm12915_vm14 = vcmp.lt.s32.totalorder %v11881_v7, 2 }
 0x48d   : > { %v7594_v61 = vpop.eup %7593  ;;  %v3255_v45 = vsel %vm12915_vm14, %v3251_v0, %v3254_v2  ;;  %vm12916_vm8 = vweird.f32 %v12873_v15  ;;  %vm3765_vm12 = vweird.f32 %v12893_v62  ;;  %vm3661_vm5 = vweird.f32 %v12908_v5 }
 0x48e   : > { %vm11942_vm4 = vcmp.le.f32.partialorder %v12912_v34, 0.7853982  ;;  %v7596_v32 = vpop.eup %7595  ;;  %v3565_v27 = vxor.u32 2147483648, %v7594_v61  ;;  %vm3456_vm3 = vcmp.lt.s32.totalorder %v3455_v10, 2  ;;  %vm3457_vm11 = vcmp.eq.s32.totalorder %v3455_v10, 0 }
 0x48f   : > { %v3256_v22 = vsel %vm12916_vm8, nan, %v3255_v45  ;;  %v3562_v51 = vxor.u32 2147483648, %v7596_v32  ;;  %v3459_v57 = vsel %vm3457_vm11, %v12907_v46, %v3458_v56  ;;  %vm3460_vm2 = vcmp.eq.s32.totalorder %v3455_v10, 2  ;;  %v7435_v34 = vld [vmem:[#allocation2 + $0x90] ss:$8 sps:$4 sm:$0xff]  }
 0x490   : > { %vm12917_vm14 = vcmp.lt.s32.totalorder %v11361_v19, 96  ;;  %vm12918_vm9 = vcmp.eq.s32.totalorder %v11898_v17, 2  ;;  %v3462_v3 = vsel %vm3460_vm2, %v3461_v29, %v12906_v9  ;;  %v3658_v60 = vsel %vm10658_vm1, 0, %v3656_v39  ;;  %v12923_v29 = vld [vmem:[#allocation71_spill] sm:$0xff]  ;;  %5711 = vmatpush2.bf16.msra.mxu1 %v7435_v34 }
 0x491   : > { %v5039_v7 = vsel %vm12917_vm14, %v3256_v22, %v12873_v15  ;;  %v3566_v12 = vsel %vm12918_vm9, %v3565_v27, %v7596_v32  ;;  %vm12920_vm8 = vcmp.eq.s32.totalorder %v11898_v17, 0  ;;  %v3463_v46 = vsel %vm3456_vm3, %v3459_v57, %v3462_v3 }
 0x492   : > { %v5063_v2 = vpack.c.bf16 %v5039_v7, %v5037_v26  ;;  %v3563_v56 = vsel %vm12920_vm8, %v7594_v61, %v3562_v51  ;;  %v3662_v0 = vadd.s32 3, %v3658_v60  ;;  %vm12921_vm11 = vcmp.lt.s32.totalorder %v11898_v17, 2 }
 0x493   : > { %v7598_v45 = vpop.eup %7597  ;;  %v3567_v15 = vsel %vm12921_vm11, %v3563_v56, %v3566_v12  ;;  %vm12922_vm9 = vweird.f32 %v12901_v40  ;;  %v3967_v32 = vsub.s32 4, %v12923_v29  ;;  %v3969_v26 = vsel %vm11942_vm4, %v10369_v50, %v11101_v58 }
 0x494   : > { %v3464_v9 = vsel %vm12922_vm9, nan, %v3463_v46  ;;  %v7600_v39 = vpop.eup %7599  ;;  %5328 = vmatmul.mubr.bf16.gmra.mxu0 %v5063_v2  ;;  %vm12924_vm2 = vweird.f32 %v10013_v4  ;;  %vm3772_vm3 = vcmp.eq.s32.totalorder %v11928_v30, 2  ;;  %v3773_v17 = vxor.u32 2147483648, %v7598_v45  ;;  %v12933_v2 = vld [vmem:[#allocation23_spill] sm:$0xff] }
 0x495   : > { %v3568_v10 = vsel %vm12924_vm2, nan, %v3567_v15  ;;  %v3663_v14 = vand.u32 3, %v3662_v0  ;;  %v3770_v61 = vxor.u32 2147483648, %v7600_v39  ;;  %v5041_v27 = vsel %vm12917_vm14, %v3464_v9, %v12901_v40  ;;  %v12934_v46 = vld [vmem:[#allocation27_spill] sm:$0xff]  ;;  %v12936_v15 = vld [vmem:[#allocation69_spill] sm:$0xff] }
 0x496   : > { %vm12925_vm8 = vcmp.lt.s32.totalorder %v10369_v50, 0  ;;  %7601 = vcosq.f32 %v3969_v26  ;;  %v3774_v22 = vsel %vm3772_vm3, %v3773_v17, %v7600_v39  ;;  %vm12926_vm1 = vcmp.eq.s32.totalorder %v11928_v30, 0 }
 0x497   : > { %v3968_v58 = vsel %vm12925_vm8, %v3967_v32, %v12923_v29  ;;  %vm3664_vm11 = vcmp.lt.s32.totalorder %v3663_v14, 2  ;;  %vm3665_vm9 = vcmp.eq.s32.totalorder %v3663_v14, 0  ;;  %vm3668_vm2 = vcmp.eq.s32.totalorder %v3663_v14, 2 }
 0x498   : > { %v3771_v51 = vsel %vm12926_vm1, %v7598_v45, %v3770_v61  ;;  %v3667_v57 = vsel %vm3665_vm9, %v12911_v23, %v3666_v35  ;;  %v3670_v7 = vsel %vm3668_vm2, %v3669_v1, %v12910_v43  ;;  %v3970_v40 = vsel %vm11942_vm4, 0, %v3968_v58  ;;  %v12928_v43 = vld [vmem:[#allocation70_spill] sm:$0xff]  ;;  %v12945_v58 = vld [vmem:[#allocation80_spill] sm:$0xff] }
 0x499   : > { %vm12927_vm14 = vcmp.lt.s32.totalorder %v11928_v30, 2  ;;  %v5042_v3 = vsel %vm11479_vm15, %v3568_v10, %v10013_v4  ;;  %v3671_v42 = vsel %vm3664_vm11, %v3667_v57, %v3670_v7  ;;  %7603 = vsinq.f32 %v3969_v26  ;;  %v12948_v57 = vld [vmem:[#allocation79_spill] sm:$0xff]  ;;  %v12957_v10 = vld [vmem:[#allocation82_spill] sm:$0xff] }
 0x49a   : > { %v3775_v12 = vsel %vm12927_vm14, %v3771_v51, %v3774_v22  ;;  %v3672_v35 = vsel %vm3661_vm5, nan, %v3671_v42  ;;  %v3974_v23 = vadd.s32 3, %v3970_v40  ;;  %v12929_v1 = vand.u32 2147483647, %v12928_v43 }
 0x49b   : > { %v3776_v60 = vsel %vm3765_vm12, nan, %v3775_v12  ;;  %vm12932_vm4 = vcmp.lt.s32.totalorder %v11361_v19, 96  ;;  %v4175_v56 = vsub.s32 4, %v12933_v2  ;;  %v12020_v34 = vmul.f32 %v5003_v59, %v5001_v16 }
 0x49c   : > { %vm12001_vm1 = vcmp.le.f32.partialorder %v12929_v1, 0.7853982  ;;  %v5044_v30 = vsel %vm11479_vm15, %v3776_v60, %v12893_v62  ;;  %v5043_v4 = vsel %vm12932_vm4, %v3672_v35, %v12908_v5  ;;  %v12022_v62 = vand.u32 3, %v3974_v23  ;;  %v12962_v1 = vld [vmem:[#allocation83_spill] sm:$0xff] }
 0x49d   : > { %v4177_v0 = vsel %vm12001_vm1, %v12928_v43, %v12934_v46  ;;  %v5066_v25 = vpack.c.bf16 %v5044_v30, %v5042_v3  ;;  %v5065_v45 = vpack.c.bf16 %v5043_v4, %v5041_v27  ;;  %vm12935_vm5 = vcmp.lt.s32.totalorder %v12928_v43, 0  ;;  %v12949_v3 = vld [vmem:[#allocation78_spill] sm:$0xff] }
 0x49e   : > { %7605 = vcosq.f32 %v4177_v0  ;;  %v4176_v5 = vsel %vm12935_vm5, %v4175_v56, %v12933_v2  ;;  %v3863_v9 = vsub.s32 4, %v12936_v15  ;;  %vm12937_vm12 = vcmp.lt.s32.totalorder %v10947_v55, 0  ;;  %v12955_v56 = vld [vmem:[#allocation85_spill] sm:$0xff] }
 0x49f   : > { %7607 = vsinq.f32 %v4177_v0  ;;  %v12033_v37 = vsel %vm12937_vm12, %v4589_v49, %v11453_v53  ;;  %v12938_v63 = vand.u32 2147483647, %v11208_v38  ;;  %5337 = vmatprep.mubr.bf16.mxu0 %v5066_v25  ;;  %v4178_v16 = vsel %vm12001_vm1, 0, %v4176_v5  ;;  %v12941_v53 = vld [vmem:[#allocation65_spill] sm:$0xff]  ;;  %v12956_v0 = vld [vmem:[#allocation84_spill] sm:$0xff] }
 0x4a0   : > { %7609 = vcosq.f32 %v11583_v44  ;;  %v4797_v29 = vxor.u32 2147483648, %v11608_v13  ;;  %5338 = vmatmul.mubr.bf16.gmra.mxu0 %v5065_v45  ;;  %v4182_v32 = vadd.s32 3, %v4178_v16  ;;  %vm12942_vm8 = vcmp.lt.s32.totalorder %v12941_v53, 0 }
 0x4a1   : > { %vm12038_vm3 = vcmp.le.f32.partialorder %v12938_v63, 0.7853982  ;;  %7611 = vsinq.f32 %v11583_v44  ;;  %v3864_v49 = vsel %vm12942_vm8, %v3863_v9, %v12936_v15  ;;  %v5005_v39 = vxor.u32 2147483648, %v12020_v34  ;;  %v12944_v44 = vld [vmem:[#allocation72_spill] sm:$0xff] }
 0x4a2   : > { %v12053_v26 = vsel %vm12038_vm3, %v11208_v38, %v11612_v6  ;;  %v3866_v17 = vsel %vm10774_vm13, 0, %v3864_v49  ;;  %v4071_v14 = vsub.s32 4, %v12944_v44  ;;  %vm3976_vm11 = vcmp.lt.s32.totalorder %v12022_v62, 2  ;;  %v12946_v6 = vld [vmem:[#allocation21_spill] sm:$0xff] }
 0x4a3   : > { %vm3977_vm9 = vcmp.eq.s32.totalorder %v12022_v62, 0  ;;  %v12061_v61 = vand.u32 3, %v4182_v32  ;;  %v3870_v27 = vadd.s32 3, %v3866_v17  ;;  %vm3980_vm2 = vcmp.eq.s32.totalorder %v12022_v62, 2  ;;  %v7602_v40 = vpop.eup %7601 }
 0x4a4   : > { %v3874_v22 = vxor.u32 2147483648, %v12945_v58  ;;  %vm12947_vm14 = vcmp.lt.s32.totalorder %v12946_v6, 0  ;;  %v4383_v7 = vsub.s32 4, %v12948_v57  ;;  %v3877_v42 = vxor.u32 2147483648, %v12949_v3 }
 0x4a5   : > { %v4072_v51 = vsel %vm12947_vm14, %v4071_v14, %v12944_v44  ;;  %v3871_v12 = vand.u32 3, %v3870_v27  ;;  %vm4077_vm13 = vweird.f32 %v12946_v6  ;;  %v12950_v60 = vand.u32 2147483647, %v10719_v11 }
 0x4a6   : > { %v3981_v23 = vxor.u32 2147483648, %v7602_v40  ;;  %v4074_v33 = vsel %vm11065_vm7, 0, %v4072_v51  ;;  %vm12954_vm5 = vcmp.lt.s32.totalorder %v10719_v11, 0  ;;  %v4082_v46 = vxor.u32 2147483648, %v12955_v56  ;;  %v7604_v45 = vpop.eup %7603 }
 0x4a7   : > { %vm12073_vm1 = vcmp.le.f32.partialorder %v12950_v60, 0.7853982  ;;  %v4384_v30 = vsel %vm12954_vm5, %v4383_v7, %v12948_v57  ;;  %v4078_v2 = vadd.s32 3, %v4074_v33  ;;  %v4085_v25 = vxor.u32 2147483648, %v12956_v0 }
 0x4a8   : > { %v4385_v4 = vsel %vm12073_vm1, %v10719_v11, %v11567_v20  ;;  %vm3872_vm7 = vcmp.lt.s32.totalorder %v3871_v12, 2  ;;  %vm3873_vm14 = vcmp.eq.s32.totalorder %v3871_v12, 0  ;;  %v4386_v5 = vsel %vm12073_vm1, 0, %v4384_v30 }
 0x4a9   : > { %7613 = vcosq.f32 %v4385_v4  ;;  %v3978_v15 = vxor.u32 2147483648, %v7604_v45  ;;  %v3982_v20 = vsel %vm3980_vm2, %v3981_v23, %v7604_v45  ;;  %vm3876_vm5 = vcmp.eq.s32.totalorder %v3871_v12, 2 }
 0x4aa   : > { %v4079_v9 = vand.u32 3, %v4078_v2  ;;  %v3875_v63 = vsel %vm3873_vm14, %v12949_v3, %v3874_v22  ;;  %v3878_v16 = vsel %vm3876_vm5, %v3877_v42, %v12945_v58  ;;  %7615 = vsinq.f32 %v4385_v4  ;;  %v7438_v4 = vld [vmem:[#allocation2 + $0x80] ss:$8 sps:$4 sm:$0xff]   ;;  %v7440_v2 = vld [vmem:[#allocation2 + $0x84] ss:$8 sps:$4 sm:$0xff]  }
 0x4ab   : > { %v4390_v32 = vadd.s32 3, %v4386_v5  ;;  %v7606_v49 = vpop.eup %7605  ;;  %vm4715_vm8 = vcmp.lt.s32.totalorder %v12957_v10, 0  ;;  %v3979_v17 = vsel %vm3977_vm9, %v7602_v40, %v3978_v15  ;;  %vm12559_vm2 = vcmp.lt.s32.totalorder %v11260_v24, 0  ;;  %5712 = vmatprep.subr.bf16.mxu1 %v7440_v2 }
 0x4ac   : > { %vm4080_vm1 = vcmp.lt.s32.totalorder %v4079_v9, 2  ;;  %vm4081_vm12 = vcmp.eq.s32.totalorder %v4079_v9, 0  ;;  %vm4084_vm4 = vcmp.eq.s32.totalorder %v4079_v9, 2  ;;  %v7608_v44 = vpop.eup %7607  ;;  %v3983_v14 = vsel %vm3976_vm11, %v3979_v17, %v3982_v20  ;;  %5713 = vmatpush2.bf16.msra.mxu1 %v7438_v4 }
 0x4ad   : > { %v4189_v27 = vxor.u32 2147483648, %v7606_v49  ;;  %v4083_v58 = vsel %vm4081_vm12, %v12956_v0, %v4082_v46  ;;  %v4086_v22 = vsel %vm4084_vm4, %v4085_v25, %v12955_v56  ;;  %v12105_v51 = vpop.eup %7609  ;;  %v4186_v57 = vxor.u32 2147483648, %v7608_v44 }
 0x4ae   : > { %vm4188_vm14 = vcmp.eq.s32.totalorder %v12061_v61, 2  ;;  %v3879_v7 = vsel %vm3872_vm7, %v3875_v63, %v3878_v16  ;;  %v4087_v40 = vsel %vm4080_vm1, %v4083_v58, %v4086_v22  ;;  %v12109_v3 = vpop.eup %7611  ;;  %vm4185_vm9 = vcmp.eq.s32.totalorder %v12061_v61, 0  ;;  %v12968_v63 = vld [vmem:[#allocation77_spill] sm:$0xff] }
 0x4af   : > { %v4190_v42 = vsel %vm4188_vm14, %v4189_v27, %v7608_v44  ;;  %v4088_v62 = vsel %vm4077_vm13, nan, %v4087_v40  ;;  %v12958_v60 = vand.u32 2147483647, %v10947_v55  ;;  %vm12961_vm4 = vweird.f32 %v10369_v50  ;;  %v12976_v40 = vld [vmem:[#allocation87_spill] sm:$0xff] }
 0x4b0   : > { %v3984_v23 = vsel %vm12961_vm4, nan, %v3983_v14  ;;  %v4187_v12 = vsel %vm4185_vm9, %v7606_v49, %v4186_v57  ;;  %v4591_v33 = vsub.s32 4, %v12962_v1  ;;  %vm4181_vm13 = vweird.f32 %v12928_v43 }
 0x4b1   : > { %vm12116_vm11 = vcmp.le.f32.partialorder %v12958_v60, 0.7853982  ;;  %vm12963_vm12 = vcmp.lt.s32.totalorder %v12061_v61, 2  ;;  %vm12964_vm7 = vweird.f32 %v12941_v53  ;;  %v12132_v0 = vand.u32 3, %v4390_v32  ;;  %v12969_v32 = vld [vmem:[#allocation26_spill] sm:$0xff]  ;;  %v12977_v60 = vld [vmem:[#allocation88_spill] sm:$0xff] }
 0x4b2   : > { %v4593_v30 = vsel %vm12116_vm11, %v10947_v55, %v12033_v37  ;;  %v4191_v56 = vsel %vm12963_vm12, %v4187_v12, %v4190_v42  ;;  %v3880_v46 = vsel %vm12964_vm7, nan, %v3879_v7  ;;  %vm12965_vm5 = vcmp.lt.s32.totalorder %v11361_v19, 96 }
 0x4b3   : > { %v4192_v25 = vsel %vm4181_vm13, nan, %v4191_v56  ;;  %v5047_v45 = vsel %vm12965_vm5, %v4088_v62, %v12946_v6  ;;  %vm12966_vm1 = vcmp.lt.s32.totalorder %v10947_v55, 0  ;;  %7617 = vcosq.f32 %v4593_v30  ;;  %vm12967_vm14 = vmmov %vm12965_vm5 }
 0x4b4   : > { %v4592_v37 = vsel %vm12966_vm1, %v4591_v33, %v12962_v1  ;;  %v5046_v61 = vsel %vm11479_vm15, %v3984_v23, %v10369_v50  ;;  %v5048_v5 = vsel %vm11479_vm15, %v4192_v25, %v12928_v43  ;;  %7619 = vsinq.f32 %v4593_v30 }
 0x4b5   : > { %v4594_v15 = vsel %vm12116_vm11, 0, %v4592_v37  ;;  %v5068_v6 = vpack.c.bf16 %v5048_v5, %v5046_v61  ;;  %v5045_v20 = vsel %vm12967_vm14, %v3880_v46, %v12941_v53  ;;  %v4279_v16 = vsub.s32 4, %v12968_v63 }
 0x4b6   : > { %v4598_v9 = vadd.s32 3, %v4594_v15  ;;  %v4798_v50 = vsel %vm4715_vm8, %v4797_v29, %v11608_v13  ;;  %7621 = vcosq.f32 %v12053_v26  ;;  %v5067_v43 = vpack.c.bf16 %v5047_v45, %v5045_v20  ;;  %v7614_v17 = vpop.eup %7613 }
 0x4b7   : > { %v4487_v49 = vsub.s32 4, %v12969_v32  ;;  %7623 = vsinq.f32 %v12053_v26  ;;  %v5006_v53 = vsel %vm12559_vm2, %v5005_v39, %v12020_v34  ;;  %5347 = vmatprep.mubr.bf16.mxu0 %v5068_v6  ;;  %vm4392_vm9 = vcmp.lt.s32.totalorder %v12132_v0, 2  ;;  %v7616_v14 = vpop.eup %7615 }
 0x4b8   : > { %vm12970_vm11 = vcmp.lt.s32.totalorder %v10634_v8, 0  ;;  %5348 = vmatmul.mubr.bf16.gmra.mxu0 %v5067_v43  ;;  %vm4393_vm4 = vcmp.eq.s32.totalorder %v12132_v0, 0  ;;  %v4599_v29 = vand.u32 3, %v4598_v9  ;;  %vm12971_vm13 = vcmp.lt.s32.totalorder %v10830_v41, 0 }
 0x4b9   : > { %v4280_v13 = vsel %vm12970_vm11, %v4279_v16, %v12968_v63  ;;  %v4488_v44 = vsel %vm12971_vm13, %v4487_v49, %v12969_v32  ;;  %vm4396_vm12 = vcmp.eq.s32.totalorder %v12132_v0, 2  ;;  %v4397_v34 = vxor.u32 2147483648, %v7614_v17 }
 0x4ba   : > { %v4282_v26 = vsel %vm11228_vm6, 0, %v4280_v13  ;;  %v4290_v27 = vxor.u32 2147483648, %v11338_v18  ;;  %vm4389_vm7 = vweird.f32 %v10719_v11  ;;  %v4394_v58 = vxor.u32 2147483648, %v7616_v14 }
 0x4bb   : > { %v4286_v39 = vadd.s32 3, %v4282_v26  ;;  %v4490_v57 = vsel %vm11254_vm0, 0, %v4488_v44  ;;  %v12973_v54 = vand.u32 2147483647, %v12957_v10  ;;  %v4799_v42 = vsub.s32 4, %v12976_v40 }
 0x4bc   : > { %v4293_v35 = vxor.u32 2147483648, %v12977_v60  ;;  %v4494_v23 = vadd.s32 3, %v4490_v57  ;;  %vm4601_vm5 = vcmp.eq.s32.totalorder %v4599_v29, 0  ;;  %vm4493_vm1 = vweird.f32 %v10830_v41 }
 0x4bd   : > { %vm12182_vm6 = vcmp.le.f32.partialorder %v12973_v54, 0.7853982  ;;  %v4287_v62 = vand.u32 3, %v4286_v39  ;;  %v4498_v1 = vxor.u32 2147483648, %v11405_v52  ;;  %v4501_v33 = vxor.u32 2147483648, %v11401_v21 }
 0x4be   : > { %v4801_v12 = vsel %vm12182_vm6, %v12957_v10, %v4798_v50  ;;  %v4395_v30 = vsel %vm4393_vm4, %v7614_v17, %v4394_v58  ;;  %v4398_v4 = vsel %vm4396_vm12, %v4397_v34, %v7616_v14  ;;  %vm4604_vm14 = vcmp.eq.s32.totalorder %v4599_v29, 2  ;;  %v12984_v58 = vld [vmem:[#allocation28_spill] sm:$0xff] }
 0x4bf   : > { %7625 = vcosq.f32 %v4801_v12  ;;  %vm4289_vm11 = vcmp.eq.s32.totalorder %v4287_v62, 0  ;;  %vm4292_vm13 = vcmp.eq.s32.totalorder %v4287_v62, 2  ;;  %v4495_v2 = vand.u32 3, %v4494_v23 }
 0x4c0   : > { %v4800_v56 = vsel %vm4715_vm8, %v4799_v42, %v12976_v40  ;;  %v4291_v46 = vsel %vm4289_vm11, %v12977_v60, %v4290_v27  ;;  %v4294_v25 = vsel %vm4292_vm13, %v4293_v35, %v11338_v18  ;;  %7627 = vsinq.f32 %v4801_v12  ;;  %v7618_v61 = vpop.eup %7617 }
 0x4c1   : > { %v12978_v45 = vand.u32 2147483647, %v11260_v24  ;;  %v4399_v5 = vsel %vm4392_vm9, %v4395_v30, %v4398_v4  ;;  %vm4288_vm12 = vcmp.lt.s32.totalorder %v4287_v62, 2  ;;  %vm4497_vm0 = vcmp.eq.s32.totalorder %v4495_v2, 0  ;;  %v7620_v15 = vpop.eup %7619 }
 0x4c2   : > { %vm4500_vm2 = vcmp.eq.s32.totalorder %v4495_v2, 2  ;;  %v4605_v6 = vxor.u32 2147483648, %v7618_v61  ;;  %vm4496_vm8 = vcmp.lt.s32.totalorder %v4495_v2, 2  ;;  %v4499_v20 = vsel %vm4497_vm0, %v11401_v21, %v4498_v1 }
 0x4c3   : > { %vm12206_vm4 = vcmp.le.f32.partialorder %v12978_v45, 0.7853982  ;;  %v4502_v18 = vsel %vm4500_vm2, %v4501_v33, %v11405_v52  ;;  %v4602_v9 = vxor.u32 2147483648, %v7620_v15  ;;  %v4295_v63 = vsel %vm4288_vm12, %v4291_v46, %v4294_v25  ;;  %v12215_v43 = vpop.eup %7621 }
 0x4c4   : > { %v4503_v16 = vsel %vm4496_vm8, %v4499_v20, %v4502_v18  ;;  %v5007_v50 = vsub.s32 4, %v11469_v47  ;;  %v4400_v0 = vsel %vm4389_vm7, nan, %v4399_v5  ;;  %v4606_v32 = vsel %vm4604_vm14, %v4605_v6, %v7620_v15  ;;  %v12225_v52 = vpop.eup %7623 }
 0x4c5   : > { %v4504_v49 = vsel %vm4493_vm1, nan, %v4503_v16  ;;  %v5009_v21 = vsel %vm12206_vm4, %v11260_v24, %v5006_v53  ;;  %vm4600_vm2 = vcmp.lt.s32.totalorder %v4599_v29, 2  ;;  %v4603_v17 = vsel %vm4601_vm5, %v7618_v61, %v4602_v9 }
 0x4c6   : > { %vm4285_vm9 = vweird.f32 %v10634_v8  ;;  %v4802_v13 = vsel %vm12182_vm6, 0, %v4800_v56  ;;  %v4607_v26 = vsel %vm4600_vm2, %v4603_v17, %v4606_v32  ;;  %vm12981_vm7 = vcmp.lt.s32.totalorder %v11260_v24, 0 }
 0x4c7   : > { %v4296_v44 = vsel %vm4285_vm9, nan, %v4295_v63  ;;  %v5008_v14 = vsel %vm12981_vm7, %v5007_v50, %v11469_v47  ;;  %7629 = vcosq.f32 %v5009_v21  ;;  %vm12982_vm1 = vweird.f32 %v10947_v55 }
 0x4c8   : > { %v4608_v53 = vsel %vm12982_vm1, nan, %v4607_v26  ;;  %v5050_v29 = vsel %vm11479_vm15, %v4400_v0, %v10719_v11  ;;  %vm12983_vm5 = vcmp.lt.s32.totalorder %v11361_v19, 96  ;;  %v4806_v27 = vadd.s32 3, %v4802_v13 }
 0x4c9   : > { %v5051_v34 = vsel %vm12983_vm5, %v4504_v49, %v10830_v41  ;;  %v5052_v39 = vsel %vm11479_vm15, %v4608_v53, %v10947_v55  ;;  %7631 = vsinq.f32 %v5009_v21  ;;  %v4695_v47 = vsub.s32 4, %v12984_v58  ;;  %vm12985_vm6 = vmmov %vm12983_vm5 }
 0x4ca   : > { %v5070_v22 = vpack.c.bf16 %v5052_v39, %v5050_v29  ;;  %v5049_v57 = vsel %vm12985_vm6, %v4296_v44, %v10634_v8  ;;  %v5010_v11 = vsel %vm12206_vm4, 0, %v5008_v14  ;;  %vm12986_vm0 = vcmp.lt.s32.totalorder %v11045_v36, 0 }
 0x4cb   : > { %v5069_v54 = vpack.c.bf16 %v5051_v34, %v5049_v57  ;;  %v4696_v41 = vsel %vm12986_vm0, %v4695_v47, %v12984_v58  ;;  %v4903_v7 = vsub.s32 4, %v11391_v31  ;;  %v4807_v42 = vand.u32 3, %v4806_v27  ;;  %v7441_v57 = vld [vmem:[#allocation4 + $0x70] ss:$8 sps:$4 sm:$0xff]  }
 0x4cc   : > { %v7626_v55 = vpop.eup %7625  ;;  %5357 = vmatprep.mubr.bf16.mxu0 %v5070_v22  ;;  %v4698_v40 = vsel %vm11509_vm10, 0, %v4696_v41  ;;  %v5014_v62 = vadd.s32 3, %v5010_v11  ;;  %vm12987_vm14 = vcmp.lt.s32.totalorder %v11208_v38, 0  ;;  %v4706_v30 = vxor.u32 2147483648, %v12109_v3  ;;  %v7443_v11 = vld [vmem:[#allocation4 + $0x74] ss:$8 sps:$4 sm:$0xff]  }
 0x4cd   : > { %5358 = vmatmul.mubr.bf16.gmra.mxu0 %v5069_v54  ;;  %v4702_v60 = vadd.s32 3, %v4698_v40  ;;  %v7628_v8 = vpop.eup %7627  ;;  %v4904_v35 = vsel %vm12987_vm14, %v4903_v7, %v11391_v31  ;;  %v4813_v12 = vxor.u32 2147483648, %v7626_v55  ;;  %v4709_v28 = vxor.u32 2147483648, %v12105_v51  ;;  %v7446_v54 = vld [vmem:[#allocation4 + $0x64] ss:$8 sps:$4 sm:$0xff]   ;;  %6099 = vmatprep.subr.bf16.mxu0 %v7443_v11 }
 0x4ce   : > { %v4810_v23 = vxor.u32 2147483648, %v7628_v8  ;;  %v4906_v33 = vsel %vm12038_vm3, 0, %v4904_v35  ;;  %vm4808_vm10 = vcmp.lt.s32.totalorder %v4807_v42, 2  ;;  %v5015_v2 = vand.u32 3, %v5014_v62  ;;  %6100 = vmatpush1.bf16.msra.mxu0 %v7441_v57  ;;  %v7444_v7 = vld [vmem:[#allocation4 + $0x60] ss:$8 sps:$4 sm:$0xff]  }
 0x4cf   : > { %v4703_v1 = vand.u32 3, %v4702_v60  ;;  %v4910_v4 = vadd.s32 3, %v4906_v33  ;;  %v4914_v56 = vxor.u32 2147483648, %v12225_v52  ;;  %vm4809_vm11 = vcmp.eq.s32.totalorder %v4807_v42, 0  ;;  %6101 = vmatprep.subr.bf16.mxu0 %v7446_v54  ;;  %v7447_v62 = vld [vmem:[#allocation4 + $0x50] ss:$8 sps:$4 sm:$0xff]  }
 0x4d0   : > { %vm4812_vm13 = vcmp.eq.s32.totalorder %v4807_v42, 2  ;;  %v4917_v31 = vxor.u32 2147483648, %v12215_v43  ;;  %v4811_v25 = vsel %vm4809_vm11, %v7626_v55, %v4810_v23  ;;  %vm4909_vm3 = vweird.f32 %v11208_v38  ;;  %v7449_v55 = vld [vmem:[#allocation4 + $0x54] ss:$8 sps:$4 sm:$0xff]   ;;  %v7452_v60 = vld [vmem:[#allocation4 + $0x44] ss:$8 sps:$4 sm:$0xff]  }
 0x4d1   : > { %v4911_v46 = vand.u32 3, %v4910_v4  ;;  %v4814_v45 = vsel %vm4812_vm13, %v4813_v12, %v7628_v8  ;;  %vm4705_vm4 = vcmp.eq.s32.totalorder %v4703_v1, 0  ;;  %vm4708_vm12 = vcmp.eq.s32.totalorder %v4703_v1, 2 }
 0x4d2   : > { %v4707_v37 = vsel %vm4705_vm4, %v12105_v51, %v4706_v30  ;;  %v4710_v61 = vsel %vm4708_vm12, %v4709_v28, %v12109_v3  ;;  %vm5020_vm2 = vcmp.eq.s32.totalorder %v5015_v2, 2  ;;  %v4815_v20 = vsel %vm4808_vm10, %v4811_v25, %v4814_v45  ;;  %6102 = vmatpush1.bf16.msra.mxu0 %v7444_v7  ;;  %v7450_v30 = vld [vmem:[#allocation4 + $0x40] ss:$8 sps:$4 sm:$0xff]   ;;  %v7453_v25 = vld [vmem:[#allocation4 + $0x30] ss:$8 sps:$4 sm:$0xff]  }
 0x4d3   : > { %vm4913_vm8 = vcmp.eq.s32.totalorder %v4911_v46, 0  ;;  %vm4916_vm9 = vcmp.eq.s32.totalorder %v4911_v46, 2  ;;  %vm4704_vm7 = vcmp.lt.s32.totalorder %v4703_v1, 2  ;;  %vm4912_vm1 = vcmp.lt.s32.totalorder %v4911_v46, 2  ;;  %6103 = vmatprep.subr.bf16.mxu0 %v7449_v55  ;;  %v7458_v45 = vld [vmem:[#allocation4 + $0x24] ss:$8 sps:$4 sm:$0xff]  }
 0x4d4   : > { %v7630_v59 = vpop.eup %7629  ;;  %v4915_v15 = vsel %vm4913_vm8, %v12215_v43, %v4914_v56  ;;  %v4918_v18 = vsel %vm4916_vm9, %v4917_v31, %v12225_v52  ;;  %v4711_v51 = vsel %vm4704_vm7, %v4707_v37, %v4710_v61  ;;  %vm4805_vm5 = vweird.f32 %v12957_v10  ;;  %v7461_v37 = vld [vmem:[#allocation4 + $0x14] ss:$8 sps:$4 sm:$0xff]   ;;  %v7459_v61 = vld [vmem:[#allocation4 + $0x10] ss:$8 sps:$4 sm:$0xff]  }
 0x4d5   : > { %v5021_v5 = vxor.u32 2147483648, %v7630_v59  ;;  %v4919_v16 = vsel %vm4912_vm1, %v4915_v15, %v4918_v18  ;;  %vm5017_vm6 = vcmp.eq.s32.totalorder %v5015_v2, 0  ;;  %v4816_v50 = vsel %vm4805_vm5, nan, %v4815_v20  ;;  %v7467_v18 = vld [vmem:[#allocation4 + $0xf4] ss:$8 sps:$4 sm:$0xff]  }
 0x4d6   : > { %v7632_v6 = vpop.eup %7631  ;;  %v4920_v3 = vsel %vm4909_vm3, nan, %v4919_v16  ;;  %vm5016_vm0 = vcmp.lt.s32.totalorder %v5015_v2, 2  ;;  %vm4701_vm14 = vweird.f32 %v11045_v36  ;;  %vm5013_vm10 = vweird.f32 %v11260_v24  ;;  %6104 = vmatpush1.bf16.msra.mxu0 %v7447_v62  ;;  %v7455_v2 = vld [vmem:[#allocation4 + $0x34] ss:$8 sps:$4 sm:$0xff]   ;;  %v7483_v62 = vld [vmem:[#allocation4 + $0x90] ss:$8 sps:$4 sm:$0xff]  }
 0x4d7   : > { %v5018_v9 = vxor.u32 2147483648, %v7632_v6  ;;  %v5022_v63 = vsel %vm5020_vm2, %v5021_v5, %v7632_v6  ;;  %v4712_v32 = vsel %vm4701_vm14, nan, %v4711_v51  ;;  %vm12988_vm11 = vcmp.lt.s32.totalorder %v11361_v19, 96  ;;  %6105 = vmatprep.subr.bf16.mxu0 %v7452_v60  ;;  %v7464_v5 = vld [vmem:[#allocation4 + $0x4] ss:$8 sps:$4 sm:$0xff]  }
 0x4d8   : > { %v5055_v21 = vsel %vm12988_vm11, %v4920_v3, %v11208_v38  ;;  %v5054_v52 = vsel %vm11479_vm15, %v4816_v50, %v12957_v10  ;;  %vm12989_vm13 = vmmov %vm12988_vm11  ;;  %v7462_v6 = vld [vmem:[#allocation4] ss:$8 sps:$4 sm:$0xff]  }
 0x4d9   : > { %v5019_v43 = vsel %vm5017_vm6, %v7630_v59, %v5018_v9  ;;  %v5053_v26 = vsel %vm12989_vm13, %v4712_v32, %v11045_v36  ;;  %v7456_v59 = vld [vmem:[#allocation4 + $0x20] ss:$8 sps:$4 sm:$0xff]  }
 0x4da   : > { %v5023_v0 = vsel %vm5016_vm0, %v5019_v43, %v5022_v63  ;;  %v5071_v44 = vpack.c.bf16 %v5055_v21, %v5053_v26  ;;  %6106 = vmatpush1.bf16.msra.mxu0 %v7450_v30  ;;  %v7465_v63 = vld [vmem:[#allocation4 + $0xf0] ss:$8 sps:$4 sm:$0xff]   ;;  %v7470_v43 = vld [vmem:[#allocation4 + $0xe4] ss:$8 sps:$4 sm:$0xff]   ;;  %v7473_v26 = vld [vmem:[#allocation4 + $0xd4] ss:$8 sps:$4 sm:$0xff]  }
 0x4db   : > { %v5024_v49 = vsel %vm5013_vm10, nan, %v5023_v0  ;;  %6107 = vmatprep.subr.bf16.mxu0 %v7455_v2 }
 0x4dc   : > { %v5056_v17 = vsel %vm11479_vm15, %v5024_v49, %v11260_v24 }
 0x4dd   : > { %v5072_v13 = vpack.c.bf16 %v5056_v17, %v5054_v52  ;;  %v7468_v52 = vld [vmem:[#allocation4 + $0xe0] ss:$8 sps:$4 sm:$0xff]  }
 0x4de   : > { %6108 = vmatpush1.bf16.msra.mxu0 %v7453_v25 }
 0x4df   : > { %5367 = vmatprep.mubr.bf16.mxu0 %v5072_v13  ;;  %6109 = vmatprep.subr.bf16.mxu0 %v7458_v45 }
 0x4e0   : > { %5368 = vmatmul.mubr.bf16.gmra.mxu0 %v5071_v44 }
 0x4e2   : > { %6110 = vmatpush1.bf16.msra.mxu0 %v7456_v59 }
 0x4e3   : > { %6111 = vmatprep.subr.bf16.mxu0 %v7461_v37 }
 0x4e6   : > { %6112 = vmatpush1.bf16.msra.mxu0 %v7459_v61 }
 0x4e7   : > { %6113 = vmatprep.subr.bf16.mxu0 %v7464_v5 }
 0x4ea   : > { %6114 = vmatpush1.bf16.msra.mxu0 %v7462_v6  ;;  %v7486_v6 = vld [vmem:[#allocation4 + $0x80] ss:$8 sps:$4 sm:$0xff]  }
 0x4eb   : > { %6115 = vmatprep.subr.bf16.mxu0 %v7467_v18 }
 0x4ee   : > { %6116 = vmatpush2.bf16.msra.mxu0 %v7465_v63 }
 0x4ef   : > { %6117 = vmatprep.subr.bf16.mxu0 %v7470_v43 }
 0x4f2   : > { %6118 = vmatpush2.bf16.msra.mxu0 %v7468_v52 }
 0x4f3   : > { %6119 = vmatprep.subr.bf16.mxu0 %v7473_v26 }
 0x4ff   : > { %v5299_v14 = vpop.f32.mrf.mxu0 }
 0x500   : > { %v5410_v39 = vmul.f32 0.01, %v5299_v14  ;;  %vm5378_vm3 = vcmp.gt.f32.partialorder %v5299_v14, 0.0 }
 0x501   : > { %v5301_v53 = vpop.f32.mrf.mxu0 }
 0x502   : > { %v5411_v38 = vmul.f32 0.01, %v5301_v53  ;;  %vm5379_vm12 = vcmp.gt.f32.partialorder %v5301_v53, 0.0  ;;  %v5442_v47 = vsel %vm5378_vm3, %v5299_v14, %v5410_v39  ;;  %v7471_v14 = vld [vmem:[#allocation4 + $0xd0] ss:$8 sps:$4 sm:$0xff]  }
 0x503   : > { %v5303_v29 = vpop.f32.mrf.mxu0  ;;  %6120 = vmatpush2.bf16.msra.mxu0 %v7471_v14  ;;  %v7477_v39 = vld [vmem:[#allocation4 + $0xb0] ss:$8 sps:$4 sm:$0xff]  }
 0x504   : > { %vm5380_vm4 = vcmp.gt.f32.partialorder %v5303_v29, 0.0  ;;  %v5412_v34 = vmul.f32 0.01, %v5303_v29  ;;  %v5443_v27 = vsel %vm5379_vm12, %v5301_v53, %v5411_v38  ;;  %v7476_v53 = vld [vmem:[#allocation4 + $0xc4] ss:$8 sps:$4 sm:$0xff]  }
 0x505   : > { %v5305_v10 = vpop.f32.mrf.mxu0  ;;  %6121 = vmatprep.subr.bf16.mxu0 %v7476_v53  ;;  %v7479_v38 = vld [vmem:[#allocation4 + $0xb4] ss:$8 sps:$4 sm:$0xff]  }
 0x506   : > { %vm5381_vm8 = vcmp.gt.f32.partialorder %v5305_v10, 0.0  ;;  %v5413_v24 = vmul.f32 0.01, %v5305_v10  ;;  %v5444_v48 = vsel %vm5380_vm4, %v5303_v29, %v5412_v34  ;;  %v7474_v29 = vld [vmem:[#allocation4 + $0xc0] ss:$8 sps:$4 sm:$0xff]  }
 0x507   : > { %v5474_v22 = vpack.c.bf16 %v5444_v48, %v5442_v47  ;;  %6122 = vmatpush2.bf16.msra.mxu0 %v7474_v29 }
 0x508   : > { %v5445_v58 = vsel %vm5381_vm8, %v5305_v10, %v5413_v24  ;;  %6123 = vmatprep.subr.bf16.mxu0 %v7479_v38 }
 0x509   : > { %v5475_v36 = vpack.c.bf16 %v5445_v58, %v5443_v27 }
 0x50b   : > { %5714 = vmatprep.mubr.bf16.mxu1 %v5475_v36  ;;  %6124 = vmatpush2.bf16.msra.mxu0 %v7477_v39  ;;  %v7480_v36 = vld [vmem:[#allocation4 + $0xa0] ss:$8 sps:$4 sm:$0xff]  }
 0x50c   : > { %5715 = vmatmul.mubr.bf16.vlgmr.msra.gmra.mxu1 %v5474_v22  ;;  %v7482_v22 = vld [vmem:[#allocation4 + $0xa4] ss:$8 sps:$4 sm:$0xff]  }
 0x50d   : > { %6125 = vmatprep.subr.bf16.mxu0 %v7482_v22 }
 0x50f   : > { %6126 = vmatpush2.bf16.msra.mxu0 %v7480_v36 }
 0x523   : > { %v5309_v41 = vpop.f32.mrf.mxu0 }
 0x524   : > { %v5414_v23 = vmul.f32 0.01, %v5309_v41  ;;  %vm5382_vm9 = vcmp.gt.f32.partialorder %v5309_v41, 0.0 }
 0x525   : > { %v5311_v40 = vpop.f32.mrf.mxu0 }
 0x526   : > { %v5415_v8 = vmul.f32 0.01, %v5311_v40  ;;  %vm5383_vm2 = vcmp.gt.f32.partialorder %v5311_v40, 0.0  ;;  %v5446_v56 = vsel %vm5382_vm9, %v5309_v41, %v5414_v23 }
 0x527   : > { %v5313_v42 = vpop.f32.mrf.mxu0 }
 0x528   : > { %vm5384_vm15 = vcmp.gt.f32.partialorder %v5313_v42, 0.0  ;;  %v5416_v35 = vmul.f32 0.01, %v5313_v42  ;;  %v5447_v28 = vsel %vm5383_vm2, %v5311_v40, %v5415_v8  ;;  %v7485_v8 = vld [vmem:[#allocation4 + $0x94] ss:$8 sps:$4 sm:$0xff]  }
 0x529   : > { %v5315_v12 = vpop.f32.mrf.mxu0  ;;  %6127 = vmatprep.subr.bf16.mxu0 %v7485_v8 }
 0x52a   : > { %vm5385_vm7 = vcmp.gt.f32.partialorder %v5315_v12, 0.0  ;;  %v5417_v1 = vmul.f32 0.01, %v5315_v12  ;;  %v5448_v33 = vsel %vm5384_vm15, %v5313_v42, %v5416_v35  ;;  %6128 = vmatpush2.bf16.msra.mxu0 %v7483_v62 }
 0x52b   : > { %v5476_v31 = vpack.c.bf16 %v5448_v33, %v5446_v56 }
 0x52c   : > { %v5449_v4 = vsel %vm5385_vm7, %v5315_v12, %v5417_v1 }
 0x52d   : > { %v5477_v46 = vpack.c.bf16 %v5449_v4, %v5447_v28 }
 0x52f   : > { %5724 = vmatprep.mubr.bf16.mxu1 %v5477_v46 }
 0x530   : > { %5725 = vmatmul.mubr.bf16.gmra.mxu1 %v5476_v31 }
 0x53d   : > { %v5319_v15 = vpop.f32.mrf.mxu0 }
 0x53e   : > { %v5418_v3 = vmul.f32 0.01, %v5319_v15  ;;  %vm5386_vm6 = vcmp.gt.f32.partialorder %v5319_v15, 0.0 }
 0x53f   : > { %v5321_v20 = vpop.f32.mrf.mxu0 }
 0x540   : > { %v5419_v51 = vmul.f32 0.01, %v5321_v20  ;;  %vm5387_vm5 = vcmp.gt.f32.partialorder %v5321_v20, 0.0  ;;  %v5450_v17 = vsel %vm5386_vm6, %v5319_v15, %v5418_v3 }
 0x541   : > { %v5323_v9 = vpop.f32.mrf.mxu0 }
 0x542   : > { %vm5388_vm1 = vcmp.gt.f32.partialorder %v5323_v9, 0.0  ;;  %v5420_v16 = vmul.f32 0.01, %v5323_v9  ;;  %v5451_v49 = vsel %vm5387_vm5, %v5321_v20, %v5419_v51  ;;  %v7488_v20 = vld [vmem:[#allocation4 + $0x84] ss:$8 sps:$4 sm:$0xff]  }
 0x543   : > { %v5325_v50 = vpop.f32.mrf.mxu0  ;;  %6129 = vmatprep.subr.bf16.mxu0 %v7488_v20 }
 0x544   : > { %vm5389_vm0 = vcmp.gt.f32.partialorder %v5325_v50, 0.0  ;;  %v5421_v0 = vmul.f32 0.01, %v5325_v50  ;;  %v5452_v32 = vsel %vm5388_vm1, %v5323_v9, %v5420_v16  ;;  %6130 = vmatpush2.bf16.msra.mxu0 %v7486_v6 }
 0x545   : > { %v5478_v44 = vpack.c.bf16 %v5452_v32, %v5450_v17 }
 0x546   : > { %v5453_v21 = vsel %vm5389_vm0, %v5325_v50, %v5421_v0 }
 0x547   : > { %v5479_v13 = vpack.c.bf16 %v5453_v21, %v5451_v49 }
 0x549   : > { %5734 = vmatprep.mubr.bf16.mxu1 %v5479_v13 }
 0x54a   : > { %5735 = vmatmul.mubr.bf16.gmra.mxu1 %v5478_v44 }
 0x554   : > { %v5329_v34 = vpop.f32.mrf.mxu0 }
 0x555   : > { %v5422_v24 = vmul.f32 0.01, %v5329_v34  ;;  %vm5390_vm11 = vcmp.gt.f32.partialorder %v5329_v34, 0.0 }
 0x556   : > { %v5331_v10 = vpop.f32.mrf.mxu0 }
 0x557   : > { %v5423_v27 = vmul.f32 0.01, %v5331_v10  ;;  %vm5391_vm10 = vcmp.gt.f32.partialorder %v5331_v10, 0.0  ;;  %v5454_v7 = vsel %vm5390_vm11, %v5329_v34, %v5422_v24 }
 0x558   : > { %v5333_v48 = vpop.f32.mrf.mxu0 }
 0x559   : > { %vm5392_vm14 = vcmp.gt.f32.partialorder %v5333_v48, 0.0  ;;  %v5424_v58 = vmul.f32 0.01, %v5333_v48  ;;  %v5455_v54 = vsel %vm5391_vm10, %v5331_v10, %v5423_v27 }
 0x55a   : > { %v5335_v47 = vpop.f32.mrf.mxu0 }
 0x55b   : > { %vm5393_vm13 = vcmp.gt.f32.partialorder %v5335_v47, 0.0  ;;  %v5425_v57 = vmul.f32 0.01, %v5335_v47  ;;  %v5456_v11 = vsel %vm5392_vm14, %v5333_v48, %v5424_v58 }
 0x55c   : > { %v5480_v42 = vpack.c.bf16 %v5456_v11, %v5454_v7 }
 0x55d   : > { %v5457_v41 = vsel %vm5393_vm13, %v5335_v47, %v5425_v57 }
 0x55e   : > { %v5481_v40 = vpack.c.bf16 %v5457_v41, %v5455_v54 }
 0x560   : > { %v5339_v55 = vpop.f32.mrf.mxu0  ;;  %5744 = vmatprep.mubr.bf16.mxu1 %v5481_v40 }
 0x561   : > { %5745 = vmatmul.mubr.bf16.gmra.mxu1 %v5480_v42  ;;  %v5426_v1 = vmul.f32 0.01, %v5339_v55  ;;  %vm5394_vm3 = vcmp.gt.f32.partialorder %v5339_v55, 0.0 }
 0x562   : > { %v5341_v60 = vpop.f32.mrf.mxu0 }
 0x563   : > { %v5427_v23 = vmul.f32 0.01, %v5341_v60  ;;  %vm5395_vm12 = vcmp.gt.f32.partialorder %v5341_v60, 0.0  ;;  %v5458_v56 = vsel %vm5394_vm3, %v5339_v55, %v5426_v1 }
 0x564   : > { %v5343_v35 = vpop.f32.mrf.mxu0 }
 0x565   : > { %vm5396_vm4 = vcmp.gt.f32.partialorder %v5343_v35, 0.0  ;;  %v5428_v12 = vmul.f32 0.01, %v5343_v35  ;;  %v5459_v4 = vsel %vm5395_vm12, %v5341_v60, %v5427_v23 }
 0x566   : > { %v5345_v33 = vpop.f32.mrf.mxu0 }
 0x567   : > { %vm5397_vm8 = vcmp.gt.f32.partialorder %v5345_v33, 0.0  ;;  %v5429_v30 = vmul.f32 0.01, %v5345_v33  ;;  %v5460_v28 = vsel %vm5396_vm4, %v5343_v35, %v5428_v12 }
 0x568   : > { %v5482_v31 = vpack.c.bf16 %v5460_v28, %v5458_v56  ;;  %v7491_v56 = vld [vmem:[#allocation6 + $0x70] sm:$0xff]  }
 0x569   : > { %v5461_v2 = vsel %vm5397_vm8, %v5345_v33, %v5429_v30 }
 0x56a   : > { %v5483_v46 = vpack.c.bf16 %v5461_v2, %v5459_v4  ;;  %v7489_v4 = vld [vmem:[#allocation6 + $0x78] sm:$0xff]  }
 0x56b   : > { %v7490_v2 = vld [vmem:[#allocation6 + $0x38] sm:$0xff]   ;;  %7103 = vmatprep.subr.bf16.mxu1 %v7489_v4 }
 0x56c   : > { %5754 = vmatprep.mubr.bf16.mxu1 %v5483_v46  ;;  %7104 = vmatpush3.bf16.msra.mxu1 %v7490_v2 }
 0x56d   : > { %5755 = vmatmul.mubr.bf16.gmra.mxu1 %v5482_v31  ;;  %v7492_v31 = vld [vmem:[#allocation6 + $0x30] sm:$0xff]   ;;  %7105 = vmatprep.subr.bf16.mxu1 %v7491_v56 }
 0x570   : > { %7106 = vmatpush3.bf16.msra.mxu1 %v7492_v31 }
 0x578   : > { %v5349_v25 = vpop.f32.mrf.mxu0 }
 0x579   : > { %v5430_v59 = vmul.f32 0.01, %v5349_v25  ;;  %vm5398_vm9 = vcmp.gt.f32.partialorder %v5349_v25, 0.0 }
 0x57a   : > { %v5351_v45 = vpop.f32.mrf.mxu0 }
 0x57b   : > { %v5431_v61 = vmul.f32 0.01, %v5351_v45  ;;  %vm5399_vm2 = vcmp.gt.f32.partialorder %v5351_v45, 0.0  ;;  %v5462_v16 = vsel %vm5398_vm9, %v5349_v25, %v5430_v59  ;;  %v7493_v25 = vld [vmem:[#allocation6 + $0x68] sm:$0xff]  }
 0x57c   : > { %v5353_v37 = vpop.f32.mrf.mxu0  ;;  %7107 = vmatprep.subr.bf16.mxu1 %v7493_v25 }
 0x57d   : > { %vm5400_vm15 = vcmp.gt.f32.partialorder %v5353_v37, 0.0  ;;  %v5432_v5 = vmul.f32 0.01, %v5353_v37  ;;  %v5463_v63 = vsel %vm5399_vm2, %v5351_v45, %v5431_v61 }
 0x57e   : > { %v5355_v15 = vpop.f32.mrf.mxu0 }
 0x57f   : > { %vm5401_vm7 = vcmp.gt.f32.partialorder %v5355_v15, 0.0  ;;  %v5433_v18 = vmul.f32 0.01, %v5355_v15  ;;  %v5464_v9 = vsel %vm5400_vm15, %v5353_v37, %v5432_v5  ;;  %v7494_v37 = vld [vmem:[#allocation6 + $0x28] sm:$0xff]  }
 0x580   : > { %v5484_v50 = vpack.c.bf16 %v5464_v9, %v5462_v16  ;;  %7108 = vmatpush3.bf16.msra.mxu1 %v7494_v37 }
 0x581   : > { %v5465_v51 = vsel %vm5401_vm7, %v5355_v15, %v5433_v18  ;;  %v7495_v15 = vld [vmem:[#allocation6 + $0x60] sm:$0xff]  }
 0x582   : > { %v5485_v3 = vpack.c.bf16 %v5465_v51, %v5463_v63  ;;  %v7496_v63 = vld [vmem:[#allocation6 + $0x20] sm:$0xff]   ;;  %7109 = vmatprep.subr.bf16.mxu1 %v7495_v15 }
 0x584   : > { %5764 = vmatprep.mubr.bf16.mxu1 %v5485_v3  ;;  %v7497_v3 = vld [vmem:[#allocation6 + $0x58] sm:$0xff]   ;;  %7110 = vmatpush3.bf16.msra.mxu1 %v7496_v63 }
 0x585   : > { %5765 = vmatmul.mubr.bf16.gmra.mxu1 %v5484_v50  ;;  %7111 = vmatprep.subr.bf16.mxu1 %v7497_v3 }
 0x58d   : > { %v5359_v43 = vpop.f32.mrf.mxu0 }
 0x58e   : > { %v5434_v52 = vmul.f32 0.01, %v5359_v43  ;;  %vm5402_vm6 = vcmp.gt.f32.partialorder %v5359_v43, 0.0 }
 0x58f   : > { %v5361_v0 = vpop.f32.mrf.mxu0 }
 0x590   : > { %v5435_v49 = vmul.f32 0.01, %v5361_v0  ;;  %vm5403_vm5 = vcmp.gt.f32.partialorder %v5361_v0, 0.0  ;;  %v5466_v53 = vsel %vm5402_vm6, %v5359_v43, %v5434_v52  ;;  %v7501_v52 = vld [vmem:[#allocation6 + $0x48] sm:$0xff]  }
 0x591   : > { %v5363_v32 = vpop.f32.mrf.mxu0 }
 0x592   : > { %vm5404_vm1 = vcmp.gt.f32.partialorder %v5363_v32, 0.0  ;;  %v5436_v21 = vmul.f32 0.01, %v5363_v32  ;;  %v5467_v44 = vsel %vm5403_vm5, %v5361_v0, %v5435_v49  ;;  %v7499_v49 = vld [vmem:[#allocation6 + $0x50] sm:$0xff]  }
 0x593   : > { %v5365_v17 = vpop.f32.mrf.mxu0 }
 0x594   : > { %vm5405_vm0 = vcmp.gt.f32.partialorder %v5365_v17, 0.0  ;;  %v5437_v13 = vmul.f32 0.01, %v5365_v17  ;;  %v5468_v26 = vsel %vm5404_vm1, %v5363_v32, %v5436_v21  ;;  %v7498_v32 = vld [vmem:[#allocation6 + $0x18] sm:$0xff]   ;;  %v7500_v21 = vld [vmem:[#allocation6 + $0x10] sm:$0xff]  }
 0x595   : > { %v5486_v38 = vpack.c.bf16 %v5468_v26, %v5466_v53  ;;  %7112 = vmatpush3.bf16.msra.mxu1 %v7498_v32 }
 0x596   : > { %v5469_v14 = vsel %vm5405_vm0, %v5365_v17, %v5437_v13  ;;  %7113 = vmatprep.subr.bf16.mxu1 %v7499_v49  ;;  %v7502_v17 = vld [vmem:[#allocation6 + $0x8] sm:$0xff]  }
 0x597   : > { %v5487_v29 = vpack.c.bf16 %v5469_v14, %v5467_v44 }
 0x599   : > { %5774 = vmatprep.mubr.bf16.mxu1 %v5487_v29  ;;  %7114 = vmatpush3.bf16.msra.mxu1 %v7500_v21 }
 0x59a   : > { %5775 = vmatmul.mubr.bf16.gmra.mxu1 %v5486_v38  ;;  %7115 = vmatprep.subr.bf16.mxu1 %v7501_v52 }
 0x59d   : > { %7116 = vmatpush3.bf16.msra.mxu1 %v7502_v17 }
 0x5a0   : > { %v5369_v34 = vpop.f32.mrf.mxu0 }
 0x5a1   : > { %v5438_v27 = vmul.f32 0.01, %v5369_v34  ;;  %vm5406_vm11 = vcmp.gt.f32.partialorder %v5369_v34, 0.0 }
 0x5a2   : > { %v5371_v39 = vpop.f32.mrf.mxu0 }
 0x5a3   : > { %v5439_v24 = vmul.f32 0.01, %v5371_v39  ;;  %vm5407_vm10 = vcmp.gt.f32.partialorder %v5371_v39, 0.0  ;;  %v5470_v11 = vsel %vm5406_vm11, %v5369_v34, %v5438_v27 }
 0x5a4   : > { %v5373_v10 = vpop.f32.mrf.mxu0 }
 0x5a5   : > { %vm5408_vm14 = vcmp.gt.f32.partialorder %v5373_v10, 0.0  ;;  %v5440_v48 = vmul.f32 0.01, %v5373_v10  ;;  %v5471_v22 = vsel %vm5407_vm10, %v5371_v39, %v5439_v24 }
 0x5a6   : > { %v5375_v58 = vpop.f32.mrf.mxu0 }
 0x5a7   : > { %vm5409_vm13 = vcmp.gt.f32.partialorder %v5375_v58, 0.0  ;;  %v5441_v47 = vmul.f32 0.01, %v5375_v58  ;;  %v5472_v36 = vsel %vm5408_vm14, %v5373_v10, %v5440_v48 }
 0x5a8   : > { %v5488_v41 = vpack.c.bf16 %v5472_v36, %v5470_v11 }
 0x5a9   : > { %v5473_v57 = vsel %vm5409_vm13, %v5375_v58, %v5441_v47 }
 0x5aa   : > { %v5489_v54 = vpack.c.bf16 %v5473_v57, %v5471_v22 }
 0x5ac   : > { %5784 = vmatprep.mubr.bf16.mxu1 %v5489_v54 }
 0x5ad   : > { %5785 = vmatmul.mubr.bf16.gmra.mxu1 %v5488_v41 }
 0x5cc   : > { %v5716_v7 = vpop.f32.mrf.mxu1 }
 0x5cd   : > { %v5827_v60 = vmul.f32 0.01, %v5716_v7  ;;  %vm5795_vm3 = vcmp.gt.f32.partialorder %v5716_v7, 0.0 }
 0x5ce   : > { %v5718_v55 = vpop.f32.mrf.mxu1 }
 0x5cf   : > { %v5828_v42 = vmul.f32 0.01, %v5718_v55  ;;  %vm5796_vm12 = vcmp.gt.f32.partialorder %v5718_v55, 0.0  ;;  %v5859_v33 = vsel %vm5795_vm3, %v5716_v7, %v5827_v60 }
 0x5d0   : > { %v5720_v40 = vpop.f32.mrf.mxu1 }
 0x5d1   : > { %vm5797_vm4 = vcmp.gt.f32.partialorder %v5720_v40, 0.0  ;;  %v5829_v62 = vmul.f32 0.01, %v5720_v40  ;;  %v5860_v12 = vsel %vm5796_vm12, %v5718_v55, %v5828_v42 }
 0x5d2   : > { %v5722_v8 = vpop.f32.mrf.mxu1 }
 0x5d3   : > { %vm5798_vm8 = vcmp.gt.f32.partialorder %v5722_v8, 0.0  ;;  %v5830_v35 = vmul.f32 0.01, %v5722_v8  ;;  %v5861_v23 = vsel %vm5797_vm4, %v5720_v40, %v5829_v62 }
 0x5d4   : > { %v5891_v28 = vpack.c.bf16 %v5861_v23, %v5859_v33  ;;  %v7503_v23 = vld [vmem:[#allocation6 + $0x40] sm:$0xff]  }
 0x5d5   : > { %v5862_v1 = vsel %vm5798_vm8, %v5722_v8, %v5830_v35  ;;  %7117 = vmatprep.subr.bf16.mxu1 %v7503_v23 }
 0x5d6   : > { %v5892_v30 = vpack.c.bf16 %v5862_v1, %v5860_v12  ;;  %v7504_v1 = vld [vmem:[#allocation6] sm:$0xff]  }
 0x5d7   : > { %7118 = vmatpush3.bf16.msra.mxu1 %v7504_v1 }
 0x5d8   : > { %6131 = vmatprep.mubr.bf16.mxu0 %v5892_v30 }
 0x5d9   : > { %6132 = vmatmul.mubr.bf16.vlgmr.msra.gmra.mxu0 %v5891_v28 }
 0x5f0   : > { %v5726_v46 = vpop.f32.mrf.mxu1 }
 0x5f1   : > { %v5831_v6 = vmul.f32 0.01, %v5726_v46  ;;  %vm5799_vm9 = vcmp.gt.f32.partialorder %v5726_v46, 0.0 }
 0x5f2   : > { %v5728_v45 = vpop.f32.mrf.mxu1 }
 0x5f3   : > { %v5832_v61 = vmul.f32 0.01, %v5728_v45  ;;  %vm5800_vm2 = vcmp.gt.f32.partialorder %v5728_v45, 0.0  ;;  %v5863_v50 = vsel %vm5799_vm9, %v5726_v46, %v5831_v6 }
 0x5f4   : > { %v5730_v59 = vpop.f32.mrf.mxu1 }
 0x5f5   : > { %vm5801_vm15 = vcmp.gt.f32.partialorder %v5730_v59, 0.0  ;;  %v5833_v5 = vmul.f32 0.01, %v5730_v59  ;;  %v5864_v51 = vsel %vm5800_vm2, %v5728_v45, %v5832_v61 }
 0x5f6   : > { %v5732_v20 = vpop.f32.mrf.mxu1 }
 0x5f7   : > { %vm5802_vm7 = vcmp.gt.f32.partialorder %v5732_v20, 0.0  ;;  %v5834_v18 = vmul.f32 0.01, %v5732_v20  ;;  %v5865_v9 = vsel %vm5801_vm15, %v5730_v59, %v5833_v5 }
 0x5f8   : > { %v5893_v0 = vpack.c.bf16 %v5865_v9, %v5863_v50 }
 0x5f9   : > { %v5866_v16 = vsel %vm5802_vm7, %v5732_v20, %v5834_v18 }
 0x5fa   : > { %v5894_v43 = vpack.c.bf16 %v5866_v16, %v5864_v51 }
 0x5fc   : > { %6141 = vmatprep.mubr.bf16.mxu0 %v5894_v43 }
 0x5fd   : > { %6142 = vmatmul.mubr.bf16.gmra.mxu0 %v5893_v0 }
 0x60a   : > { %v5736_v13 = vpop.f32.mrf.mxu1 }
 0x60b   : > { %v5835_v29 = vmul.f32 0.01, %v5736_v13  ;;  %vm5803_vm6 = vcmp.gt.f32.partialorder %v5736_v13, 0.0 }
 0x60c   : > { %v5738_v26 = vpop.f32.mrf.mxu1 }
 0x60d   : > { %v5836_v14 = vmul.f32 0.01, %v5738_v26  ;;  %vm5804_vm5 = vcmp.gt.f32.partialorder %v5738_v26, 0.0  ;;  %v5867_v48 = vsel %vm5803_vm6, %v5736_v13, %v5835_v29 }
 0x60e   : > { %v5740_v44 = vpop.f32.mrf.mxu1 }
 0x60f   : > { %vm5805_vm1 = vcmp.gt.f32.partialorder %v5740_v44, 0.0  ;;  %v5837_v53 = vmul.f32 0.01, %v5740_v44  ;;  %v5868_v10 = vsel %vm5804_vm5, %v5738_v26, %v5836_v14 }
 0x610   : > { %v5742_v38 = vpop.f32.mrf.mxu1 }
 0x611   : > { %vm5806_vm0 = vcmp.gt.f32.partialorder %v5742_v38, 0.0  ;;  %v5838_v34 = vmul.f32 0.01, %v5742_v38  ;;  %v5869_v39 = vsel %vm5805_vm1, %v5740_v44, %v5837_v53 }
 0x612   : > { %v5895_v58 = vpack.c.bf16 %v5869_v39, %v5867_v48 }
 0x613   : > { %v5870_v24 = vsel %vm5806_vm0, %v5742_v38, %v5838_v34 }
 0x614   : > { %v5896_v27 = vpack.c.bf16 %v5870_v24, %v5868_v10 }
 0x616   : > { %6151 = vmatprep.mubr.bf16.mxu0 %v5896_v27 }
 0x617   : > { %6152 = vmatmul.mubr.bf16.gmra.mxu0 %v5895_v58 }
 0x621   : > { %v5746_v47 = vpop.f32.mrf.mxu1 }
 0x622   : > { %v5839_v54 = vmul.f32 0.01, %v5746_v47  ;;  %vm5807_vm11 = vcmp.gt.f32.partialorder %v5746_v47, 0.0 }
 0x623   : > { %v5748_v36 = vpop.f32.mrf.mxu1 }
 0x624   : > { %v5840_v57 = vmul.f32 0.01, %v5748_v36  ;;  %vm5808_vm10 = vcmp.gt.f32.partialorder %v5748_v36, 0.0  ;;  %v5871_v62 = vsel %vm5807_vm11, %v5746_v47, %v5839_v54 }
 0x625   : > { %v5750_v22 = vpop.f32.mrf.mxu1 }
 0x626   : > { %vm5809_vm14 = vcmp.gt.f32.partialorder %v5750_v22, 0.0  ;;  %v5841_v11 = vmul.f32 0.01, %v5750_v22  ;;  %v5872_v40 = vsel %vm5808_vm10, %v5748_v36, %v5840_v57 }
 0x627   : > { %v5752_v41 = vpop.f32.mrf.mxu1 }
 0x628   : > { %vm5810_vm13 = vcmp.gt.f32.partialorder %v5752_v41, 0.0  ;;  %v5842_v7 = vmul.f32 0.01, %v5752_v41  ;;  %v5873_v55 = vsel %vm5809_vm14, %v5750_v22, %v5841_v11 }
 0x629   : > { %v5897_v35 = vpack.c.bf16 %v5873_v55, %v5871_v62 }
 0x62a   : > { %v5874_v42 = vsel %vm5810_vm13, %v5752_v41, %v5842_v7 }
 0x62b   : > { %v5898_v8 = vpack.c.bf16 %v5874_v42, %v5872_v40 }
 0x62d   : > { %v5756_v60 = vpop.f32.mrf.mxu1  ;;  %6161 = vmatprep.mubr.bf16.mxu0 %v5898_v8 }
 0x62e   : > { %6162 = vmatmul.mubr.bf16.gmra.mxu0 %v5897_v35  ;;  %v5843_v4 = vmul.f32 0.01, %v5756_v60  ;;  %vm5811_vm3 = vcmp.gt.f32.partialorder %v5756_v60, 0.0 }
 0x62f   : > { %v5758_v12 = vpop.f32.mrf.mxu1 }
 0x630   : > { %v5844_v30 = vmul.f32 0.01, %v5758_v12  ;;  %vm5812_vm12 = vcmp.gt.f32.partialorder %v5758_v12, 0.0  ;;  %v5875_v45 = vsel %vm5811_vm3, %v5756_v60, %v5843_v4 }
 0x631   : > { %v5760_v33 = vpop.f32.mrf.mxu1 }
 0x632   : > { %vm5813_vm4 = vcmp.gt.f32.partialorder %v5760_v33, 0.0  ;;  %v5845_v28 = vmul.f32 0.01, %v5760_v33  ;;  %v5876_v31 = vsel %vm5812_vm12, %v5758_v12, %v5844_v30 }
 0x633   : > { %v5762_v2 = vpop.f32.mrf.mxu1 }
 0x634   : > { %vm5814_vm8 = vcmp.gt.f32.partialorder %v5762_v2, 0.0  ;;  %v5846_v56 = vmul.f32 0.01, %v5762_v2  ;;  %v5877_v46 = vsel %vm5813_vm4, %v5760_v33, %v5845_v28 }
 0x635   : > { %v5899_v37 = vpack.c.bf16 %v5877_v46, %v5875_v45 }
 0x636   : > { %v5878_v25 = vsel %vm5814_vm8, %v5762_v2, %v5846_v56 }
 0x637   : > { %v5900_v59 = vpack.c.bf16 %v5878_v25, %v5876_v31 }
 0x639   : > { %6171 = vmatprep.mubr.bf16.mxu0 %v5900_v59 }
 0x63a   : > { %6172 = vmatmul.mubr.bf16.gmra.mxu0 %v5899_v37 }
 0x645   : > { %v5766_v61 = vpop.f32.mrf.mxu1 }
 0x646   : > { %v5847_v18 = vmul.f32 0.01, %v5766_v61  ;;  %vm5815_vm9 = vcmp.gt.f32.partialorder %v5766_v61, 0.0 }
 0x647   : > { %v5768_v5 = vpop.f32.mrf.mxu1 }
 0x648   : > { %v5848_v6 = vmul.f32 0.01, %v5768_v5  ;;  %vm5816_vm2 = vcmp.gt.f32.partialorder %v5768_v5, 0.0  ;;  %v5879_v50 = vsel %vm5815_vm9, %v5766_v61, %v5847_v18 }
 0x649   : > { %v5770_v15 = vpop.f32.mrf.mxu1 }
 0x64a   : > { %vm5817_vm15 = vcmp.gt.f32.partialorder %v5770_v15, 0.0  ;;  %v5849_v20 = vmul.f32 0.01, %v5770_v15  ;;  %v5880_v16 = vsel %vm5816_vm2, %v5768_v5, %v5848_v6 }
 0x64b   : > { %v5772_v9 = vpop.f32.mrf.mxu1 }
 0x64c   : > { %vm5818_vm7 = vcmp.gt.f32.partialorder %v5772_v9, 0.0  ;;  %v5850_v63 = vmul.f32 0.01, %v5772_v9  ;;  %v5881_v51 = vsel %vm5817_vm15, %v5770_v15, %v5849_v20 }
 0x64d   : > { %v5901_v0 = vpack.c.bf16 %v5881_v51, %v5879_v50 }
 0x64e   : > { %v5882_v3 = vsel %vm5818_vm7, %v5772_v9, %v5850_v63 }
 0x64f   : > { %v5902_v43 = vpack.c.bf16 %v5882_v3, %v5880_v16 }
 0x651   : > { %6181 = vmatprep.mubr.bf16.mxu0 %v5902_v43 }
 0x652   : > { %6182 = vmatmul.mubr.bf16.gmra.mxu0 %v5901_v0 }
 0x65a   : > { %v5776_v32 = vpop.f32.mrf.mxu1 }
 0x65b   : > { %v5851_v13 = vmul.f32 0.01, %v5776_v32  ;;  %vm5819_vm6 = vcmp.gt.f32.partialorder %v5776_v32, 0.0 }
 0x65c   : > { %v5778_v49 = vpop.f32.mrf.mxu1 }
 0x65d   : > { %v5852_v52 = vmul.f32 0.01, %v5778_v49  ;;  %vm5820_vm5 = vcmp.gt.f32.partialorder %v5778_v49, 0.0  ;;  %v5883_v38 = vsel %vm5819_vm6, %v5776_v32, %v5851_v13 }
 0x65e   : > { %v5780_v21 = vpop.f32.mrf.mxu1 }
 0x65f   : > { %vm5821_vm1 = vcmp.gt.f32.partialorder %v5780_v21, 0.0  ;;  %v5853_v17 = vmul.f32 0.01, %v5780_v21  ;;  %v5884_v53 = vsel %vm5820_vm5, %v5778_v49, %v5852_v52 }
 0x660   : > { %v5782_v26 = vpop.f32.mrf.mxu1 }
 0x661   : > { %vm5822_vm0 = vcmp.gt.f32.partialorder %v5782_v26, 0.0  ;;  %v5854_v44 = vmul.f32 0.01, %v5782_v26  ;;  %v5885_v14 = vsel %vm5821_vm1, %v5780_v21, %v5853_v17 }
 0x662   : > { %v5903_v39 = vpack.c.bf16 %v5885_v14, %v5883_v38 }
 0x663   : > { %v5886_v29 = vsel %vm5822_vm0, %v5782_v26, %v5854_v44 }
 0x664   : > { %v5904_v34 = vpack.c.bf16 %v5886_v29, %v5884_v53 }
 0x666   : > { %6191 = vmatprep.mubr.bf16.mxu0 %v5904_v34 }
 0x667   : > { %6192 = vmatmul.mubr.bf16.gmra.mxu0 %v5903_v39 }
 0x66d   : > { %v5786_v10 = vpop.f32.mrf.mxu1 }
 0x66e   : > { %v5855_v47 = vmul.f32 0.01, %v5786_v10  ;;  %vm5823_vm11 = vcmp.gt.f32.partialorder %v5786_v10, 0.0 }
 0x66f   : > { %v5788_v24 = vpop.f32.mrf.mxu1 }
 0x670   : > { %v5856_v27 = vmul.f32 0.01, %v5788_v24  ;;  %vm5824_vm10 = vcmp.gt.f32.partialorder %v5788_v24, 0.0  ;;  %v5887_v41 = vsel %vm5823_vm11, %v5786_v10, %v5855_v47 }
 0x671   : > { %v5790_v48 = vpop.f32.mrf.mxu1 }
 0x672   : > { %vm5825_vm14 = vcmp.gt.f32.partialorder %v5790_v48, 0.0  ;;  %v5857_v58 = vmul.f32 0.01, %v5790_v48  ;;  %v5888_v11 = vsel %vm5824_vm10, %v5788_v24, %v5856_v27 }
 0x673   : > { %v5792_v36 = vpop.f32.mrf.mxu1 }
 0x674   : > { %vm5826_vm13 = vcmp.gt.f32.partialorder %v5792_v36, 0.0  ;;  %v5858_v22 = vmul.f32 0.01, %v5792_v36  ;;  %v5889_v57 = vsel %vm5825_vm14, %v5790_v48, %v5857_v58 }
 0x675   : > { %v5905_v55 = vpack.c.bf16 %v5889_v57, %v5887_v41 }
 0x676   : > { %v5890_v54 = vsel %vm5826_vm13, %v5792_v36, %v5858_v22 }
 0x677   : > { %v5906_v7 = vpack.c.bf16 %v5890_v54, %v5888_v11 }
 0x679   : > { %6201 = vmatprep.mubr.bf16.mxu0 %v5906_v7 }
 0x67a   : > { %6202 = vmatmul.mubr.bf16.gmra.mxu0 %v5905_v55 }
 0x699   : > { %v6133_v40 = vpop.f32.mrf.mxu0 }
 0x69a   : > { %v6244_v35 = vmul.f32 0.01, %v6133_v40  ;;  %vm6212_vm3 = vcmp.gt.f32.partialorder %v6133_v40, 0.0 }
 0x69b   : > { %v6135_v42 = vpop.f32.mrf.mxu0 }
 0x69c   : > { %v6245_v60 = vmul.f32 0.01, %v6135_v42  ;;  %vm6213_vm12 = vcmp.gt.f32.partialorder %v6135_v42, 0.0  ;;  %v6276_v28 = vsel %vm6212_vm3, %v6133_v40, %v6244_v35 }
 0x69d   : > { %v6137_v62 = vpop.f32.mrf.mxu0 }
 0x69e   : > { %vm6214_vm4 = vcmp.gt.f32.partialorder %v6137_v62, 0.0  ;;  %v6246_v8 = vmul.f32 0.01, %v6137_v62  ;;  %v6277_v33 = vsel %vm6213_vm12, %v6135_v42, %v6245_v60 }
 0x69f   : > { %v6139_v23 = vpop.f32.mrf.mxu0 }
 0x6a0   : > { %vm6215_vm8 = vcmp.gt.f32.partialorder %v6139_v23, 0.0  ;;  %v6247_v12 = vmul.f32 0.01, %v6139_v23  ;;  %v6278_v1 = vsel %vm6214_vm4, %v6137_v62, %v6246_v8 }
 0x6a1   : > { %v6308_v2 = vpack.c.bf16 %v6278_v1, %v6276_v28 }
 0x6a2   : > { %v6279_v30 = vsel %vm6215_vm8, %v6139_v23, %v6247_v12 }
 0x6a3   : > { %v6309_v4 = vpack.c.bf16 %v6279_v30, %v6277_v33 }
 0x6a5   : > { %6484 = vmatprep.mubr.bf16.mxu1 %v6309_v4 }
 0x6a6   : > { %6485 = vmatmul.mubr.bf16.vlgmr.msra.gmra.mxu1 %v6308_v2 }
 0x6bd   : > { %v6143_v56 = vpop.f32.mrf.mxu0 }
 0x6be   : > { %v6248_v59 = vmul.f32 0.01, %v6143_v56  ;;  %vm6216_vm9 = vcmp.gt.f32.partialorder %v6143_v56, 0.0 }
 0x6bf   : > { %v6145_v46 = vpop.f32.mrf.mxu0 }
 0x6c0   : > { %v6249_v25 = vmul.f32 0.01, %v6145_v46  ;;  %vm6217_vm2 = vcmp.gt.f32.partialorder %v6145_v46, 0.0  ;;  %v6280_v20 = vsel %vm6216_vm9, %v6143_v56, %v6248_v59 }
 0x6c1   : > { %v6147_v31 = vpop.f32.mrf.mxu0 }
 0x6c2   : > { %vm6218_vm15 = vcmp.gt.f32.partialorder %v6147_v31, 0.0  ;;  %v6250_v45 = vmul.f32 0.01, %v6147_v31  ;;  %v6281_v15 = vsel %vm6217_vm2, %v6145_v46, %v6249_v25 }
 0x6c3   : > { %v6149_v37 = vpop.f32.mrf.mxu0 }
 0x6c4   : > { %vm6219_vm7 = vcmp.gt.f32.partialorder %v6149_v37, 0.0  ;;  %v6251_v61 = vmul.f32 0.01, %v6149_v37  ;;  %v6282_v5 = vsel %vm6218_vm15, %v6147_v31, %v6250_v45 }
 0x6c5   : > { %v6310_v9 = vpack.c.bf16 %v6282_v5, %v6280_v20 }
 0x6c6   : > { %v6283_v6 = vsel %vm6219_vm7, %v6149_v37, %v6251_v61 }
 0x6c7   : > { %v6311_v18 = vpack.c.bf16 %v6283_v6, %v6281_v15 }
 0x6c9   : > { %6492 = vmatprep.mubr.bf16.mxu1 %v6311_v18 }
 0x6ca   : > { %6493 = vmatmul.mubr.bf16.gmra.mxu1 %v6310_v9 }
 0x6d7   : > { %v6153_v63 = vpop.f32.mrf.mxu0 }
 0x6d8   : > { %v6252_v43 = vmul.f32 0.01, %v6153_v63  ;;  %vm6220_vm6 = vcmp.gt.f32.partialorder %v6153_v63, 0.0 }
 0x6d9   : > { %v6155_v51 = vpop.f32.mrf.mxu0 }
 0x6da   : > { %v6253_v3 = vmul.f32 0.01, %v6155_v51  ;;  %vm6221_vm5 = vcmp.gt.f32.partialorder %v6155_v51, 0.0  ;;  %v6284_v17 = vsel %vm6220_vm6, %v6153_v63, %v6252_v43 }
 0x6db   : > { %v6157_v16 = vpop.f32.mrf.mxu0 }
 0x6dc   : > { %vm6222_vm1 = vcmp.gt.f32.partialorder %v6157_v16, 0.0  ;;  %v6254_v50 = vmul.f32 0.01, %v6157_v16  ;;  %v6285_v21 = vsel %vm6221_vm5, %v6155_v51, %v6253_v3 }
 0x6dd   : > { %v6159_v0 = vpop.f32.mrf.mxu0 }
 0x6de   : > { %vm6223_vm0 = vcmp.gt.f32.partialorder %v6159_v0, 0.0  ;;  %v6255_v32 = vmul.f32 0.01, %v6159_v0  ;;  %v6286_v49 = vsel %vm6222_vm1, %v6157_v16, %v6254_v50 }
 0x6df   : > { %v6312_v26 = vpack.c.bf16 %v6286_v49, %v6284_v17 }
 0x6e0   : > { %v6287_v52 = vsel %vm6223_vm0, %v6159_v0, %v6255_v32 }
 0x6e1   : > { %v6313_v13 = vpack.c.bf16 %v6287_v52, %v6285_v21 }
 0x6e3   : > { %6500 = vmatprep.mubr.bf16.mxu1 %v6313_v13 }
 0x6e4   : > { %6501 = vmatmul.mubr.bf16.gmra.mxu1 %v6312_v26 }
 0x6ee   : > { %v6163_v44 = vpop.f32.mrf.mxu0 }
 0x6ef   : > { %v6256_v34 = vmul.f32 0.01, %v6163_v44  ;;  %vm6224_vm11 = vcmp.gt.f32.partialorder %v6163_v44, 0.0 }
 0x6f0   : > { %v6165_v14 = vpop.f32.mrf.mxu0 }
 0x6f1   : > { %v6257_v29 = vmul.f32 0.01, %v6165_v14  ;;  %vm6225_vm10 = vcmp.gt.f32.partialorder %v6165_v14, 0.0  ;;  %v6288_v58 = vsel %vm6224_vm11, %v6163_v44, %v6256_v34 }
 0x6f2   : > { %v6167_v53 = vpop.f32.mrf.mxu0 }
 0x6f3   : > { %vm6226_vm14 = vcmp.gt.f32.partialorder %v6167_v53, 0.0  ;;  %v6258_v38 = vmul.f32 0.01, %v6167_v53  ;;  %v6289_v48 = vsel %vm6225_vm10, %v6165_v14, %v6257_v29 }
 0x6f4   : > { %v6169_v39 = vpop.f32.mrf.mxu0 }
 0x6f5   : > { %vm6227_vm13 = vcmp.gt.f32.partialorder %v6169_v39, 0.0  ;;  %v6259_v10 = vmul.f32 0.01, %v6169_v39  ;;  %v6290_v24 = vsel %vm6226_vm14, %v6167_v53, %v6258_v38 }
 0x6f6   : > { %v6314_v22 = vpack.c.bf16 %v6290_v24, %v6288_v58 }
 0x6f7   : > { %v6291_v27 = vsel %vm6227_vm13, %v6169_v39, %v6259_v10 }
 0x6f8   : > { %v6315_v36 = vpack.c.bf16 %v6291_v27, %v6289_v48 }
 0x6fa   : > { %v6173_v47 = vpop.f32.mrf.mxu0  ;;  %6508 = vmatprep.mubr.bf16.mxu1 %v6315_v36 }
 0x6fb   : > { %6509 = vmatmul.mubr.bf16.gmra.mxu1 %v6314_v22  ;;  %v6260_v7 = vmul.f32 0.01, %v6173_v47  ;;  %vm6228_vm3 = vcmp.gt.f32.partialorder %v6173_v47, 0.0 }
 0x6fc   : > { %v6175_v57 = vpop.f32.mrf.mxu0 }
 0x6fd   : > { %v6261_v54 = vmul.f32 0.01, %v6175_v57  ;;  %vm6229_vm12 = vcmp.gt.f32.partialorder %v6175_v57, 0.0  ;;  %v6292_v8 = vsel %vm6228_vm3, %v6173_v47, %v6260_v7 }
 0x6fe   : > { %v6177_v11 = vpop.f32.mrf.mxu0 }
 0x6ff   : > { %vm6230_vm4 = vcmp.gt.f32.partialorder %v6177_v11, 0.0  ;;  %v6262_v41 = vmul.f32 0.01, %v6177_v11  ;;  %v6293_v62 = vsel %vm6229_vm12, %v6175_v57, %v6261_v54  ;;  %vm6710_vm12 = vcmask 31744  }
 0x700   : > { %v6179_v55 = vpop.f32.mrf.mxu0 }
 0x701   : > { %vm6231_vm8 = vcmp.gt.f32.partialorder %v6179_v55, 0.0  ;;  %v6263_v40 = vmul.f32 0.01, %v6179_v55  ;;  %v6294_v42 = vsel %vm6230_vm4, %v6177_v11, %v6262_v41  ;;  %vm6645_vm4 = vcmp.eq.s32.totalorder %v11361_v19, 0 }
 0x702   : > { %v6316_v23 = vpack.c.bf16 %v6294_v42, %v6292_v8 }
 0x703   : > { %v6295_v60 = vsel %vm6231_vm8, %v6179_v55, %v6263_v40 }
 0x704   : > { %v6317_v35 = vpack.c.bf16 %v6295_v60, %v6293_v62 }
 0x706   : > { %6516 = vmatprep.mubr.bf16.mxu1 %v6317_v35 }
 0x707   : > { %6517 = vmatmul.mubr.bf16.gmra.mxu1 %v6316_v23 }
 0x712   : > { %v6183_v12 = vpop.f32.mrf.mxu0 }
 0x713   : > { %v6264_v4 = vmul.f32 0.01, %v6183_v12  ;;  %vm6232_vm9 = vcmp.gt.f32.partialorder %v6183_v12, 0.0 }
 0x714   : > { %v6185_v1 = vpop.f32.mrf.mxu0 }
 0x715   : > { %v6265_v30 = vmul.f32 0.01, %v6185_v1  ;;  %vm6233_vm2 = vcmp.gt.f32.partialorder %v6185_v1, 0.0  ;;  %v6296_v45 = vsel %vm6232_vm9, %v6183_v12, %v6264_v4 }
 0x716   : > { %v6187_v33 = vpop.f32.mrf.mxu0 }
 0x717   : > { %vm6234_vm15 = vcmp.gt.f32.partialorder %v6187_v33, 0.0  ;;  %v6266_v28 = vmul.f32 0.01, %v6187_v33  ;;  %v6297_v31 = vsel %vm6233_vm2, %v6185_v1, %v6265_v30 }
 0x718   : > { %v6189_v2 = vpop.f32.mrf.mxu0 }
 0x719   : > { %vm6235_vm7 = vcmp.gt.f32.partialorder %v6189_v2, 0.0  ;;  %v6267_v56 = vmul.f32 0.01, %v6189_v2  ;;  %v6298_v46 = vsel %vm6234_vm15, %v6187_v33, %v6266_v28 }
 0x71a   : > { %v6318_v37 = vpack.c.bf16 %v6298_v46, %v6296_v45 }
 0x71b   : > { %v6299_v25 = vsel %vm6235_vm7, %v6189_v2, %v6267_v56 }
 0x71c   : > { %v6319_v59 = vpack.c.bf16 %v6299_v25, %v6297_v31 }
 0x71e   : > { %6524 = vmatprep.mubr.bf16.mxu1 %v6319_v59 }
 0x71f   : > { %6525 = vmatmul.mubr.bf16.gmra.mxu1 %v6318_v37 }
 0x727   : > { %v6193_v61 = vpop.f32.mrf.mxu0 }
 0x728   : > { %v6268_v18 = vmul.f32 0.01, %v6193_v61  ;;  %vm6236_vm6 = vcmp.gt.f32.partialorder %v6193_v61, 0.0 }
 0x729   : > { %v6195_v5 = vpop.f32.mrf.mxu0 }
 0x72a   : > { %v6269_v6 = vmul.f32 0.01, %v6195_v5  ;;  %vm6237_vm5 = vcmp.gt.f32.partialorder %v6195_v5, 0.0  ;;  %v6300_v50 = vsel %vm6236_vm6, %v6193_v61, %v6268_v18 }
 0x72b   : > { %v6197_v15 = vpop.f32.mrf.mxu0 }
 0x72c   : > { %vm6238_vm1 = vcmp.gt.f32.partialorder %v6197_v15, 0.0  ;;  %v6270_v20 = vmul.f32 0.01, %v6197_v15  ;;  %v6301_v16 = vsel %vm6237_vm5, %v6195_v5, %v6269_v6 }
 0x72d   : > { %v6199_v9 = vpop.f32.mrf.mxu0 }
 0x72e   : > { %vm6239_vm0 = vcmp.gt.f32.partialorder %v6199_v9, 0.0  ;;  %v6271_v63 = vmul.f32 0.01, %v6199_v9  ;;  %v6302_v51 = vsel %vm6238_vm1, %v6197_v15, %v6270_v20 }
 0x72f   : > { %v6320_v0 = vpack.c.bf16 %v6302_v51, %v6300_v50 }
 0x730   : > { %v6303_v3 = vsel %vm6239_vm0, %v6199_v9, %v6271_v63 }
 0x731   : > { %v6321_v43 = vpack.c.bf16 %v6303_v3, %v6301_v16 }
 0x733   : > { %6532 = vmatprep.mubr.bf16.mxu1 %v6321_v43 }
 0x734   : > { %6533 = vmatmul.mubr.bf16.gmra.mxu1 %v6320_v0 }
 0x73a   : > { %v6203_v32 = vpop.f32.mrf.mxu0 }
 0x73b   : > { %v6272_v13 = vmul.f32 0.01, %v6203_v32  ;;  %vm6240_vm11 = vcmp.gt.f32.partialorder %v6203_v32, 0.0 }
 0x73c   : > { %v6205_v49 = vpop.f32.mrf.mxu0 }
 0x73d   : > { %v6273_v52 = vmul.f32 0.01, %v6205_v49  ;;  %vm6241_vm10 = vcmp.gt.f32.partialorder %v6205_v49, 0.0  ;;  %v6304_v38 = vsel %vm6240_vm11, %v6203_v32, %v6272_v13 }
 0x73e   : > { %v6207_v21 = vpop.f32.mrf.mxu0 }
 0x73f   : > { %vm6242_vm14 = vcmp.gt.f32.partialorder %v6207_v21, 0.0  ;;  %v6274_v17 = vmul.f32 0.01, %v6207_v21  ;;  %v6305_v53 = vsel %vm6241_vm10, %v6205_v49, %v6273_v52 }
 0x740   : > { %v6209_v26 = vpop.f32.mrf.mxu0 }
 0x741   : > { %vm6243_vm13 = vcmp.gt.f32.partialorder %v6209_v26, 0.0  ;;  %v6275_v44 = vmul.f32 0.01, %v6209_v26  ;;  %v6306_v14 = vsel %vm6242_vm14, %v6207_v21, %v6274_v17 }
 0x742   : > { %v6322_v39 = vpack.c.bf16 %v6306_v14, %v6304_v38 }
 0x743   : > { %v6307_v29 = vsel %vm6243_vm13, %v6209_v26, %v6275_v44 }
 0x744   : > { %v6323_v34 = vpack.c.bf16 %v6307_v29, %v6305_v53 }
 0x746   : > { %6540 = vmatprep.mubr.bf16.mxu1 %v6323_v34 }
 0x747   : > { %6541 = vmatmul.mubr.bf16.gmra.mxu1 %v6322_v39 }
 0x766   : > { %v7119_v10 = vpop.f32.mrf.mxu1 }
 0x768   : > { %v7120_v24 = vpop.f32.mrf.mxu1 }
 0x769   : > { %v7121_v48 = vadd.f32 %v7120_v24, %v7119_v10 }
 0x76a   : > { %v7122_v27 = vpop.f32.mrf.mxu1 }
 0x76b   : > { %v7069_v58 = vmul.f32 -1.442695, %v7121_v48 }
 0x76c   : > { %v7123_v47 = vpop.f32.mrf.mxu1 }
 0x76d   : > { %7633 = vpow2.f32 %v7069_v58  ;;  %v7124_v36 = vadd.f32 %v7123_v47, %v7122_v27 }
 0x76f   : > { %v7070_v22 = vmul.f32 -1.442695, %v7124_v36 }
 0x771   : > { %7635 = vpow2.f32 %v7070_v22 }
 0x77a   : > { %v7634_v57 = vpop.eup %7633 }
 0x77b   : > { %v6597_v11 = vadd.f32 1.0, %v7634_v57 }
 0x77d   : > { %7637 = vrcp.f32 %v6597_v11 }
 0x77e   : > { %v7636_v54 = vpop.eup %7635 }
 0x77f   : > { %v6598_v41 = vadd.f32 1.0, %v7636_v54 }
 0x781   : > { %7639 = vrcp.f32 %v6598_v41 }
 0x78a   : > { %v7125_v7 = vpop.f32.mrf.mxu1  ;;  %v7638_v62 = vpop.eup %7637 }
 0x78b   : > { %v7085_v8 = vadd.f32 -1e-05, %v7638_v62  ;;  %v6678_v1 = vmul.f32 2.0, %v7638_v62 }
 0x78c   : > { %v7126_v55 = vpop.f32.mrf.mxu1 }
 0x78d   : > { %v7127_v40 = vadd.f32 %v7126_v55, %v7125_v7  ;;  %v6662_v12 = vmax.f32 %v7085_v8, 0.0 }
 0x78e   : > { %v7128_v42 = vpop.f32.mrf.mxu1  ;;  %v7640_v33 = vpop.eup %7639 }
 0x78f   : > { %v7071_v60 = vmul.f32 -1.442695, %v7127_v40  ;;  %v6694_v28 = vsel %vm6645_vm4, %v6662_v12, %v6678_v1  ;;  %v7086_v4 = vadd.f32 -1e-05, %v7640_v33  ;;  %v6679_v56 = vmul.f32 2.0, %v7640_v33 }
 0x790   : > { %v7129_v35 = vpop.f32.mrf.mxu1  ;;  %6711 = vst.msk [vmem:[%s12295_s12] sm:$0xff] %vm6710_vm12, %v6694_v28 }
 0x791   : > { %7641 = vpow2.f32 %v7071_v60  ;;  %v7130_v23 = vadd.f32 %v7129_v35, %v7128_v42  ;;  %v6663_v2 = vmax.f32 %v7086_v4, 0.0 }
 0x793   : > { %v7072_v30 = vmul.f32 -1.442695, %v7130_v23  ;;  %v6695_v46 = vsel %vm6645_vm4, %v6663_v2, %v6679_v56 }
 0x794   : > { %6712 = vst.msk [vmem:[%s12295_s12 + $0x8] sm:$0xff] %vm6710_vm12, %v6695_v46 }
 0x795   : > { %7643 = vpow2.f32 %v7072_v30 }
 0x79e   : > { %v7642_v31 = vpop.eup %7641 }
 0x79f   : > { %v6599_v25 = vadd.f32 1.0, %v7642_v31 }
 0x7a1   : > { %7645 = vrcp.f32 %v6599_v25 }
 0x7a2   : > { %v7644_v59 = vpop.eup %7643 }
 0x7a3   : > { %v6600_v37 = vadd.f32 1.0, %v7644_v59 }
 0x7a4   : > { %v7131_v45 = vpop.f32.mrf.mxu1 }
 0x7a5   : > { %7647 = vrcp.f32 %v6600_v37 }
 0x7a6   : > { %v7132_v61 = vpop.f32.mrf.mxu1 }
 0x7a7   : > { %v7133_v5 = vadd.f32 %v7132_v61, %v7131_v45 }
 0x7a8   : > { %v7134_v15 = vpop.f32.mrf.mxu1 }
 0x7a9   : > { %v7073_v6 = vmul.f32 -1.442695, %v7133_v5 }
 0x7aa   : > { %v7135_v20 = vpop.f32.mrf.mxu1 }
 0x7ab   : > { %7649 = vpow2.f32 %v7073_v6  ;;  %v7136_v18 = vadd.f32 %v7135_v20, %v7134_v15 }
 0x7ad   : > { %v7074_v9 = vmul.f32 -1.442695, %v7136_v18 }
 0x7ae   : > { %v7646_v63 = vpop.eup %7645 }
 0x7af   : > { %7651 = vpow2.f32 %v7074_v9  ;;  %v7087_v51 = vadd.f32 -1e-05, %v7646_v63  ;;  %v6680_v3 = vmul.f32 2.0, %v7646_v63 }
 0x7b1   : > { %v6664_v16 = vmax.f32 %v7087_v51, 0.0 }
 0x7b2   : > { %v7648_v50 = vpop.eup %7647 }
 0x7b3   : > { %v6696_v43 = vsel %vm6645_vm4, %v6664_v16, %v6680_v3  ;;  %v7088_v0 = vadd.f32 -1e-05, %v7648_v50  ;;  %v6681_v21 = vmul.f32 2.0, %v7648_v50 }
 0x7b4   : > { %6713 = vst.msk [vmem:[%s12295_s12 + $0x10] sm:$0xff] %vm6710_vm12, %v6696_v43 }
 0x7b5   : > { %v6665_v49 = vmax.f32 %v7088_v0, 0.0 }
 0x7b7   : > { %v6697_v13 = vsel %vm6645_vm4, %v6665_v49, %v6681_v21 }
 0x7b8   : > { %v7650_v32 = vpop.eup %7649  ;;  %6714 = vst.msk [vmem:[%s12295_s12 + $0x18] sm:$0xff] %vm6710_vm12, %v6697_v13 }
 0x7b9   : > { %v6601_v17 = vadd.f32 1.0, %v7650_v32 }
 0x7bb   : > { %v7137_v52 = vpop.f32.mrf.mxu1  ;;  %7653 = vrcp.f32 %v6601_v17 }
 0x7bc   : > { %v7652_v14 = vpop.eup %7651 }
 0x7bd   : > { %v7138_v26 = vpop.f32.mrf.mxu1  ;;  %v6602_v29 = vadd.f32 1.0, %v7652_v14 }
 0x7be   : > { %v7139_v44 = vadd.f32 %v7138_v26, %v7137_v52 }
 0x7bf   : > { %v7140_v53 = vpop.f32.mrf.mxu1  ;;  %7655 = vrcp.f32 %v6602_v29 }
 0x7c0   : > { %v7075_v38 = vmul.f32 -1.442695, %v7139_v44 }
 0x7c1   : > { %v7141_v34 = vpop.f32.mrf.mxu1 }
 0x7c2   : > { %v7142_v39 = vadd.f32 %v7141_v34, %v7140_v53  ;;  %7657 = vpow2.f32 %v7075_v38 }
 0x7c4   : > { %v7076_v10 = vmul.f32 -1.442695, %v7142_v39 }
 0x7c6   : > { %7659 = vpow2.f32 %v7076_v10 }
 0x7c7   : > { %v7143_v24 = vpop.f32.mrf.mxu1 }
 0x7c8   : > { %v7654_v36 = vpop.eup %7653 }
 0x7c9   : > { %v7144_v48 = vpop.f32.mrf.mxu1  ;;  %v7089_v57 = vadd.f32 -1e-05, %v7654_v36  ;;  %v6682_v41 = vmul.f32 2.0, %v7654_v36 }
 0x7ca   : > { %v7145_v27 = vadd.f32 %v7144_v48, %v7143_v24 }
 0x7cb   : > { %v7146_v58 = vpop.f32.mrf.mxu1  ;;  %v6666_v54 = vmax.f32 %v7089_v57, 0.0 }
 0x7cc   : > { %v7077_v47 = vmul.f32 -1.442695, %v7145_v27  ;;  %v7656_v55 = vpop.eup %7655 }
 0x7cd   : > { %v7147_v22 = vpop.f32.mrf.mxu1  ;;  %v6698_v42 = vsel %vm6645_vm4, %v6666_v54, %v6682_v41  ;;  %v7090_v62 = vadd.f32 -1e-05, %v7656_v55  ;;  %v6683_v35 = vmul.f32 2.0, %v7656_v55 }
 0x7ce   : > { %7661 = vpow2.f32 %v7077_v47  ;;  %v7148_v11 = vadd.f32 %v7147_v22, %v7146_v58  ;;  %6715 = vst.msk [vmem:[%s12295_s12 + $0x20] sm:$0xff] %vm6710_vm12, %v6698_v42 }
 0x7cf   : > { %v7658_v40 = vpop.eup %7657  ;;  %v6667_v8 = vmax.f32 %v7090_v62, 0.0 }
 0x7d0   : > { %v7078_v7 = vmul.f32 -1.442695, %v7148_v11  ;;  %v6603_v60 = vadd.f32 1.0, %v7658_v40 }
 0x7d1   : > { %v6699_v12 = vsel %vm6645_vm4, %v6667_v8, %v6683_v35 }
 0x7d2   : > { %7663 = vpow2.f32 %v7078_v7  ;;  %6716 = vst.msk [vmem:[%s12295_s12 + $0x28] sm:$0xff] %vm6710_vm12, %v6699_v12 }
 0x7d3   : > { %v7660_v23 = vpop.eup %7659  ;;  %7665 = vrcp.f32 %v6603_v60 }
 0x7d4   : > { %v6604_v1 = vadd.f32 1.0, %v7660_v23 }
 0x7d6   : > { %7667 = vrcp.f32 %v6604_v1 }
 0x7db   : > { %v7662_v33 = vpop.eup %7661 }
 0x7dc   : > { %v6605_v30 = vadd.f32 1.0, %v7662_v33 }
 0x7de   : > { %7669 = vrcp.f32 %v6605_v30 }
 0x7df   : > { %v7149_v28 = vpop.f32.mrf.mxu1  ;;  %v7664_v2 = vpop.eup %7663 }
 0x7e0   : > { %v6606_v46 = vadd.f32 1.0, %v7664_v2  ;;  %v7666_v45 = vpop.eup %7665 }
 0x7e1   : > { %v7150_v4 = vpop.f32.mrf.mxu1  ;;  %v7091_v37 = vadd.f32 -1e-05, %v7666_v45  ;;  %v6684_v6 = vmul.f32 2.0, %v7666_v45 }
 0x7e2   : > { %v7151_v56 = vadd.f32 %v7150_v4, %v7149_v28  ;;  %7671 = vrcp.f32 %v6606_v46 }
 0x7e3   : > { %v7152_v31 = vpop.f32.mrf.mxu1  ;;  %v7668_v5 = vpop.eup %7667  ;;  %v6668_v15 = vmax.f32 %v7091_v37, 0.0 }
 0x7e4   : > { %v7079_v25 = vmul.f32 -1.442695, %v7151_v56  ;;  %v7092_v18 = vadd.f32 -1e-05, %v7668_v5  ;;  %v6685_v51 = vmul.f32 2.0, %v7668_v5 }
 0x7e5   : > { %v7153_v59 = vpop.f32.mrf.mxu1  ;;  %v6700_v9 = vsel %vm6645_vm4, %v6668_v15, %v6684_v6 }
 0x7e6   : > { %7673 = vpow2.f32 %v7079_v25  ;;  %v7154_v61 = vadd.f32 %v7153_v59, %v7152_v31  ;;  %6717 = vst.msk [vmem:[%s12295_s12 + $0x30] sm:$0xff] %vm6710_vm12, %v6700_v9  ;;  %v6669_v63 = vmax.f32 %v7092_v18, 0.0 }
 0x7e8   : > { %v7080_v20 = vmul.f32 -1.442695, %v7154_v61  ;;  %v6701_v16 = vsel %vm6645_vm4, %v6669_v63, %v6685_v51 }
 0x7e9   : > { %6718 = vst.msk [vmem:[%s12295_s12 + $0x38] sm:$0xff] %vm6710_vm12, %v6701_v16 }
 0x7ea   : > { %7675 = vpow2.f32 %v7080_v20 }
 0x7eb   : > { %v7670_v3 = vpop.eup %7669 }
 0x7ec   : > { %v7093_v50 = vadd.f32 -1e-05, %v7670_v3  ;;  %v6686_v0 = vmul.f32 2.0, %v7670_v3 }
 0x7ee   : > { %v6670_v43 = vmax.f32 %v7093_v50, 0.0 }
 0x7ef   : > { %v7672_v32 = vpop.eup %7671 }
 0x7f0   : > { %v6702_v52 = vsel %vm6645_vm4, %v6670_v43, %v6686_v0  ;;  %v7094_v17 = vadd.f32 -1e-05, %v7672_v32  ;;  %v6687_v14 = vmul.f32 2.0, %v7672_v32 }
 0x7f1   : > { %6719 = vst.msk [vmem:[%s12295_s12 + $0x40] sm:$0xff] %vm6710_vm12, %v6702_v52 }
 0x7f2   : > { %v6671_v44 = vmax.f32 %v7094_v17, 0.0 }
 0x7f3   : > { %v7674_v21 = vpop.eup %7673 }
 0x7f4   : > { %v7155_v49 = vpop.f32.mrf.mxu1  ;;  %v6607_v13 = vadd.f32 1.0, %v7674_v21  ;;  %v6703_v34 = vsel %vm6645_vm4, %v6671_v44, %v6687_v14 }
 0x7f5   : > { %6720 = vst.msk [vmem:[%s12295_s12 + $0x48] sm:$0xff] %vm6710_vm12, %v6703_v34 }
 0x7f6   : > { %v7156_v26 = vpop.f32.mrf.mxu1  ;;  %7677 = vrcp.f32 %v6607_v13 }
 0x7f7   : > { %v7157_v53 = vadd.f32 %v7156_v26, %v7155_v49  ;;  %v7676_v38 = vpop.eup %7675 }
 0x7f8   : > { %v7158_v29 = vpop.f32.mrf.mxu1  ;;  %v6608_v10 = vadd.f32 1.0, %v7676_v38 }
 0x7f9   : > { %v7081_v39 = vmul.f32 -1.442695, %v7157_v53 }
 0x7fa   : > { %v7159_v24 = vpop.f32.mrf.mxu1 }
 0x7fb   : > { %7679 = vpow2.f32 %v7081_v39  ;;  %v7160_v48 = vadd.f32 %v7159_v24, %v7158_v29 }
 0x7fc   : > { %7681 = vrcp.f32 %v6608_v10 }
 0x7fd   : > { %v7082_v27 = vmul.f32 -1.442695, %v7160_v48 }
 0x7ff   : > { %7683 = vpow2.f32 %v7082_v27 }
 0x803   : > { %v7678_v58 = vpop.eup %7677 }
 0x804   : > { %v7095_v47 = vadd.f32 -1e-05, %v7678_v58  ;;  %v6688_v11 = vmul.f32 2.0, %v7678_v58 }
 0x806   : > { %v6672_v57 = vmax.f32 %v7095_v47, 0.0 }
 0x807   : > { %v7161_v36 = vpop.f32.mrf.mxu1 }
 0x808   : > { %v7680_v22 = vpop.eup %7679  ;;  %v6704_v55 = vsel %vm6645_vm4, %v6672_v57, %v6688_v11 }
 0x809   : > { %v7682_v54 = vpop.eup %7681  ;;  %v6609_v41 = vadd.f32 1.0, %v7680_v22  ;;  %v7162_v7 = vpop.f32.mrf.mxu1  ;;  %6721 = vst.msk [vmem:[%s12295_s12 + $0x50] sm:$0xff] %vm6710_vm12, %v6704_v55 }
 0x80a   : > { %v7096_v40 = vadd.f32 -1e-05, %v7682_v54  ;;  %v7163_v42 = vadd.f32 %v7162_v7, %v7161_v36  ;;  %v6689_v35 = vmul.f32 2.0, %v7682_v54 }
 0x80b   : > { %7685 = vrcp.f32 %v6609_v41  ;;  %v7164_v62 = vpop.f32.mrf.mxu1 }
 0x80c   : > { %v7684_v60 = vpop.eup %7683  ;;  %v6673_v8 = vmax.f32 %v7096_v40, 0.0  ;;  %v7083_v23 = vmul.f32 -1.442695, %v7163_v42 }
 0x80d   : > { %v6610_v12 = vadd.f32 1.0, %v7684_v60  ;;  %v7165_v1 = vpop.f32.mrf.mxu1 }
 0x80e   : > { %v6705_v33 = vsel %vm6645_vm4, %v6673_v8, %v6689_v35  ;;  %7687 = vpow2.f32 %v7083_v23  ;;  %v7166_v30 = vadd.f32 %v7165_v1, %v7164_v62 }
 0x80f   : > { %6722 = vst.msk [vmem:[%s12295_s12 + $0x58] sm:$0xff] %vm6710_vm12, %v6705_v33  ;;  %7689 = vrcp.f32 %v6610_v12 }
 0x810   : > { %v7084_v28 = vmul.f32 -1.442695, %v7166_v30 }
 0x812   : > { %7691 = vpow2.f32 %v7084_v28 }
 0x818   : > { %v7686_v4 = vpop.eup %7685 }
 0x819   : > { %v7097_v2 = vadd.f32 -1e-05, %v7686_v4  ;;  %v6690_v31 = vmul.f32 2.0, %v7686_v4 }
 0x81b   : > { %v7688_v56 = vpop.eup %7687  ;;  %v6674_v46 = vmax.f32 %v7097_v2, 0.0 }
 0x81c   : > { %v7690_v25 = vpop.eup %7689  ;;  %v6611_v45 = vadd.f32 1.0, %v7688_v56 }
 0x81d   : > { %v6706_v59 = vsel %vm6645_vm4, %v6674_v46, %v6690_v31  ;;  %v7098_v37 = vadd.f32 -1e-05, %v7690_v25  ;;  %v6691_v15 = vmul.f32 2.0, %v7690_v25 }
 0x81e   : > { %6723 = vst.msk [vmem:[%s12295_s12 + $0x60] sm:$0xff] %vm6710_vm12, %v6706_v59  ;;  %7693 = vrcp.f32 %v6611_v45 }
 0x81f   : > { %v7692_v61 = vpop.eup %7691  ;;  %v6675_v5 = vmax.f32 %v7098_v37, 0.0 }
 0x820   : > { %v6612_v6 = vadd.f32 1.0, %v7692_v61 }
 0x821   : > { %v6707_v20 = vsel %vm6645_vm4, %v6675_v5, %v6691_v15 }
 0x822   : > { %6724 = vst.msk [vmem:[%s12295_s12 + $0x68] sm:$0xff] %vm6710_vm12, %v6707_v20  ;;  %7695 = vrcp.f32 %v6612_v6 }
 0x82b   : > { %v7694_v18 = vpop.eup %7693 }
 0x82c   : > { %v7099_v9 = vadd.f32 -1e-05, %v7694_v18  ;;  %v6692_v51 = vmul.f32 2.0, %v7694_v18 }
 0x82e   : > { %v6676_v63 = vmax.f32 %v7099_v9, 0.0 }
 0x82f   : > { %v7696_v16 = vpop.eup %7695 }
 0x830   : > { %v6708_v3 = vsel %vm6645_vm4, %v6676_v63, %v6692_v51  ;;  %v7100_v50 = vadd.f32 -1e-05, %v7696_v16  ;;  %v6693_v0 = vmul.f32 2.0, %v7696_v16 }
 0x831   : > { %6725 = vst.msk [vmem:[%s12295_s12 + $0x70] sm:$0xff] %vm6710_vm12, %v6708_v3 }
 0x832   : > { %v6677_v43 = vmax.f32 %v7100_v50, 0.0 }
 0x834   : > { %v6709_v32 = vsel %vm6645_vm4, %v6677_v43, %v6693_v0 }
 0x835   : > { %6726 = vst.msk [vmem:[%s12295_s12 + $0x78] sm:$0xff] %vm6710_vm12, %v6709_v32 }
 0x836 PF: > { %s19_s24 = sadd.s32 1, %s7789_s24  }
 0x837   : > { %p16_p2 = scmp.ge.s32.totalorder %s19_s24, 4  }
 0x839   :  { %18 = sbr.rel (!%p16_p2) target bundleno = 2 (0x2), region = 91 }
 0x83e   :  { %6749 = vsyncpa [#allocation3], 1 }
 0x83f   :  { %6751 = vsyncpa [#allocation3 + $0x1], 1 }
 0x840   :  { %6752 = vsyncpa [#allocation5], 1 }

</bundles_post_ra>
